<compile_context>
chip_gen: v6e
topology: v6e:2x2x1
jax: 0.10.0
libtpu: 0.0.40
codegen_flags: <defaults>
</compile_context>

<pallas_src>
import functools

import numpy as np
import jax
import jax.numpy as jnp
from jax import lax
from jax.experimental import pallas as pl
from jax.experimental.pallas import tpu as pltpu

# ----------------------------- constants ------------------------------------
SAMPLE_RATE = 16000
N_FFT = 64
HOP_SIZE = 64
F_MIN = 0.0
F_MAX = 8000.0
N_MELS = 16          # must be divisible by 4 (ConvStack pools freq twice)
HIDDEN = 88          # LSTM hidden size (fixed by the module)
HIDDEN_P = 128       # padded hidden (lane-dense)
CNN_UNIT = 4
FC_UNIT = 32
BN_EPS = 1e-5
N_STREAMS = 4        # (frame_fwd, frame_bwd, onset_fwd, onset_bwd)
GATES = 4 * HIDDEN_P
VMEM_LIMIT = 64 * 1024 * 1024


def _round_up(x, m):
    return ((x + m - 1) // m) * m


def _sigmoid(x):
    # numerically-stable sigmoid via EUP tanh (no exp overflow, no divide)
    return 0.5 * (jnp.tanh(0.5 * x) + 1.0)


# ---------------------- kernel 1: tiled matmul + affine (+ReLU) --------------
def _matmul_affine_kernel(x_ref, w_ref, s_ref, b_ref, o_ref, *, relu):
    y = jnp.dot(x_ref[...], w_ref[...], preferred_element_type=jnp.float32)
    y = y * s_ref[...] + b_ref[...]
    if relu:
        y = jnp.maximum(y, 0.0)
    o_ref[...] = y


def pallas_matmul_affine(x, w, scale, bias, relu=False, block_m=256):
    """y = (x @ w) * scale + bias, optional ReLU.

    x:(M,K) w:(K,N) scale/bias:(N,). M is tiled on a parallel grid axis, operands
    are bf16 (f32 accumulate); callers guarantee N is a multiple of 128.
    """
    M, K = x.shape
    N = w.shape[1]
    tm = min(block_m, _round_up(M, 16))
    Mp = _round_up(M, tm)
    if Mp != M:
        x = jnp.pad(x, ((0, Mp - M), (0, 0)))
    out = pl.pallas_call(
        functools.partial(_matmul_affine_kernel, relu=relu),
        out_shape=jax.ShapeDtypeStruct((Mp, N), jnp.float32),
        grid=(Mp // tm,),
        in_specs=[pl.BlockSpec((tm, K), lambda i: (i, 0)),
                  pl.BlockSpec((K, N), lambda i: (0, 0)),
                  pl.BlockSpec((1, N), lambda i: (0, 0)),
                  pl.BlockSpec((1, N), lambda i: (0, 0))],
        out_specs=pl.BlockSpec((tm, N), lambda i: (i, 0)),
        compiler_params=pltpu.CompilerParams(
            dimension_semantics=("parallel",),
            vmem_limit_bytes=VMEM_LIMIT),
    )(x.astype(jnp.bfloat16), w.astype(jnp.bfloat16),
      scale.reshape(1, N).astype(jnp.float32),
      bias.reshape(1, N).astype(jnp.float32))
    return out[:M] if Mp != M else out


# ---------------------- kernel 2: fused log-mel spectrogram -------------------
def _logmel_kernel(fr_ref, basis_ref, fb2_ref, o_ref):
    # basis = [cos | -sin] with Hann window folded in, freq bins zero-padded to 64.
    spec = jnp.dot(fr_ref[...], basis_ref[...], preferred_element_type=jnp.float32)
    power = spec * spec                      # re^2 and im^2 share the duplicated fb
    mel = jnp.dot(power, fb2_ref[...], preferred_element_type=jnp.float32)
    o_ref[...] = jnp.log(jnp.maximum(mel, 1e-9))


def pallas_logmel(frames, basis, fb2, block_m=512):
    M, K = frames.shape
    n_mels = fb2.shape[1]
    tm = min(block_m, _round_up(M, 8))
    Mp = _round_up(M, tm)
    if Mp != M:
        frames = jnp.pad(frames, ((0, Mp - M), (0, 0)))
    out = pl.pallas_call(
        _logmel_kernel,
        out_shape=jax.ShapeDtypeStruct((Mp, n_mels), jnp.float32),
        grid=(Mp // tm,),
        in_specs=[pl.BlockSpec((tm, K), lambda i: (i, 0)),
                  pl.BlockSpec(basis.shape, lambda i: (0, 0)),
                  pl.BlockSpec(fb2.shape, lambda i: (0, 0))],
        out_specs=pl.BlockSpec((tm, n_mels), lambda i: (i, 0)),
        compiler_params=pltpu.CompilerParams(
            dimension_semantics=("parallel",),
            vmem_limit_bytes=VMEM_LIMIT),
    )(frames.astype(jnp.float32), basis.astype(jnp.float32),
      fb2.astype(jnp.float32))
    return out[:M] if Mp != M else out


# ---------------------- kernel 3: 4-stream LSTM time recurrence ---------------
def _lstm_multi_kernel(xg_ref, whh_ref, out_ref, h_sc, c_sc, *,
                       n_streams, batch, hidden):
    # xg_ref : (S*T, B, 4*Hp)  precomputed x @ W_ih + b_ih + b_hh (per stream)
    # whh_ref: (S*Hp, 4*Hp)    bf16 recurrent weights, vertically stacked per stream
    # out_ref: (S*T, B, Hp)
    # streams: 0=frame_fwd, 1=frame_bwd, 2=onset_fwd, 3=onset_bwd
    # odd streams run over reversed time (reversal handled purely by indexing).
    S, B, Hp = n_streams, batch, hidden
    T = xg_ref.shape[0] // S
    h_sc[...] = jnp.zeros_like(h_sc)
    c_sc[...] = jnp.zeros_like(c_sc)

    def step(t, carry):
        tr = T - 1 - t
        g_parts = []
        for s in range(S):
            ts = t if (s % 2 == 0) else tr
            h_prev = h_sc[s * B:(s + 1) * B, :].astype(jnp.bfloat16)
            whh_s = whh_ref[s * Hp:(s + 1) * Hp, :]
            g_parts.append(xg_ref[s * T + ts] +
                           jnp.dot(h_prev, whh_s,
                                   preferred_element_type=jnp.float32))
        g = jnp.concatenate(g_parts, axis=0)          # (S*B, 4*Hp) = (8, 512)
        i = _sigmoid(g[:, 0:Hp])
        f = _sigmoid(g[:, Hp:2 * Hp])
        gc = jnp.tanh(g[:, 2 * Hp:3 * Hp])
        o = _sigmoid(g[:, 3 * Hp:4 * Hp])
        c = f * c_sc[...] + i * gc
        h = o * jnp.tanh(c)
        c_sc[...] = c
        h_sc[...] = h
        for s in range(S):
            ts = t if (s % 2 == 0) else tr
            out_ref[s * T + ts] = h[s * B:(s + 1) * B, :]
        return carry

    lax.fori_loop(0, T, step, 0)


def pallas_lstm_streams(xg, whh):
    """xg:(S*T,B,4*Hp) f32, whh:(S*Hp,4*Hp) -> h:(S*T,B,Hp) f32."""
    ST, B, G = xg.shape
    Hp = G // 4
    S = N_STREAMS
    return pl.pallas_call(
        functools.partial(_lstm_multi_kernel, n_streams=S, batch=B, hidden=Hp),
        out_shape=jax.ShapeDtypeStruct((ST, B, Hp), jnp.float32),
        grid=(1,),
        in_specs=[pl.BlockSpec((ST, B, G), lambda i: (0, 0, 0)),
                  pl.BlockSpec((S * Hp, G), lambda i: (0, 0))],
        out_specs=pl.BlockSpec((ST, B, Hp), lambda i: (0, 0, 0)),
        scratch_shapes=[pltpu.VMEM((S * B, Hp), jnp.float32),
                        pltpu.VMEM((S * B, Hp), jnp.float32)],
        compiler_params=pltpu.CompilerParams(
            dimension_semantics=("arbitrary",),
            vmem_limit_bytes=VMEM_LIMIT),
    )(xg.astype(jnp.float32), whh.astype(jnp.bfloat16))


# ----------------------------- mel front-end ----------------------------------
def _hz_to_mel(f):
    return 2595.0 * np.log10(1.0 + f / 700.0)


def _mel_to_hz(m):
    return 700.0 * (10.0 ** (m / 2595.0) - 1.0)


def mel_filterbank(n_freqs, n_mels, sample_rate, f_min, f_max):
    all_freqs = np.linspace(0.0, sample_rate // 2, n_freqs)
    m_pts = np.linspace(_hz_to_mel(f_min), _hz_to_mel(f_max), n_mels + 2)
    f_pts = _mel_to_hz(m_pts)
    f_diff = f_pts[1:] - f_pts[:-1]
    slopes = f_pts[None, :] - all_freqs[:, None]
    down = (-1.0 * slopes[:, :-2]) / f_diff[:-1]
    up = slopes[:, 2:] / f_diff[1:]
    return np.maximum(0.0, np.minimum(down, up)).astype(np.float32)


def build_logmel_consts():
    n_freqs = N_FFT // 2 + 1                   # 33
    half = N_FFT                               # pad freq bins 33 -> 64 (lane-dense)
    n = np.arange(N_FFT, dtype=np.float64)[:, None]
    k = np.arange(n_freqs, dtype=np.float64)[None, :]
    ang = 2.0 * np.pi * k * n / N_FFT
    win = 0.5 * (1.0 - np.cos(2.0 * np.pi * np.arange(N_FFT) / N_FFT))
    basis = np.zeros((N_FFT, 2 * half), np.float32)
    basis[:, :n_freqs] = np.cos(ang) * win[:, None]
    basis[:, half:half + n_freqs] = -np.sin(ang) * win[:, None]
    fb = np.zeros((half, N_MELS), np.float32)
    fb[:n_freqs] = mel_filterbank(n_freqs, N_MELS, SAMPLE_RATE, F_MIN, F_MAX)
    fb2 = np.concatenate([fb, fb], axis=0)     # (128, 16): re^2 and im^2 blocks
    return jnp.asarray(basis), jnp.asarray(fb2)


def log_mel_spectrogram(audio, basis, fb2):
    """(B, n_samples) -> (B, T, N_MELS), T = n_samples // HOP_SIZE."""
    B, _ = audio.shape
    pad = N_FFT // 2
    # Reference computes F.pad(audio, (N_FFT//2, 0)) and never uses it — no-op here.
    ap = jnp.pad(audio, ((0, 0), (pad, pad)), mode="reflect")    # STFT center pad
    n_frames = ap.shape[1] // N_FFT
    # HOP_SIZE == N_FFT: windows are contiguous & non-overlapping -> pure reshape.
    frames = ap[:, :n_frames * N_FFT].reshape(B * n_frames, N_FFT)
    logmel = pallas_logmel(frames, basis, fb2).reshape(B, n_frames, N_MELS)
    return logmel[:, 1:, :]    # drop frame 0 (matches mel[:, :, 1:] in the reference)


# ----------------------------- conv front-end ---------------------------------
def time_concat3(x):
    """x:(B,T,F) -> (B,T,3F) rows [x_{t-1} | x_t | x_{t+1}] with zero time padding."""
    xp = jnp.pad(x, ((0, 0), (1, 1), (0, 0)))
    return jnp.concatenate([xp[:, :-2], xp[:, 1:-1], xp[:, 2:]], axis=-1)


def freq_maxpool2(x, w, c):
    """x:(B,T,w*c) columns ordered (freq-major, channel-minor) -> (B,T,(w//2)*c)."""
    B, T, _ = x.shape
    return jnp.max(x.reshape(B, T, w // 2, 2, c), axis=3).reshape(B, T, (w // 2) * c)


def conv_frontend(mel, p):
    """Fused frame+onset ConvStack.  mel:(B,T,16) -> feat:(B*T,128),
    columns = [frame fc (32) | onset fc (32) | zero pad (64)]."""
    B, T, _ = mel.shape
    x1 = time_concat3(mel).reshape(B * T, -1)                       # (BT, 48)
    y1 = pallas_matmul_affine(x1, p["k1"], p["s1"], p["b1"], relu=True)
    x2 = time_concat3(y1.reshape(B, T, -1)).reshape(B * T, -1)      # (BT, 384)
    y2 = pallas_matmul_affine(x2, p["k2"], p["s2"], p["b2"], relu=True)
    y2 = freq_maxpool2(y2.reshape(B, T, -1), N_MELS, 2 * CNN_UNIT)  # (B,T,64)
    x3 = time_concat3(y2).reshape(B * T, -1)                        # (BT, 192)
    y3 = pallas_matmul_affine(x3, p["k3"], p["s3"], p["b3"], relu=True)
    y3 = freq_maxpool2(y3.reshape(B, T, -1), N_MELS // 2, 4 * CNN_UNIT)
    feat = pallas_matmul_affine(y3.reshape(B * T, -1), p["fc_w"],
                                p["fc_s"], p["fc_b"])               # (BT, 128)
    return feat


# ----------------------------- bidirectional LSTM ------------------------------
def bilstm_layer(x_bt, w_ih, b_ih, whh, B, T):
    """x_bt:(B*T,F) -> (B*T, 4*HIDDEN_P) columns [h_ff | h_fb | h_of | h_ob]."""
    G = GATES
    ones = jnp.ones((N_STREAMS * G,), jnp.float32)
    xg = pallas_matmul_affine(x_bt, w_ih, ones, b_ih)               # (BT, 2048)
    xg = xg.reshape(B, T, N_STREAMS, G).transpose(2, 1, 0, 3)
    xg = xg.reshape(N_STREAMS * T, B, G)
    h = pallas_lstm_streams(xg, whh)                                # (S*T, B, Hp)
    h = h.reshape(N_STREAMS, T, B, HIDDEN_P).transpose(2, 1, 0, 3)
    return h.reshape(B * T, N_STREAMS * HIDDEN_P)


# ----------------------------- full forward ------------------------------------
def transcriber_crnn_forward(audio, p):
    mel = log_mel_spectrogram(audio, p["basis"], p["fb2"])          # (B, T, 16)
    B, T, _ = mel.shape
    feat = conv_frontend(mel, p["conv"])                            # (B*T, 128)
    h0 = bilstm_layer(feat, p["w_ih0"], p["b_ih0"], p["whh0"], B, T)
    h1 = bilstm_layer(h0, p["w_ih1"], p["b_ih1"], p["whh1"], B, T)
    ones = jnp.ones((2 * HIDDEN_P,), jnp.float32)
    out = pallas_matmul_affine(h1, p["w_out"], ones, p["b_out"])    # (B*T, 256)
    out = out.reshape(B, T, 2 * HIDDEN_P)
    frame_out = out[:, :, :HIDDEN]
    onset_out = out[:, :, HIDDEN_P:HIDDEN_P + HIDDEN]
    return frame_out, onset_out


# ----------------------------- deterministic logical params --------------------
def _randn(key, shape, scale):
    return scale * jax.random.normal(key, shape, dtype=jnp.float32)


def init_conv_stack_params(key, n_mels, cnn_unit, fc_unit):
    ks = jax.random.split(key, 5)

    def conv_bn(k, cin, cout):
        kk = jax.random.split(k, 6)
        return {
            "w": _randn(kk[0], (3, 3, cin, cout), 1.0 / float((9 * cin) ** 0.5)),
            "b": _randn(kk[1], (cout,), 0.1),
            "gamma": 1.0 + _randn(kk[2], (cout,), 0.1),
            "beta": _randn(kk[3], (cout,), 0.1),
            "mean": _randn(kk[4], (cout,), 0.1),
            "var": 1.0 + 0.5 * jax.random.uniform(kk[5], (cout,), dtype=jnp.float32),
        }

    fc_in = cnn_unit * 2 * (n_mels // 4)
    return {
        "c1": conv_bn(ks[0], 1, cnn_unit),
        "c2": conv_bn(ks[1], cnn_unit, cnn_unit),
        "c3": conv_bn(ks[2], cnn_unit, cnn_unit * 2),
        "fc_w": _randn(ks[3], (fc_in, fc_unit), 1.0 / float(fc_in ** 0.5)),
        "fc_b": _randn(ks[4], (fc_unit,), 0.1),
    }


def init_bilstm_params(key, in_dim, hidden):
    kk = jax.random.split(key, 8)
    s = 1.0 / float(hidden ** 0.5)
    return {
        "w_ih_f": _randn(kk[0], (in_dim, 4 * hidden), s),
        "w_hh_f": _randn(kk[1], (hidden, 4 * hidden), s),
        "b_f": _randn(kk[2], (4 * hidden,), s) + _randn(kk[3], (4 * hidden,), s),
        "w_ih_b": _randn(kk[4], (in_dim, 4 * hidden), s),
        "w_hh_b": _randn(kk[5], (hidden, 4 * hidden), s),
        "b_b": _randn(kk[6], (4 * hidden,), s) + _randn(kk[7], (4 * hidden,), s),
    }


def init_params(key):
    ks = jax.random.split(key, 10)
    s_fc = 1.0 / float((2 * HIDDEN) ** 0.5)
    return {
        "frame_conv": init_conv_stack_params(ks[0], N_MELS, CNN_UNIT, FC_UNIT),
        "frame_lstm0": init_bilstm_params(ks[1], FC_UNIT, HIDDEN),
        "frame_lstm1": init_bilstm_params(ks[2], 2 * HIDDEN, HIDDEN),
        "frame_fc_w": _randn(ks[3], (2 * HIDDEN, HIDDEN), s_fc),
        "frame_fc_b": _randn(ks[4], (HIDDEN,), 0.1),
        "onset_conv": init_conv_stack_params(ks[5], N_MELS, CNN_UNIT, FC_UNIT),
        "onset_lstm0": init_bilstm_params(ks[6], FC_UNIT, HIDDEN),
        "onset_lstm1": init_bilstm_params(ks[7], 2 * HIDDEN, HIDDEN),
        "onset_fc_w": _randn(ks[8], (2 * HIDDEN, HIDDEN), s_fc),
        "onset_fc_b": _randn(ks[9], (HIDDEN,), 0.1),
    }


# ----------------------------- fused/padded operand construction ----------------
def band_conv_weight(w, W):
    """w:(3,3,Cin,Cout) -> (3*W*Cin, W*Cout) matrix implementing a 3x3 conv (pad=1)
    over (time,freq) when input rows are [x_{t-1}|x_t|x_{t+1}] with per-row layout
    (freq-major, channel-minor)."""
    _, _, Cin, Cout = w.shape
    K = np.zeros((3, W * Cin, W * Cout), np.float32)
    for dt in range(3):
        for dw in range(3):
            for wo in range(W):
                wi = wo + dw - 1
                if 0 <= wi < W:
                    K[dt, wi * Cin:(wi + 1) * Cin, wo * Cout:(wo + 1) * Cout] = w[dt, dw]
    return K.reshape(3 * W * Cin, W * Cout)


def blockdiag_conv(wf, wo):
    kh, kw, ci, co = wf.shape
    w = np.zeros((kh, kw, 2 * ci, 2 * co), np.float32)
    w[:, :, :ci, :co] = wf
    w[:, :, ci:, co:] = wo
    return w


def fold_bn(frame_p, onset_p, W):
    def one(p):
        scale = np.asarray(p["gamma"]) / np.sqrt(np.asarray(p["var"]) + BN_EPS)
        bias = (np.asarray(p["b"]) - np.asarray(p["mean"])) * scale + np.asarray(p["beta"])
        return scale, bias
    sf, bf = one(frame_p)
    so, bo = one(onset_p)
    s = np.concatenate([sf, so])
    b = np.concatenate([bf, bo])
    return np.tile(s, W).astype(np.float32), np.tile(b, W).astype(np.float32)


def pad_gates_cols(w):
    """Zero-pad each of the 4 gate blocks 88 -> 128 along the last axis."""
    w = np.asarray(w, np.float32)
    lead = w.shape[:-1]
    w = w.reshape(lead + (4, HIDDEN))
    w = np.pad(w, [(0, 0)] * len(lead) + [(0, 0), (0, HIDDEN_P - HIDDEN)])
    return w.reshape(lead + (GATES,))


def prepare_params(params):
    fr_c, on_c = params["frame_conv"], params["onset_conv"]

    # conv1: shared mel input, concat output channels (frame | onset)
    w1 = np.concatenate([np.asarray(fr_c["c1"]["w"]), np.asarray(on_c["c1"]["w"])], axis=-1)
    k1 = band_conv_weight(w1, W=N_MELS)                                # (48, 128)
    s1, b1 = fold_bn(fr_c["c1"], on_c["c1"], W=N_MELS)
    # conv2/conv3: block-diagonal across branches
    w2 = blockdiag_conv(np.asarray(fr_c["c2"]["w"]), np.asarray(on_c["c2"]["w"]))
    k2 = band_conv_weight(w2, W=N_MELS)                                # (384, 128)
    s2, b2 = fold_bn(fr_c["c2"], on_c["c2"], W=N_MELS)
    w3 = blockdiag_conv(np.asarray(fr_c["c3"]["w"]), np.asarray(on_c["c3"]["w"]))
    k3 = band_conv_weight(w3, W=N_MELS // 2)                           # (192, 128)
    s3, b3 = fold_bn(fr_c["c3"], on_c["c3"], W=N_MELS // 2)

    # fused conv FC: input cols (w*16 + c), c 0..7 frame / 8..15 onset; output padded to 128
    W2 = N_MELS // 4
    CC3 = 4 * CNN_UNIT
    fc_w = np.zeros((W2 * CC3, 128), np.float32)
    fw = np.asarray(fr_c["fc_w"]).reshape(2 * CNN_UNIT, W2, FC_UNIT)   # (c, w, out)
    ow = np.asarray(on_c["fc_w"]).reshape(2 * CNN_UNIT, W2, FC_UNIT)
    for w in range(W2):
        fc_w[w * CC3: w * CC3 + 2 * CNN_UNIT, 0:FC_UNIT] = fw[:, w, :]
        fc_w[w * CC3 + 2 * CNN_UNIT: (w + 1) * CC3, FC_UNIT:2 * FC_UNIT] = ow[:, w, :]
    fc_b = np.zeros((128,), np.float32)
    fc_b[0:FC_UNIT] = np.asarray(fr_c["fc_b"])
    fc_b[FC_UNIT:2 * FC_UNIT] = np.asarray(on_c["fc_b"])

    # LSTM layer 0: feat cols [frame 0..31 | onset 32..63 | zero 64..127]
    fl0, ol0 = params["frame_lstm0"], params["onset_lstm0"]
    w_ih0 = np.zeros((128, N_STREAMS * GATES), np.float32)
    w_ih0[0:FC_UNIT, 0 * GATES:1 * GATES] = pad_gates_cols(fl0["w_ih_f"])
    w_ih0[0:FC_UNIT, 1 * GATES:2 * GATES] = pad_gates_cols(fl0["w_ih_b"])
    w_ih0[FC_UNIT:2 * FC_UNIT, 2 * GATES:3 * GATES] = pad_gates_cols(ol0["w_ih_f"])
    w_ih0[FC_UNIT:2 * FC_UNIT, 3 * GATES:4 * GATES] = pad_gates_cols(ol0["w_ih_b"])
    b_ih0 = np.concatenate([pad_gates_cols(fl0["b_f"]), pad_gates_cols(fl0["b_b"]),
                            pad_gates_cols(ol0["b_f"]), pad_gates_cols(ol0["b_b"])])
    whh0 = np.zeros((N_STREAMS * HIDDEN_P, GATES), np.float32)
    for s, (pp, key) in enumerate([(fl0, "w_hh_f"), (fl0, "w_hh_b"),
                                   (ol0, "w_hh_f"), (ol0, "w_hh_b")]):
        whh0[s * HIDDEN_P: s * HIDDEN_P + HIDDEN, :] = pad_gates_cols(pp[key])

    # LSTM layer 1: input cols [h_ff(128) | h_fb(128) | h_of(128) | h_ob(128)]
    fl1, ol1 = params["frame_lstm1"], params["onset_lstm1"]
    w_ih1 = np.zeros((N_STREAMS * HIDDEN_P, N_STREAMS * GATES), np.float32)

    def place_l1(w, in_base, col_base):
        wp = pad_gates_cols(w)                     # (176, GATES)
        w_ih1[in_base: in_base + HIDDEN, col_base:col_base + GATES] = wp[0:HIDDEN]
        w_ih1[in_base + HIDDEN_P: in_base + HIDDEN_P + HIDDEN,
              col_base:col_base + GATES] = wp[HIDDEN:2 * HIDDEN]

    place_l1(fl1["w_ih_f"], 0, 0 * GATES)
    place_l1(fl1["w_ih_b"], 0, 1 * GATES)
    place_l1(ol1["w_ih_f"], 2 * HIDDEN_P, 2 * GATES)
    place_l1(ol1["w_ih_b"], 2 * HIDDEN_P, 3 * GATES)
    b_ih1 = np.concatenate([pad_gates_cols(fl1["b_f"]), pad_gates_cols(fl1["b_b"]),
                            pad_gates_cols(ol1["b_f"]), pad_gates_cols(ol1["b_b"])])
    whh1 = np.zeros((N_STREAMS * HIDDEN_P, GATES), np.float32)
    for s, (pp, key) in enumerate([(fl1, "w_hh_f"), (fl1, "w_hh_b"),
                                   (ol1, "w_hh_f"), (ol1, "w_hh_b")]):
        whh1[s * HIDDEN_P: s * HIDDEN_P + HIDDEN, :] = pad_gates_cols(pp[key])

    # fused final FC: out cols [frame 0..87 | pad | onset 128..215 | pad]
    w_out = np.zeros((N_STREAMS * HIDDEN_P, 2 * HIDDEN_P), np.float32)
    fcw = np.asarray(params["frame_fc_w"])
    ocw = np.asarray(params["onset_fc_w"])
    w_out[0:HIDDEN, 0:HIDDEN] = fcw[0:HIDDEN]
    w_out[HIDDEN_P:HIDDEN_P + HIDDEN, 0:HIDDEN] = fcw[HIDDEN:2 * HIDDEN]
    w_out[2 * HIDDEN_P:2 * HIDDEN_P + HIDDEN, HIDDEN_P:HIDDEN_P + HIDDEN] = ocw[0:HIDDEN]
    w_out[3 * HIDDEN_P:3 * HIDDEN_P + HIDDEN, HIDDEN_P:HIDDEN_P + HIDDEN] = ocw[HIDDEN:2 * HIDDEN]
    b_out = np.zeros((2 * HIDDEN_P,), np.float32)
    b_out[0:HIDDEN] = np.asarray(params["frame_fc_b"])
    b_out[HIDDEN_P:HIDDEN_P + HIDDEN] = np.asarray(params["onset_fc_b"])

    basis, fb2 = build_logmel_consts()
    return {
        "basis": basis, "fb2": fb2,
        "conv": {"k1": jnp.asarray(k1), "s1": jnp.asarray(s1), "b1": jnp.asarray(b1),
                 "k2": jnp.asarray(k2), "s2": jnp.asarray(s2), "b2": jnp.asarray(b2),
                 "k3": jnp.asarray(k3), "s3": jnp.asarray(s3), "b3": jnp.asarray(b3),
                 "fc_w": jnp.asarray(fc_w), "fc_s": jnp.ones((128,), jnp.float32),
                 "fc_b": jnp.asarray(fc_b)},
        "w_ih0": jnp.asarray(w_ih0), "b_ih0": jnp.asarray(b_ih0), "whh0": jnp.asarray(whh0),
        "w_ih1": jnp.asarray(w_ih1), "b_ih1": jnp.asarray(b_ih1), "whh1": jnp.asarray(whh1),
        "w_out": jnp.asarray(w_out), "b_out": jnp.asarray(b_out),
    }


# ----------------------------- main -------------------------------------------
if __name__ == "__main__":
    T_FRAMES = 8
    N_SAMPLES = T_FRAMES * HOP_SIZE            # 512 samples -> 8 mel frames
    BATCH = 2

    key = jax.random.PRNGKey(0)
    k_audio, k_params = jax.random.split(key)
    audio = 0.1 * jax.random.normal(k_audio, (BATCH, N_SAMPLES), dtype=jnp.float32)
    params = init_params(k_params)
    prep = prepare_params(params)

    fwd = jax.jit(transcriber_crnn_forward)
    frame_out, onset_out = fwd(audio, prep)
    jax.block_until_ready((frame_out, onset_out))

    assert frame_out.shape == (BATCH, T_FRAMES, 88), frame_out.shape
    assert onset_out.shape == (BATCH, T_FRAMES, 88), onset_out.shape
    assert bool(jnp.all(jnp.isfinite(frame_out))) and bool(jnp.all(jnp.isfinite(onset_out)))
    print("KERNEL_OK")
</pallas_src>

<mosaic_0001>
module attributes {stable_mosaic.version = 11 : i64} {
  func.func @_logmel_kernel(%arg0: i32, %arg1: memref<24x64xf32, #tpu.memory_space<vmem>>, %arg2: memref<64x128xf32, #tpu.memory_space<vmem>>, %arg3: memref<128x16xf32, #tpu.memory_space<vmem>>, %arg4: memref<24x16xf32, #tpu.memory_space<vmem>>) attributes {dimension_semantics = [#tpu.dimension_semantics<parallel>], iteration_bounds = array<i64: 1>, scalar_prefetch = 0 : i64, scratch_operands = 0 : i64, tpu.core_type = #tpu.core_type<tc>, window_params = [{transform_indices = @transform_0, window_bounds = array<i64: 24, 64>}, {pipeline_mode = #tpu.pipeline_mode<synchronous>, transform_indices = @transform_1, window_bounds = array<i64: 64, 128>}, {pipeline_mode = #tpu.pipeline_mode<synchronous>, transform_indices = @transform_2, window_bounds = array<i64: 128, 16>}, {transform_indices = @transform_3, window_bounds = array<i64: 24, 16>}]} {
    %c0 = arith.constant 0 : index
    %c0_0 = arith.constant 0 : index
    %0 = vector.load %arg1[%c0, %c0_0] : memref<24x64xf32, #tpu.memory_space<vmem>>, vector<24x64xf32>
    %c0_1 = arith.constant 0 : index
    %c0_2 = arith.constant 0 : index
    %1 = vector.load %arg2[%c0_1, %c0_2] : memref<64x128xf32, #tpu.memory_space<vmem>>, vector<64x128xf32>
    %cst = arith.constant dense<0.000000e+00> : vector<24x128xf32>
    %2 = tpu.matmul %0, %1, %cst {dimension_numbers = #tpu.dot_dimension_numbers<[1], [0], [0], [1], [0, 0, 1, 1], [], []>} : vector<24x64xf32>, vector<64x128xf32>, vector<24x128xf32> -> vector<24x128xf32>
    %3 = arith.mulf %2, %2 : vector<24x128xf32>
    %c0_3 = arith.constant 0 : index
    %c0_4 = arith.constant 0 : index
    %4 = vector.load %arg3[%c0_3, %c0_4] : memref<128x16xf32, #tpu.memory_space<vmem>>, vector<128x16xf32>
    %cst_5 = arith.constant dense<0.000000e+00> : vector<24x16xf32>
    %5 = tpu.matmul %3, %4, %cst_5 {dimension_numbers = #tpu.dot_dimension_numbers<[1], [0], [0], [1], [0, 0, 1, 1], [], []>} : vector<24x128xf32>, vector<128x16xf32>, vector<24x16xf32> -> vector<24x16xf32>
    %cst_6 = arith.constant 9.99999971E-10 : f32
    %6 = vector.broadcast %cst_6 : f32 to vector<24x16xf32>
    %7 = arith.maximumf %5, %6 : vector<24x16xf32>
    %8 = math.log %7 : vector<24x16xf32>
    %c0_7 = arith.constant 0 : index
    %c0_8 = arith.constant 0 : index
    %9 = vector.load %arg4[%c0_7, %c0_8] : memref<24x16xf32, #tpu.memory_space<vmem>>, vector<24x16xf32>
    tpu.vector_store %arg4[%c0_7, %c0_8], %8 {strides = array<i32>} : memref<24x16xf32, #tpu.memory_space<vmem>>, vector<24x16xf32>,
    return
  }
  func.func @transform_0(%arg0: i32) -> (i32, i32) {
    %c0_i32 = arith.constant 0 : i32
    %c0_i32_0 = arith.constant 0 : i32
    return %arg0, %c0_i32 : i32, i32
  }
  func.func @transform_1(%arg0: i32) -> (i32, i32) {
    %c0_i32 = arith.constant 0 : i32
    %c0_i32_0 = arith.constant 0 : i32
    %c0_i32_1 = arith.constant 0 : i32
    return %c0_i32, %c0_i32_0 : i32, i32
  }
  func.func @transform_2(%arg0: i32) -> (i32, i32) {
    %c0_i32 = arith.constant 0 : i32
    %c0_i32_0 = arith.constant 0 : i32
    %c0_i32_1 = arith.constant 0 : i32
    return %c0_i32, %c0_i32_0 : i32, i32
  }
  func.func @transform_3(%arg0: i32) -> (i32, i32) {
    %c0_i32 = arith.constant 0 : i32
    %c0_i32_0 = arith.constant 0 : i32
    return %arg0, %c0_i32 : i32, i32
  }
}

module attributes {stable_mosaic.version = 11 : i64} {
  func.func @_matmul_affine_kernel(%arg0: i32, %arg1: memref<16x48xbf16, #tpu.memory_space<vmem>>, %arg2: memref<48x128xbf16, #tpu.memory_space<vmem>>, %arg3: memref<1x128xf32, #tpu.memory_space<vmem>>, %arg4: memref<1x128xf32, #tpu.memory_space<vmem>>, %arg5: memref<16x128xf32, #tpu.memory_space<vmem>>) attributes {dimension_semantics = [#tpu.dimension_semantics<parallel>], iteration_bounds = array<i64: 1>, scalar_prefetch = 0 : i64, scratch_operands = 0 : i64, tpu.core_type = #tpu.core_type<tc>, window_params = [{transform_indices = @transform_0, window_bounds = array<i64: 16, 48>}, {pipeline_mode = #tpu.pipeline_mode<synchronous>, transform_indices = @transform_1, window_bounds = array<i64: 48, 128>}, {pipeline_mode = #tpu.pipeline_mode<synchronous>, transform_indices = @transform_2, window_bounds = array<i64: 1, 128>}, {pipeline_mode = #tpu.pipeline_mode<synchronous>, transform_indices = @transform_3, window_bounds = array<i64: 1, 128>}, {transform_indices = @transform_4, window_bounds = array<i64: 16, 128>}]} {
    %c0 = arith.constant 0 : index
    %c0_0 = arith.constant 0 : index
    %0 = vector.load %arg1[%c0, %c0_0] : memref<16x48xbf16, #tpu.memory_space<vmem>>, vector<16x48xbf16>
    %c0_1 = arith.constant 0 : index
    %c0_2 = arith.constant 0 : index
    %1 = vector.load %arg2[%c0_1, %c0_2] : memref<48x128xbf16, #tpu.memory_space<vmem>>, vector<48x128xbf16>
    %cst = arith.constant dense<0.000000e+00> : vector<16x128xf32>
    %2 = tpu.matmul %0, %1, %cst {dimension_numbers = #tpu.dot_dimension_numbers<[1], [0], [0], [1], [0, 0, 1, 1], [], []>} : vector<16x48xbf16>, vector<48x128xbf16>, vector<16x128xf32> -> vector<16x128xf32>
    %c0_3 = arith.constant 0 : index
    %c0_4 = arith.constant 0 : index
    %3 = vector.load %arg3[%c0_3, %c0_4] : memref<1x128xf32, #tpu.memory_space<vmem>>, vector<1x128xf32>
    %4 = vector.broadcast %3 : vector<1x128xf32> to vector<16x128xf32>
    %5 = arith.mulf %2, %4 : vector<16x128xf32>
    %c0_5 = arith.constant 0 : index
    %c0_6 = arith.constant 0 : index
    %6 = vector.load %arg4[%c0_5, %c0_6] : memref<1x128xf32, #tpu.memory_space<vmem>>, vector<1x128xf32>
    %7 = vector.broadcast %6 : vector<1x128xf32> to vector<16x128xf32>
    %8 = arith.addf %5, %7 : vector<16x128xf32>
    %cst_7 = arith.constant 0.000000e+00 : f32
    %9 = vector.broadcast %cst_7 : f32 to vector<16x128xf32>
    %10 = arith.maximumf %8, %9 : vector<16x128xf32>
    %c0_8 = arith.constant 0 : index
    %c0_9 = arith.constant 0 : index
    %11 = vector.load %arg5[%c0_8, %c0_9] : memref<16x128xf32, #tpu.memory_space<vmem>>, vector<16x128xf32>
    tpu.vector_store %arg5[%c0_8, %c0_9], %10 {strides = array<i32>} : memref<16x128xf32, #tpu.memory_space<vmem>>, vector<16x128xf32>,
    return
  }
  func.func @transform_0(%arg0: i32) -> (i32, i32) {
    %c0_i32 = arith.constant 0 : i32
    %c0_i32_0 = arith.constant 0 : i32
    return %arg0, %c0_i32 : i32, i32
  }
  func.func @transform_1(%arg0: i32) -> (i32, i32) {
    %c0_i32 = arith.constant 0 : i32
    %c0_i32_0 = arith.constant 0 : i32
    %c0_i32_1 = arith.constant 0 : i32
    return %c0_i32, %c0_i32_0 : i32, i32
  }
  func.func @transform_2(%arg0: i32) -> (i32, i32) {
    %c0_i32 = arith.constant 0 : i32
    %c0_i32_0 = arith.constant 0 : i32
    %c0_i32_1 = arith.constant 0 : i32
    return %c0_i32, %c0_i32_0 : i32, i32
  }
  func.func @transform_3(%arg0: i32) -> (i32, i32) {
    %c0_i32 = arith.constant 0 : i32
    %c0_i32_0 = arith.constant 0 : i32
    %c0_i32_1 = arith.constant 0 : i32
    return %c0_i32, %c0_i32_0 : i32, i32
  }
  func.func @transform_4(%arg0: i32) -> (i32, i32) {
    %c0_i32 = arith.constant 0 : i32
    %c0_i32_0 = arith.constant 0 : i32
    return %arg0, %c0_i32 : i32, i32
  }
}

module attributes {stable_mosaic.version = 11 : i64} {
  func.func @_matmul_affine_kernel(%arg0: i32, %arg1: memref<16x384xbf16, #tpu.memory_space<vmem>>, %arg2: memref<384x128xbf16, #tpu.memory_space<vmem>>, %arg3: memref<1x128xf32, #tpu.memory_space<vmem>>, %arg4: memref<1x128xf32, #tpu.memory_space<vmem>>, %arg5: memref<16x128xf32, #tpu.memory_space<vmem>>) attributes {dimension_semantics = [#tpu.dimension_semantics<parallel>], iteration_bounds = array<i64: 1>, scalar_prefetch = 0 : i64, scratch_operands = 0 : i64, tpu.core_type = #tpu.core_type<tc>, window_params = [{transform_indices = @transform_0, window_bounds = array<i64: 16, 384>}, {pipeline_mode = #tpu.pipeline_mode<synchronous>, transform_indices = @transform_1, window_bounds = array<i64: 384, 128>}, {pipeline_mode = #tpu.pipeline_mode<synchronous>, transform_indices = @transform_2, window_bounds = array<i64: 1, 128>}, {pipeline_mode = #tpu.pipeline_mode<synchronous>, transform_indices = @transform_3, window_bounds = array<i64: 1, 128>}, {transform_indices = @transform_4, window_bounds = array<i64: 16, 128>}]} {
    %c0 = arith.constant 0 : index
    %c0_0 = arith.constant 0 : index
    %0 = vector.load %arg1[%c0, %c0_0] : memref<16x384xbf16, #tpu.memory_space<vmem>>, vector<16x384xbf16>
    %c0_1 = arith.constant 0 : index
    %c0_2 = arith.constant 0 : index
    %1 = vector.load %arg2[%c0_1, %c0_2] : memref<384x128xbf16, #tpu.memory_space<vmem>>, vector<384x128xbf16>
    %cst = arith.constant dense<0.000000e+00> : vector<16x128xf32>
    %2 = tpu.matmul %0, %1, %cst {dimension_numbers = #tpu.dot_dimension_numbers<[1], [0], [0], [1], [0, 0, 1, 1], [], []>} : vector<16x384xbf16>, vector<384x128xbf16>, vector<16x128xf32> -> vector<16x128xf32>
    %c0_3 = arith.constant 0 : index
    %c0_4 = arith.constant 0 : index
    %3 = vector.load %arg3[%c0_3, %c0_4] : memref<1x128xf32, #tpu.memory_space<vmem>>, vector<1x128xf32>
    %4 = vector.broadcast %3 : vector<1x128xf32> to vector<16x128xf32>
    %5 = arith.mulf %2, %4 : vector<16x128xf32>
    %c0_5 = arith.constant 0 : index
    %c0_6 = arith.constant 0 : index
    %6 = vector.load %arg4[%c0_5, %c0_6] : memref<1x128xf32, #tpu.memory_space<vmem>>, vector<1x128xf32>
    %7 = vector.broadcast %6 : vector<1x128xf32> to vector<16x128xf32>
    %8 = arith.addf %5, %7 : vector<16x128xf32>
    %cst_7 = arith.constant 0.000000e+00 : f32
    %9 = vector.broadcast %cst_7 : f32 to vector<16x128xf32>
    %10 = arith.maximumf %8, %9 : vector<16x128xf32>
    %c0_8 = arith.constant 0 : index
    %c0_9 = arith.constant 0 : index
    %11 = vector.load %arg5[%c0_8, %c0_9] : memref<16x128xf32, #tpu.memory_space<vmem>>, vector<16x128xf32>
    tpu.vector_store %arg5[%c0_8, %c0_9], %10 {strides = array<i32>} : memref<16x128xf32, #tpu.memory_space<vmem>>, vector<16x128xf32>,
    return
  }
  func.func @transform_0(%arg0: i32) -> (i32, i32) {
    %c0_i32 = arith.constant 0 : i32
    %c0_i32_0 = arith.constant 0 : i32
    return %arg0, %c0_i32 : i32, i32
  }
  func.func @transform_1(%arg0: i32) -> (i32, i32) {
    %c0_i32 = arith.constant 0 : i32
    %c0_i32_0 = arith.constant 0 : i32
    %c0_i32_1 = arith.constant 0 : i32
    return %c0_i32, %c0_i32_0 : i32, i32
  }
  func.func @transform_2(%arg0: i32) -> (i32, i32) {
    %c0_i32 = arith.constant 0 : i32
    %c0_i32_0 = arith.constant 0 : i32
    %c0_i32_1 = arith.constant 0 : i32
    return %c0_i32, %c0_i32_0 : i32, i32
  }
  func.func @transform_3(%arg0: i32) -> (i32, i32) {
    %c0_i32 = arith.constant 0 : i32
    %c0_i32_0 = arith.constant 0 : i32
    %c0_i32_1 = arith.constant 0 : i32
    return %c0_i32, %c0_i32_0 : i32, i32
  }
  func.func @transform_4(%arg0: i32) -> (i32, i32) {
    %c0_i32 = arith.constant 0 : i32
    %c0_i32_0 = arith.constant 0 : i32
    return %arg0, %c0_i32 : i32, i32
  }
}

module attributes {stable_mosaic.version = 11 : i64} {
  func.func @_matmul_affine_kernel(%arg0: i32, %arg1: memref<16x192xbf16, #tpu.memory_space<vmem>>, %arg2: memref<192x128xbf16, #tpu.memory_space<vmem>>, %arg3: memref<1x128xf32, #tpu.memory_space<vmem>>, %arg4: memref<1x128xf32, #tpu.memory_space<vmem>>, %arg5: memref<16x128xf32, #tpu.memory_space<vmem>>) attributes {dimension_semantics = [#tpu.dimension_semantics<parallel>], iteration_bounds = array<i64: 1>, scalar_prefetch = 0 : i64, scratch_operands = 0 : i64, tpu.core_type = #tpu.core_type<tc>, window_params = [{transform_indices = @transform_0, window_bounds = array<i64: 16, 192>}, {pipeline_mode = #tpu.pipeline_mode<synchronous>, transform_indices = @transform_1, window_bounds = array<i64: 192, 128>}, {pipeline_mode = #tpu.pipeline_mode<synchronous>, transform_indices = @transform_2, window_bounds = array<i64: 1, 128>}, {pipeline_mode = #tpu.pipeline_mode<synchronous>, transform_indices = @transform_3, window_bounds = array<i64: 1, 128>}, {transform_indices = @transform_4, window_bounds = array<i64: 16, 128>}]} {
    %c0 = arith.constant 0 : index
    %c0_0 = arith.constant 0 : index
    %0 = vector.load %arg1[%c0, %c0_0] : memref<16x192xbf16, #tpu.memory_space<vmem>>, vector<16x192xbf16>
    %c0_1 = arith.constant 0 : index
    %c0_2 = arith.constant 0 : index
    %1 = vector.load %arg2[%c0_1, %c0_2] : memref<192x128xbf16, #tpu.memory_space<vmem>>, vector<192x128xbf16>
    %cst = arith.constant dense<0.000000e+00> : vector<16x128xf32>
    %2 = tpu.matmul %0, %1, %cst {dimension_numbers = #tpu.dot_dimension_numbers<[1], [0], [0], [1], [0, 0, 1, 1], [], []>} : vector<16x192xbf16>, vector<192x128xbf16>, vector<16x128xf32> -> vector<16x128xf32>
    %c0_3 = arith.constant 0 : index
    %c0_4 = arith.constant 0 : index
    %3 = vector.load %arg3[%c0_3, %c0_4] : memref<1x128xf32, #tpu.memory_space<vmem>>, vector<1x128xf32>
    %4 = vector.broadcast %3 : vector<1x128xf32> to vector<16x128xf32>
    %5 = arith.mulf %2, %4 : vector<16x128xf32>
    %c0_5 = arith.constant 0 : index
    %c0_6 = arith.constant 0 : index
    %6 = vector.load %arg4[%c0_5, %c0_6] : memref<1x128xf32, #tpu.memory_space<vmem>>, vector<1x128xf32>
    %7 = vector.broadcast %6 : vector<1x128xf32> to vector<16x128xf32>
    %8 = arith.addf %5, %7 : vector<16x128xf32>
    %cst_7 = arith.constant 0.000000e+00 : f32
    %9 = vector.broadcast %cst_7 : f32 to vector<16x128xf32>
    %10 = arith.maximumf %8, %9 : vector<16x128xf32>
    %c0_8 = arith.constant 0 : index
    %c0_9 = arith.constant 0 : index
    %11 = vector.load %arg5[%c0_8, %c0_9] : memref<16x128xf32, #tpu.memory_space<vmem>>, vector<16x128xf32>
    tpu.vector_store %arg5[%c0_8, %c0_9], %10 {strides = array<i32>} : memref<16x128xf32, #tpu.memory_space<vmem>>, vector<16x128xf32>,
    return
  }
  func.func @transform_0(%arg0: i32) -> (i32, i32) {
    %c0_i32 = arith.constant 0 : i32
    %c0_i32_0 = arith.constant 0 : i32
    return %arg0, %c0_i32 : i32, i32
  }
  func.func @transform_1(%arg0: i32) -> (i32, i32) {
    %c0_i32 = arith.constant 0 : i32
    %c0_i32_0 = arith.constant 0 : i32
    %c0_i32_1 = arith.constant 0 : i32
    return %c0_i32, %c0_i32_0 : i32, i32
  }
  func.func @transform_2(%arg0: i32) -> (i32, i32) {
    %c0_i32 = arith.constant 0 : i32
    %c0_i32_0 = arith.constant 0 : i32
    %c0_i32_1 = arith.constant 0 : i32
    return %c0_i32, %c0_i32_0 : i32, i32
  }
  func.func @transform_3(%arg0: i32) -> (i32, i32) {
    %c0_i32 = arith.constant 0 : i32
    %c0_i32_0 = arith.constant 0 : i32
    %c0_i32_1 = arith.constant 0 : i32
    return %c0_i32, %c0_i32_0 : i32, i32
  }
  func.func @transform_4(%arg0: i32) -> (i32, i32) {
    %c0_i32 = arith.constant 0 : i32
    %c0_i32_0 = arith.constant 0 : i32
    return %arg0, %c0_i32 : i32, i32
  }
}

module attributes {stable_mosaic.version = 11 : i64} {
  func.func @_matmul_affine_kernel(%arg0: i32, %arg1: memref<16x64xbf16, #tpu.memory_space<vmem>>, %arg2: memref<64x128xbf16, #tpu.memory_space<vmem>>, %arg3: memref<1x128xf32, #tpu.memory_space<vmem>>, %arg4: memref<1x128xf32, #tpu.memory_space<vmem>>, %arg5: memref<16x128xf32, #tpu.memory_space<vmem>>) attributes {dimension_semantics = [#tpu.dimension_semantics<parallel>], iteration_bounds = array<i64: 1>, scalar_prefetch = 0 : i64, scratch_operands = 0 : i64, tpu.core_type = #tpu.core_type<tc>, window_params = [{transform_indices = @transform_0, window_bounds = array<i64: 16, 64>}, {pipeline_mode = #tpu.pipeline_mode<synchronous>, transform_indices = @transform_1, window_bounds = array<i64: 64, 128>}, {pipeline_mode = #tpu.pipeline_mode<synchronous>, transform_indices = @transform_2, window_bounds = array<i64: 1, 128>}, {pipeline_mode = #tpu.pipeline_mode<synchronous>, transform_indices = @transform_3, window_bounds = array<i64: 1, 128>}, {transform_indices = @transform_4, window_bounds = array<i64: 16, 128>}]} {
    %c0 = arith.constant 0 : index
    %c0_0 = arith.constant 0 : index
    %0 = vector.load %arg1[%c0, %c0_0] : memref<16x64xbf16, #tpu.memory_space<vmem>>, vector<16x64xbf16>
    %c0_1 = arith.constant 0 : index
    %c0_2 = arith.constant 0 : index
    %1 = vector.load %arg2[%c0_1, %c0_2] : memref<64x128xbf16, #tpu.memory_space<vmem>>, vector<64x128xbf16>
    %cst = arith.constant dense<0.000000e+00> : vector<16x128xf32>
    %2 = tpu.matmul %0, %1, %cst {dimension_numbers = #tpu.dot_dimension_numbers<[1], [0], [0], [1], [0, 0, 1, 1], [], []>} : vector<16x64xbf16>, vector<64x128xbf16>, vector<16x128xf32> -> vector<16x128xf32>
    %c0_3 = arith.constant 0 : index
    %c0_4 = arith.constant 0 : index
    %3 = vector.load %arg3[%c0_3, %c0_4] : memref<1x128xf32, #tpu.memory_space<vmem>>, vector<1x128xf32>
    %4 = vector.broadcast %3 : vector<1x128xf32> to vector<16x128xf32>
    %5 = arith.mulf %2, %4 : vector<16x128xf32>
    %c0_5 = arith.constant 0 : index
    %c0_6 = arith.constant 0 : index
    %6 = vector.load %arg4[%c0_5, %c0_6] : memref<1x128xf32, #tpu.memory_space<vmem>>, vector<1x128xf32>
    %7 = vector.broadcast %6 : vector<1x128xf32> to vector<16x128xf32>
    %8 = arith.addf %5, %7 : vector<16x128xf32>
    %c0_7 = arith.constant 0 : index
    %c0_8 = arith.constant 0 : index
    %9 = vector.load %arg5[%c0_7, %c0_8] : memref<16x128xf32, #tpu.memory_space<vmem>>, vector<16x128xf32>
    tpu.vector_store %arg5[%c0_7, %c0_8], %8 {strides = array<i32>} : memref<16x128xf32, #tpu.memory_space<vmem>>, vector<16x128xf32>,
    return
  }
  func.func @transform_0(%arg0: i32) -> (i32, i32) {
    %c0_i32 = arith.constant 0 : i32
    %c0_i32_0 = arith.constant 0 : i32
    return %arg0, %c0_i32 : i32, i32
  }
  func.func @transform_1(%arg0: i32) -> (i32, i32) {
    %c0_i32 = arith.constant 0 : i32
    %c0_i32_0 = arith.constant 0 : i32
    %c0_i32_1 = arith.constant 0 : i32
    return %c0_i32, %c0_i32_0 : i32, i32
  }
  func.func @transform_2(%arg0: i32) -> (i32, i32) {
    %c0_i32 = arith.constant 0 : i32
    %c0_i32_0 = arith.constant 0 : i32
    %c0_i32_1 = arith.constant 0 : i32
    return %c0_i32, %c0_i32_0 : i32, i32
  }
  func.func @transform_3(%arg0: i32) -> (i32, i32) {
    %c0_i32 = arith.constant 0 : i32
    %c0_i32_0 = arith.constant 0 : i32
    %c0_i32_1 = arith.constant 0 : i32
    return %c0_i32, %c0_i32_0 : i32, i32
  }
  func.func @transform_4(%arg0: i32) -> (i32, i32) {
    %c0_i32 = arith.constant 0 : i32
    %c0_i32_0 = arith.constant 0 : i32
    return %arg0, %c0_i32 : i32, i32
  }
}

module attributes {stable_mosaic.version = 11 : i64} {
  func.func @_matmul_affine_kernel(%arg0: i32, %arg1: memref<16x128xbf16, #tpu.memory_space<vmem>>, %arg2: memref<128x2048xbf16, #tpu.memory_space<vmem>>, %arg3: memref<1x2048xf32, #tpu.memory_space<vmem>>, %arg4: memref<1x2048xf32, #tpu.memory_space<vmem>>, %arg5: memref<16x2048xf32, #tpu.memory_space<vmem>>) attributes {dimension_semantics = [#tpu.dimension_semantics<parallel>], iteration_bounds = array<i64: 1>, scalar_prefetch = 0 : i64, scratch_operands = 0 : i64, tpu.core_type = #tpu.core_type<tc>, window_params = [{transform_indices = @transform_0, window_bounds = array<i64: 16, 128>}, {pipeline_mode = #tpu.pipeline_mode<synchronous>, transform_indices = @transform_1, window_bounds = array<i64: 128, 2048>}, {pipeline_mode = #tpu.pipeline_mode<synchronous>, transform_indices = @transform_2, window_bounds = array<i64: 1, 2048>}, {pipeline_mode = #tpu.pipeline_mode<synchronous>, transform_indices = @transform_3, window_bounds = array<i64: 1, 2048>}, {transform_indices = @transform_4, window_bounds = array<i64: 16, 2048>}]} {
    %c0 = arith.constant 0 : index
    %c0_0 = arith.constant 0 : index
    %0 = vector.load %arg1[%c0, %c0_0] : memref<16x128xbf16, #tpu.memory_space<vmem>>, vector<16x128xbf16>
    %c0_1 = arith.constant 0 : index
    %c0_2 = arith.constant 0 : index
    %1 = vector.load %arg2[%c0_1, %c0_2] : memref<128x2048xbf16, #tpu.memory_space<vmem>>, vector<128x2048xbf16>
    %cst = arith.constant dense<0.000000e+00> : vector<16x2048xf32>
    %2 = tpu.matmul %0, %1, %cst {dimension_numbers = #tpu.dot_dimension_numbers<[1], [0], [0], [1], [0, 0, 1, 1], [], []>} : vector<16x128xbf16>, vector<128x2048xbf16>, vector<16x2048xf32> -> vector<16x2048xf32>
    %c0_3 = arith.constant 0 : index
    %c0_4 = arith.constant 0 : index
    %3 = vector.load %arg3[%c0_3, %c0_4] : memref<1x2048xf32, #tpu.memory_space<vmem>>, vector<1x2048xf32>
    %4 = vector.broadcast %3 : vector<1x2048xf32> to vector<16x2048xf32>
    %5 = arith.mulf %2, %4 : vector<16x2048xf32>
    %c0_5 = arith.constant 0 : index
    %c0_6 = arith.constant 0 : index
    %6 = vector.load %arg4[%c0_5, %c0_6] : memref<1x2048xf32, #tpu.memory_space<vmem>>, vector<1x2048xf32>
    %7 = vector.broadcast %6 : vector<1x2048xf32> to vector<16x2048xf32>
    %8 = arith.addf %5, %7 : vector<16x2048xf32>
    %c0_7 = arith.constant 0 : index
    %c0_8 = arith.constant 0 : index
    %9 = vector.load %arg5[%c0_7, %c0_8] : memref<16x2048xf32, #tpu.memory_space<vmem>>, vector<16x2048xf32>
    tpu.vector_store %arg5[%c0_7, %c0_8], %8 {strides = array<i32>} : memref<16x2048xf32, #tpu.memory_space<vmem>>, vector<16x2048xf32>,
    return
  }
  func.func @transform_0(%arg0: i32) -> (i32, i32) {
    %c0_i32 = arith.constant 0 : i32
    %c0_i32_0 = arith.constant 0 : i32
    return %arg0, %c0_i32 : i32, i32
  }
  func.func @transform_1(%arg0: i32) -> (i32, i32) {
    %c0_i32 = arith.constant 0 : i32
    %c0_i32_0 = arith.constant 0 : i32
    %c0_i32_1 = arith.constant 0 : i32
    return %c0_i32, %c0_i32_0 : i32, i32
  }
  func.func @transform_2(%arg0: i32) -> (i32, i32) {
    %c0_i32 = arith.constant 0 : i32
    %c0_i32_0 = arith.constant 0 : i32
    %c0_i32_1 = arith.constant 0 : i32
    return %c0_i32, %c0_i32_0 : i32, i32
  }
  func.func @transform_3(%arg0: i32) -> (i32, i32) {
    %c0_i32 = arith.constant 0 : i32
    %c0_i32_0 = arith.constant 0 : i32
    %c0_i32_1 = arith.constant 0 : i32
    return %c0_i32, %c0_i32_0 : i32, i32
  }
  func.func @transform_4(%arg0: i32) -> (i32, i32) {
    %c0_i32 = arith.constant 0 : i32
    %c0_i32_0 = arith.constant 0 : i32
    return %arg0, %c0_i32 : i32, i32
  }
}

module attributes {stable_mosaic.version = 11 : i64} {
  func.func @_lstm_multi_kernel(%arg0: i32, %arg1: memref<32x2x512xf32, #tpu.memory_space<vmem>>, %arg2: memref<512x512xbf16, #tpu.memory_space<vmem>>, %arg3: memref<32x2x128xf32, #tpu.memory_space<vmem>>, %arg4: memref<8x128xf32, #tpu.memory_space<vmem>>, %arg5: memref<8x128xf32, #tpu.memory_space<vmem>>) attributes {dimension_semantics = [#tpu.dimension_semantics<arbitrary>], iteration_bounds = array<i64: 1>, scalar_prefetch = 0 : i64, scratch_operands = 2 : i64, tpu.core_type = #tpu.core_type<tc>, window_params = [{pipeline_mode = #tpu.pipeline_mode<synchronous>, transform_indices = @transform_0, window_bounds = array<i64: 32, 2, 512>}, {pipeline_mode = #tpu.pipeline_mode<synchronous>, transform_indices = @transform_1, window_bounds = array<i64: 512, 512>}, {pipeline_mode = #tpu.pipeline_mode<synchronous>, transform_indices = @transform_2, window_bounds = array<i64: 32, 2, 128>}]} {
    %cst = arith.constant 0.000000e+00 : f32
    %0 = vector.broadcast %cst : f32 to vector<8x128xf32>
    %c0 = arith.constant 0 : index
    %c0_0 = arith.constant 0 : index
    %1 = vector.load %arg4[%c0, %c0_0] : memref<8x128xf32, #tpu.memory_space<vmem>>, vector<8x128xf32>
    tpu.vector_store %arg4[%c0, %c0_0], %0 {strides = array<i32>} : memref<8x128xf32, #tpu.memory_space<vmem>>, vector<8x128xf32>,
    %cst_1 = arith.constant 0.000000e+00 : f32
    %2 = vector.broadcast %cst_1 : f32 to vector<8x128xf32>
    %c0_2 = arith.constant 0 : index
    %c0_3 = arith.constant 0 : index
    %3 = vector.load %arg5[%c0_2, %c0_3] : memref<8x128xf32, #tpu.memory_space<vmem>>, vector<8x128xf32>
    tpu.vector_store %arg5[%c0_2, %c0_3], %2 {strides = array<i32>} : memref<8x128xf32, #tpu.memory_space<vmem>>, vector<8x128xf32>,
    %c0_i32 = arith.constant 0 : i32
    %c8_i32 = arith.constant 8 : i32
    %4 = arith.addi %c0_i32, %c8_i32 : i32
    %c1_i32 = arith.constant 1 : i32
    scf.for %arg6 = %c0_i32 to %4 step %c1_i32  : i32 {
      %c7_i32 = arith.constant 7 : i32
      %5 = arith.subi %c7_i32, %arg6 : i32
      %c0_5 = arith.constant 0 : index
      %c0_6 = arith.constant 0 : index
      %6 = vector.load %arg4[%c0_5, %c0_6] : memref<8x128xf32, #tpu.memory_space<vmem>>, vector<2x128xf32>
      %7 = arith.truncf %6 : vector<2x128xf32> to vector<2x128xbf16>
      %c0_7 = arith.constant 0 : index
      %c0_8 = arith.constant 0 : index
      %8 = vector.load %arg2[%c0_7, %c0_8] : memref<512x512xbf16, #tpu.memory_space<vmem>>, vector<128x512xbf16>
      %c0_i32_9 = arith.constant 0 : i32
      %9 = arith.addi %c0_i32_9, %arg6 : i32
      %10 = arith.index_cast %9 : i32 to index
      %c0_10 = arith.constant 0 : index
      %c0_11 = arith.constant 0 : index
      %11 = vector.load %arg1[%10, %c0_10, %c0_11] : memref<32x2x512xf32, #tpu.memory_space<vmem>>, vector<1x2x512xf32>
      %12 = vector.shape_cast %11 : vector<1x2x512xf32> to vector<2x512xf32>
      %cst_12 = arith.constant dense<0.000000e+00> : vector<2x512xf32>
      %13 = tpu.matmul %7, %8, %cst_12 {dimension_numbers = #tpu.dot_dimension_numbers<[1], [0], [0], [1], [0, 0, 1, 1], [], []>} : vector<2x128xbf16>, vector<128x512xbf16>, vector<2x512xf32> -> vector<2x512xf32>
      %14 = arith.addf %12, %13 : vector<2x512xf32>
      %c2 = arith.constant 2 : index
      %c0_13 = arith.constant 0 : index
      %15 = vector.load %arg4[%c2, %c0_13] : memref<8x128xf32, #tpu.memory_space<vmem>>, vector<2x128xf32>
      %16 = arith.truncf %15 : vector<2x128xf32> to vector<2x128xbf16>
      %c128 = arith.constant 128 : index
      %c0_14 = arith.constant 0 : index
      %17 = vector.load %arg2[%c128, %c0_14] : memref<512x512xbf16, #tpu.memory_space<vmem>>, vector<128x512xbf16>
      %c8_i32_15 = arith.constant 8 : i32
      %18 = arith.addi %c8_i32_15, %5 : i32
      %19 = arith.index_cast %18 : i32 to index
      %c0_16 = arith.constant 0 : index
      %c0_17 = arith.constant 0 : index
      %20 = vector.load %arg1[%19, %c0_16, %c0_17] : memref<32x2x512xf32, #tpu.memory_space<vmem>>, vector<1x2x512xf32>
      %21 = vector.shape_cast %20 : vector<1x2x512xf32> to vector<2x512xf32>
      %cst_18 = arith.constant dense<0.000000e+00> : vector<2x512xf32>
      %22 = tpu.matmul %16, %17, %cst_18 {dimension_numbers = #tpu.dot_dimension_numbers<[1], [0], [0], [1], [0, 0, 1, 1], [], []>} : vector<2x128xbf16>, vector<128x512xbf16>, vector<2x512xf32> -> vector<2x512xf32>
      %23 = arith.addf %21, %22 : vector<2x512xf32>
      %c4 = arith.constant 4 : index
      %c0_19 = arith.constant 0 : index
      %24 = vector.load %arg4[%c4, %c0_19] : memref<8x128xf32, #tpu.memory_space<vmem>>, vector<2x128xf32>
      %25 = arith.truncf %24 : vector<2x128xf32> to vector<2x128xbf16>
      %c256 = arith.constant 256 : index
      %c0_20 = arith.constant 0 : index
      %26 = vector.load %arg2[%c256, %c0_20] : memref<512x512xbf16, #tpu.memory_space<vmem>>, vector<128x512xbf16>
      %c16_i32 = arith.constant 16 : i32
      %27 = arith.addi %c16_i32, %arg6 : i32
      %28 = arith.index_cast %27 : i32 to index
      %c0_21 = arith.constant 0 : index
      %c0_22 = arith.constant 0 : index
      %29 = vector.load %arg1[%28, %c0_21, %c0_22] : memref<32x2x512xf32, #tpu.memory_space<vmem>>, vector<1x2x512xf32>
      %30 = vector.shape_cast %29 : vector<1x2x512xf32> to vector<2x512xf32>
      %cst_23 = arith.constant dense<0.000000e+00> : vector<2x512xf32>
      %31 = tpu.matmul %25, %26, %cst_23 {dimension_numbers = #tpu.dot_dimension_numbers<[1], [0], [0], [1], [0, 0, 1, 1], [], []>} : vector<2x128xbf16>, vector<128x512xbf16>, vector<2x512xf32> -> vector<2x512xf32>
      %32 = arith.addf %30, %31 : vector<2x512xf32>
      %c6 = arith.constant 6 : index
      %c0_24 = arith.constant 0 : index
      %33 = vector.load %arg4[%c6, %c0_24] : memref<8x128xf32, #tpu.memory_space<vmem>>, vector<2x128xf32>
      %34 = arith.truncf %33 : vector<2x128xf32> to vector<2x128xbf16>
      %c384 = arith.constant 384 : index
      %c0_25 = arith.constant 0 : index
      %35 = vector.load %arg2[%c384, %c0_25] : memref<512x512xbf16, #tpu.memory_space<vmem>>, vector<128x512xbf16>
      %c24_i32 = arith.constant 24 : i32
      %36 = arith.addi %c24_i32, %5 : i32
      %37 = arith.index_cast %36 : i32 to index
      %c0_26 = arith.constant 0 : index
      %c0_27 = arith.constant 0 : index
      %38 = vector.load %arg1[%37, %c0_26, %c0_27] : memref<32x2x512xf32, #tpu.memory_space<vmem>>, vector<1x2x512xf32>
      %39 = vector.shape_cast %38 : vector<1x2x512xf32> to vector<2x512xf32>
      %cst_28 = arith.constant dense<0.000000e+00> : vector<2x512xf32>
      %40 = tpu.matmul %34, %35, %cst_28 {dimension_numbers = #tpu.dot_dimension_numbers<[1], [0], [0], [1], [0, 0, 1, 1], [], []>} : vector<2x128xbf16>, vector<128x512xbf16>, vector<2x512xf32> -> vector<2x512xf32>
      %41 = arith.addf %39, %40 : vector<2x512xf32>
      %42 = tpu.concatenate %14, %23, %32, %41 in 0 : vector<2x512xf32>, vector<2x512xf32>, vector<2x512xf32>, vector<2x512xf32> -> vector<8x512xf32>
      %43 = vector.extract_strided_slice %42 {offsets = [0, 0], sizes = [8, 128], strides = [1, 1]} : vector<8x512xf32> to vector<8x128xf32>
      %cst_29 = arith.constant 5.000000e-01 : f32
      %44 = vector.broadcast %cst_29 : f32 to vector<8x128xf32>
      %45 = arith.mulf %44, %43 : vector<8x128xf32>
      %46 = math.tanh %45 : vector<8x128xf32>
      %cst_30 = arith.constant 1.000000e+00 : f32
      %47 = vector.broadcast %cst_30 : f32 to vector<8x128xf32>
      %48 = arith.addf %46, %47 : vector<8x128xf32>
      %cst_31 = arith.constant 5.000000e-01 : f32
      %49 = vector.broadcast %cst_31 : f32 to vector<8x128xf32>
      %50 = arith.mulf %49, %48 : vector<8x128xf32>
      %51 = vector.extract_strided_slice %42 {offsets = [0, 128], sizes = [8, 128], strides = [1, 1]} : vector<8x512xf32> to vector<8x128xf32>
      %cst_32 = arith.constant 5.000000e-01 : f32
      %52 = vector.broadcast %cst_32 : f32 to vector<8x128xf32>
      %53 = arith.mulf %52, %51 : vector<8x128xf32>
      %54 = math.tanh %53 : vector<8x128xf32>
      %cst_33 = arith.constant 1.000000e+00 : f32
      %55 = vector.broadcast %cst_33 : f32 to vector<8x128xf32>
      %56 = arith.addf %54, %55 : vector<8x128xf32>
      %cst_34 = arith.constant 5.000000e-01 : f32
      %57 = vector.broadcast %cst_34 : f32 to vector<8x128xf32>
      %58 = arith.mulf %57, %56 : vector<8x128xf32>
      %59 = vector.extract_strided_slice %42 {offsets = [0, 256], sizes = [8, 128], strides = [1, 1]} : vector<8x512xf32> to vector<8x128xf32>
      %60 = math.tanh %59 : vector<8x128xf32>
      %61 = vector.extract_strided_slice %42 {offsets = [0, 384], sizes = [8, 128], strides = [1, 1]} : vector<8x512xf32> to vector<8x128xf32>
      %cst_35 = arith.constant 5.000000e-01 : f32
      %62 = vector.broadcast %cst_35 : f32 to vector<8x128xf32>
      %63 = arith.mulf %62, %61 : vector<8x128xf32>
      %64 = math.tanh %63 : vector<8x128xf32>
      %cst_36 = arith.constant 1.000000e+00 : f32
      %65 = vector.broadcast %cst_36 : f32 to vector<8x128xf32>
      %66 = arith.addf %64, %65 : vector<8x128xf32>
      %cst_37 = arith.constant 5.000000e-01 : f32
      %67 = vector.broadcast %cst_37 : f32 to vector<8x128xf32>
      %68 = arith.mulf %67, %66 : vector<8x128xf32>
      %c0_38 = arith.constant 0 : index
      %c0_39 = arith.constant 0 : index
      %69 = vector.load %arg5[%c0_38, %c0_39] : memref<8x128xf32, #tpu.memory_space<vmem>>, vector<8x128xf32>
      %70 = arith.mulf %58, %69 : vector<8x128xf32>
      %71 = arith.mulf %50, %60 : vector<8x128xf32>
      %72 = arith.addf %70, %71 : vector<8x128xf32>
      %73 = math.tanh %72 : vector<8x128xf32>
      %74 = arith.mulf %68, %73 : vector<8x128xf32>
      %c0_40 = arith.constant 0 : index
      %c0_41 = arith.constant 0 : index
      %75 = vector.load %arg5[%c0_40, %c0_41] : memref<8x128xf32, #tpu.memory_space<vmem>>, vector<8x128xf32>
      tpu.vector_store %arg5[%c0_40, %c0_41], %72 {strides = array<i32>} : memref<8x128xf32, #tpu.memory_space<vmem>>, vector<8x128xf32>,
      %c0_42 = arith.constant 0 : index
      %c0_43 = arith.constant 0 : index
      %76 = vector.load %arg4[%c0_42, %c0_43] : memref<8x128xf32, #tpu.memory_space<vmem>>, vector<8x128xf32>
      tpu.vector_store %arg4[%c0_42, %c0_43], %74 {strides = array<i32>} : memref<8x128xf32, #tpu.memory_space<vmem>>, vector<8x128xf32>,
      %77 = vector.extract_strided_slice %74 {offsets = [0, 0], sizes = [2, 128], strides = [1, 1]} : vector<8x128xf32> to vector<2x128xf32>
      %c0_i32_44 = arith.constant 0 : i32
      %78 = arith.addi %c0_i32_44, %arg6 : i32
      %79 = arith.index_cast %78 : i32 to index
      %c0_45 = arith.constant 0 : index
      %c0_46 = arith.constant 0 : index
      %80 = vector.load %arg3[%79, %c0_45, %c0_46] : memref<32x2x128xf32, #tpu.memory_space<vmem>>, vector<1x2x128xf32>
      %81 = vector.shape_cast %80 : vector<1x2x128xf32> to vector<2x128xf32>
      %82 = vector.shape_cast %77 : vector<2x128xf32> to vector<1x2x128xf32>
      tpu.vector_store %arg3[%79, %c0_45, %c0_46], %82 {strides = array<i32>} : memref<32x2x128xf32, #tpu.memory_space<vmem>>, vector<1x2x128xf32>,
      %83 = vector.extract_strided_slice %74 {offsets = [2, 0], sizes = [2, 128], strides = [1, 1]} : vector<8x128xf32> to vector<2x128xf32>
      %c8_i32_47 = arith.constant 8 : i32
      %84 = arith.addi %c8_i32_47, %5 : i32
      %85 = arith.index_cast %84 : i32 to index
      %c0_48 = arith.constant 0 : index
      %c0_49 = arith.constant 0 : index
      %86 = vector.load %arg3[%85, %c0_48, %c0_49] : memref<32x2x128xf32, #tpu.memory_space<vmem>>, vector<1x2x128xf32>
      %87 = vector.shape_cast %86 : vector<1x2x128xf32> to vector<2x128xf32>
      %88 = vector.shape_cast %83 : vector<2x128xf32> to vector<1x2x128xf32>
      tpu.vector_store %arg3[%85, %c0_48, %c0_49], %88 {strides = array<i32>} : memref<32x2x128xf32, #tpu.memory_space<vmem>>, vector<1x2x128xf32>,
      %89 = vector.extract_strided_slice %74 {offsets = [4, 0], sizes = [2, 128], strides = [1, 1]} : vector<8x128xf32> to vector<2x128xf32>
      %c16_i32_50 = arith.constant 16 : i32
      %90 = arith.addi %c16_i32_50, %arg6 : i32
      %91 = arith.index_cast %90 : i32 to index
      %c0_51 = arith.constant 0 : index
      %c0_52 = arith.constant 0 : index
      %92 = vector.load %arg3[%91, %c0_51, %c0_52] : memref<32x2x128xf32, #tpu.memory_space<vmem>>, vector<1x2x128xf32>
      %93 = vector.shape_cast %92 : vector<1x2x128xf32> to vector<2x128xf32>
      %94 = vector.shape_cast %89 : vector<2x128xf32> to vector<1x2x128xf32>
      tpu.vector_store %arg3[%91, %c0_51, %c0_52], %94 {strides = array<i32>} : memref<32x2x128xf32, #tpu.memory_space<vmem>>, vector<1x2x128xf32>,
      %95 = vector.extract_strided_slice %74 {offsets = [6, 0], sizes = [2, 128], strides = [1, 1]} : vector<8x128xf32> to vector<2x128xf32>
      %c24_i32_53 = arith.constant 24 : i32
      %96 = arith.addi %c24_i32_53, %5 : i32
      %97 = arith.index_cast %96 : i32 to index
      %c0_54 = arith.constant 0 : index
      %c0_55 = arith.constant 0 : index
      %98 = vector.load %arg3[%97, %c0_54, %c0_55] : memref<32x2x128xf32, #tpu.memory_space<vmem>>, vector<1x2x128xf32>
      %99 = vector.shape_cast %98 : vector<1x2x128xf32> to vector<2x128xf32>
      %100 = vector.shape_cast %95 : vector<2x128xf32> to vector<1x2x128xf32>
      tpu.vector_store %arg3[%97, %c0_54, %c0_55], %100 {strides = array<i32>} : memref<32x2x128xf32, #tpu.memory_space<vmem>>, vector<1x2x128xf32>,
    }
    %c8_i32_4 = arith.constant 8 : i32
    return
  }
  func.func @transform_0(%arg0: i32) -> (i32, i32, i32) {
    %c0_i32 = arith.constant 0 : i32
    %c0_i32_0 = arith.constant 0 : i32
    %c0_i32_1 = arith.constant 0 : i32
    %c0_i32_2 = arith.constant 0 : i32
    return %c0_i32, %c0_i32_0, %c0_i32_1 : i32, i32, i32
  }
  func.func @transform_1(%arg0: i32) -> (i32, i32) {
    %c0_i32 = arith.constant 0 : i32
    %c0_i32_0 = arith.constant 0 : i32
    %c0_i32_1 = arith.constant 0 : i32
    return %c0_i32, %c0_i32_0 : i32, i32
  }
  func.func @transform_2(%arg0: i32) -> (i32, i32, i32) {
    %c0_i32 = arith.constant 0 : i32
    %c0_i32_0 = arith.constant 0 : i32
    %c0_i32_1 = arith.constant 0 : i32
    %c0_i32_2 = arith.constant 0 : i32
    return %c0_i32, %c0_i32_0, %c0_i32_1 : i32, i32, i32
  }
}

module attributes {stable_mosaic.version = 11 : i64} {
  func.func @_matmul_affine_kernel(%arg0: i32, %arg1: memref<16x512xbf16, #tpu.memory_space<vmem>>, %arg2: memref<512x2048xbf16, #tpu.memory_space<vmem>>, %arg3: memref<1x2048xf32, #tpu.memory_space<vmem>>, %arg4: memref<1x2048xf32, #tpu.memory_space<vmem>>, %arg5: memref<16x2048xf32, #tpu.memory_space<vmem>>) attributes {dimension_semantics = [#tpu.dimension_semantics<parallel>], iteration_bounds = array<i64: 1>, scalar_prefetch = 0 : i64, scratch_operands = 0 : i64, tpu.core_type = #tpu.core_type<tc>, window_params = [{transform_indices = @transform_0, window_bounds = array<i64: 16, 512>}, {pipeline_mode = #tpu.pipeline_mode<synchronous>, transform_indices = @transform_1, window_bounds = array<i64: 512, 2048>}, {pipeline_mode = #tpu.pipeline_mode<synchronous>, transform_indices = @transform_2, window_bounds = array<i64: 1, 2048>}, {pipeline_mode = #tpu.pipeline_mode<synchronous>, transform_indices = @transform_3, window_bounds = array<i64: 1, 2048>}, {transform_indices = @transform_4, window_bounds = array<i64: 16, 2048>}]} {
    %c0 = arith.constant 0 : index
    %c0_0 = arith.constant 0 : index
    %0 = vector.load %arg1[%c0, %c0_0] : memref<16x512xbf16, #tpu.memory_space<vmem>>, vector<16x512xbf16>
    %c0_1 = arith.constant 0 : index
    %c0_2 = arith.constant 0 : index
    %1 = vector.load %arg2[%c0_1, %c0_2] : memref<512x2048xbf16, #tpu.memory_space<vmem>>, vector<512x2048xbf16>
    %cst = arith.constant dense<0.000000e+00> : vector<16x2048xf32>
    %2 = tpu.matmul %0, %1, %cst {dimension_numbers = #tpu.dot_dimension_numbers<[1], [0], [0], [1], [0, 0, 1, 1], [], []>} : vector<16x512xbf16>, vector<512x2048xbf16>, vector<16x2048xf32> -> vector<16x2048xf32>
    %c0_3 = arith.constant 0 : index
    %c0_4 = arith.constant 0 : index
    %3 = vector.load %arg3[%c0_3, %c0_4] : memref<1x2048xf32, #tpu.memory_space<vmem>>, vector<1x2048xf32>
    %4 = vector.broadcast %3 : vector<1x2048xf32> to vector<16x2048xf32>
    %5 = arith.mulf %2, %4 : vector<16x2048xf32>
    %c0_5 = arith.constant 0 : index
    %c0_6 = arith.constant 0 : index
    %6 = vector.load %arg4[%c0_5, %c0_6] : memref<1x2048xf32, #tpu.memory_space<vmem>>, vector<1x2048xf32>
    %7 = vector.broadcast %6 : vector<1x2048xf32> to vector<16x2048xf32>
    %8 = arith.addf %5, %7 : vector<16x2048xf32>
    %c0_7 = arith.constant 0 : index
    %c0_8 = arith.constant 0 : index
    %9 = vector.load %arg5[%c0_7, %c0_8] : memref<16x2048xf32, #tpu.memory_space<vmem>>, vector<16x2048xf32>
    tpu.vector_store %arg5[%c0_7, %c0_8], %8 {strides = array<i32>} : memref<16x2048xf32, #tpu.memory_space<vmem>>, vector<16x2048xf32>,
    return
  }
  func.func @transform_0(%arg0: i32) -> (i32, i32) {
    %c0_i32 = arith.constant 0 : i32
    %c0_i32_0 = arith.constant 0 : i32
    return %arg0, %c0_i32 : i32, i32
  }
  func.func @transform_1(%arg0: i32) -> (i32, i32) {
    %c0_i32 = arith.constant 0 : i32
    %c0_i32_0 = arith.constant 0 : i32
    %c0_i32_1 = arith.constant 0 : i32
    return %c0_i32, %c0_i32_0 : i32, i32
  }
  func.func @transform_2(%arg0: i32) -> (i32, i32) {
    %c0_i32 = arith.constant 0 : i32
    %c0_i32_0 = arith.constant 0 : i32
    %c0_i32_1 = arith.constant 0 : i32
    return %c0_i32, %c0_i32_0 : i32, i32
  }
  func.func @transform_3(%arg0: i32) -> (i32, i32) {
    %c0_i32 = arith.constant 0 : i32
    %c0_i32_0 = arith.constant 0 : i32
    %c0_i32_1 = arith.constant 0 : i32
    return %c0_i32, %c0_i32_0 : i32, i32
  }
  func.func @transform_4(%arg0: i32) -> (i32, i32) {
    %c0_i32 = arith.constant 0 : i32
    %c0_i32_0 = arith.constant 0 : i32
    return %arg0, %c0_i32 : i32, i32
  }
}

module attributes {stable_mosaic.version = 11 : i64} {
  func.func @_matmul_affine_kernel(%arg0: i32, %arg1: memref<16x512xbf16, #tpu.memory_space<vmem>>, %arg2: memref<512x256xbf16, #tpu.memory_space<vmem>>, %arg3: memref<1x256xf32, #tpu.memory_space<vmem>>, %arg4: memref<1x256xf32, #tpu.memory_space<vmem>>, %arg5: memref<16x256xf32, #tpu.memory_space<vmem>>) attributes {dimension_semantics = [#tpu.dimension_semantics<parallel>], iteration_bounds = array<i64: 1>, scalar_prefetch = 0 : i64, scratch_operands = 0 : i64, tpu.core_type = #tpu.core_type<tc>, window_params = [{transform_indices = @transform_0, window_bounds = array<i64: 16, 512>}, {pipeline_mode = #tpu.pipeline_mode<synchronous>, transform_indices = @transform_1, window_bounds = array<i64: 512, 256>}, {pipeline_mode = #tpu.pipeline_mode<synchronous>, transform_indices = @transform_2, window_bounds = array<i64: 1, 256>}, {pipeline_mode = #tpu.pipeline_mode<synchronous>, transform_indices = @transform_3, window_bounds = array<i64: 1, 256>}, {transform_indices = @transform_4, window_bounds = array<i64: 16, 256>}]} {
    %c0 = arith.constant 0 : index
    %c0_0 = arith.constant 0 : index
    %0 = vector.load %arg1[%c0, %c0_0] : memref<16x512xbf16, #tpu.memory_space<vmem>>, vector<16x512xbf16>
    %c0_1 = arith.constant 0 : index
    %c0_2 = arith.constant 0 : index
    %1 = vector.load %arg2[%c0_1, %c0_2] : memref<512x256xbf16, #tpu.memory_space<vmem>>, vector<512x256xbf16>
    %cst = arith.constant dense<0.000000e+00> : vector<16x256xf32>
    %2 = tpu.matmul %0, %1, %cst {dimension_numbers = #tpu.dot_dimension_numbers<[1], [0], [0], [1], [0, 0, 1, 1], [], []>} : vector<16x512xbf16>, vector<512x256xbf16>, vector<16x256xf32> -> vector<16x256xf32>
    %c0_3 = arith.constant 0 : index
    %c0_4 = arith.constant 0 : index
    %3 = vector.load %arg3[%c0_3, %c0_4] : memref<1x256xf32, #tpu.memory_space<vmem>>, vector<1x256xf32>
    %4 = vector.broadcast %3 : vector<1x256xf32> to vector<16x256xf32>
    %5 = arith.mulf %2, %4 : vector<16x256xf32>
    %c0_5 = arith.constant 0 : index
    %c0_6 = arith.constant 0 : index
    %6 = vector.load %arg4[%c0_5, %c0_6] : memref<1x256xf32, #tpu.memory_space<vmem>>, vector<1x256xf32>
    %7 = vector.broadcast %6 : vector<1x256xf32> to vector<16x256xf32>
    %8 = arith.addf %5, %7 : vector<16x256xf32>
    %c0_7 = arith.constant 0 : index
    %c0_8 = arith.constant 0 : index
    %9 = vector.load %arg5[%c0_7, %c0_8] : memref<16x256xf32, #tpu.memory_space<vmem>>, vector<16x256xf32>
    tpu.vector_store %arg5[%c0_7, %c0_8], %8 {strides = array<i32>} : memref<16x256xf32, #tpu.memory_space<vmem>>, vector<16x256xf32>,
    return
  }
  func.func @transform_0(%arg0: i32) -> (i32, i32) {
    %c0_i32 = arith.constant 0 : i32
    %c0_i32_0 = arith.constant 0 : i32
    return %arg0, %c0_i32 : i32, i32
  }
  func.func @transform_1(%arg0: i32) -> (i32, i32) {
    %c0_i32 = arith.constant 0 : i32
    %c0_i32_0 = arith.constant 0 : i32
    %c0_i32_1 = arith.constant 0 : i32
    return %c0_i32, %c0_i32_0 : i32, i32
  }
  func.func @transform_2(%arg0: i32) -> (i32, i32) {
    %c0_i32 = arith.constant 0 : i32
    %c0_i32_0 = arith.constant 0 : i32
    %c0_i32_1 = arith.constant 0 : i32
    return %c0_i32, %c0_i32_0 : i32, i32
  }
  func.func @transform_3(%arg0: i32) -> (i32, i32) {
    %c0_i32 = arith.constant 0 : i32
    %c0_i32_0 = arith.constant 0 : i32
    %c0_i32_1 = arith.constant 0 : i32
    return %c0_i32, %c0_i32_0 : i32, i32
  }
  func.func @transform_4(%arg0: i32) -> (i32, i32) {
    %c0_i32 = arith.constant 0 : i32
    %c0_i32_0 = arith.constant 0 : i32
    return %arg0, %c0_i32 : i32, i32
  }
}

</mosaic_0001>

<bundles_post_ra>
// kernel: transcriber_crnn_forward.11
= control target key start
LH: loop header
LB: loop body
LE: loop exit
PB: predicated region body
PF: predicated region fallthrough
CT: control target
= control target key end

     0   :  { %9 = vsyncpa [#allocation3], 0  ;;  %s272_s0 = inlined_call_operand.vmem [shape: bf16[16,48], index: 0, kind: input, shape index: {}]   ;;  %s273_s1 = inlined_call_operand.vmem [shape: bf16[48,128], index: 1, kind: input, shape index: {}]   ;;  %s274_s2 = inlined_call_operand.hbm [shape: f32[1,128], index: 2, kind: input, shape index: {}]   ;;  %s275_s3 = inlined_call_operand.hbm [shape: f32[1,128], index: 3, kind: input, shape index: {}]   ;;  %s276_s4 = inlined_call_operand.vmem [shape: f32[16,128], index: 4, kind: output, shape index: {}]  }
   0x1   :  { %10 = vsyncpa [#allocation5], 0  ;;  %s219_s15 = smov [#allocation2]   ;;  %s220_s17 = smov [#allocation4]  }
   0x2   :  { %s21_s16 = sshll.u32 %s219_s15, 4  ;;  %s31_s18 = sshll.u32 %s220_s17, 4  ;;  %s22_s16 = int_to_ptr.vmem [resolvable:$true] %s21_s16  ;;  %s32_s18 = int_to_ptr.vmem [resolvable:$true] %s31_s18 }
   0x3   :  { %s183_s19 = scalar_lea.vmem %s22_s16, 16  ;;  %s187_s20 = scalar_lea.vmem %s22_s16, 32 }
   0x4   :  { %p184_p0 = scmp.ne.s32.totalorder %s22_s16, %s183_s19  ;;  %p188_p1 = scmp.lt.s32.totalorder %s22_s16, %s22_s16 }
   0x5   :  { %p189_p2 = scmp.lt.s32.totalorder %s187_s20, %s183_s19 }
   0x7   :  { %p190_p3 = por %p189_p2, %p188_p1 }
   0x9   :  { %p191_p4 = pnand %p190_p3, %p184_p0 }
   0xb   :  { %194 = shalt.err (!%p191_p4)
}
   0xc   :  { %24 = dma.hbm_to_vmem [thread:$0]  %s274_s2, 16, %s22_s16, [#allocation3]  }
   0xd   :  { %s203_s23 = scalar_lea.vmem %s32_s18, 16  ;;  %s207_s24 = scalar_lea.vmem %s32_s18, 32 }
   0xe   :  { %p204_p5 = scmp.ne.s32.totalorder %s32_s18, %s203_s23  ;;  %p208_p6 = scmp.lt.s32.totalorder %s32_s18, %s32_s18 }
   0xf   :  { %p209_p7 = scmp.lt.s32.totalorder %s207_s24, %s203_s23 }
  0x11   :  { %p210_p8 = por %p209_p7, %p208_p6 }
  0x13   :  { %p211_p9 = pnand %p210_p8, %p204_p5 }
  0x15   :  { %214 = shalt.err (!%p211_p9)
}
  0x16   :  { %34 = dma.hbm_to_vmem [thread:$0]  %s275_s3, 16, %s32_s18, [#allocation5]  }
  0x17   :  { %215 = dma.done.wait [#allocation3], 16  }
  0x18   :  { %216 = vsyncadd [#allocation3], 4294967280 }
  0x19   :  { %217 = dma.done.wait [#allocation5], 16  }
  0x1a   :  { %218 = vsyncadd [#allocation5], 4294967280  ;;  %v221_v0 = vmov 0.0   ;;  %vm222_vm0 = vmmov 0   ;;  %v171_v1 = vld [vmem:[%s273_s1 + $0x10] sm:$0xff]   ;;  %v172_v2 = vld [vmem:[%s273_s1 + $0x8] sm:$0xff]  }
  0x1b   :  { %157 = vmatprep.subr.bf16.mxu0 %v221_v0  ;;  %163 = vmatprep.mubr.msk.bf16.mxu0 %vm222_vm0, %v221_v0  ;;  %v173_v3 = vld [vmem:[%s273_s1] sm:$0xff]   ;;  %vm73_vm1 = vcmask 392192  }
  0x1c   :  { %158 = vmatpush3.bf16.msra.mxu0 %v171_v1  ;;  %v174_v4 = vld [vmem:[%s272_s0] sm:$0xff]  }
  0x1d   :  { %159 = vmatprep.subr.bf16.mxu0 %v221_v0  ;;  %v151_v5 = vld [vmem:[#allocation2] ss:$0 sm:$0xff]  ;;  %v152_v7 = vld [vmem:[#allocation4] ss:$0 sm:$0xff] }
  0x20   :  { %160 = vmatpush3.bf16.msra.mxu0 %v172_v2 }
  0x21   :  { %161 = vmatprep.subr.bf16.mxu0 %v221_v0 }
  0x24   :  { %162 = vmatpush3.bf16.msra.mxu0 %v173_v3 }
  0x27   :  { %164 = vmatmul.mubr.msk.bf16.vlgmr.msra.gmra.mxu0 %vm73_vm1, %v174_v4 }
  0xe7   :  { %v111_v6 = vpop.f32.mrf.mxu0 }
  0xe8   :  { %v125_v8 = vmul.f32 %v151_v5, %v111_v6 }
  0xe9   :  { %v165_v9 = vpop.f32.mrf.mxu0 }
  0xea   :  { %v134_v10 = vadd.f32 %v152_v7, %v125_v8 }
  0xeb   :  { %v114_v11 = vpop.f32.mrf.mxu0 }
  0xec   :  { %v136_v12 = vmax.f32 %v134_v10, 0.0  ;;  %v126_v13 = vmul.f32 %v151_v5, %v114_v11 }
  0xed   :  { %v166_v14 = vpop.f32.mrf.mxu0 }
  0xee   :  { %138 = vst [vmem:[%s276_s4] sm:$0xff] %v136_v12  ;;  %v135_v15 = vadd.f32 %v152_v7, %v126_v13 }
  0xf0   :  { %v137_v16 = vmax.f32 %v135_v15, 0.0 }
  0xf2   :  { %139 = vst [vmem:[%s276_s4 + $0x8] sm:$0xff] %v137_v16 }
  0xf3   :  { %144 = vsyncpa [#allocation3], 1 }
  0xf4   :  { %145 = vsyncpa [#allocation5], 1 }

// kernel: transcriber_crnn_forward.10
= control target key start
LH: loop header
LB: loop body
LE: loop exit
PB: predicated region body
PF: predicated region fallthrough
CT: control target
= control target key end

     0   :  { %8 = vsyncpa [#allocation3], 0  ;;  %s378_s12 = smov [#allocation2]   ;;  %s511_s0 = inlined_call_operand.vmem [shape: f32[24,64], index: 0, kind: input, shape index: {}]   ;;  %s512_s1 = inlined_call_operand.hbm [shape: f32[64,128], index: 1, kind: input, shape index: {}]   ;;  %s513_s2 = inlined_call_operand.vmem [shape: f32[128,16], index: 2, kind: input, shape index: {}]   ;;  %s514_s3 = inlined_call_operand.vmem [shape: f32[24,16], index: 3, kind: output, shape index: {}]  }
   0x1   :  { %s16_s13 = sshll.u32 %s378_s12, 4  ;;  %s17_s13 = int_to_ptr.vmem [resolvable:$true] %s16_s13 }
   0x2   :  { %s364_s14 = scalar_lea.vmem %s17_s13, 1024  ;;  %p369_p1 = scmp.lt.s32.totalorder %s17_s13, %s17_s13 }
   0x3   :  { %p365_p0 = scmp.ne.s32.totalorder %s17_s13, %s364_s14  ;;  %p370_p2 = scmp.lt.s32.totalorder %s364_s14, %s364_s14 }
   0x5   :  { %p371_p3 = por %p370_p2, %p369_p1 }
   0x7   :  { %p372_p4 = pnand %p371_p3, %p365_p0 }
   0x9   :  { %375 = shalt.err (!%p372_p4)
}
   0xa   :  { %s379_s15 = smov 128   ;;  %s380_s16 = smov 8  }
   0xb   :  { %22 = dma.hbm_to_vmem [thread:$0]  %s512_s1, 1024, %s17_s13, [#allocation3], %s379_s15, %s379_s15, %s380_s16  }
   0xc   :  { %376 = dma.done.wait [#allocation3], 1024  }
   0xd   :  { %377 = vsyncadd [#allocation3], 4294966272  ;;  %v381_v0 = vmov 0.0   ;;  %vm382_vm0 = vmmov 0   ;;  %v38_v1 = vld [vmem:[#allocation2 + $0x38] sm:$0xff]  ;;  %v37_v2 = vld [vmem:[#allocation2 + $0x30] sm:$0xff] }
   0xe   :  { %279 = vmatprep.subr.mxu0 %v381_v0  ;;  %295 = vmatprep.mubr.msk.f32.mxu0 %vm382_vm0, %v381_v0  ;;  %v36_v3 = vld [vmem:[#allocation2 + $0x28] sm:$0xff]  ;;  %v147_v4 = vld [vmem:[%s513_s2 + $0x78] sm:$0xff]  ;;  %v35_v5 = vld [vmem:[#allocation2 + $0x20] sm:$0xff]  ;;  %vm39_vm1 = vcmask 523264   ;;  %vm237_vm2 = vcmask 130048  }
   0xf   :  { %304 = vmatprep.subr.mxu1 %v381_v0  ;;  %336 = vmatprep.mubr.msk.f32.mxu1 %vm382_vm0, %v381_v0  ;;  %v146_v6 = vld [vmem:[%s513_s2 + $0x70] sm:$0xff]  ;;  %v145_v7 = vld [vmem:[%s513_s2 + $0x68] sm:$0xff]  ;;  %v34_v8 = vld [vmem:[#allocation2 + $0x18] sm:$0xff] }
  0x10   :  { %280 = vmatpush3.msra.mxu0 %v38_v1  ;;  %305 = vmatpush3.msra.mxu1 %v147_v4  ;;  %v144_v9 = vld [vmem:[%s513_s2 + $0x60] sm:$0xff]  ;;  %v33_v10 = vld [vmem:[#allocation2 + $0x10] sm:$0xff]  ;;  %v143_v11 = vld [vmem:[%s513_s2 + $0x58] sm:$0xff] }
  0x11   :  { %281 = vmatprep.subr.mxu0 %v381_v0  ;;  %306 = vmatprep.subr.mxu1 %v381_v0  ;;  %v32_v12 = vld [vmem:[#allocation2 + $0x8] sm:$0xff]  ;;  %v142_v13 = vld [vmem:[%s513_s2 + $0x50] sm:$0xff]  ;;  %v31_v14 = vld [vmem:[#allocation2] sm:$0xff] }
  0x12   :  { %282 = vmatpush3.msra.mxu0 %v37_v2  ;;  %307 = vmatpush3.msra.mxu1 %v146_v6  ;;  %v28_v15 = vld [vmem:[%s511_s0] sm:$0xff]  ;;  %v141_v16 = vld [vmem:[%s513_s2 + $0x48] sm:$0xff]  ;;  %v139_v19 = vld [vmem:[%s513_s2 + $0x38] sm:$0xff] }
  0x13   :  { %283 = vmatprep.subr.mxu0 %v381_v0  ;;  %308 = vmatprep.subr.mxu1 %v381_v0  ;;  %v140_v17 = vld [vmem:[%s513_s2 + $0x40] sm:$0xff]  ;;  %v29_v18 = vld [vmem:[%s511_s0 + $0x8] sm:$0xff]  ;;  %v138_v20 = vld [vmem:[%s513_s2 + $0x30] sm:$0xff] }
  0x14   :  { %284 = vmatpush3.msra.mxu0 %v36_v3  ;;  %309 = vmatpush3.msra.mxu1 %v145_v7  ;;  %v30_v21 = vld [vmem:[%s511_s0 + $0x10] sm:$0xff]  ;;  %v137_v22 = vld [vmem:[%s513_s2 + $0x28] sm:$0xff]  ;;  %v136_v23 = vld [vmem:[%s513_s2 + $0x20] sm:$0xff] }
  0x15   :  { %285 = vmatprep.subr.mxu0 %v381_v0  ;;  %310 = vmatprep.subr.mxu1 %v381_v0  ;;  %v135_v24 = vld [vmem:[%s513_s2 + $0x18] sm:$0xff]  ;;  %v134_v25 = vld [vmem:[%s513_s2 + $0x10] sm:$0xff]  ;;  %v133_v26 = vld [vmem:[%s513_s2 + $0x8] sm:$0xff] }
  0x16   :  { %286 = vmatpush3.msra.mxu0 %v35_v5  ;;  %311 = vmatpush3.msra.mxu1 %v144_v9  ;;  %v132_v27 = vld [vmem:[%s513_s2] sm:$0xff] }
  0x17   :  { %287 = vmatprep.subr.mxu0 %v381_v0  ;;  %312 = vmatprep.subr.mxu1 %v381_v0 }
  0x18   :  { %288 = vmatpush3.msra.mxu0 %v34_v8  ;;  %313 = vmatpush3.msra.mxu1 %v143_v11 }
  0x19   :  { %289 = vmatprep.subr.mxu0 %v381_v0  ;;  %314 = vmatprep.subr.mxu1 %v381_v0 }
  0x1a   :  { %290 = vmatpush3.msra.mxu0 %v33_v10  ;;  %315 = vmatpush3.msra.mxu1 %v142_v13 }
  0x1b   :  { %291 = vmatprep.subr.mxu0 %v381_v0  ;;  %316 = vmatprep.subr.mxu1 %v381_v0 }
  0x1c   :  { %292 = vmatpush3.msra.mxu0 %v32_v12  ;;  %317 = vmatpush3.msra.mxu1 %v141_v16 }
  0x1d   :  { %293 = vmatprep.subr.mxu0 %v381_v0  ;;  %318 = vmatprep.subr.mxu1 %v381_v0 }
  0x1e   :  { %294 = vmatpush3.msra.mxu0 %v31_v14  ;;  %319 = vmatpush3.msra.mxu1 %v140_v17 }
  0x1f   :  { %296 = vmatmul.mubr.msk.f32.vlgmr.msra.gmra.mxu0 %vm39_vm1, %v28_v15  ;;  %320 = vmatprep.subr.mxu1 %v381_v0 }
  0x20   :  { %298 = vmatprep.mubr.msk.f32.mxu0 %vm382_vm0, %v381_v0  ;;  %321 = vmatpush3.msra.mxu1 %v139_v19 }
  0x21   :  { %322 = vmatprep.subr.mxu1 %v381_v0 }
  0x22   :  { %323 = vmatpush3.msra.mxu1 %v138_v20 }
  0x23   :  { %299 = vmatmul.mubr.msk.f32.gmra.mxu0 %vm39_vm1, %v29_v18  ;;  %324 = vmatprep.subr.mxu1 %v381_v0 }
  0x24   :  { %301 = vmatprep.mubr.msk.f32.mxu0 %vm382_vm0, %v381_v0  ;;  %325 = vmatpush3.msra.mxu1 %v137_v22 }
  0x25   :  { %326 = vmatprep.subr.mxu1 %v381_v0 }
  0x26   :  { %327 = vmatpush3.msra.mxu1 %v136_v23 }
  0x27   :  { %302 = vmatmul.mubr.msk.f32.gmra.mxu0 %vm39_vm1, %v30_v21  ;;  %328 = vmatprep.subr.mxu1 %v381_v0 }
  0x28   :  { %329 = vmatpush3.msra.mxu1 %v135_v24 }
  0x29   :  { %330 = vmatprep.subr.mxu1 %v381_v0 }
  0x2a   :  { %331 = vmatpush3.msra.mxu1 %v134_v25 }
  0x2b   :  { %332 = vmatprep.subr.mxu1 %v381_v0 }
  0x2c   :  { %333 = vmatpush3.msra.mxu1 %v133_v26 }
  0x2d   :  { %334 = vmatprep.subr.mxu1 %v381_v0 }
  0x2e   :  { %335 = vmatpush3.msra.mxu1 %v132_v27 }
  0xdf   :  { %v115_v28 = vpop.f32.mrf.mxu0 }
  0xe0   :  { %v129_v29 = vmul.f32 %v115_v28, %v115_v28 }
  0xe1   :  { %v297_v30 = vpop.f32.mrf.mxu0 }
  0xe2   :  { %337 = vmatmul.mubr.f32.vlgmr.msra.gmra.mxu1 %v129_v29 }
  0xe3   :  { %v120_v31 = vpop.f32.mrf.mxu0  ;;  %339 = vmatprep.mubr.msk.f32.mxu1 %vm382_vm0, %v381_v0 }
  0xe4   :  { %v130_v32 = vmul.f32 %v120_v31, %v120_v31 }
  0xe5   :  { %v300_v33 = vpop.f32.mrf.mxu0 }
  0xe6   :  { %340 = vmatmul.mubr.f32.gmra.mxu1 %v130_v32 }
  0xe7   :  { %v125_v34 = vpop.f32.mrf.mxu0  ;;  %342 = vmatprep.mubr.msk.f32.mxu1 %vm382_vm0, %v381_v0 }
  0xe8   :  { %v131_v35 = vmul.f32 %v125_v34, %v125_v34 }
  0xe9   :  { %v303_v36 = vpop.f32.mrf.mxu0 }
  0xea   :  { %343 = vmatmul.mubr.f32.gmra.mxu1 %v131_v35 }
 0x1a2   :  { %v214_v37 = vpop.f32.mrf.mxu1 }
 0x1a3   :  { %v228_v38 = vmax.f32 %v214_v37, 1e-09 }
 0x1a4   :  { %v338_v39 = vpop.f32.mrf.mxu1 }
 0x1a5   :  { %350 = vlog2.f32 %v228_v38 }
 0x1a6   :  { %v219_v40 = vpop.f32.mrf.mxu1 }
 0x1a7   :  { %v229_v41 = vmax.f32 %v219_v40, 1e-09 }
 0x1a8   :  { %v341_v42 = vpop.f32.mrf.mxu1 }
 0x1a9   :  { %352 = vlog2.f32 %v229_v41 }
 0x1aa   :  { %v224_v43 = vpop.f32.mrf.mxu1 }
 0x1ab   :  { %v230_v44 = vmax.f32 %v224_v43, 1e-09 }
 0x1ac   :  { %v344_v45 = vpop.f32.mrf.mxu1 }
 0x1ad   :  { %354 = vlog2.f32 %v230_v44 }
 0x1b2   :  { %v351_v46 = vpop.eup %350 }
 0x1b3   :  { %v232_v47 = vmul.f32 0.6931472, %v351_v46 }
 0x1b5   :  { %238 = vst.msk [vmem:[%s514_s3] sm:$0xff] %vm237_vm2, %v232_v47 }
 0x1b6   :  { %v353_v48 = vpop.eup %352 }
 0x1b7   :  { %v234_v49 = vmul.f32 0.6931472, %v353_v48 }
 0x1b9   :  { %239 = vst.msk [vmem:[%s514_s3 + $0x8] sm:$0xff] %vm237_vm2, %v234_v49 }
 0x1ba   :  { %v355_v50 = vpop.eup %354 }
 0x1bb   :  { %v236_v51 = vmul.f32 0.6931472, %v355_v50 }
 0x1bd   :  { %240 = vst.msk [vmem:[%s514_s3 + $0x10] sm:$0xff] %vm237_vm2, %v236_v51 }
 0x1be   :  { %245 = vsyncpa [#allocation3], 1 }

// kernel: transcriber_crnn_forward.12
= control target key start
LH: loop header
LB: loop body
LE: loop exit
PB: predicated region body
PF: predicated region fallthrough
CT: control target
= control target key end

     0   :  { %9 = vsyncpa [#allocation3], 0  ;;  %s642_s0 = inlined_call_operand.vmem [shape: bf16[16,384], index: 0, kind: input, shape index: {}]   ;;  %s643_s1 = inlined_call_operand.vmem [shape: bf16[384,128], index: 1, kind: input, shape index: {}]   ;;  %s644_s2 = inlined_call_operand.hbm [shape: f32[1,128], index: 2, kind: input, shape index: {}]   ;;  %s645_s3 = inlined_call_operand.hbm [shape: f32[1,128], index: 3, kind: input, shape index: {}]   ;;  %s646_s4 = inlined_call_operand.vmem [shape: f32[16,128], index: 4, kind: output, shape index: {}]  }
   0x1   :  { %10 = vsyncpa [#allocation5], 0  ;;  %s520_s15 = smov [#allocation2]   ;;  %s521_s17 = smov [#allocation4]  }
   0x2   :  { %s21_s16 = sshll.u32 %s520_s15, 4  ;;  %s31_s18 = sshll.u32 %s521_s17, 4  ;;  %s22_s16 = int_to_ptr.vmem [resolvable:$true] %s21_s16  ;;  %s32_s18 = int_to_ptr.vmem [resolvable:$true] %s31_s18 }
   0x3   :  { %s484_s19 = scalar_lea.vmem %s22_s16, 16  ;;  %s488_s20 = scalar_lea.vmem %s22_s16, 32 }
   0x4   :  { %p485_p0 = scmp.ne.s32.totalorder %s22_s16, %s484_s19  ;;  %p489_p1 = scmp.lt.s32.totalorder %s22_s16, %s22_s16 }
   0x5   :  { %p490_p2 = scmp.lt.s32.totalorder %s488_s20, %s484_s19 }
   0x7   :  { %p491_p3 = por %p490_p2, %p489_p1 }
   0x9   :  { %p492_p4 = pnand %p491_p3, %p485_p0 }
   0xb   :  { %495 = shalt.err (!%p492_p4)
}
   0xc   :  { %24 = dma.hbm_to_vmem [thread:$0]  %s644_s2, 16, %s22_s16, [#allocation3]  }
   0xd   :  { %s504_s23 = scalar_lea.vmem %s32_s18, 16  ;;  %s508_s24 = scalar_lea.vmem %s32_s18, 32 }
   0xe   :  { %p505_p5 = scmp.ne.s32.totalorder %s32_s18, %s504_s23  ;;  %p509_p6 = scmp.lt.s32.totalorder %s32_s18, %s32_s18 }
   0xf   :  { %p510_p7 = scmp.lt.s32.totalorder %s508_s24, %s504_s23 }
  0x11   :  { %p511_p8 = por %p510_p7, %p509_p6 }
  0x13   :  { %p512_p9 = pnand %p511_p8, %p505_p5 }
  0x15   :  { %515 = shalt.err (!%p512_p9)
}
  0x16   :  { %34 = dma.hbm_to_vmem [thread:$0]  %s645_s3, 16, %s32_s18, [#allocation5]  }
  0x17   :  { %516 = dma.done.wait [#allocation3], 16  }
  0x18   :  { %517 = vsyncadd [#allocation3], 4294967280 }
  0x19   :  { %518 = dma.done.wait [#allocation5], 16  }
  0x1a   :  { %519 = vsyncadd [#allocation5], 4294967280  ;;  %v522_v0 = vmov 0.0   ;;  %vm523_vm0 = vmmov 0   ;;  %v448_v1 = vld [vmem:[%s643_s1 + $0x78] sm:$0xff]   ;;  %v451_v4 = vld [vmem:[%s643_s1 + $0x70] sm:$0xff]  }
  0x1b   :  { %424 = vmatprep.subr.bf16.mxu1 %v522_v0  ;;  %440 = vmatprep.mubr.msk.bf16.mxu1 %vm523_vm0, %v522_v0  ;;  %v449_v2 = vld [vmem:[%s643_s1 + $0xb8] sm:$0xff]   ;;  %v452_v5 = vld [vmem:[%s643_s1 + $0xb0] sm:$0xff]   ;;  %v454_v7 = vld [vmem:[%s643_s1 + $0x68] sm:$0xff]  }
  0x1c   :  { %393 = vmatprep.subr.bf16.mxu0 %v448_v1  ;;  %v450_v3 = vld [vmem:[%s643_s1 + $0x38] sm:$0xff]   ;;  %425 = vmatpush3.bf16.msra.mxu1 %v449_v2  ;;  %v453_v6 = vld [vmem:[%s643_s1 + $0x30] sm:$0xff]   ;;  %v455_v8 = vld [vmem:[%s643_s1 + $0xa8] sm:$0xff]  }
  0x1d   :  { %394 = vmatpush3.bf16.msra.mxu0 %v450_v3  ;;  %426 = vmatprep.subr.bf16.mxu1 %v522_v0  ;;  %v456_v9 = vld [vmem:[%s643_s1 + $0x28] sm:$0xff]   ;;  %v457_v10 = vld [vmem:[%s643_s1 + $0x60] sm:$0xff]   ;;  %v460_v13 = vld [vmem:[%s643_s1 + $0x58] sm:$0xff]  }
  0x1e   :  { %395 = vmatprep.subr.bf16.mxu0 %v451_v4  ;;  %v458_v11 = vld [vmem:[%s643_s1 + $0xa0] sm:$0xff]   ;;  %v461_v14 = vld [vmem:[%s643_s1 + $0x98] sm:$0xff]   ;;  %v463_v16 = vld [vmem:[%s643_s1 + $0x50] sm:$0xff]  }
  0x1f   :  { %v459_v12 = vld [vmem:[%s643_s1 + $0x20] sm:$0xff]   ;;  %v462_v15 = vld [vmem:[%s643_s1 + $0x18] sm:$0xff]   ;;  %v464_v17 = vld [vmem:[%s643_s1 + $0x90] sm:$0xff]  }
  0x20   :  { %427 = vmatpush3.bf16.msra.mxu1 %v452_v5  ;;  %v465_v18 = vld [vmem:[%s643_s1 + $0x10] sm:$0xff]   ;;  %v466_v19 = vld [vmem:[%s643_s1 + $0x48] sm:$0xff]   ;;  %v469_v22 = vld [vmem:[%s643_s1 + $0x40] sm:$0xff]  }
  0x21   :  { %396 = vmatpush3.bf16.msra.mxu0 %v453_v6  ;;  %428 = vmatprep.subr.bf16.mxu1 %v522_v0  ;;  %v467_v20 = vld [vmem:[%s643_s1 + $0x88] sm:$0xff]   ;;  %v474_v23 = vld [vmem:[%s642_s0 + $0x4] ss:$12 sps:$4 sm:$0xff]   ;;  %v391_v34 = vld [vmem:[#allocation2] ss:$0 sm:$0xff] }
  0x22   :  { %397 = vmatprep.subr.bf16.mxu0 %v454_v7  ;;  %v468_v21 = vld [vmem:[%s643_s1 + $0x8] sm:$0xff]   ;;  %v470_v24 = vld [vmem:[%s643_s1 + $0x80] sm:$0xff]   ;;  %286 = vmatprep.mubr.bf16.mxu0 %v474_v23 }
  0x23   :  { %v471_v25 = vld [vmem:[%s643_s1] sm:$0xff]   ;;  %v475_v26 = vld [vmem:[%s642_s0 + $0x8] ss:$12 sps:$4 sm:$0xff]  }
  0x24   :  { %429 = vmatpush3.bf16.msra.mxu1 %v455_v8  ;;  %v472_v27 = vld [vmem:[%s642_s0] ss:$12 sps:$4 sm:$0xff]  }
  0x25   :  { %398 = vmatpush3.bf16.msra.mxu0 %v456_v9  ;;  %430 = vmatprep.subr.bf16.mxu1 %v522_v0  ;;  %v392_v38 = vld [vmem:[#allocation4] ss:$0 sm:$0xff] }
  0x26   :  { %399 = vmatprep.subr.bf16.mxu0 %v457_v10 }
  0x28   :  { %431 = vmatpush3.bf16.msra.mxu1 %v458_v11 }
  0x29   :  { %400 = vmatpush3.bf16.msra.mxu0 %v459_v12  ;;  %432 = vmatprep.subr.bf16.mxu1 %v522_v0 }
  0x2a   :  { %401 = vmatprep.subr.bf16.mxu0 %v460_v13 }
  0x2c   :  { %433 = vmatpush3.bf16.msra.mxu1 %v461_v14 }
  0x2d   :  { %402 = vmatpush3.bf16.msra.mxu0 %v462_v15  ;;  %434 = vmatprep.subr.bf16.mxu1 %v522_v0 }
  0x2e   :  { %403 = vmatprep.subr.bf16.mxu0 %v463_v16 }
  0x30   :  { %435 = vmatpush3.bf16.msra.mxu1 %v464_v17 }
  0x31   :  { %404 = vmatpush3.bf16.msra.mxu0 %v465_v18  ;;  %436 = vmatprep.subr.bf16.mxu1 %v522_v0 }
  0x32   :  { %405 = vmatprep.subr.bf16.mxu0 %v466_v19 }
  0x34   :  { %437 = vmatpush3.bf16.msra.mxu1 %v467_v20 }
  0x35   :  { %406 = vmatpush3.bf16.msra.mxu0 %v468_v21  ;;  %438 = vmatprep.subr.bf16.mxu1 %v522_v0 }
  0x36   :  { %407 = vmatprep.subr.bf16.mxu0 %v469_v22 }
  0x38   :  { %439 = vmatpush3.bf16.msra.mxu1 %v470_v24 }
  0x39   :  { %408 = vmatpush3.bf16.msra.mxu0 %v471_v25 }
  0x3b   :  { %441 = vmatmul.mubr.bf16.vlgmr.msra.gmra.mxu1 %v475_v26 }
  0x3c   :  { %287 = vmatmul.mubr.bf16.vlgmr.msra.gmra.mxu0 %v472_v27 }
  0xfb   :  { %v329_v28 = vpop.f32.mrf.mxu1 }
  0xfc   :  { %v409_v29 = vpop.f32.mrf.mxu0 }
  0xfd   :  { %v442_v30 = vpop.f32.mrf.mxu1 }
  0xfe   :  { %v410_v31 = vpop.f32.mrf.mxu0 }
  0xff   :  { %v411_v32 = vadd.f32 %v410_v31, %v409_v29  ;;  %v332_v33 = vpop.f32.mrf.mxu1 }
 0x100   :  { %v412_v35 = vpop.f32.mrf.mxu0 }
 0x101   :  { %v330_v36 = vadd.f32 %v411_v32, %v329_v28  ;;  %v443_v37 = vpop.f32.mrf.mxu1 }
 0x102   :  { %v413_v39 = vpop.f32.mrf.mxu0 }
 0x103   :  { %v343_v40 = vmul.f32 %v391_v34, %v330_v36  ;;  %v414_v41 = vadd.f32 %v413_v39, %v412_v35 }
 0x105   :  { %v352_v42 = vadd.f32 %v392_v38, %v343_v40  ;;  %v333_v43 = vadd.f32 %v414_v41, %v332_v33 }
 0x107   :  { %v354_v44 = vmax.f32 %v352_v42, 0.0  ;;  %v344_v45 = vmul.f32 %v391_v34, %v333_v43 }
 0x109   :  { %356 = vst [vmem:[%s646_s4] sm:$0xff] %v354_v44  ;;  %v353_v46 = vadd.f32 %v392_v38, %v344_v45 }
 0x10b   :  { %v355_v47 = vmax.f32 %v353_v46, 0.0 }
 0x10d   :  { %357 = vst [vmem:[%s646_s4 + $0x8] sm:$0xff] %v355_v47 }
 0x10e   :  { %362 = vsyncpa [#allocation3], 1 }
 0x10f   :  { %363 = vsyncpa [#allocation5], 1 }

// kernel: transcriber_crnn_forward.13
= control target key start
LH: loop header
LB: loop body
LE: loop exit
PB: predicated region body
PF: predicated region fallthrough
CT: control target
= control target key end

     0   :  { %9 = vsyncpa [#allocation3], 0  ;;  %s383_s0 = inlined_call_operand.vmem [shape: bf16[16,192], index: 0, kind: input, shape index: {}]   ;;  %s384_s1 = inlined_call_operand.vmem [shape: bf16[192,128], index: 1, kind: input, shape index: {}]   ;;  %s385_s2 = inlined_call_operand.hbm [shape: f32[1,128], index: 2, kind: input, shape index: {}]   ;;  %s386_s3 = inlined_call_operand.hbm [shape: f32[1,128], index: 3, kind: input, shape index: {}]   ;;  %s387_s4 = inlined_call_operand.vmem [shape: f32[16,128], index: 4, kind: output, shape index: {}]  }
   0x1   :  { %10 = vsyncpa [#allocation5], 0  ;;  %s301_s15 = smov [#allocation2]   ;;  %s302_s17 = smov [#allocation4]  }
   0x2   :  { %s21_s16 = sshll.u32 %s301_s15, 4  ;;  %s31_s18 = sshll.u32 %s302_s17, 4  ;;  %s22_s16 = int_to_ptr.vmem [resolvable:$true] %s21_s16  ;;  %s32_s18 = int_to_ptr.vmem [resolvable:$true] %s31_s18 }
   0x3   :  { %s265_s19 = scalar_lea.vmem %s22_s16, 16  ;;  %s269_s20 = scalar_lea.vmem %s22_s16, 32 }
   0x4   :  { %p266_p0 = scmp.ne.s32.totalorder %s22_s16, %s265_s19  ;;  %p270_p1 = scmp.lt.s32.totalorder %s22_s16, %s22_s16 }
   0x5   :  { %p271_p2 = scmp.lt.s32.totalorder %s269_s20, %s265_s19 }
   0x7   :  { %p272_p3 = por %p271_p2, %p270_p1 }
   0x9   :  { %p273_p4 = pnand %p272_p3, %p266_p0 }
   0xb   :  { %276 = shalt.err (!%p273_p4)
}
   0xc   :  { %24 = dma.hbm_to_vmem [thread:$0]  %s385_s2, 16, %s22_s16, [#allocation3]  }
   0xd   :  { %s285_s23 = scalar_lea.vmem %s32_s18, 16  ;;  %s289_s24 = scalar_lea.vmem %s32_s18, 32 }
   0xe   :  { %p286_p5 = scmp.ne.s32.totalorder %s32_s18, %s285_s23  ;;  %p290_p6 = scmp.lt.s32.totalorder %s32_s18, %s32_s18 }
   0xf   :  { %p291_p7 = scmp.lt.s32.totalorder %s289_s24, %s285_s23 }
  0x11   :  { %p292_p8 = por %p291_p7, %p290_p6 }
  0x13   :  { %p293_p9 = pnand %p292_p8, %p286_p5 }
  0x15   :  { %296 = shalt.err (!%p293_p9)
}
  0x16   :  { %34 = dma.hbm_to_vmem [thread:$0]  %s386_s3, 16, %s32_s18, [#allocation5]  }
  0x17   :  { %297 = dma.done.wait [#allocation3], 16  }
  0x18   :  { %298 = vsyncadd [#allocation3], 4294967280 }
  0x19   :  { %299 = dma.done.wait [#allocation5], 16  }
  0x1a   :  { %300 = vsyncadd [#allocation5], 4294967280  ;;  %v303_v0 = vmov 0   ;;  %v242_v1 = vld [vmem:[%s384_s1 + $0x38] sm:$0xff]   ;;  %v243_v2 = vld [vmem:[%s384_s1 + $0x30] sm:$0xff]   ;;  %vm149_vm0 = vcmask 523264  }
  0x1b   :  { %153 = vmatprep.subr.bf16.mxu0 %v303_v0  ;;  %v244_v3 = vld [vmem:[%s384_s1 + $0x28] sm:$0xff]   ;;  %v245_v4 = vld [vmem:[%s384_s1 + $0x20] sm:$0xff]   ;;  %v246_v6 = vld [vmem:[%s384_s1 + $0x18] sm:$0xff]  }
  0x1c   :  { %154 = vmatpush1.bf16.msra.mxu0 %v242_v1  ;;  %v256_v5 = vld [vmem:[%s383_s0 + $0x4] ss:$8 sps:$4 sm:$0xff]   ;;  %v247_v7 = vld [vmem:[%s384_s1 + $0x10] sm:$0xff]   ;;  %v250_v10 = vld [vmem:[%s384_s1 + $0x58] sm:$0xff]  }
  0x1d   :  { %155 = vmatprep.subr.bf16.mxu0 %v303_v0  ;;  %236 = vmatprep.mubr.msk.bf16.mxu0 %vm149_vm0, %v256_v5  ;;  %v248_v8 = vld [vmem:[%s384_s1 + $0x8] sm:$0xff]   ;;  %v249_v9 = vld [vmem:[%s384_s1] sm:$0xff]   ;;  %v251_v11 = vld [vmem:[%s384_s1 + $0x50] sm:$0xff]  }
  0x1e   :  { %v252_v12 = vld [vmem:[%s384_s1 + $0x48] sm:$0xff]   ;;  %v253_v13 = vld [vmem:[%s384_s1 + $0x40] sm:$0xff]  }
  0x1f   :  { %v254_v14 = vld [vmem:[%s383_s0] ss:$8 sps:$4 sm:$0xff]  }
  0x20   :  { %156 = vmatpush1.bf16.msra.mxu0 %v243_v2  ;;  %v237_v15 = vld [vmem:[#allocation2] ss:$0 sm:$0xff]  ;;  %v238_v17 = vld [vmem:[#allocation4] ss:$0 sm:$0xff] }
  0x21   :  { %157 = vmatprep.subr.bf16.mxu0 %v303_v0 }
  0x24   :  { %158 = vmatpush1.bf16.msra.mxu0 %v244_v3 }
  0x25   :  { %159 = vmatprep.subr.bf16.mxu0 %v303_v0 }
  0x28   :  { %160 = vmatpush1.bf16.msra.mxu0 %v245_v4 }
  0x29   :  { %161 = vmatprep.subr.bf16.mxu0 %v303_v0 }
  0x2c   :  { %162 = vmatpush1.bf16.msra.mxu0 %v246_v6 }
  0x2d   :  { %163 = vmatprep.subr.bf16.mxu0 %v303_v0 }
  0x30   :  { %164 = vmatpush1.bf16.msra.mxu0 %v247_v7 }
  0x31   :  { %165 = vmatprep.subr.bf16.mxu0 %v303_v0 }
  0x34   :  { %166 = vmatpush1.bf16.msra.mxu0 %v248_v8 }
  0x35   :  { %167 = vmatprep.subr.bf16.mxu0 %v303_v0 }
  0x38   :  { %168 = vmatpush1.bf16.msra.mxu0 %v249_v9 }
  0x39   :  { %177 = vmatprep.subr.bf16.mxu0 %v303_v0 }
  0x3c   :  { %178 = vmatpush2.bf16.msra.mxu0 %v250_v10 }
  0x3d   :  { %179 = vmatprep.subr.bf16.mxu0 %v303_v0 }
  0x40   :  { %180 = vmatpush2.bf16.msra.mxu0 %v251_v11 }
  0x41   :  { %181 = vmatprep.subr.bf16.mxu0 %v303_v0 }
  0x44   :  { %182 = vmatpush2.bf16.msra.mxu0 %v252_v12 }
  0x45   :  { %183 = vmatprep.subr.bf16.mxu0 %v303_v0 }
  0x48   :  { %184 = vmatpush2.bf16.msra.mxu0 %v253_v13 }
  0x4b   :  { %186 = vmatmul.mubr.bf16.vlgmr.msra.gmra.mxu0 %v254_v14 }
 0x10b   :  { %v187_v16 = vpop.f32.mrf.mxu0 }
 0x10c   :  { %v201_v18 = vmul.f32 %v237_v15, %v187_v16 }
 0x10d   :  { %v189_v19 = vpop.f32.mrf.mxu0 }
 0x10e   :  { %v210_v20 = vadd.f32 %v238_v17, %v201_v18 }
 0x10f   :  { %v190_v21 = vpop.f32.mrf.mxu0 }
 0x110   :  { %v212_v22 = vmax.f32 %v210_v20, 0.0  ;;  %v202_v23 = vmul.f32 %v237_v15, %v190_v21 }
 0x111   :  { %v192_v24 = vpop.f32.mrf.mxu0 }
 0x112   :  { %214 = vst [vmem:[%s387_s4] sm:$0xff] %v212_v22  ;;  %v211_v25 = vadd.f32 %v238_v17, %v202_v23 }
 0x114   :  { %v213_v26 = vmax.f32 %v211_v25, 0.0 }
 0x116   :  { %215 = vst [vmem:[%s387_s4 + $0x8] sm:$0xff] %v213_v26 }
 0x117   :  { %220 = vsyncpa [#allocation3], 1 }
 0x118   :  { %221 = vsyncpa [#allocation5], 1 }

// kernel: transcriber_crnn_forward.14
= control target key start
LH: loop header
LB: loop body
LE: loop exit
PB: predicated region body
PF: predicated region fallthrough
CT: control target
= control target key end

     0   :  { %9 = vsyncpa [#allocation3], 0  ;;  %s286_s0 = inlined_call_operand.vmem [shape: bf16[16,64], index: 0, kind: input, shape index: {}]   ;;  %s287_s1 = inlined_call_operand.vmem [shape: bf16[64,128], index: 1, kind: input, shape index: {}]   ;;  %s288_s2 = inlined_call_operand.hbm [shape: f32[1,128], index: 2, kind: input, shape index: {}]   ;;  %s289_s3 = inlined_call_operand.hbm [shape: f32[1,128], index: 3, kind: input, shape index: {}]   ;;  %s290_s4 = inlined_call_operand.vmem [shape: f32[16,128], index: 4, kind: output, shape index: {}]  }
   0x1   :  { %10 = vsyncpa [#allocation5], 0  ;;  %s230_s15 = smov [#allocation2]   ;;  %s231_s17 = smov [#allocation4]  }
   0x2   :  { %s21_s16 = sshll.u32 %s230_s15, 4  ;;  %s31_s18 = sshll.u32 %s231_s17, 4  ;;  %s22_s16 = int_to_ptr.vmem [resolvable:$true] %s21_s16  ;;  %s32_s18 = int_to_ptr.vmem [resolvable:$true] %s31_s18 }
   0x3   :  { %s194_s19 = scalar_lea.vmem %s22_s16, 16  ;;  %s198_s20 = scalar_lea.vmem %s22_s16, 32 }
   0x4   :  { %p195_p0 = scmp.ne.s32.totalorder %s22_s16, %s194_s19  ;;  %p199_p1 = scmp.lt.s32.totalorder %s22_s16, %s22_s16 }
   0x5   :  { %p200_p2 = scmp.lt.s32.totalorder %s198_s20, %s194_s19 }
   0x7   :  { %p201_p3 = por %p200_p2, %p199_p1 }
   0x9   :  { %p202_p4 = pnand %p201_p3, %p195_p0 }
   0xb   :  { %205 = shalt.err (!%p202_p4)
}
   0xc   :  { %24 = dma.hbm_to_vmem [thread:$0]  %s288_s2, 16, %s22_s16, [#allocation3]  }
   0xd   :  { %s214_s23 = scalar_lea.vmem %s32_s18, 16  ;;  %s218_s24 = scalar_lea.vmem %s32_s18, 32 }
   0xe   :  { %p215_p5 = scmp.ne.s32.totalorder %s32_s18, %s214_s23  ;;  %p219_p6 = scmp.lt.s32.totalorder %s32_s18, %s32_s18 }
   0xf   :  { %p220_p7 = scmp.lt.s32.totalorder %s218_s24, %s214_s23 }
  0x11   :  { %p221_p8 = por %p220_p7, %p219_p6 }
  0x13   :  { %p222_p9 = pnand %p221_p8, %p215_p5 }
  0x15   :  { %225 = shalt.err (!%p222_p9)
}
  0x16   :  { %34 = dma.hbm_to_vmem [thread:$0]  %s289_s3, 16, %s32_s18, [#allocation5]  }
  0x17   :  { %226 = dma.done.wait [#allocation3], 16  }
  0x18   :  { %227 = vsyncadd [#allocation3], 4294967280 }
  0x19   :  { %228 = dma.done.wait [#allocation5], 16  }
  0x1a   :  { %229 = vsyncadd [#allocation5], 4294967280  ;;  %v232_v0 = vmov 0.0   ;;  %vm233_vm0 = vmmov 0   ;;  %v181_v1 = vld [vmem:[%s287_s1 + $0x18] sm:$0xff]   ;;  %v182_v2 = vld [vmem:[%s287_s1 + $0x10] sm:$0xff]  }
  0x1b   :  { %165 = vmatprep.subr.bf16.mxu0 %v232_v0  ;;  %173 = vmatprep.mubr.msk.bf16.mxu0 %vm233_vm0, %v232_v0  ;;  %v183_v3 = vld [vmem:[%s287_s1 + $0x8] sm:$0xff]   ;;  %v184_v4 = vld [vmem:[%s287_s1] sm:$0xff]   ;;  %vm81_vm1 = vcmask 523264  }
  0x1c   :  { %166 = vmatpush3.bf16.msra.mxu0 %v181_v1  ;;  %v185_v5 = vld [vmem:[%s286_s0] sm:$0xff]  }
  0x1d   :  { %167 = vmatprep.subr.bf16.mxu0 %v232_v0  ;;  %v158_v6 = vld [vmem:[#allocation2] ss:$0 sm:$0xff]  ;;  %v159_v8 = vld [vmem:[#allocation4] ss:$0 sm:$0xff] }
  0x20   :  { %168 = vmatpush3.bf16.msra.mxu0 %v182_v2 }
  0x21   :  { %169 = vmatprep.subr.bf16.mxu0 %v232_v0 }
  0x24   :  { %170 = vmatpush3.bf16.msra.mxu0 %v183_v3 }
  0x25   :  { %171 = vmatprep.subr.bf16.mxu0 %v232_v0 }
  0x28   :  { %172 = vmatpush3.bf16.msra.mxu0 %v184_v4 }
  0x2b   :  { %174 = vmatmul.mubr.msk.bf16.vlgmr.msra.gmra.mxu0 %vm81_vm1, %v185_v5 }
  0xeb   :  { %v119_v7 = vpop.f32.mrf.mxu0 }
  0xec   :  { %v133_v9 = vmul.f32 %v158_v6, %v119_v7 }
  0xed   :  { %v175_v10 = vpop.f32.mrf.mxu0 }
  0xee   :  { %v142_v11 = vadd.f32 %v159_v8, %v133_v9 }
  0xef   :  { %v122_v12 = vpop.f32.mrf.mxu0 }
  0xf0   :  { %144 = vst [vmem:[%s290_s4] sm:$0xff] %v142_v11  ;;  %v134_v13 = vmul.f32 %v158_v6, %v122_v12 }
  0xf1   :  { %v176_v14 = vpop.f32.mrf.mxu0 }
  0xf2   :  { %v143_v15 = vadd.f32 %v159_v8, %v134_v13 }
  0xf4   :  { %145 = vst [vmem:[%s290_s4 + $0x8] sm:$0xff] %v143_v15 }
  0xf5   :  { %150 = vsyncpa [#allocation3], 1 }
  0xf6   :  { %151 = vsyncpa [#allocation5], 1 }

// kernel: transcriber_crnn_forward.15
= control target key start
LH: loop header
LB: loop body
LE: loop exit
PB: predicated region body
PF: predicated region fallthrough
CT: control target
= control target key end

     0   :  { %9 = vsyncpa [#allocation3], 0  ;;  %s1573_s15 = smov [#allocation2]   ;;  %s2158_s0 = inlined_call_operand.vmem [shape: bf16[16,128], index: 0, kind: input, shape index: {}]   ;;  %s2159_s1 = inlined_call_operand.vmem [shape: bf16[128,2048], index: 1, kind: input, shape index: {}]   ;;  %s2160_s2 = inlined_call_operand.vmem [shape: f32[1,2048], index: 2, kind: input, shape index: {}]   ;;  %s2161_s3 = inlined_call_operand.hbm [shape: f32[1,2048], index: 3, kind: input, shape index: {}]   ;;  %s2162_s4 = inlined_call_operand.vmem [shape: f32[16,2048], index: 4, kind: output, shape index: {}]  }
   0x1   :  { %s22_s16 = sshll.u32 %s1573_s15, 4  ;;  %s23_s16 = int_to_ptr.vmem [resolvable:$true] %s22_s16 }
   0x2   :  { %s1559_s17 = scalar_lea.vmem %s23_s16, 256  ;;  %p1564_p1 = scmp.lt.s32.totalorder %s23_s16, %s23_s16 }
   0x3   :  { %p1560_p0 = scmp.ne.s32.totalorder %s23_s16, %s1559_s17  ;;  %p1565_p2 = scmp.lt.s32.totalorder %s1559_s17, %s1559_s17 }
   0x5   :  { %p1566_p3 = por %p1565_p2, %p1564_p1 }
   0x7   :  { %p1567_p4 = pnand %p1566_p3, %p1560_p0 }
   0x9   :  { %1570 = shalt.err (!%p1567_p4)
}
   0xa   :  { %25 = dma.hbm_to_vmem [thread:$0]  %s2161_s3, 256, %s23_s16, [#allocation3]  }
   0xb   :  { %1571 = dma.done.wait [#allocation3], 256  }
   0xc   :  { %1572 = vsyncadd [#allocation3], 4294967040  ;;  %v1574_v0 = vmov 0   ;;  %v144_v1 = vld [vmem:[%s2159_s1 + $0x380] sm:$0xff]  ;;  %v145_v3 = vld [vmem:[%s2159_s1 + $0x388] sm:$0xff] }
   0xd   :  { %838 = vmatprep.mubr.bf16.mxu0 %v1574_v0  ;;  %881 = vmatprep.mubr.bf16.mxu1 %v1574_v0  ;;  %v152_v2 = vld [vmem:[%s2159_s1 + $0x3c0] sm:$0xff]  ;;  %v153_v5 = vld [vmem:[%s2159_s1 + $0x3c8] sm:$0xff]  ;;  %v146_v63 = vld [vmem:[%s2159_s1 + $0x390] sm:$0xff] }
   0xe   :  { %v1533_v4 = vcombine.high %v144_v1, %v152_v2  ;;  %v1532_v6 = vcombine.low %v144_v1, %v152_v2  ;;  %v128_v7 = vld [vmem:[%s2159_s1 + $0x300] sm:$0xff]  ;;  %v1535_v9 = vcombine.high %v145_v3, %v153_v5  ;;  %v1534_v10 = vcombine.low %v145_v3, %v153_v5  ;;  %v129_v12 = vld [vmem:[%s2159_s1 + $0x308] sm:$0xff]  ;;  %v154_v1 = vld [vmem:[%s2159_s1 + $0x3d0] sm:$0xff] }
   0xf   :  { %v136_v8 = vld [vmem:[%s2159_s1 + $0x340] sm:$0xff]  ;;  %v137_v13 = vld [vmem:[%s2159_s1 + $0x348] sm:$0xff]  ;;  %v147_v2 = vld [vmem:[%s2159_s1 + $0x398] sm:$0xff] }
  0x10   :  { %v1517_v11 = vcombine.high %v128_v7, %v136_v8  ;;  %v112_v14 = vld [vmem:[%s2159_s1 + $0x280] sm:$0xff]  ;;  %806 = vmatprep.subr.bf16.mxu0 %v1533_v4  ;;  %v1519_v15 = vcombine.high %v129_v12, %v137_v13  ;;  %v113_v17 = vld [vmem:[%s2159_s1 + $0x288] sm:$0xff]  ;;  %849 = vmatprep.subr.bf16.mxu1 %v1535_v9  ;;  %v1516_v19 = vcombine.low %v128_v7, %v136_v8  ;;  %v155_v3 = vld [vmem:[%s2159_s1 + $0x3d8] sm:$0xff] }
  0x11   :  { %v120_v16 = vld [vmem:[%s2159_s1 + $0x2c0] sm:$0xff]  ;;  %v121_v18 = vld [vmem:[%s2159_s1 + $0x2c8] sm:$0xff]  ;;  %807 = vmatpush1.bf16.msra.mxu0 %v1532_v6  ;;  %850 = vmatpush1.bf16.msra.mxu1 %v1534_v10  ;;  %v1518_v20 = vcombine.low %v129_v12, %v137_v13  ;;  %v1537_v6 = vcombine.high %v146_v63, %v154_v1  ;;  %v1539_v7 = vcombine.high %v147_v2, %v155_v3  ;;  %v130_v8 = vld [vmem:[%s2159_s1 + $0x310] sm:$0xff] }
  0x12   :  { %808 = vmatprep.subr.bf16.mxu0 %v1517_v11  ;;  %v1501_v21 = vcombine.high %v112_v14, %v120_v16  ;;  %851 = vmatprep.subr.bf16.mxu1 %v1519_v15  ;;  %v1503_v22 = vcombine.high %v113_v17, %v121_v18  ;;  %v96_v23 = vld [vmem:[%s2159_s1 + $0x200] sm:$0xff]  ;;  %v97_v25 = vld [vmem:[%s2159_s1 + $0x208] sm:$0xff]  ;;  %v1500_v27 = vcombine.low %v112_v14, %v120_v16  ;;  %v138_v9 = vld [vmem:[%s2159_s1 + $0x350] sm:$0xff] }
  0x13   :  { %v104_v24 = vld [vmem:[%s2159_s1 + $0x240] sm:$0xff]  ;;  %v105_v26 = vld [vmem:[%s2159_s1 + $0x248] sm:$0xff]  ;;  %v1502_v28 = vcombine.low %v113_v17, %v121_v18  ;;  %v131_v11 = vld [vmem:[%s2159_s1 + $0x318] sm:$0xff]  ;;  %v1536_v13 = vcombine.low %v146_v63, %v154_v1  ;;  %v1538_v14 = vcombine.low %v147_v2, %v155_v3  ;;  %v1521_v15 = vcombine.high %v130_v8, %v138_v9 }
  0x14   :  { %v1485_v29 = vcombine.high %v96_v23, %v104_v24  ;;  %v1487_v30 = vcombine.high %v97_v25, %v105_v26  ;;  %v80_v31 = vld [vmem:[%s2159_s1 + $0x180] sm:$0xff]  ;;  %v81_v33 = vld [vmem:[%s2159_s1 + $0x188] sm:$0xff]  ;;  %v1484_v35 = vcombine.low %v96_v23, %v104_v24  ;;  %v1486_v36 = vcombine.low %v97_v25, %v105_v26  ;;  %v139_v12 = vld [vmem:[%s2159_s1 + $0x358] sm:$0xff] }
  0x15   :  { %809 = vmatpush1.bf16.msra.mxu0 %v1516_v19  ;;  %852 = vmatpush1.bf16.msra.mxu1 %v1518_v20  ;;  %v88_v32 = vld [vmem:[%s2159_s1 + $0x1c0] sm:$0xff]  ;;  %v89_v34 = vld [vmem:[%s2159_s1 + $0x1c8] sm:$0xff]  ;;  %v1523_v16 = vcombine.high %v131_v11, %v139_v12  ;;  %v114_v17 = vld [vmem:[%s2159_s1 + $0x290] sm:$0xff] }
  0x16   :  { %810 = vmatprep.subr.bf16.mxu0 %v1501_v21  ;;  %853 = vmatprep.subr.bf16.mxu1 %v1503_v22  ;;  %v1469_v37 = vcombine.high %v80_v31, %v88_v32  ;;  %v1471_v38 = vcombine.high %v81_v33, %v89_v34  ;;  %v64_v39 = vld [vmem:[%s2159_s1 + $0x100] sm:$0xff]  ;;  %v65_v41 = vld [vmem:[%s2159_s1 + $0x108] sm:$0xff]  ;;  %v1468_v43 = vcombine.low %v80_v31, %v88_v32  ;;  %v122_v18 = vld [vmem:[%s2159_s1 + $0x2d0] sm:$0xff] }
  0x17   :  { %v72_v40 = vld [vmem:[%s2159_s1 + $0x140] sm:$0xff]  ;;  %v73_v42 = vld [vmem:[%s2159_s1 + $0x148] sm:$0xff]  ;;  %v1470_v44 = vcombine.low %v81_v33, %v89_v34  ;;  %v115_v19 = vld [vmem:[%s2159_s1 + $0x298] sm:$0xff]  ;;  %v1520_v21 = vcombine.low %v130_v8, %v138_v9  ;;  %v1522_v22 = vcombine.low %v131_v11, %v139_v12  ;;  %v1505_v23 = vcombine.high %v114_v17, %v122_v18 }
  0x18   :  { %v1453_v45 = vcombine.high %v64_v39, %v72_v40  ;;  %v1455_v46 = vcombine.high %v65_v41, %v73_v42  ;;  %v48_v47 = vld [vmem:[%s2159_s1 + $0x80] sm:$0xff]  ;;  %v49_v49 = vld [vmem:[%s2159_s1 + $0x88] sm:$0xff]  ;;  %v1452_v51 = vcombine.low %v64_v39, %v72_v40  ;;  %v1454_v52 = vcombine.low %v65_v41, %v73_v42  ;;  %v123_v20 = vld [vmem:[%s2159_s1 + $0x2d8] sm:$0xff] }
  0x19   :  { %811 = vmatpush1.bf16.msra.mxu0 %v1500_v27  ;;  %854 = vmatpush1.bf16.msra.mxu1 %v1502_v28  ;;  %v56_v48 = vld [vmem:[%s2159_s1 + $0xc0] sm:$0xff]  ;;  %v57_v50 = vld [vmem:[%s2159_s1 + $0xc8] sm:$0xff]  ;;  %v1507_v24 = vcombine.high %v115_v19, %v123_v20  ;;  %v98_v25 = vld [vmem:[%s2159_s1 + $0x210] sm:$0xff] }
  0x1a   :  { %812 = vmatprep.subr.bf16.mxu0 %v1485_v29  ;;  %855 = vmatprep.subr.bf16.mxu1 %v1487_v30  ;;  %v1437_v53 = vcombine.high %v48_v47, %v56_v48  ;;  %v1439_v54 = vcombine.high %v49_v49, %v57_v50  ;;  %v32_v55 = vld [vmem:[%s2159_s1] sm:$0xff]  ;;  %v33_v57 = vld [vmem:[%s2159_s1 + $0x8] sm:$0xff]  ;;  %v1436_v59 = vcombine.low %v48_v47, %v56_v48  ;;  %v106_v26 = vld [vmem:[%s2159_s1 + $0x250] sm:$0xff] }
  0x1b   :  { %v40_v56 = vld [vmem:[%s2159_s1 + $0x40] sm:$0xff]  ;;  %v41_v58 = vld [vmem:[%s2159_s1 + $0x48] sm:$0xff]  ;;  %v1438_v60 = vcombine.low %v49_v49, %v57_v50  ;;  %v99_v27 = vld [vmem:[%s2159_s1 + $0x218] sm:$0xff]  ;;  %v1504_v29 = vcombine.low %v114_v17, %v122_v18  ;;  %v1506_v30 = vcombine.low %v115_v19, %v123_v20  ;;  %v1489_v31 = vcombine.high %v98_v25, %v106_v26 }
  0x1c   :  { %v1421_v61 = vcombine.high %v32_v55, %v40_v56  ;;  %v1423_v62 = vcombine.high %v33_v57, %v41_v58  ;;  %v1420_v4 = vcombine.low %v32_v55, %v40_v56  ;;  %v1422_v5 = vcombine.low %v33_v57, %v41_v58  ;;  %v1722_v10 = vld [vmem:[%s2158_s0] sm:$0xff]   ;;  %v107_v28 = vld [vmem:[%s2159_s1 + $0x258] sm:$0xff]  ;;  %v82_v33 = vld [vmem:[%s2159_s1 + $0x190] sm:$0xff] }
  0x1d   :  { %813 = vmatpush1.bf16.msra.mxu0 %v1484_v35  ;;  %856 = vmatpush1.bf16.msra.mxu1 %v1486_v36  ;;  %v1491_v32 = vcombine.high %v99_v27, %v107_v28  ;;  %v90_v34 = vld [vmem:[%s2159_s1 + $0x1d0] sm:$0xff]  ;;  %v83_v35 = vld [vmem:[%s2159_s1 + $0x198] sm:$0xff]  ;;  %v148_v2 = vld [vmem:[%s2159_s1 + $0x3a0] sm:$0xff] }
  0x1e   :  { %814 = vmatprep.subr.bf16.mxu0 %v1469_v37  ;;  %857 = vmatprep.subr.bf16.mxu1 %v1471_v38  ;;  %v91_v36 = vld [vmem:[%s2159_s1 + $0x1d8] sm:$0xff]  ;;  %v1488_v37 = vcombine.low %v98_v25, %v106_v26  ;;  %v1490_v38 = vcombine.low %v99_v27, %v107_v28  ;;  %v1473_v39 = vcombine.high %v82_v33, %v90_v34  ;;  %v66_v41 = vld [vmem:[%s2159_s1 + $0x110] sm:$0xff]  ;;  %v156_v3 = vld [vmem:[%s2159_s1 + $0x3e0] sm:$0xff] }
  0x1f   :  { %v1475_v40 = vcombine.high %v83_v35, %v91_v36  ;;  %v74_v42 = vld [vmem:[%s2159_s1 + $0x150] sm:$0xff]  ;;  %v1541_v8 = vcombine.high %v148_v2, %v156_v3  ;;  %v132_v11 = vld [vmem:[%s2159_s1 + $0x320] sm:$0xff] }
  0x20   :  { %v1457_v47 = vcombine.high %v66_v41, %v74_v42  ;;  %v50_v49 = vld [vmem:[%s2159_s1 + $0x90] sm:$0xff]  ;;  %v140_v12 = vld [vmem:[%s2159_s1 + $0x360] sm:$0xff] }
  0x21   :  { %815 = vmatpush1.bf16.msra.mxu0 %v1468_v43  ;;  %858 = vmatpush1.bf16.msra.mxu1 %v1470_v44  ;;  %v67_v43 = vld [vmem:[%s2159_s1 + $0x118] sm:$0xff]  ;;  %v58_v50 = vld [vmem:[%s2159_s1 + $0xd0] sm:$0xff]  ;;  %v1525_v17 = vcombine.high %v132_v11, %v140_v12  ;;  %v116_v19 = vld [vmem:[%s2159_s1 + $0x2a0] sm:$0xff] }
  0x22   :  { %816 = vmatprep.subr.bf16.mxu0 %v1453_v45  ;;  %859 = vmatprep.subr.bf16.mxu1 %v1455_v46  ;;  %v75_v44 = vld [vmem:[%s2159_s1 + $0x158] sm:$0xff]  ;;  %v1472_v45 = vcombine.low %v82_v33, %v90_v34  ;;  %v1474_v46 = vcombine.low %v83_v35, %v91_v36  ;;  %v1441_v55 = vcombine.high %v50_v49, %v58_v50  ;;  %v34_v57 = vld [vmem:[%s2159_s1 + $0x10] sm:$0xff]  ;;  %v124_v20 = vld [vmem:[%s2159_s1 + $0x2e0] sm:$0xff] }
  0x23   :  { %v1459_v48 = vcombine.high %v67_v43, %v75_v44  ;;  %v42_v58 = vld [vmem:[%s2159_s1 + $0x50] sm:$0xff]  ;;  %v1509_v25 = vcombine.high %v116_v19, %v124_v20  ;;  %v100_v27 = vld [vmem:[%s2159_s1 + $0x220] sm:$0xff] }
  0x24   :  { %v1425_v63 = vcombine.high %v34_v57, %v42_v58  ;;  %v108_v28 = vld [vmem:[%s2159_s1 + $0x260] sm:$0xff] }
  0x25   :  { %817 = vmatpush1.bf16.msra.mxu0 %v1452_v51  ;;  %860 = vmatpush1.bf16.msra.mxu1 %v1454_v52  ;;  %v51_v51 = vld [vmem:[%s2159_s1 + $0x98] sm:$0xff]  ;;  %v1493_v33 = vcombine.high %v100_v27, %v108_v28  ;;  %v84_v35 = vld [vmem:[%s2159_s1 + $0x1a0] sm:$0xff] }
  0x26   :  { %818 = vmatprep.subr.bf16.mxu0 %v1437_v53  ;;  %861 = vmatprep.subr.bf16.mxu1 %v1439_v54  ;;  %v59_v52 = vld [vmem:[%s2159_s1 + $0xd8] sm:$0xff]  ;;  %v1456_v53 = vcombine.low %v66_v41, %v74_v42  ;;  %v1458_v54 = vcombine.low %v67_v43, %v75_v44  ;;  %v92_v36 = vld [vmem:[%s2159_s1 + $0x1e0] sm:$0xff] }
  0x27   :  { %v1443_v56 = vcombine.high %v51_v51, %v59_v52  ;;  %v1477_v41 = vcombine.high %v84_v35, %v92_v36  ;;  %v68_v43 = vld [vmem:[%s2159_s1 + $0x120] sm:$0xff] }
  0x28   :  { %v76_v44 = vld [vmem:[%s2159_s1 + $0x160] sm:$0xff] }
  0x29   :  { %819 = vmatpush1.bf16.msra.mxu0 %v1436_v59  ;;  %862 = vmatpush1.bf16.msra.mxu1 %v1438_v60  ;;  %v35_v59 = vld [vmem:[%s2159_s1 + $0x18] sm:$0xff] }
  0x2a   :  { %820 = vmatprep.subr.bf16.mxu0 %v1421_v61  ;;  %863 = vmatprep.subr.bf16.mxu1 %v1423_v62  ;;  %v43_v60 = vld [vmem:[%s2159_s1 + $0x58] sm:$0xff]  ;;  %v1440_v61 = vcombine.low %v50_v49, %v58_v50  ;;  %v1442_v62 = vcombine.low %v51_v51, %v59_v52  ;;  %v1461_v49 = vcombine.high %v68_v43, %v76_v44  ;;  %v52_v51 = vld [vmem:[%s2159_s1 + $0xa0] sm:$0xff] }
  0x2b   :  { %v1427_v1 = vcombine.high %v35_v59, %v43_v60  ;;  %v60_v52 = vld [vmem:[%s2159_s1 + $0xe0] sm:$0xff] }
  0x2d   :  { %821 = vmatpush1.bf16.msra.mxu0 %v1420_v4  ;;  %864 = vmatpush1.bf16.msra.mxu1 %v1422_v5  ;;  %v149_v4 = vld [vmem:[%s2159_s1 + $0x3a8] sm:$0xff] }
  0x2e   :  { %892 = vmatprep.subr.bf16.mxu0 %v1537_v6  ;;  %935 = vmatprep.subr.bf16.mxu1 %v1539_v7  ;;  %v157_v5 = vld [vmem:[%s2159_s1 + $0x3e8] sm:$0xff]  ;;  %v1424_v6 = vcombine.low %v34_v57, %v42_v58  ;;  %v1426_v7 = vcombine.low %v35_v59, %v43_v60  ;;  %v1445_v57 = vcombine.high %v52_v51, %v60_v52  ;;  %v36_v59 = vld [vmem:[%s2159_s1 + $0x20] sm:$0xff] }
  0x2f   :  { %v1543_v9 = vcombine.high %v149_v4, %v157_v5  ;;  %v44_v60 = vld [vmem:[%s2159_s1 + $0x60] sm:$0xff] }
  0x30   :  { %839 = vmatmul.mubr.bf16.vlgmr.msra.gmra.mxu0 %v1722_v10  ;;  %882 = vmatmul.mubr.bf16.vlgmr.msra.gmra.mxu1 %v1722_v10 }
  0x31   :  { %893 = vmatpush1.bf16.msra.mxu0 %v1536_v13  ;;  %936 = vmatpush1.bf16.msra.mxu1 %v1538_v14  ;;  %v133_v13 = vld [vmem:[%s2159_s1 + $0x328] sm:$0xff] }
  0x32   :  { %894 = vmatprep.subr.bf16.mxu0 %v1521_v15  ;;  %937 = vmatprep.subr.bf16.mxu1 %v1523_v16  ;;  %v141_v14 = vld [vmem:[%s2159_s1 + $0x368] sm:$0xff]  ;;  %v1540_v15 = vcombine.low %v148_v2, %v156_v3  ;;  %v1542_v16 = vcombine.low %v149_v4, %v157_v5  ;;  %v1429_v2 = vcombine.high %v36_v59, %v44_v60  ;;  %v150_v4 = vld [vmem:[%s2159_s1 + $0x3b0] sm:$0xff] }
  0x33   :  { %924 = vmatprep.mubr.bf16.mxu0 %v1574_v0  ;;  %967 = vmatprep.mubr.bf16.mxu1 %v1574_v0  ;;  %v1527_v18 = vcombine.high %v133_v13, %v141_v14  ;;  %v158_v5 = vld [vmem:[%s2159_s1 + $0x3f0] sm:$0xff] }
  0x35   :  { %895 = vmatpush1.bf16.msra.mxu0 %v1520_v21  ;;  %938 = vmatpush1.bf16.msra.mxu1 %v1522_v22  ;;  %v117_v21 = vld [vmem:[%s2159_s1 + $0x2a8] sm:$0xff] }
  0x36   :  { %896 = vmatprep.subr.bf16.mxu0 %v1505_v23  ;;  %939 = vmatprep.subr.bf16.mxu1 %v1507_v24  ;;  %v125_v22 = vld [vmem:[%s2159_s1 + $0x2e8] sm:$0xff]  ;;  %v1524_v23 = vcombine.low %v132_v11, %v140_v12  ;;  %v1526_v24 = vcombine.low %v133_v13, %v141_v14  ;;  %v1545_v11 = vcombine.high %v150_v4, %v158_v5  ;;  %v134_v13 = vld [vmem:[%s2159_s1 + $0x330] sm:$0xff] }
  0x37   :  { %v1511_v26 = vcombine.high %v117_v21, %v125_v22  ;;  %v142_v14 = vld [vmem:[%s2159_s1 + $0x370] sm:$0xff] }
  0x39   :  { %897 = vmatpush1.bf16.msra.mxu0 %v1504_v29  ;;  %940 = vmatpush1.bf16.msra.mxu1 %v1506_v30  ;;  %v101_v29 = vld [vmem:[%s2159_s1 + $0x228] sm:$0xff] }
  0x3a   :  { %898 = vmatprep.subr.bf16.mxu0 %v1489_v31  ;;  %941 = vmatprep.subr.bf16.mxu1 %v1491_v32  ;;  %v109_v30 = vld [vmem:[%s2159_s1 + $0x268] sm:$0xff]  ;;  %v1508_v31 = vcombine.low %v116_v19, %v124_v20  ;;  %v1510_v32 = vcombine.low %v117_v21, %v125_v22  ;;  %v1529_v19 = vcombine.high %v134_v13, %v142_v14  ;;  %v118_v21 = vld [vmem:[%s2159_s1 + $0x2b0] sm:$0xff] }
  0x3b   :  { %v1495_v34 = vcombine.high %v101_v29, %v109_v30  ;;  %v126_v22 = vld [vmem:[%s2159_s1 + $0x2f0] sm:$0xff] }
  0x3d   :  { %899 = vmatpush1.bf16.msra.mxu0 %v1488_v37  ;;  %942 = vmatpush1.bf16.msra.mxu1 %v1490_v38  ;;  %v85_v37 = vld [vmem:[%s2159_s1 + $0x1a8] sm:$0xff] }
  0x3e   :  { %900 = vmatprep.subr.bf16.mxu0 %v1473_v39  ;;  %943 = vmatprep.subr.bf16.mxu1 %v1475_v40  ;;  %v93_v38 = vld [vmem:[%s2159_s1 + $0x1e8] sm:$0xff]  ;;  %v1492_v39 = vcombine.low %v100_v27, %v108_v28  ;;  %v1494_v40 = vcombine.low %v101_v29, %v109_v30  ;;  %v1513_v27 = vcombine.high %v118_v21, %v126_v22  ;;  %v102_v29 = vld [vmem:[%s2159_s1 + $0x230] sm:$0xff] }
  0x3f   :  { %v1479_v42 = vcombine.high %v85_v37, %v93_v38  ;;  %v110_v30 = vld [vmem:[%s2159_s1 + $0x270] sm:$0xff] }
  0x41   :  { %901 = vmatpush1.bf16.msra.mxu0 %v1472_v45  ;;  %944 = vmatpush1.bf16.msra.mxu1 %v1474_v46  ;;  %v69_v45 = vld [vmem:[%s2159_s1 + $0x128] sm:$0xff] }
  0x42   :  { %902 = vmatprep.subr.bf16.mxu0 %v1457_v47  ;;  %945 = vmatprep.subr.bf16.mxu1 %v1459_v48  ;;  %v77_v46 = vld [vmem:[%s2159_s1 + $0x168] sm:$0xff]  ;;  %v1476_v47 = vcombine.low %v84_v35, %v92_v36  ;;  %v1478_v48 = vcombine.low %v85_v37, %v93_v38  ;;  %v1497_v35 = vcombine.high %v102_v29, %v110_v30  ;;  %v86_v37 = vld [vmem:[%s2159_s1 + $0x1b0] sm:$0xff] }
  0x43   :  { %v1463_v50 = vcombine.high %v69_v45, %v77_v46  ;;  %v94_v38 = vld [vmem:[%s2159_s1 + $0x1f0] sm:$0xff] }
  0x45   :  { %903 = vmatpush1.bf16.msra.mxu0 %v1456_v53  ;;  %946 = vmatpush1.bf16.msra.mxu1 %v1458_v54  ;;  %v53_v53 = vld [vmem:[%s2159_s1 + $0xa8] sm:$0xff] }
  0x46   :  { %904 = vmatprep.subr.bf16.mxu0 %v1441_v55  ;;  %947 = vmatprep.subr.bf16.mxu1 %v1443_v56  ;;  %v61_v54 = vld [vmem:[%s2159_s1 + $0xe8] sm:$0xff]  ;;  %v1460_v55 = vcombine.low %v68_v43, %v76_v44  ;;  %v1462_v56 = vcombine.low %v69_v45, %v77_v46  ;;  %v70_v44 = vld [vmem:[%s2159_s1 + $0x130] sm:$0xff]  ;;  %v71_v46 = vld [vmem:[%s2159_s1 + $0x138] sm:$0xff] }
  0x47   :  { %v1447_v58 = vcombine.high %v53_v53, %v61_v54  ;;  %v78_v45 = vld [vmem:[%s2159_s1 + $0x170] sm:$0xff] }
  0x49   :  { %905 = vmatpush1.bf16.msra.mxu0 %v1440_v61  ;;  %948 = vmatpush1.bf16.msra.mxu1 %v1442_v62  ;;  %v37_v61 = vld [vmem:[%s2159_s1 + $0x28] sm:$0xff] }
  0x4a   :  { %906 = vmatprep.subr.bf16.mxu0 %v1425_v63  ;;  %949 = vmatprep.subr.bf16.mxu1 %v1427_v1  ;;  %v45_v62 = vld [vmem:[%s2159_s1 + $0x68] sm:$0xff]  ;;  %v1444_v63 = vcombine.low %v52_v51, %v60_v52  ;;  %v1446_v1 = vcombine.low %v53_v53, %v61_v54  ;;  %v54_v52 = vld [vmem:[%s2159_s1 + $0xb0] sm:$0xff]  ;;  %v55_v54 = vld [vmem:[%s2159_s1 + $0xb8] sm:$0xff] }
  0x4b   :  { %v1431_v3 = vcombine.high %v37_v61, %v45_v62  ;;  %v62_v53 = vld [vmem:[%s2159_s1 + $0xf0] sm:$0xff] }
  0x4d   :  { %907 = vmatpush1.bf16.msra.mxu0 %v1424_v6  ;;  %950 = vmatpush1.bf16.msra.mxu1 %v1426_v7  ;;  %v151_v6 = vld [vmem:[%s2159_s1 + $0x3b8] sm:$0xff] }
  0x4e   :  { %978 = vmatprep.subr.bf16.mxu0 %v1541_v8  ;;  %1021 = vmatprep.subr.bf16.mxu1 %v1543_v9  ;;  %v159_v7 = vld [vmem:[%s2159_s1 + $0x3f8] sm:$0xff]  ;;  %v1428_v8 = vcombine.low %v36_v59, %v44_v60  ;;  %v1430_v9 = vcombine.low %v37_v61, %v45_v62  ;;  %v38_v60 = vld [vmem:[%s2159_s1 + $0x30] sm:$0xff] }
  0x4f   :  { %v1547_v12 = vcombine.high %v151_v6, %v159_v7  ;;  %v46_v61 = vld [vmem:[%s2159_s1 + $0x70] sm:$0xff]  ;;  %v39_v62 = vld [vmem:[%s2159_s1 + $0x38] sm:$0xff] }
  0x50   :  { %925 = vmatmul.mubr.bf16.vlgmr.msra.gmra.mxu0 %v1722_v10  ;;  %968 = vmatmul.mubr.bf16.vlgmr.msra.gmra.mxu1 %v1722_v10 }
  0x51   :  { %979 = vmatpush1.bf16.msra.mxu0 %v1540_v15  ;;  %1022 = vmatpush1.bf16.msra.mxu1 %v1542_v16  ;;  %v135_v15 = vld [vmem:[%s2159_s1 + $0x338] sm:$0xff] }
  0x52   :  { %980 = vmatprep.subr.bf16.mxu0 %v1525_v17  ;;  %1023 = vmatprep.subr.bf16.mxu1 %v1527_v18  ;;  %v143_v16 = vld [vmem:[%s2159_s1 + $0x378] sm:$0xff]  ;;  %v1544_v17 = vcombine.low %v150_v4, %v158_v5  ;;  %v1546_v18 = vcombine.low %v151_v6, %v159_v7  ;;  %v1432_v5 = vcombine.low %v38_v60, %v46_v61  ;;  %v1154_v7 = vlaneseq }
  0x53   :  { %1010 = vmatprep.mubr.bf16.mxu0 %v1574_v0  ;;  %1053 = vmatprep.mubr.bf16.mxu1 %v1574_v0  ;;  %v1531_v20 = vcombine.high %v135_v15, %v143_v16 }
  0x55   :  { %981 = vmatpush1.bf16.msra.mxu0 %v1524_v23  ;;  %1024 = vmatpush1.bf16.msra.mxu1 %v1526_v24  ;;  %v119_v23 = vld [vmem:[%s2159_s1 + $0x2b8] sm:$0xff] }
  0x56   :  { %982 = vmatprep.subr.bf16.mxu0 %v1509_v25  ;;  %1025 = vmatprep.subr.bf16.mxu1 %v1511_v26  ;;  %v127_v24 = vld [vmem:[%s2159_s1 + $0x2f8] sm:$0xff]  ;;  %v1528_v25 = vcombine.low %v134_v13, %v142_v14  ;;  %v1530_v26 = vcombine.low %v135_v15, %v143_v16  ;;  %v1266_v14 = vld [vmem:[#allocation2] sm:$0xff] }
  0x57   :  { %v1515_v28 = vcombine.high %v119_v23, %v127_v24 }
  0x59   :  { %983 = vmatpush1.bf16.msra.mxu0 %v1508_v31  ;;  %1026 = vmatpush1.bf16.msra.mxu1 %v1510_v32  ;;  %v103_v31 = vld [vmem:[%s2159_s1 + $0x238] sm:$0xff] }
  0x5a   :  { %984 = vmatprep.subr.bf16.mxu0 %v1493_v33  ;;  %1027 = vmatprep.subr.bf16.mxu1 %v1495_v34  ;;  %v111_v32 = vld [vmem:[%s2159_s1 + $0x278] sm:$0xff]  ;;  %v1512_v33 = vcombine.low %v118_v21, %v126_v22  ;;  %v1514_v34 = vcombine.low %v119_v23, %v127_v24 }
  0x5b   :  { %v1499_v36 = vcombine.high %v103_v31, %v111_v32 }
  0x5d   :  { %985 = vmatpush1.bf16.msra.mxu0 %v1492_v39  ;;  %1028 = vmatpush1.bf16.msra.mxu1 %v1494_v40  ;;  %v95_v39 = vld [vmem:[%s2159_s1 + $0x1f8] sm:$0xff]  ;;  %v1496_v40 = vcombine.low %v102_v29, %v110_v30 }
  0x5e   :  { %986 = vmatprep.subr.bf16.mxu0 %v1477_v41  ;;  %1029 = vmatprep.subr.bf16.mxu1 %v1479_v42  ;;  %v1498_v41 = vcombine.low %v103_v31, %v111_v32  ;;  %v1481_v42 = vcombine.high %v86_v37, %v94_v38 }
  0x61   :  { %987 = vmatpush1.bf16.msra.mxu0 %v1476_v47  ;;  %1030 = vmatpush1.bf16.msra.mxu1 %v1478_v48  ;;  %v79_v47 = vld [vmem:[%s2159_s1 + $0x178] sm:$0xff]  ;;  %v1480_v48 = vcombine.low %v86_v37, %v94_v38 }
  0x62   :  { %988 = vmatprep.subr.bf16.mxu0 %v1461_v49  ;;  %1031 = vmatprep.subr.bf16.mxu1 %v1463_v50  ;;  %v1465_v50 = vcombine.high %v70_v44, %v78_v45  ;;  %v1467_v51 = vcombine.high %v71_v46, %v79_v47 }
  0x65   :  { %989 = vmatpush1.bf16.msra.mxu0 %v1460_v55  ;;  %1032 = vmatpush1.bf16.msra.mxu1 %v1462_v56  ;;  %v63_v55 = vld [vmem:[%s2159_s1 + $0xf8] sm:$0xff]  ;;  %v1464_v56 = vcombine.low %v70_v44, %v78_v45 }
  0x66   :  { %990 = vmatprep.subr.bf16.mxu0 %v1445_v57  ;;  %1033 = vmatprep.subr.bf16.mxu1 %v1447_v58  ;;  %v1466_v57 = vcombine.low %v71_v46, %v79_v47  ;;  %v1449_v58 = vcombine.high %v54_v52, %v62_v53  ;;  %v1451_v59 = vcombine.high %v55_v54, %v63_v55 }
  0x69   :  { %991 = vmatpush1.bf16.msra.mxu0 %v1444_v63  ;;  %1034 = vmatpush1.bf16.msra.mxu1 %v1446_v1  ;;  %v47_v63 = vld [vmem:[%s2159_s1 + $0x78] sm:$0xff]  ;;  %v1448_v1 = vcombine.low %v54_v52, %v62_v53 }
  0x6a   :  { %992 = vmatprep.subr.bf16.mxu0 %v1429_v2  ;;  %1035 = vmatprep.subr.bf16.mxu1 %v1431_v3  ;;  %v1450_v2 = vcombine.low %v55_v54, %v63_v55  ;;  %v1433_v3 = vcombine.high %v38_v60, %v46_v61  ;;  %v1435_v4 = vcombine.high %v39_v62, %v47_v63 }
  0x6b   :  { %v1434_v6 = vcombine.low %v39_v62, %v47_v63 }
  0x6d   :  { %993 = vmatpush1.bf16.msra.mxu0 %v1428_v8  ;;  %1036 = vmatpush1.bf16.msra.mxu1 %v1430_v9  ;;  %v1155_v8 = vshrl.u32 %v1154_v7, 7 }
  0x6e   :  { %1064 = vmatprep.subr.bf16.mxu0 %v1545_v11  ;;  %1107 = vmatprep.subr.bf16.mxu1 %v1547_v12  ;;  %v1150_v11 = vld [vmem:[%s2160_s2] sm:$0xff] }
  0x6f   :  { %v2008_v9 = vsub.s32 0, %v1155_v8  ;;  %v2013_v12 = vsub.s32 2, %v1155_v8  ;;  %v2015_v13 = vsub.s32 1, %v1155_v8  ;;  %v2017_v15 = vsub.s32 3, %v1155_v8 }
  0x70   :  { %1011 = vmatmul.mubr.bf16.vlgmr.msra.gmra.mxu0 %v1722_v10  ;;  %1054 = vmatmul.mubr.bf16.vlgmr.msra.gmra.mxu1 %v1722_v10  ;;  %v2051_v46 = vsub.s32 4, %v1155_v8  ;;  %v2053_v47 = vsub.s32 6, %v1155_v8 }
  0x71   :  { %1065 = vmatpush1.bf16.msra.mxu0 %v1544_v17  ;;  %1108 = vmatpush1.bf16.msra.mxu1 %v1546_v18  ;;  %v1157_v16 = vrot.slane %v1150_v11, %v2008_v9  ;;  %v1165_v17 = vrot.slane %v1150_v11, %v2013_v12  ;;  %v1161_v18 = vrot.slane %v1150_v11, %v2015_v13 }
  0x72   :  { %1066 = vmatprep.subr.bf16.mxu0 %v1529_v19  ;;  %1109 = vmatprep.subr.bf16.mxu1 %v1531_v20  ;;  %v1281_v20 = vrot.slane %v1266_v14, %v2013_v12  ;;  %v1169_v21 = vrot.slane %v1150_v11, %v2017_v15  ;;  %v1277_v24 = vrot.slane %v1266_v14, %v2015_v13 }
  0x73   :  { %1096 = vmatprep.mubr.bf16.mxu0 %v1574_v0  ;;  %1139 = vmatprep.mubr.bf16.mxu1 %v1574_v0  ;;  %v87_v0 = vld [vmem:[%s2159_s1 + $0x1b8] sm:$0xff]  ;;  %v1289_v52 = vrot.slane %v1266_v14, %v2051_v46  ;;  %v1297_v55 = vrot.slane %v1266_v14, %v2053_v47 }
  0x74   :  { %v1483_v43 = vcombine.high %v87_v0, %v95_v39  ;;  %v1482_v49 = vcombine.low %v87_v0, %v95_v39 }
  0x75   :  { %1067 = vmatpush1.bf16.msra.mxu0 %v1528_v25  ;;  %1110 = vmatpush1.bf16.msra.mxu1 %v1530_v26 }
  0x76   :  { %1068 = vmatprep.subr.bf16.mxu0 %v1513_v27  ;;  %1111 = vmatprep.subr.bf16.mxu1 %v1515_v28  ;;  %v1285_v27 = vrot.slane %v1266_v14, %v2017_v15 }
  0x79   :  { %1069 = vmatpush1.bf16.msra.mxu0 %v1512_v33  ;;  %1112 = vmatpush1.bf16.msra.mxu1 %v1514_v34 }
  0x7a   :  { %1070 = vmatprep.subr.bf16.mxu0 %v1497_v35  ;;  %1113 = vmatprep.subr.bf16.mxu1 %v1499_v36 }
  0x7d   :  { %1071 = vmatpush1.bf16.msra.mxu0 %v1496_v40  ;;  %1114 = vmatpush1.bf16.msra.mxu1 %v1498_v41 }
  0x7e   :  { %1072 = vmatprep.subr.bf16.mxu0 %v1481_v42  ;;  %1115 = vmatprep.subr.bf16.mxu1 %v1483_v43 }
  0x81   :  { %1073 = vmatpush1.bf16.msra.mxu0 %v1480_v48  ;;  %1116 = vmatpush1.bf16.msra.mxu1 %v1482_v49  ;;  %v2055_v48 = vsub.s32 5, %v1155_v8  ;;  %v2057_v49 = vsub.s32 7, %v1155_v8 }
  0x82   :  { %1074 = vmatprep.subr.bf16.mxu0 %v1465_v50  ;;  %1117 = vmatprep.subr.bf16.mxu1 %v1467_v51  ;;  %v1173_v50 = vrot.slane %v1150_v11, %v2051_v46  ;;  %v1181_v51 = vrot.slane %v1150_v11, %v2053_v47 }
  0x83   :  { %v1177_v53 = vrot.slane %v1150_v11, %v2055_v48  ;;  %v1301_v62 = vrot.slane %v1266_v14, %v2057_v49 }
  0x85   :  { %1075 = vmatpush1.bf16.msra.mxu0 %v1464_v56  ;;  %1118 = vmatpush1.bf16.msra.mxu1 %v1466_v57  ;;  %v1185_v56 = vrot.slane %v1150_v11, %v2057_v49 }
  0x86   :  { %1076 = vmatprep.subr.bf16.mxu0 %v1449_v58  ;;  %1119 = vmatprep.subr.bf16.mxu1 %v1451_v59  ;;  %v1293_v59 = vrot.slane %v1266_v14, %v2055_v48 }
  0x89   :  { %1077 = vmatpush1.bf16.msra.mxu0 %v1448_v1  ;;  %1120 = vmatpush1.bf16.msra.mxu1 %v1450_v2 }
  0x8a   :  { %1078 = vmatprep.subr.bf16.mxu0 %v1433_v3  ;;  %1121 = vmatprep.subr.bf16.mxu1 %v1435_v4 }
  0x8d   :  { %1079 = vmatpush1.bf16.msra.mxu0 %v1432_v5  ;;  %1122 = vmatpush1.bf16.msra.mxu1 %v1434_v6 }
  0x90   :  { %1097 = vmatmul.mubr.bf16.vlgmr.msra.gmra.mxu0 %v1722_v10  ;;  %1140 = vmatmul.mubr.bf16.vlgmr.msra.gmra.mxu1 %v1722_v10  ;;  %v1273_v10 = vrot.slane %v1266_v14, %v2008_v9 }
  0xf0   :  { %v840_v19 = vpop.f32.mrf.mxu0  ;;  %v883_v23 = vpop.f32.mrf.mxu1 }
  0xf1   :  { %v1234_v22 = vmul.f32 %v1157_v16, %v840_v19  ;;  %v1236_v25 = vmul.f32 %v1165_v17, %v883_v23  ;;  %v1151_v23 = vld [vmem:[%s2160_s2 + $0x8] sm:$0xff] }
  0xf2   :  { %v842_v26 = vpop.f32.mrf.mxu0  ;;  %v885_v30 = vpop.f32.mrf.mxu1 }
  0xf3   :  { %v1350_v28 = vadd.f32 %v1273_v10, %v1234_v22  ;;  %v1235_v29 = vmul.f32 %v1161_v18, %v842_v26  ;;  %v1352_v31 = vadd.f32 %v1281_v20, %v1236_v25  ;;  %v1237_v32 = vmul.f32 %v1169_v21, %v885_v30 }
  0xf4   :  { %v844_v33 = vpop.f32.mrf.mxu0  ;;  %v887_v36 = vpop.f32.mrf.mxu1  ;;  %v1189_v25 = vrot.slane %v1151_v23, %v2008_v9  ;;  %v1197_v26 = vrot.slane %v1151_v23, %v2013_v12 }
  0xf5   :  { %1382 = vst [vmem:[%s2162_s4] sm:$0xff] %v1350_v28  ;;  %v1351_v34 = vadd.f32 %v1277_v24, %v1235_v29  ;;  %v1250_v35 = vmul.f32 %v1157_v16, %v844_v33  ;;  %1384 = vst [vmem:[%s2162_s4 + $0x10] sm:$0xff] %v1352_v31  ;;  %v1353_v37 = vadd.f32 %v1285_v27, %v1237_v32 }
  0xf6   :  { %v1252_v38 = vmul.f32 %v1165_v17, %v887_v36  ;;  %v846_v0 = vpop.f32.mrf.mxu0  ;;  %v889_v41 = vpop.f32.mrf.mxu1  ;;  %v1193_v28 = vrot.slane %v1151_v23, %v2015_v13  ;;  %v1201_v31 = vrot.slane %v1151_v23, %v2017_v15 }
  0xf7   :  { %1383 = vst [vmem:[%s2162_s4 + $0x8] sm:$0xff] %v1351_v34  ;;  %v1366_v39 = vadd.f32 %v1273_v10, %v1250_v35  ;;  %v1251_v40 = vmul.f32 %v1161_v18, %v846_v0  ;;  %1385 = vst [vmem:[%s2162_s4 + $0x18] sm:$0xff] %v1353_v37  ;;  %v1253_v43 = vmul.f32 %v1169_v21, %v889_v41 }
  0xf8   :  { %v1368_v42 = vadd.f32 %v1281_v20, %v1252_v38 }
  0xf9   :  { %1398 = vst [vmem:[%s2162_s4 + $0x80] sm:$0xff] %v1366_v39  ;;  %v1367_v44 = vadd.f32 %v1277_v24, %v1251_v40  ;;  %v1369_v45 = vadd.f32 %v1285_v27, %v1253_v43  ;;  %v1267_v24 = vld [vmem:[#allocation2 + $0x8] sm:$0xff] }
  0xfa   :  { %1400 = vst [vmem:[%s2162_s4 + $0x90] sm:$0xff] %v1368_v42  ;;  %v1305_v27 = vrot.slane %v1267_v24, %v2008_v9  ;;  %v1313_v30 = vrot.slane %v1267_v24, %v2013_v12  ;;  %v1309_v34 = vrot.slane %v1267_v24, %v2015_v13  ;;  %v1317_v37 = vrot.slane %v1267_v24, %v2017_v15 }
  0xfb   :  { %1399 = vst [vmem:[%s2162_s4 + $0x88] sm:$0xff] %v1367_v44  ;;  %1401 = vst [vmem:[%s2162_s4 + $0x98] sm:$0xff] %v1369_v45 }
 0x110   :  { %v926_v54 = vpop.f32.mrf.mxu0  ;;  %v969_v58 = vpop.f32.mrf.mxu1 }
 0x111   :  { %v1238_v57 = vmul.f32 %v1173_v50, %v926_v54  ;;  %v1240_v60 = vmul.f32 %v1181_v51, %v969_v58  ;;  %v1321_v58 = vrot.slane %v1267_v24, %v2051_v46 }
 0x112   :  { %v928_v61 = vpop.f32.mrf.mxu0  ;;  %v971_v2 = vpop.f32.mrf.mxu1 }
 0x113   :  { %v1354_v63 = vadd.f32 %v1289_v52, %v1238_v57  ;;  %v1239_v1 = vmul.f32 %v1177_v53, %v928_v61  ;;  %v1356_v3 = vadd.f32 %v1297_v55, %v1240_v60  ;;  %v1241_v4 = vmul.f32 %v1185_v56, %v971_v2 }
 0x114   :  { %v930_v5 = vpop.f32.mrf.mxu0  ;;  %v973_v8 = vpop.f32.mrf.mxu1  ;;  %v1213_v57 = vrot.slane %v1151_v23, %v2053_v47  ;;  %v1329_v61 = vrot.slane %v1267_v24, %v2053_v47  ;;  %v1325_v2 = vrot.slane %v1267_v24, %v2055_v48 }
 0x115   :  { %1386 = vst [vmem:[%s2162_s4 + $0x20] sm:$0xff] %v1354_v63  ;;  %v1355_v6 = vadd.f32 %v1293_v59, %v1239_v1  ;;  %v1254_v7 = vmul.f32 %v1173_v50, %v930_v5  ;;  %1388 = vst [vmem:[%s2162_s4 + $0x30] sm:$0xff] %v1356_v3  ;;  %v1357_v11 = vadd.f32 %v1301_v62, %v1241_v4 }
 0x116   :  { %v1256_v16 = vmul.f32 %v1181_v51, %v973_v8  ;;  %v932_v14 = vpop.f32.mrf.mxu0  ;;  %v975_v18 = vpop.f32.mrf.mxu1  ;;  %v1333_v5 = vrot.slane %v1267_v24, %v2057_v49 }
 0x117   :  { %1387 = vst [vmem:[%s2162_s4 + $0x28] sm:$0xff] %v1355_v6  ;;  %v1370_v17 = vadd.f32 %v1289_v52, %v1254_v7  ;;  %v1255_v10 = vmul.f32 %v1177_v53, %v932_v14  ;;  %1389 = vst [vmem:[%s2162_s4 + $0x38] sm:$0xff] %v1357_v11  ;;  %v1257_v20 = vmul.f32 %v1185_v56, %v975_v18 }
 0x118   :  { %v1372_v19 = vadd.f32 %v1297_v55, %v1256_v16  ;;  %v1205_v56 = vrot.slane %v1151_v23, %v2051_v46 }
 0x119   :  { %1402 = vst [vmem:[%s2162_s4 + $0xa0] sm:$0xff] %v1370_v17  ;;  %v1371_v21 = vadd.f32 %v1293_v59, %v1255_v10  ;;  %v1373_v22 = vadd.f32 %v1301_v62, %v1257_v20  ;;  %v1209_v59 = vrot.slane %v1151_v23, %v2055_v48  ;;  %v1217_v62 = vrot.slane %v1151_v23, %v2057_v49 }
 0x11a   :  { %1404 = vst [vmem:[%s2162_s4 + $0xb0] sm:$0xff] %v1372_v19 }
 0x11b   :  { %1403 = vst [vmem:[%s2162_s4 + $0xa8] sm:$0xff] %v1371_v21  ;;  %1405 = vst [vmem:[%s2162_s4 + $0xb8] sm:$0xff] %v1373_v22 }
 0x130   :  { %v1012_v29 = vpop.f32.mrf.mxu0  ;;  %v1055_v33 = vpop.f32.mrf.mxu1 }
 0x131   :  { %v1242_v32 = vmul.f32 %v1189_v25, %v1012_v29  ;;  %v1244_v35 = vmul.f32 %v1197_v26, %v1055_v33 }
 0x132   :  { %v1014_v36 = vpop.f32.mrf.mxu0  ;;  %v1057_v39 = vpop.f32.mrf.mxu1 }
 0x133   :  { %v1358_v38 = vadd.f32 %v1305_v27, %v1242_v32  ;;  %v1243_v0 = vmul.f32 %v1193_v28, %v1014_v36  ;;  %v1360_v40 = vadd.f32 %v1313_v30, %v1244_v35  ;;  %v1245_v9 = vmul.f32 %v1201_v31, %v1057_v39 }
 0x134   :  { %v1016_v41 = vpop.f32.mrf.mxu0  ;;  %v1059_v43 = vpop.f32.mrf.mxu1 }
 0x135   :  { %1390 = vst [vmem:[%s2162_s4 + $0x40] sm:$0xff] %v1358_v38  ;;  %v1359_v12 = vadd.f32 %v1309_v34, %v1243_v0  ;;  %v1258_v42 = vmul.f32 %v1189_v25, %v1016_v41  ;;  %1392 = vst [vmem:[%s2162_s4 + $0x50] sm:$0xff] %v1360_v40  ;;  %v1361_v13 = vadd.f32 %v1317_v37, %v1245_v9 }
 0x136   :  { %v1260_v44 = vmul.f32 %v1197_v26, %v1059_v43  ;;  %v1018_v15 = vpop.f32.mrf.mxu0  ;;  %v1061_v51 = vpop.f32.mrf.mxu1 }
 0x137   :  { %1391 = vst [vmem:[%s2162_s4 + $0x48] sm:$0xff] %v1359_v12  ;;  %v1374_v45 = vadd.f32 %v1305_v27, %v1258_v42  ;;  %v1259_v50 = vmul.f32 %v1193_v28, %v1018_v15  ;;  %1393 = vst [vmem:[%s2162_s4 + $0x58] sm:$0xff] %v1361_v13  ;;  %v1261_v53 = vmul.f32 %v1201_v31, %v1061_v51 }
 0x138   :  { %v1376_v52 = vadd.f32 %v1313_v30, %v1260_v44 }
 0x139   :  { %1406 = vst [vmem:[%s2162_s4 + $0xc0] sm:$0xff] %v1374_v45  ;;  %v1375_v54 = vadd.f32 %v1309_v34, %v1259_v50  ;;  %v1377_v55 = vadd.f32 %v1317_v37, %v1261_v53 }
 0x13a   :  { %1408 = vst [vmem:[%s2162_s4 + $0xd0] sm:$0xff] %v1376_v52 }
 0x13b   :  { %1407 = vst [vmem:[%s2162_s4 + $0xc8] sm:$0xff] %v1375_v54  ;;  %1409 = vst [vmem:[%s2162_s4 + $0xd8] sm:$0xff] %v1377_v55 }
 0x150   :  { %v1098_v60 = vpop.f32.mrf.mxu0  ;;  %v1141_v1 = vpop.f32.mrf.mxu1 }
 0x151   :  { %v1246_v63 = vmul.f32 %v1205_v56, %v1098_v60  ;;  %v1248_v3 = vmul.f32 %v1213_v57, %v1141_v1 }
 0x152   :  { %v1100_v4 = vpop.f32.mrf.mxu0  ;;  %v1143_v8 = vpop.f32.mrf.mxu1 }
 0x153   :  { %v1362_v6 = vadd.f32 %v1321_v58, %v1246_v63  ;;  %v1247_v7 = vmul.f32 %v1209_v59, %v1100_v4  ;;  %v1364_v11 = vadd.f32 %v1329_v61, %v1248_v3  ;;  %v1249_v46 = vmul.f32 %v1217_v62, %v1143_v8 }
 0x154   :  { %v1102_v16 = vpop.f32.mrf.mxu0  ;;  %v1145_v17 = vpop.f32.mrf.mxu1 }
 0x155   :  { %1394 = vst [vmem:[%s2162_s4 + $0x60] sm:$0xff] %v1362_v6  ;;  %v1363_v47 = vadd.f32 %v1325_v2, %v1247_v7  ;;  %v1262_v14 = vmul.f32 %v1205_v56, %v1102_v16  ;;  %1396 = vst [vmem:[%s2162_s4 + $0x70] sm:$0xff] %v1364_v11  ;;  %v1365_v48 = vadd.f32 %v1333_v5, %v1249_v46 }
 0x156   :  { %v1264_v10 = vmul.f32 %v1213_v57, %v1145_v17  ;;  %v1104_v49 = vpop.f32.mrf.mxu0  ;;  %v1147_v20 = vpop.f32.mrf.mxu1 }
 0x157   :  { %1395 = vst [vmem:[%s2162_s4 + $0x68] sm:$0xff] %v1363_v47  ;;  %v1378_v18 = vadd.f32 %v1321_v58, %v1262_v14  ;;  %v1263_v19 = vmul.f32 %v1209_v59, %v1104_v49  ;;  %1397 = vst [vmem:[%s2162_s4 + $0x78] sm:$0xff] %v1365_v48  ;;  %v1265_v22 = vmul.f32 %v1217_v62, %v1147_v20 }
 0x158   :  { %v1380_v21 = vadd.f32 %v1329_v61, %v1264_v10 }
 0x159   :  { %1410 = vst [vmem:[%s2162_s4 + $0xe0] sm:$0xff] %v1378_v18  ;;  %v1379_v23 = vadd.f32 %v1325_v2, %v1263_v19  ;;  %v1381_v24 = vadd.f32 %v1333_v5, %v1265_v22 }
 0x15a   :  { %1412 = vst [vmem:[%s2162_s4 + $0xf0] sm:$0xff] %v1380_v21 }
 0x15b   :  { %1411 = vst [vmem:[%s2162_s4 + $0xe8] sm:$0xff] %v1379_v23  ;;  %1413 = vst [vmem:[%s2162_s4 + $0xf8] sm:$0xff] %v1381_v24 }
 0x15c   :  { %1418 = vsyncpa [#allocation3], 1 }

// kernel: transcriber_crnn_forward.16
= control target key start
LH: loop header
LB: loop body
LE: loop exit
PB: predicated region body
PF: predicated region fallthrough
CT: control target
= control target key end

     0   :  { %v1763_v0 = vmov 0.0   ;;  %s1781_s9 = smov 0   ;;  %s2237_s0 = inlined_call_operand.vmem [shape: f32[32,2,512], index: 0, kind: input, shape index: {}]   ;;  %s2238_s1 = inlined_call_operand.vmem [shape: bf16[512,512], index: 1, kind: input, shape index: {}]   ;;  %s2239_s2 = inlined_call_operand.vmem [shape: f32[32,2,128], index: 2, kind: output, shape index: {}]  }
   0x1   :  { %12 = vst [vmem:[#allocation2] sm:$0xff] %v1763_v0  ;;  %13 = vst [vmem:[#allocation3] sm:$0xff] %v1763_v0 }
   0x2 LB: > { %v1553_v1 = vld [vmem:[%s2238_s1 + $0xe4] ss:$16 sps:$4 sm:$0xff]   ;;  %v1555_v2 = vld [vmem:[%s2238_s1 + $0xec] ss:$16 sps:$4 sm:$0xff]   ;;  %v1764_v3 = vmov 0   ;;  %s1539_s23 = sshll.u32 %s1761_s9, 3  ;;  %s1761_s9 = sphi %s1781_s9, %s19_s9  }
   0x3   : > { %250 = vmatprep.mubr.bf16.mxu0 %v1764_v3  ;;  %291 = vmatprep.mubr.bf16.mxu1 %v1764_v3  ;;  %v1557_v4 = vld [vmem:[%s2238_s1 + $0xe0] ss:$16 sps:$4 sm:$0xff]   ;;  %v1558_v5 = vld [vmem:[%s2238_s1 + $0xe8] ss:$16 sps:$4 sm:$0xff]   ;;  %v1559_v6 = vld [vmem:[%s2238_s1 + $0xc4] ss:$16 sps:$4 sm:$0xff]   ;;  %s2186_s26 = scalar_lea.vmem %s2237_s0, %s1539_s23 }
   0x4   : > { %218 = vmatprep.subr.bf16.mxu0 %v1553_v1  ;;  %259 = vmatprep.subr.bf16.mxu1 %v1555_v2  ;;  %v1561_v7 = vld [vmem:[%s2238_s1 + $0xcc] ss:$16 sps:$4 sm:$0xff]   ;;  %v1563_v8 = vld [vmem:[%s2238_s1 + $0xc0] ss:$16 sps:$4 sm:$0xff]   ;;  %v1564_v9 = vld [vmem:[%s2238_s1 + $0xc8] ss:$16 sps:$4 sm:$0xff]  }
   0x5   : > { %219 = vmatpush1.bf16.msra.mxu0 %v1557_v4  ;;  %260 = vmatpush1.bf16.msra.mxu1 %v1558_v5  ;;  %v1565_v10 = vld [vmem:[%s2238_s1 + $0xa4] ss:$16 sps:$4 sm:$0xff]   ;;  %v1567_v11 = vld [vmem:[%s2238_s1 + $0xac] ss:$16 sps:$4 sm:$0xff]   ;;  %v1569_v12 = vld [vmem:[%s2238_s1 + $0xa0] ss:$16 sps:$4 sm:$0xff]  }
   0x6   : > { %220 = vmatprep.subr.bf16.mxu0 %v1559_v6  ;;  %261 = vmatprep.subr.bf16.mxu1 %v1561_v7  ;;  %v1570_v13 = vld [vmem:[%s2238_s1 + $0xa8] ss:$16 sps:$4 sm:$0xff]   ;;  %v1571_v14 = vld [vmem:[%s2238_s1 + $0x84] ss:$16 sps:$4 sm:$0xff]   ;;  %v1573_v15 = vld [vmem:[%s2238_s1 + $0x8c] ss:$16 sps:$4 sm:$0xff]  }
   0x7   : > { %v1575_v16 = vld [vmem:[%s2238_s1 + $0x80] ss:$16 sps:$4 sm:$0xff]   ;;  %v1576_v17 = vld [vmem:[%s2238_s1 + $0x88] ss:$16 sps:$4 sm:$0xff]   ;;  %v1577_v18 = vld [vmem:[%s2238_s1 + $0x64] ss:$16 sps:$4 sm:$0xff]  }
   0x8   : > { %v1579_v19 = vld [vmem:[%s2238_s1 + $0x6c] ss:$16 sps:$4 sm:$0xff]   ;;  %v1581_v20 = vld [vmem:[%s2238_s1 + $0x60] ss:$16 sps:$4 sm:$0xff]   ;;  %v1582_v21 = vld [vmem:[%s2238_s1 + $0x68] ss:$16 sps:$4 sm:$0xff]  }
   0x9   : > { %221 = vmatpush1.bf16.msra.mxu0 %v1563_v8  ;;  %262 = vmatpush1.bf16.msra.mxu1 %v1564_v9  ;;  %v1583_v22 = vld [vmem:[%s2238_s1 + $0x44] ss:$16 sps:$4 sm:$0xff]   ;;  %v1585_v23 = vld [vmem:[%s2238_s1 + $0x4c] ss:$16 sps:$4 sm:$0xff]   ;;  %v1587_v24 = vld [vmem:[%s2238_s1 + $0x40] ss:$16 sps:$4 sm:$0xff]  }
   0xa   : > { %222 = vmatprep.subr.bf16.mxu0 %v1565_v10  ;;  %263 = vmatprep.subr.bf16.mxu1 %v1567_v11  ;;  %v1588_v25 = vld [vmem:[%s2238_s1 + $0x48] ss:$16 sps:$4 sm:$0xff]   ;;  %v1589_v26 = vld [vmem:[%s2238_s1 + $0x24] ss:$16 sps:$4 sm:$0xff]   ;;  %v1591_v27 = vld [vmem:[%s2238_s1 + $0x2c] ss:$16 sps:$4 sm:$0xff]  }
   0xb   : > { %v1593_v28 = vld [vmem:[%s2238_s1 + $0x20] ss:$16 sps:$4 sm:$0xff]   ;;  %v1594_v29 = vld [vmem:[%s2238_s1 + $0x28] ss:$16 sps:$4 sm:$0xff]   ;;  %v1595_v30 = vld [vmem:[%s2238_s1 + $0x4] ss:$16 sps:$4 sm:$0xff]  }
   0xc   : > { %v1597_v31 = vld [vmem:[%s2238_s1 + $0xc] ss:$16 sps:$4 sm:$0xff]   ;;  %v1599_v32 = vld [vmem:[%s2238_s1] ss:$16 sps:$4 sm:$0xff]   ;;  %v1600_v33 = vld [vmem:[%s2238_s1 + $0x8] ss:$16 sps:$4 sm:$0xff]  }
   0xd   : > { %223 = vmatpush1.bf16.msra.mxu0 %v1569_v12  ;;  %264 = vmatpush1.bf16.msra.mxu1 %v1570_v13  ;;  %v20_v34 = vld [vmem:[#allocation2] sm:$0x3]  ;;  %v1603_v35 = vld [vmem:[%s2238_s1 + $0x1e4] ss:$16 sps:$4 sm:$0xff]   ;;  %v1606_v36 = vld [vmem:[%s2238_s1 + $0x1ec] ss:$16 sps:$4 sm:$0xff]  }
   0xe   : > { %224 = vmatprep.subr.bf16.mxu0 %v1571_v14  ;;  %265 = vmatprep.subr.bf16.mxu1 %v1573_v15  ;;  %v21_v37 = vpack.c.bf16 %v20_v34, %v20_v34  ;;  %v1601_v38 = vld [vmem:[%s2238_s1 + $0x1e0] ss:$16 sps:$4 sm:$0xff]   ;;  %v1604_v39 = vld [vmem:[%s2238_s1 + $0x1e8] ss:$16 sps:$4 sm:$0xff]   ;;  %v1609_v40 = vld [vmem:[%s2238_s1 + $0x1c4] ss:$16 sps:$4 sm:$0xff]  }
   0xf   : > { %v1612_v41 = vld [vmem:[%s2238_s1 + $0x1cc] ss:$16 sps:$4 sm:$0xff]   ;;  %v1607_v42 = vld [vmem:[%s2238_s1 + $0x1c0] ss:$16 sps:$4 sm:$0xff]   ;;  %v1610_v43 = vld [vmem:[%s2238_s1 + $0x1c8] ss:$16 sps:$4 sm:$0xff]  }
  0x10   : > { %v1615_v44 = vld [vmem:[%s2238_s1 + $0x1a4] ss:$16 sps:$4 sm:$0xff]   ;;  %v1618_v45 = vld [vmem:[%s2238_s1 + $0x1ac] ss:$16 sps:$4 sm:$0xff]   ;;  %v1613_v46 = vld [vmem:[%s2238_s1 + $0x1a0] ss:$16 sps:$4 sm:$0xff]  }
  0x11   : > { %225 = vmatpush1.bf16.msra.mxu0 %v1575_v16  ;;  %266 = vmatpush1.bf16.msra.mxu1 %v1576_v17  ;;  %v1616_v47 = vld [vmem:[%s2238_s1 + $0x1a8] ss:$16 sps:$4 sm:$0xff]   ;;  %v1621_v48 = vld [vmem:[%s2238_s1 + $0x184] ss:$16 sps:$4 sm:$0xff]   ;;  %v1624_v49 = vld [vmem:[%s2238_s1 + $0x18c] ss:$16 sps:$4 sm:$0xff]  }
  0x12   : > { %226 = vmatprep.subr.bf16.mxu0 %v1577_v18  ;;  %267 = vmatprep.subr.bf16.mxu1 %v1579_v19  ;;  %v1619_v50 = vld [vmem:[%s2238_s1 + $0x180] ss:$16 sps:$4 sm:$0xff]   ;;  %v1622_v51 = vld [vmem:[%s2238_s1 + $0x188] ss:$16 sps:$4 sm:$0xff]   ;;  %v1627_v52 = vld [vmem:[%s2238_s1 + $0x164] ss:$16 sps:$4 sm:$0xff]  }
  0x13   : > { %v1630_v53 = vld [vmem:[%s2238_s1 + $0x16c] ss:$16 sps:$4 sm:$0xff]   ;;  %v1625_v54 = vld [vmem:[%s2238_s1 + $0x160] ss:$16 sps:$4 sm:$0xff]   ;;  %v1628_v55 = vld [vmem:[%s2238_s1 + $0x168] ss:$16 sps:$4 sm:$0xff]  }
  0x14   : > { %v1633_v56 = vld [vmem:[%s2238_s1 + $0x144] ss:$16 sps:$4 sm:$0xff]   ;;  %v1636_v57 = vld [vmem:[%s2238_s1 + $0x14c] ss:$16 sps:$4 sm:$0xff]   ;;  %v1631_v58 = vld [vmem:[%s2238_s1 + $0x140] ss:$16 sps:$4 sm:$0xff]  }
  0x15   : > { %227 = vmatpush1.bf16.msra.mxu0 %v1581_v20  ;;  %268 = vmatpush1.bf16.msra.mxu1 %v1582_v21  ;;  %v1634_v59 = vld [vmem:[%s2238_s1 + $0x148] ss:$16 sps:$4 sm:$0xff]   ;;  %v1639_v60 = vld [vmem:[%s2238_s1 + $0x124] ss:$16 sps:$4 sm:$0xff]   ;;  %v1642_v61 = vld [vmem:[%s2238_s1 + $0x12c] ss:$16 sps:$4 sm:$0xff]  }
  0x16   : > { %228 = vmatprep.subr.bf16.mxu0 %v1583_v22  ;;  %269 = vmatprep.subr.bf16.mxu1 %v1585_v23  ;;  %v1637_v62 = vld [vmem:[%s2238_s1 + $0x120] ss:$16 sps:$4 sm:$0xff]   ;;  %v1640_v63 = vld [vmem:[%s2238_s1 + $0x128] ss:$16 sps:$4 sm:$0xff]   ;;  %v1645_v0 = vld [vmem:[%s2238_s1 + $0x104] ss:$16 sps:$4 sm:$0xff]  }
  0x17   : > { %v1648_v1 = vld [vmem:[%s2238_s1 + $0x10c] ss:$16 sps:$4 sm:$0xff]   ;;  %v1643_v2 = vld [vmem:[%s2238_s1 + $0x100] ss:$16 sps:$4 sm:$0xff]   ;;  %v1646_v4 = vld [vmem:[%s2238_s1 + $0x108] ss:$16 sps:$4 sm:$0xff]  }
  0x18   : > { %v323_v5 = vld [vmem:[#allocation2 + $0x2] sm:$0x3]  ;;  %v1651_v6 = vld [vmem:[%s2238_s1 + $0x2e4] ss:$16 sps:$4 sm:$0xff]   ;;  %v1654_v7 = vld [vmem:[%s2238_s1 + $0x2ec] ss:$16 sps:$4 sm:$0xff]  }
  0x19   : > { %229 = vmatpush1.bf16.msra.mxu0 %v1587_v24  ;;  %270 = vmatpush1.bf16.msra.mxu1 %v1588_v25  ;;  %v324_v8 = vpack.c.bf16 %v323_v5, %v323_v5  ;;  %v1649_v9 = vld [vmem:[%s2238_s1 + $0x2e0] ss:$16 sps:$4 sm:$0xff]   ;;  %v1652_v10 = vld [vmem:[%s2238_s1 + $0x2e8] ss:$16 sps:$4 sm:$0xff]   ;;  %v1657_v11 = vld [vmem:[%s2238_s1 + $0x2c4] ss:$16 sps:$4 sm:$0xff]  }
  0x1a   : > { %230 = vmatprep.subr.bf16.mxu0 %v1589_v26  ;;  %271 = vmatprep.subr.bf16.mxu1 %v1591_v27  ;;  %v1660_v12 = vld [vmem:[%s2238_s1 + $0x2cc] ss:$16 sps:$4 sm:$0xff]   ;;  %v1655_v13 = vld [vmem:[%s2238_s1 + $0x2c0] ss:$16 sps:$4 sm:$0xff]   ;;  %v1658_v14 = vld [vmem:[%s2238_s1 + $0x2c8] ss:$16 sps:$4 sm:$0xff]  }
  0x1b   : > { %v1663_v15 = vld [vmem:[%s2238_s1 + $0x2a4] ss:$16 sps:$4 sm:$0xff]   ;;  %v1666_v16 = vld [vmem:[%s2238_s1 + $0x2ac] ss:$16 sps:$4 sm:$0xff]   ;;  %v1661_v17 = vld [vmem:[%s2238_s1 + $0x2a0] ss:$16 sps:$4 sm:$0xff]  }
  0x1c   : > { %v1664_v18 = vld [vmem:[%s2238_s1 + $0x2a8] ss:$16 sps:$4 sm:$0xff]   ;;  %v1669_v19 = vld [vmem:[%s2238_s1 + $0x284] ss:$16 sps:$4 sm:$0xff]   ;;  %v1672_v20 = vld [vmem:[%s2238_s1 + $0x28c] ss:$16 sps:$4 sm:$0xff]  }
  0x1d   : > { %231 = vmatpush1.bf16.msra.mxu0 %v1593_v28  ;;  %272 = vmatpush1.bf16.msra.mxu1 %v1594_v29  ;;  %v1667_v21 = vld [vmem:[%s2238_s1 + $0x280] ss:$16 sps:$4 sm:$0xff]   ;;  %v1670_v22 = vld [vmem:[%s2238_s1 + $0x288] ss:$16 sps:$4 sm:$0xff]   ;;  %v1675_v23 = vld [vmem:[%s2238_s1 + $0x264] ss:$16 sps:$4 sm:$0xff]  }
  0x1e   : > { %232 = vmatprep.subr.bf16.mxu0 %v1595_v30  ;;  %273 = vmatprep.subr.bf16.mxu1 %v1597_v31  ;;  %v1678_v24 = vld [vmem:[%s2238_s1 + $0x26c] ss:$16 sps:$4 sm:$0xff]   ;;  %v1673_v25 = vld [vmem:[%s2238_s1 + $0x260] ss:$16 sps:$4 sm:$0xff]   ;;  %v1676_v26 = vld [vmem:[%s2238_s1 + $0x268] ss:$16 sps:$4 sm:$0xff]  }
  0x1f   : > { %v1681_v27 = vld [vmem:[%s2238_s1 + $0x244] ss:$16 sps:$4 sm:$0xff]   ;;  %v1684_v28 = vld [vmem:[%s2238_s1 + $0x24c] ss:$16 sps:$4 sm:$0xff]   ;;  %v1679_v29 = vld [vmem:[%s2238_s1 + $0x240] ss:$16 sps:$4 sm:$0xff]  }
  0x20   : > { %v1682_v30 = vld [vmem:[%s2238_s1 + $0x248] ss:$16 sps:$4 sm:$0xff]   ;;  %v1687_v31 = vld [vmem:[%s2238_s1 + $0x224] ss:$16 sps:$4 sm:$0xff]   ;;  %s357_s27 = ssub.s32 15, %s1761_s9  ;;  %vm1323_vm0 = vcmask 1041408  }
  0x21   : > { %233 = vmatpush1.bf16.msra.mxu0 %v1599_v32  ;;  %274 = vmatpush1.bf16.msra.mxu1 %v1600_v33  ;;  %v1690_v32 = vld [vmem:[%s2238_s1 + $0x22c] ss:$16 sps:$4 sm:$0xff]   ;;  %v1685_v33 = vld [vmem:[%s2238_s1 + $0x220] ss:$16 sps:$4 sm:$0xff]   ;;  %v1688_v34 = vld [vmem:[%s2238_s1 + $0x228] ss:$16 sps:$4 sm:$0xff]  }
  0x22   : > { %522 = vmatprep.subr.bf16.mxu0 %v1603_v35  ;;  %563 = vmatprep.subr.bf16.mxu1 %v1606_v36  ;;  %v1693_v35 = vld [vmem:[%s2238_s1 + $0x204] ss:$16 sps:$4 sm:$0xff]   ;;  %v1696_v36 = vld [vmem:[%s2238_s1 + $0x20c] ss:$16 sps:$4 sm:$0xff]   ;;  %s1540_s28 = sshll.u32 %s357_s27, 3  ;;  %s965_s4 = ssub.s32 31, %s1761_s9 }
  0x23   : > { %v1741_v5 = vld [vmem:[%s2238_s1 + $0x304] ss:$16 sps:$4 sm:$0xff]   ;;  %s360_s3 = scalar_lea.vmem %s2237_s0, %s1540_s28  ;;  %s1541_s5 = sshll.u32 %s965_s4, 3  ;;  %vm1328_vm1 = vcmask 1043456   ;;  %vm1333_vm2 = vcmask 1045504  }
  0x24   : > { %251 = vmatmul.mubr.bf16.vlgmr.msra.gmra.mxu0 %v21_v37  ;;  %292 = vmatmul.mubr.bf16.vlgmr.msra.gmra.mxu1 %v21_v37  ;;  %v1691_v37 = vld [vmem:[%s2238_s1 + $0x200] ss:$16 sps:$4 sm:$0xff]   ;;  %s968_s8 = scalar_lea.vmem %s2237_s0, %s1541_s5  ;;  %s1534_s10 = sshll.u32 %s1761_s9, 1 }
  0x25   : > { %523 = vmatpush1.bf16.msra.mxu0 %v1601_v38  ;;  %564 = vmatpush1.bf16.msra.mxu1 %v1604_v39  ;;  %v1694_v38 = vld [vmem:[%s2238_s1 + $0x208] ss:$16 sps:$4 sm:$0xff]   ;;  %v627_v39 = vld [vmem:[#allocation2 + $0x4] sm:$0x3]  ;;  %s1535_s11 = sshll.u32 %s357_s27, 1  ;;  %s1360_s14 = scalar_lea.vmem %s2239_s2, %s1534_s10 }
  0x26   : > { %524 = vmatprep.subr.bf16.mxu0 %v1609_v40  ;;  %565 = vmatprep.subr.bf16.mxu1 %v1612_v41  ;;  %v1699_v40 = vld [vmem:[%s2238_s1 + $0x3e4] ss:$16 sps:$4 sm:$0xff]   ;;  %v1702_v41 = vld [vmem:[%s2238_s1 + $0x3ec] ss:$16 sps:$4 sm:$0xff]   ;;  %s1538_s15 = sshll.u32 %s965_s4, 1  ;;  %s1363_s18 = scalar_lea.vmem %s2239_s2, %s1535_s11 }
  0x27   : > { %554 = vmatprep.mubr.bf16.mxu0 %v1764_v3  ;;  %595 = vmatprep.mubr.bf16.mxu1 %v1764_v3  ;;  %s1369_s21 = scalar_lea.vmem %s2239_s2, %s1538_s15  ;;  %s19_s9 = sadd.s32 1, %s1761_s9  }
  0x28   : > { %p16_p0 = scmp.ge.s32.totalorder %s19_s9, 8  }
  0x29   : > { %525 = vmatpush1.bf16.msra.mxu0 %v1607_v42  ;;  %566 = vmatpush1.bf16.msra.mxu1 %v1610_v43  ;;  %v628_v42 = vpack.c.bf16 %v627_v39, %v627_v39  ;;  %v1697_v43 = vld [vmem:[%s2238_s1 + $0x3e0] ss:$16 sps:$4 sm:$0xff]  }
  0x2a   : > { %526 = vmatprep.subr.bf16.mxu0 %v1615_v44  ;;  %567 = vmatprep.subr.bf16.mxu1 %v1618_v45  ;;  %v1700_v44 = vld [vmem:[%s2238_s1 + $0x3e8] ss:$16 sps:$4 sm:$0xff]   ;;  %v1705_v45 = vld [vmem:[%s2238_s1 + $0x3c4] ss:$16 sps:$4 sm:$0xff]  }
  0x2d   : > { %527 = vmatpush1.bf16.msra.mxu0 %v1613_v46  ;;  %568 = vmatpush1.bf16.msra.mxu1 %v1616_v47  ;;  %v1708_v46 = vld [vmem:[%s2238_s1 + $0x3cc] ss:$16 sps:$4 sm:$0xff]   ;;  %v1703_v47 = vld [vmem:[%s2238_s1 + $0x3c0] ss:$16 sps:$4 sm:$0xff]  }
  0x2e   : > { %528 = vmatprep.subr.bf16.mxu0 %v1621_v48  ;;  %569 = vmatprep.subr.bf16.mxu1 %v1624_v49  ;;  %v1706_v48 = vld [vmem:[%s2238_s1 + $0x3c8] ss:$16 sps:$4 sm:$0xff]   ;;  %v1711_v49 = vld [vmem:[%s2238_s1 + $0x3a4] ss:$16 sps:$4 sm:$0xff]  }
  0x31   : > { %529 = vmatpush1.bf16.msra.mxu0 %v1619_v50  ;;  %570 = vmatpush1.bf16.msra.mxu1 %v1622_v51  ;;  %v1714_v50 = vld [vmem:[%s2238_s1 + $0x3ac] ss:$16 sps:$4 sm:$0xff]   ;;  %v1709_v51 = vld [vmem:[%s2238_s1 + $0x3a0] ss:$16 sps:$4 sm:$0xff]  }
  0x32   : > { %530 = vmatprep.subr.bf16.mxu0 %v1627_v52  ;;  %571 = vmatprep.subr.bf16.mxu1 %v1630_v53  ;;  %v1712_v52 = vld [vmem:[%s2238_s1 + $0x3a8] ss:$16 sps:$4 sm:$0xff]   ;;  %v1717_v53 = vld [vmem:[%s2238_s1 + $0x384] ss:$16 sps:$4 sm:$0xff]  }
  0x35   : > { %531 = vmatpush1.bf16.msra.mxu0 %v1625_v54  ;;  %572 = vmatpush1.bf16.msra.mxu1 %v1628_v55  ;;  %v1715_v54 = vld [vmem:[%s2238_s1 + $0x380] ss:$16 sps:$4 sm:$0xff]   ;;  %v1718_v55 = vld [vmem:[%s2238_s1 + $0x388] ss:$16 sps:$4 sm:$0xff]  }
  0x36   : > { %532 = vmatprep.subr.bf16.mxu0 %v1633_v56  ;;  %573 = vmatprep.subr.bf16.mxu1 %v1636_v57  ;;  %v1723_v56 = vld [vmem:[%s2238_s1 + $0x364] ss:$16 sps:$4 sm:$0xff]   ;;  %v1726_v57 = vld [vmem:[%s2238_s1 + $0x36c] ss:$16 sps:$4 sm:$0xff]  }
  0x39   : > { %533 = vmatpush1.bf16.msra.mxu0 %v1631_v58  ;;  %574 = vmatpush1.bf16.msra.mxu1 %v1634_v59  ;;  %v1721_v58 = vld [vmem:[%s2238_s1 + $0x360] ss:$16 sps:$4 sm:$0xff]   ;;  %v1724_v59 = vld [vmem:[%s2238_s1 + $0x368] ss:$16 sps:$4 sm:$0xff]  }
  0x3a   : > { %534 = vmatprep.subr.bf16.mxu0 %v1639_v60  ;;  %575 = vmatprep.subr.bf16.mxu1 %v1642_v61  ;;  %v1729_v60 = vld [vmem:[%s2238_s1 + $0x344] ss:$16 sps:$4 sm:$0xff]   ;;  %v1732_v61 = vld [vmem:[%s2238_s1 + $0x34c] ss:$16 sps:$4 sm:$0xff]  }
  0x3d   : > { %535 = vmatpush1.bf16.msra.mxu0 %v1637_v62  ;;  %576 = vmatpush1.bf16.msra.mxu1 %v1640_v63  ;;  %v1727_v62 = vld [vmem:[%s2238_s1 + $0x340] ss:$16 sps:$4 sm:$0xff]   ;;  %v1730_v63 = vld [vmem:[%s2238_s1 + $0x348] ss:$16 sps:$4 sm:$0xff]  }
  0x3e   : > { %536 = vmatprep.subr.bf16.mxu0 %v1645_v0  ;;  %577 = vmatprep.subr.bf16.mxu1 %v1648_v1  ;;  %v1735_v0 = vld [vmem:[%s2238_s1 + $0x324] ss:$16 sps:$4 sm:$0xff]   ;;  %v1738_v1 = vld [vmem:[%s2238_s1 + $0x32c] ss:$16 sps:$4 sm:$0xff]  }
  0x41   : > { %537 = vmatpush1.bf16.msra.mxu0 %v1643_v2  ;;  %578 = vmatpush1.bf16.msra.mxu1 %v1646_v4  ;;  %v1733_v2 = vld [vmem:[%s2238_s1 + $0x320] ss:$16 sps:$4 sm:$0xff]   ;;  %v1736_v4 = vld [vmem:[%s2238_s1 + $0x328] ss:$16 sps:$4 sm:$0xff]  }
  0x42   : > { %826 = vmatprep.subr.bf16.mxu0 %v1651_v6  ;;  %867 = vmatprep.subr.bf16.mxu1 %v1654_v7  ;;  %v1744_v6 = vld [vmem:[%s2238_s1 + $0x30c] ss:$16 sps:$4 sm:$0xff]   ;;  %v1739_v7 = vld [vmem:[%s2238_s1 + $0x300] ss:$16 sps:$4 sm:$0xff]  }
  0x44   : > { %555 = vmatmul.mubr.bf16.vlgmr.msra.gmra.mxu0 %v324_v8  ;;  %596 = vmatmul.mubr.bf16.vlgmr.msra.gmra.mxu1 %v324_v8  ;;  %v1742_v8 = vld [vmem:[%s2238_s1 + $0x308] ss:$16 sps:$4 sm:$0xff]  }
  0x45   : > { %827 = vmatpush1.bf16.msra.mxu0 %v1649_v9  ;;  %868 = vmatpush1.bf16.msra.mxu1 %v1652_v10  ;;  %v931_v9 = vld [vmem:[#allocation2 + $0x6] sm:$0x3] }
  0x46   : > { %828 = vmatprep.subr.bf16.mxu0 %v1657_v11  ;;  %869 = vmatprep.subr.bf16.mxu1 %v1660_v12  ;;  %v932_v10 = vpack.c.bf16 %v931_v9, %v931_v9  ;;  %v1765_v11 = vmov 1983009808  }
  0x47   : > { %858 = vmatprep.mubr.bf16.mxu0 %v1764_v3  ;;  %899 = vmatprep.mubr.bf16.mxu1 %v1764_v3  ;;  %v307_v12 = vunpack.c.l.s4 %v1765_v11 }
  0x49   : > { %829 = vmatpush1.bf16.msra.mxu0 %v1655_v13  ;;  %870 = vmatpush1.bf16.msra.mxu1 %v1658_v14  ;;  %v309_v13 = vlaneseq  ;;  %v308_v14 = vunpack.c.0.s8 %v307_v12  ;;  %v1467_v12 = vld [vmem:[%s2186_s26 + $0x80] sm:$0xff] }
  0x4a   : > { %830 = vmatprep.subr.bf16.mxu0 %v1663_v15  ;;  %871 = vmatprep.subr.bf16.mxu1 %v1666_v16 }
  0x4b   : > { %v310_v15 = vshrl.u32 %v309_v13, 7 }
  0x4d   : > { %831 = vmatpush1.bf16.msra.mxu0 %v1661_v17  ;;  %872 = vmatpush1.bf16.msra.mxu1 %v1664_v18  ;;  %v2178_v18 = vsub.s32 %v308_v14, %v310_v15 }
  0x4e   : > { %832 = vmatprep.subr.bf16.mxu0 %v1669_v19  ;;  %873 = vmatprep.subr.bf16.mxu1 %v1672_v20 }
  0x51   : > { %833 = vmatpush1.bf16.msra.mxu0 %v1667_v21  ;;  %874 = vmatpush1.bf16.msra.mxu1 %v1670_v22 }
  0x52   : > { %834 = vmatprep.subr.bf16.mxu0 %v1675_v23  ;;  %875 = vmatprep.subr.bf16.mxu1 %v1678_v24 }
  0x55   : > { %835 = vmatpush1.bf16.msra.mxu0 %v1673_v25  ;;  %876 = vmatpush1.bf16.msra.mxu1 %v1676_v26 }
  0x56   : > { %836 = vmatprep.subr.bf16.mxu0 %v1681_v27  ;;  %877 = vmatprep.subr.bf16.mxu1 %v1684_v28 }
  0x59   : > { %837 = vmatpush1.bf16.msra.mxu0 %v1679_v29  ;;  %878 = vmatpush1.bf16.msra.mxu1 %v1682_v30  ;;  %v57_v30 = vld [vmem:[%s2186_s26] sm:$0xff] }
  0x5a   : > { %838 = vmatprep.subr.bf16.mxu0 %v1687_v31  ;;  %879 = vmatprep.subr.bf16.mxu1 %v1690_v32 }
  0x5d   : > { %839 = vmatpush1.bf16.msra.mxu0 %v1685_v33  ;;  %880 = vmatpush1.bf16.msra.mxu1 %v1688_v34 }
  0x5e   : > { %840 = vmatprep.subr.bf16.mxu0 %v1693_v35  ;;  %881 = vmatprep.subr.bf16.mxu1 %v1696_v36 }
  0x61   : > { %841 = vmatpush1.bf16.msra.mxu0 %v1691_v37  ;;  %882 = vmatpush1.bf16.msra.mxu1 %v1694_v38 }
  0x62   : > { %1130 = vmatprep.subr.bf16.mxu0 %v1699_v40  ;;  %1171 = vmatprep.subr.bf16.mxu1 %v1702_v41 }
  0x64   : > { %859 = vmatmul.mubr.bf16.vlgmr.msra.gmra.mxu0 %v628_v42  ;;  %900 = vmatmul.mubr.bf16.vlgmr.msra.gmra.mxu1 %v628_v42 }
  0x65   : > { %1131 = vmatpush1.bf16.msra.mxu0 %v1697_v43  ;;  %1172 = vmatpush1.bf16.msra.mxu1 %v1700_v44  ;;  %v361_v43 = vld [vmem:[%s360_s3] sm:$0xff] }
  0x66   : > { %1132 = vmatprep.subr.bf16.mxu0 %v1705_v45  ;;  %1173 = vmatprep.subr.bf16.mxu1 %v1708_v46 }
  0x67   : > { %1162 = vmatprep.mubr.bf16.mxu0 %v1764_v3  ;;  %1203 = vmatprep.mubr.bf16.mxu1 %v1764_v3  ;;  %v1720_v3 = vld [vmem:[%s2238_s1 + $0x38c] ss:$16 sps:$4 sm:$0xff]  }
  0x69   : > { %1133 = vmatpush1.bf16.msra.mxu0 %v1703_v47  ;;  %1174 = vmatpush1.bf16.msra.mxu1 %v1706_v48 }
  0x6a   : > { %1134 = vmatprep.subr.bf16.mxu0 %v1711_v49  ;;  %1175 = vmatprep.subr.bf16.mxu1 %v1714_v50 }
  0x6d   : > { %1135 = vmatpush1.bf16.msra.mxu0 %v1709_v51  ;;  %1176 = vmatpush1.bf16.msra.mxu1 %v1712_v52 }
  0x6e   : > { %1136 = vmatprep.subr.bf16.mxu0 %v1717_v53  ;;  %1177 = vmatprep.subr.bf16.mxu1 %v1720_v3 }
  0x71   : > { %1137 = vmatpush1.bf16.msra.mxu0 %v1715_v54  ;;  %1178 = vmatpush1.bf16.msra.mxu1 %v1718_v55 }
  0x72   : > { %1138 = vmatprep.subr.bf16.mxu0 %v1723_v56  ;;  %1179 = vmatprep.subr.bf16.mxu1 %v1726_v57 }
  0x75   : > { %1139 = vmatpush1.bf16.msra.mxu0 %v1721_v58  ;;  %1180 = vmatpush1.bf16.msra.mxu1 %v1724_v59 }
  0x76   : > { %1140 = vmatprep.subr.bf16.mxu0 %v1729_v60  ;;  %1181 = vmatprep.subr.bf16.mxu1 %v1732_v61 }
  0x79   : > { %1141 = vmatpush1.bf16.msra.mxu0 %v1727_v62  ;;  %1182 = vmatpush1.bf16.msra.mxu1 %v1730_v63 }
  0x7a   : > { %1142 = vmatprep.subr.bf16.mxu0 %v1735_v0  ;;  %1183 = vmatprep.subr.bf16.mxu1 %v1738_v1 }
  0x7d   : > { %1143 = vmatpush1.bf16.msra.mxu0 %v1733_v2  ;;  %1184 = vmatpush1.bf16.msra.mxu1 %v1736_v4 }
  0x7e   : > { %1144 = vmatprep.subr.bf16.mxu0 %v1741_v5  ;;  %1185 = vmatprep.subr.bf16.mxu1 %v1744_v6 }
  0x81   : > { %1145 = vmatpush1.bf16.msra.mxu0 %v1739_v7  ;;  %1186 = vmatpush1.bf16.msra.mxu1 %v1742_v8 }
  0x84   : > { %1163 = vmatmul.mubr.bf16.vlgmr.msra.gmra.mxu0 %v932_v10  ;;  %1204 = vmatmul.mubr.bf16.vlgmr.msra.gmra.mxu1 %v932_v10 }
  0xe4   : > { %v252_v16 = vpop.f32.mrf.mxu0  ;;  %v293_v17 = vpop.f32.mrf.mxu1 }
  0xe6   : > { %v254_v19 = vpop.f32.mrf.mxu0  ;;  %v295_v20 = vpop.f32.mrf.mxu1 }
  0xe7   : > { %v304_v21 = vcombine.low %v252_v16, %v254_v19  ;;  %v305_v22 = vcombine.low %v293_v17, %v295_v20 }
  0xe8   : > { %v256_v23 = vpop.f32.mrf.mxu0  ;;  %v297_v24 = vpop.f32.mrf.mxu1 }
  0xe9   : > { %v312_v25 = vrot.slane %v304_v21, %v2178_v18  ;;  %v319_v26 = vrot.slane %v305_v22, %v2178_v18  ;;  %v969_v23 = vld [vmem:[%s968_s8] sm:$0xff] }
  0xea   : > { %v257_v27 = vpop.f32.mrf.mxu0  ;;  %v298_v28 = vpop.f32.mrf.mxu1 }
  0xeb   : > { %v320_v29 = vcombine.low %v312_v25, %v319_v26 }
  0xed   : > { %v322_v33 = vadd.f32 %v320_v29, %v57_v30 }
  0xef   : > { %v1236_v40 = vcombine.high %v322_v33, %v322_v33  ;;  %v1243_v49 = vrot.slane %v322_v33, %v2178_v18 }
  0xf1   : > { %v1250_v47 = vrot.slane %v1236_v40, %v2178_v18  ;;  %v1251_v55 = vcombine.high %v1243_v49, %v1243_v49 }
  0xf3   : > { %v1252_v52 = vcombine.high %v1250_v47, %v1250_v47 }
 0x104   : > { %v556_v31 = vpop.f32.mrf.mxu0  ;;  %v597_v32 = vpop.f32.mrf.mxu1 }
 0x106   : > { %v558_v34 = vpop.f32.mrf.mxu0  ;;  %v599_v35 = vpop.f32.mrf.mxu1 }
 0x107   : > { %v608_v36 = vcombine.low %v556_v31, %v558_v34  ;;  %v609_v37 = vcombine.low %v597_v32, %v599_v35 }
 0x108   : > { %v560_v38 = vpop.f32.mrf.mxu0  ;;  %v601_v39 = vpop.f32.mrf.mxu1 }
 0x109   : > { %v616_v41 = vrot.slane %v608_v36, %v2178_v18  ;;  %v623_v42 = vrot.slane %v609_v37, %v2178_v18 }
 0x10a   : > { %v561_v44 = vpop.f32.mrf.mxu0  ;;  %v602_v45 = vpop.f32.mrf.mxu1 }
 0x10b   : > { %v624_v46 = vcombine.low %v616_v41, %v623_v42 }
 0x10d   : > { %v626_v48 = vadd.f32 %v624_v46, %v361_v43 }
 0x10f   : > { %v1258_v50 = vcombine.low %v626_v48, %v626_v48  ;;  %v1272_v51 = vrot.slane %v626_v48, %v2178_v18 }
 0x111   : > { %v1265_v53 = vrot.slane %v1258_v50, %v2178_v18  ;;  %v1274_v3 = vcombine.high %v1272_v51, %v1272_v51  ;;  %v1326_v54 = vsel %vm1323_vm0, %v1250_v47, %v1272_v51 }
 0x113   : > { %v1273_v56 = vcombine.high %v1265_v53, %v1265_v53  ;;  %v1324_v57 = vsel %vm1323_vm0, %v1243_v49, %v1265_v53  ;;  %v1327_v58 = vsel %vm1323_vm0, %v1252_v52, %v1274_v3  ;;  %v1351_v53 = vld [vmem:[#allocation3] sm:$0xff] }
 0x115   : > { %v1325_v59 = vsel %vm1323_vm0, %v1251_v55, %v1273_v56 }
 0x124   : > { %v860_v60 = vpop.f32.mrf.mxu0  ;;  %v901_v61 = vpop.f32.mrf.mxu1 }
 0x126   : > { %v862_v62 = vpop.f32.mrf.mxu0  ;;  %v903_v63 = vpop.f32.mrf.mxu1 }
 0x127   : > { %v912_v5 = vcombine.low %v860_v60, %v862_v62  ;;  %v913_v6 = vcombine.low %v901_v61, %v903_v63 }
 0x128   : > { %v864_v0 = vpop.f32.mrf.mxu0  ;;  %v905_v1 = vpop.f32.mrf.mxu1 }
 0x129   : > { %v920_v7 = vrot.slane %v912_v5, %v2178_v18  ;;  %v927_v8 = vrot.slane %v913_v6, %v2178_v18 }
 0x12a   : > { %v865_v2 = vpop.f32.mrf.mxu0  ;;  %v906_v4 = vpop.f32.mrf.mxu1 }
 0x12b   : > { %v928_v9 = vcombine.low %v920_v7, %v927_v8 }
 0x12d   : > { %v930_v17 = vadd.f32 %v1467_v12, %v928_v9 }
 0x12f   : > { %v1280_v27 = vcombine.high %v930_v17, %v930_v17  ;;  %v1287_v28 = vrot.slane %v930_v17, %v2178_v18 }
 0x131   : > { %v1294_v31 = vrot.slane %v1280_v27, %v2178_v18  ;;  %v1295_v32 = vcombine.low %v1287_v28, %v1287_v28  ;;  %v1330_v35 = vsel %vm1328_vm1, %v1325_v59, %v1287_v28 }
 0x133   : > { %v1296_v38 = vcombine.low %v1294_v31, %v1294_v31  ;;  %v1329_v39 = vsel %vm1328_vm1, %v1324_v57, %v1295_v32 }
 0x135   : > { %v1331_v44 = vsel %vm1328_vm1, %v1326_v54, %v1296_v38 }
 0x144   : > { %v1164_v10 = vpop.f32.mrf.mxu0  ;;  %v1205_v11 = vpop.f32.mrf.mxu1 }
 0x146   : > { %v1166_v13 = vpop.f32.mrf.mxu0  ;;  %v1207_v14 = vpop.f32.mrf.mxu1 }
 0x147   : > { %v1216_v15 = vcombine.low %v1164_v10, %v1166_v13  ;;  %v1217_v16 = vcombine.low %v1205_v11, %v1207_v14 }
 0x148   : > { %v1168_v19 = vpop.f32.mrf.mxu0  ;;  %v1209_v20 = vpop.f32.mrf.mxu1 }
 0x149   : > { %v1224_v21 = vrot.slane %v1216_v15, %v2178_v18  ;;  %v1231_v22 = vrot.slane %v1217_v16, %v2178_v18 }
 0x14a   : > { %v1169_v24 = vpop.f32.mrf.mxu0  ;;  %v1210_v25 = vpop.f32.mrf.mxu1 }
 0x14b   : > { %v1232_v26 = vcombine.low %v1224_v21, %v1231_v22 }
 0x14d   : > { %v1234_v29 = vadd.f32 %v1232_v26, %v969_v23 }
 0x14f   : > { %v1302_v30 = vcombine.low %v1234_v29, %v1234_v29  ;;  %v1316_v34 = vrot.slane %v1234_v29, %v2178_v18 }
 0x151   : > { %v1309_v33 = vrot.slane %v1302_v30, %v2178_v18  ;;  %v1318_v41 = vcombine.low %v1316_v34, %v1316_v34  ;;  %v1332_v18 = vsel %vm1328_vm1, %v1327_v58, %v1294_v31 }
 0x152   : > { %v1337_v46 = vsel %vm1333_vm2, %v1332_v18, %v1316_v34 }
 0x153   : > { %v1317_v36 = vcombine.low %v1309_v33, %v1309_v33  ;;  %v1335_v37 = vsel %vm1333_vm2, %v1330_v35, %v1309_v33  ;;  %v1336_v45 = vsel %vm1333_vm2, %v1331_v44, %v1318_v41  ;;  %v1347_v47 = vmul.f32 0.5, %v1337_v46 }
 0x154   : > { %v1342_v40 = vmul.f32 0.5, %v1335_v37 }
 0x155   : > { %v1334_v42 = vsel %vm1333_vm2, %v1329_v39, %v1317_v36 }
 0x156   : > { %v1338_v43 = vmul.f32 0.5, %v1334_v42  ;;  %1745 = vtanh.f32 %v1342_v40 }
 0x158   : > { %1747 = vtanh.f32 %v1338_v43 }
 0x159   : > { %1749 = vtanh.f32 %v1336_v45 }
 0x15a   : > { %1751 = vtanh.f32 %v1347_v47 }
 0x163   : > { %v1746_v48 = vpop.eup %1745 }
 0x164   : > { %v1344_v49 = vadd.f32 1.0, %v1746_v48 }
 0x165   : > { %v1748_v50 = vpop.eup %1747 }
 0x166   : > { %v1340_v51 = vadd.f32 1.0, %v1748_v50  ;;  %v1345_v52 = vmul.f32 0.5, %v1344_v49  ;;  %v1750_v55 = vpop.eup %1749 }
 0x167   : > { %v1752_v58 = vpop.eup %1751 }
 0x168   : > { %v1341_v3 = vmul.f32 0.5, %v1340_v51  ;;  %v1352_v54 = vmul.f32 %v1351_v53, %v1345_v52  ;;  %v1349_v59 = vadd.f32 1.0, %v1752_v58 }
 0x16a   : > { %v1353_v56 = vmul.f32 %v1750_v55, %v1341_v3  ;;  %v1350_v60 = vmul.f32 0.5, %v1349_v59 }
 0x16c   : > { %v1354_v57 = vadd.f32 %v1353_v56, %v1352_v54 }
 0x16e   : > { %1753 = vtanh.f32 %v1354_v57  ;;  %1357 = vst [vmem:[#allocation3] sm:$0xff] %v1354_v57 }
 0x17b   : > { %v1754_v61 = vpop.eup %1753 }
 0x17c   : > { %v1356_v62 = vmul.f32 %v1754_v61, %v1350_v60 }
 0x17d   :  { %18 = sbr.rel (!%p16_p0) target bundleno = 2 (0x2), region = 43 }
 0x17e   : > { %1358 = vst [vmem:[#allocation2] sm:$0xff] %v1356_v62  ;;  %1361 = vst [vmem:[%s1360_s14] sm:$0x3] %v1356_v62 }
 0x17f   : > { %1364 = vst [vmem:[%s1363_s18 - $0x2] sm:$0xc] %v1356_v62 }
 0x180   : > { %1537 = vst [vmem:[%s1360_s14 + $0x1c] sm:$0x30] %v1356_v62 }
 0x181   : > { %1370 = vst [vmem:[%s1369_s21 - $0x6] sm:$0xc0] %v1356_v62 }

// kernel: transcriber_crnn_forward.19
= control target key start
LH: loop header
LB: loop body
LE: loop exit
PB: predicated region body
PF: predicated region fallthrough
CT: control target
= control target key end

     0   :  { %s968_s1 = inlined_call_operand.vmem [shape: bf16[512,256], index: 1, kind: input, shape index: {}]   ;;  %s969_s0 = inlined_call_operand.vmem [shape: bf16[16,512], index: 0, kind: input, shape index: {}]   ;;  %s970_s2 = inlined_call_operand.vmem [shape: f32[1,256], index: 2, kind: input, shape index: {}]   ;;  %s971_s3 = inlined_call_operand.vmem [shape: f32[1,256], index: 3, kind: input, shape index: {}]   ;;  %s972_s4 = inlined_call_operand.vmem [shape: f32[16,256], index: 4, kind: output, shape index: {}]  }
   0x1   :  { %v619_v0 = vld [vmem:[%s968_s1 + $0x74] ss:$8 sps:$4 sm:$0xff]   ;;  %v623_v2 = vld [vmem:[%s968_s1 + $0x70] ss:$8 sps:$4 sm:$0xff]   ;;  %v625_v4 = vld [vmem:[%s968_s1 + $0x64] ss:$8 sps:$4 sm:$0xff]  }
   0x2   :  { %v621_v1 = vld [vmem:[%s968_s1 + $0x174] ss:$8 sps:$4 sm:$0xff]   ;;  %425 = vmatprep.subr.bf16.mxu0 %v619_v0  ;;  %v624_v3 = vld [vmem:[%s968_s1 + $0x170] ss:$8 sps:$4 sm:$0xff]   ;;  %v627_v5 = vld [vmem:[%s968_s1 + $0x164] ss:$8 sps:$4 sm:$0xff]  }
   0x3   :  { %468 = vmatprep.subr.bf16.mxu1 %v621_v1  ;;  %426 = vmatpush1.bf16.msra.mxu0 %v623_v2  ;;  %v629_v6 = vld [vmem:[%s968_s1 + $0x60] ss:$8 sps:$4 sm:$0xff]   ;;  %v631_v8 = vld [vmem:[%s968_s1 + $0x54] ss:$8 sps:$4 sm:$0xff]   ;;  %v635_v10 = vld [vmem:[%s968_s1 + $0x50] ss:$8 sps:$4 sm:$0xff]  }
   0x4   :  { %469 = vmatpush1.bf16.msra.mxu1 %v624_v3  ;;  %427 = vmatprep.subr.bf16.mxu0 %v625_v4  ;;  %v630_v7 = vld [vmem:[%s968_s1 + $0x160] ss:$8 sps:$4 sm:$0xff]   ;;  %v633_v9 = vld [vmem:[%s968_s1 + $0x154] ss:$8 sps:$4 sm:$0xff]   ;;  %v636_v11 = vld [vmem:[%s968_s1 + $0x150] ss:$8 sps:$4 sm:$0xff]   ;;  %v513_v4 = vlaneseq }
   0x5   :  { %470 = vmatprep.subr.bf16.mxu1 %v627_v5  ;;  %v637_v12 = vld [vmem:[%s968_s1 + $0x44] ss:$8 sps:$4 sm:$0xff]   ;;  %v641_v14 = vld [vmem:[%s968_s1 + $0x40] ss:$8 sps:$4 sm:$0xff]   ;;  %v643_v16 = vld [vmem:[%s968_s1 + $0x34] ss:$8 sps:$4 sm:$0xff]  }
   0x6   :  { %v639_v13 = vld [vmem:[%s968_s1 + $0x144] ss:$8 sps:$4 sm:$0xff]   ;;  %v642_v15 = vld [vmem:[%s968_s1 + $0x140] ss:$8 sps:$4 sm:$0xff]   ;;  %v645_v17 = vld [vmem:[%s968_s1 + $0x134] ss:$8 sps:$4 sm:$0xff]  }
   0x7   :  { %428 = vmatpush1.bf16.msra.mxu0 %v629_v6  ;;  %v647_v18 = vld [vmem:[%s968_s1 + $0x30] ss:$8 sps:$4 sm:$0xff]   ;;  %v649_v20 = vld [vmem:[%s968_s1 + $0x24] ss:$8 sps:$4 sm:$0xff]   ;;  %v653_v22 = vld [vmem:[%s968_s1 + $0x20] ss:$8 sps:$4 sm:$0xff]  }
   0x8   :  { %471 = vmatpush1.bf16.msra.mxu1 %v630_v7  ;;  %429 = vmatprep.subr.bf16.mxu0 %v631_v8  ;;  %v648_v19 = vld [vmem:[%s968_s1 + $0x130] ss:$8 sps:$4 sm:$0xff]   ;;  %v651_v21 = vld [vmem:[%s968_s1 + $0x124] ss:$8 sps:$4 sm:$0xff]   ;;  %v654_v23 = vld [vmem:[%s968_s1 + $0x120] ss:$8 sps:$4 sm:$0xff]  }
   0x9   :  { %472 = vmatprep.subr.bf16.mxu1 %v633_v9  ;;  %v655_v24 = vld [vmem:[%s968_s1 + $0x14] ss:$8 sps:$4 sm:$0xff]   ;;  %v659_v26 = vld [vmem:[%s968_s1 + $0x10] ss:$8 sps:$4 sm:$0xff]   ;;  %v661_v28 = vld [vmem:[%s968_s1 + $0x4] ss:$8 sps:$4 sm:$0xff]  }
   0xa   :  { %v657_v25 = vld [vmem:[%s968_s1 + $0x114] ss:$8 sps:$4 sm:$0xff]   ;;  %v660_v27 = vld [vmem:[%s968_s1 + $0x110] ss:$8 sps:$4 sm:$0xff]   ;;  %v663_v29 = vld [vmem:[%s968_s1 + $0x104] ss:$8 sps:$4 sm:$0xff]  }
   0xb   :  { %430 = vmatpush1.bf16.msra.mxu0 %v635_v10  ;;  %v665_v30 = vld [vmem:[%s968_s1] ss:$8 sps:$4 sm:$0xff]   ;;  %v667_v32 = vld [vmem:[%s968_s1 + $0xf4] ss:$8 sps:$4 sm:$0xff]   ;;  %v671_v34 = vld [vmem:[%s968_s1 + $0xf0] ss:$8 sps:$4 sm:$0xff]  }
   0xc   :  { %473 = vmatpush1.bf16.msra.mxu1 %v636_v11  ;;  %431 = vmatprep.subr.bf16.mxu0 %v637_v12  ;;  %v666_v31 = vld [vmem:[%s968_s1 + $0x100] ss:$8 sps:$4 sm:$0xff]   ;;  %v669_v33 = vld [vmem:[%s968_s1 + $0x1f4] ss:$8 sps:$4 sm:$0xff]   ;;  %v672_v35 = vld [vmem:[%s968_s1 + $0x1f0] ss:$8 sps:$4 sm:$0xff]  }
   0xd   :  { %474 = vmatprep.subr.bf16.mxu1 %v639_v13  ;;  %v673_v36 = vld [vmem:[%s968_s1 + $0xe4] ss:$8 sps:$4 sm:$0xff]   ;;  %v677_v38 = vld [vmem:[%s968_s1 + $0xe0] ss:$8 sps:$4 sm:$0xff]   ;;  %v679_v40 = vld [vmem:[%s968_s1 + $0xd4] ss:$8 sps:$4 sm:$0xff]  }
   0xe   :  { %v675_v37 = vld [vmem:[%s968_s1 + $0x1e4] ss:$8 sps:$4 sm:$0xff]   ;;  %v678_v39 = vld [vmem:[%s968_s1 + $0x1e0] ss:$8 sps:$4 sm:$0xff]   ;;  %v681_v41 = vld [vmem:[%s968_s1 + $0x1d4] ss:$8 sps:$4 sm:$0xff]  }
   0xf   :  { %432 = vmatpush1.bf16.msra.mxu0 %v641_v14  ;;  %v683_v42 = vld [vmem:[%s968_s1 + $0xd0] ss:$8 sps:$4 sm:$0xff]   ;;  %v685_v44 = vld [vmem:[%s968_s1 + $0xc4] ss:$8 sps:$4 sm:$0xff]   ;;  %v689_v46 = vld [vmem:[%s968_s1 + $0xc0] ss:$8 sps:$4 sm:$0xff]  }
  0x10   :  { %475 = vmatpush1.bf16.msra.mxu1 %v642_v15  ;;  %433 = vmatprep.subr.bf16.mxu0 %v643_v16  ;;  %v684_v43 = vld [vmem:[%s968_s1 + $0x1d0] ss:$8 sps:$4 sm:$0xff]   ;;  %v687_v45 = vld [vmem:[%s968_s1 + $0x1c4] ss:$8 sps:$4 sm:$0xff]   ;;  %v690_v48 = vld [vmem:[%s968_s1 + $0x1c0] ss:$8 sps:$4 sm:$0xff]  }
  0x11   :  { %476 = vmatprep.subr.bf16.mxu1 %v645_v17  ;;  %v717_v47 = vld [vmem:[%s969_s0 + $0x4] ss:$16 sps:$4 sm:$0xff]   ;;  %v720_v51 = vld [vmem:[%s969_s0 + $0xc] ss:$16 sps:$4 sm:$0xff]   ;;  %v695_v52 = vld [vmem:[%s968_s1 + $0xb0] ss:$8 sps:$4 sm:$0xff]  }
  0x12   :  { %v691_v49 = vld [vmem:[%s968_s1 + $0xb4] ss:$8 sps:$4 sm:$0xff]   ;;  %457 = vmatprep.mubr.bf16.mxu0 %v717_v47  ;;  %500 = vmatprep.mubr.bf16.mxu1 %v720_v51  ;;  %v696_v53 = vld [vmem:[%s968_s1 + $0x1b0] ss:$8 sps:$4 sm:$0xff]   ;;  %v697_v54 = vld [vmem:[%s968_s1 + $0xa4] ss:$8 sps:$4 sm:$0xff]  }
  0x13   :  { %434 = vmatpush1.bf16.msra.mxu0 %v647_v18  ;;  %v693_v50 = vld [vmem:[%s968_s1 + $0x1b4] ss:$8 sps:$4 sm:$0xff]   ;;  %v699_v55 = vld [vmem:[%s968_s1 + $0x1a4] ss:$8 sps:$4 sm:$0xff]   ;;  %v701_v56 = vld [vmem:[%s968_s1 + $0xa0] ss:$8 sps:$4 sm:$0xff]  }
  0x14   :  { %477 = vmatpush1.bf16.msra.mxu1 %v648_v19  ;;  %435 = vmatprep.subr.bf16.mxu0 %v649_v20  ;;  %v702_v57 = vld [vmem:[%s968_s1 + $0x1a0] ss:$8 sps:$4 sm:$0xff]   ;;  %v703_v58 = vld [vmem:[%s968_s1 + $0x94] ss:$8 sps:$4 sm:$0xff]   ;;  %v707_v60 = vld [vmem:[%s968_s1 + $0x90] ss:$8 sps:$4 sm:$0xff]  }
  0x15   :  { %478 = vmatprep.subr.bf16.mxu1 %v651_v21  ;;  %v705_v59 = vld [vmem:[%s968_s1 + $0x194] ss:$8 sps:$4 sm:$0xff]   ;;  %v708_v61 = vld [vmem:[%s968_s1 + $0x190] ss:$8 sps:$4 sm:$0xff]   ;;  %v709_v62 = vld [vmem:[%s968_s1 + $0x84] ss:$8 sps:$4 sm:$0xff]  }
  0x16   :  { %v711_v63 = vld [vmem:[%s968_s1 + $0x184] ss:$8 sps:$4 sm:$0xff]   ;;  %v713_v0 = vld [vmem:[%s968_s1 + $0x80] ss:$8 sps:$4 sm:$0xff]   ;;  %v514_v5 = vshrl.u32 %v513_v4, 7 }
  0x17   :  { %436 = vmatpush1.bf16.msra.mxu0 %v653_v22  ;;  %v714_v1 = vld [vmem:[%s968_s1 + $0x180] ss:$8 sps:$4 sm:$0xff]  }
  0x18   :  { %479 = vmatpush1.bf16.msra.mxu1 %v654_v23  ;;  %437 = vmatprep.subr.bf16.mxu0 %v655_v24  ;;  %v715_v2 = vld [vmem:[%s969_s0] ss:$16 sps:$4 sm:$0xff]   ;;  %v718_v3 = vld [vmem:[%s969_s0 + $0x8] ss:$16 sps:$4 sm:$0xff]   ;;  %v515_v6 = vsub.s32 0, %v514_v5  ;;  %v519_v8 = vsub.s32 1, %v514_v5 }
  0x19   :  { %480 = vmatprep.subr.bf16.mxu1 %v657_v25  ;;  %v511_v7 = vld [vmem:[%s970_s2] sm:$0x3] }
  0x1a   :  { %v527_v9 = vld [vmem:[%s971_s3] sm:$0x3]  ;;  %v516_v10 = vrot.slane %v511_v7, %v515_v6  ;;  %v520_v15 = vrot.slane %v511_v7, %v519_v8 }
  0x1b   :  { %438 = vmatpush1.bf16.msra.mxu0 %v659_v26  ;;  %v532_v14 = vrot.slane %v527_v9, %v515_v6  ;;  %v536_v20 = vrot.slane %v527_v9, %v519_v8 }
  0x1c   :  { %481 = vmatpush1.bf16.msra.mxu1 %v660_v27  ;;  %439 = vmatprep.subr.bf16.mxu0 %v661_v28 }
  0x1d   :  { %482 = vmatprep.subr.bf16.mxu1 %v663_v29 }
  0x1f   :  { %440 = vmatpush1.bf16.msra.mxu0 %v665_v30 }
  0x20   :  { %483 = vmatpush1.bf16.msra.mxu1 %v666_v31  ;;  %441 = vmatprep.subr.bf16.mxu0 %v667_v32 }
  0x21   :  { %484 = vmatprep.subr.bf16.mxu1 %v669_v33 }
  0x23   :  { %442 = vmatpush2.bf16.msra.mxu0 %v671_v34 }
  0x24   :  { %485 = vmatpush2.bf16.msra.mxu1 %v672_v35  ;;  %443 = vmatprep.subr.bf16.mxu0 %v673_v36 }
  0x25   :  { %486 = vmatprep.subr.bf16.mxu1 %v675_v37 }
  0x27   :  { %444 = vmatpush2.bf16.msra.mxu0 %v677_v38 }
  0x28   :  { %487 = vmatpush2.bf16.msra.mxu1 %v678_v39  ;;  %445 = vmatprep.subr.bf16.mxu0 %v679_v40 }
  0x29   :  { %488 = vmatprep.subr.bf16.mxu1 %v681_v41 }
  0x2b   :  { %446 = vmatpush2.bf16.msra.mxu0 %v683_v42 }
  0x2c   :  { %489 = vmatpush2.bf16.msra.mxu1 %v684_v43  ;;  %447 = vmatprep.subr.bf16.mxu0 %v685_v44 }
  0x2d   :  { %490 = vmatprep.subr.bf16.mxu1 %v687_v45 }
  0x2f   :  { %448 = vmatpush2.bf16.msra.mxu0 %v689_v46 }
  0x30   :  { %491 = vmatpush2.bf16.msra.mxu1 %v690_v48  ;;  %449 = vmatprep.subr.bf16.mxu0 %v691_v49 }
  0x31   :  { %492 = vmatprep.subr.bf16.mxu1 %v693_v50 }
  0x33   :  { %450 = vmatpush2.bf16.msra.mxu0 %v695_v52 }
  0x34   :  { %493 = vmatpush2.bf16.msra.mxu1 %v696_v53  ;;  %451 = vmatprep.subr.bf16.mxu0 %v697_v54 }
  0x35   :  { %494 = vmatprep.subr.bf16.mxu1 %v699_v55 }
  0x37   :  { %452 = vmatpush2.bf16.msra.mxu0 %v701_v56 }
  0x38   :  { %495 = vmatpush2.bf16.msra.mxu1 %v702_v57  ;;  %453 = vmatprep.subr.bf16.mxu0 %v703_v58 }
  0x39   :  { %496 = vmatprep.subr.bf16.mxu1 %v705_v59 }
  0x3b   :  { %454 = vmatpush2.bf16.msra.mxu0 %v707_v60 }
  0x3c   :  { %497 = vmatpush2.bf16.msra.mxu1 %v708_v61  ;;  %455 = vmatprep.subr.bf16.mxu0 %v709_v62 }
  0x3d   :  { %498 = vmatprep.subr.bf16.mxu1 %v711_v63 }
  0x3f   :  { %456 = vmatpush2.bf16.msra.mxu0 %v713_v0 }
  0x40   :  { %499 = vmatpush2.bf16.msra.mxu1 %v714_v1 }
  0x42   :  { %458 = vmatmul.mubr.bf16.vlgmr.msra.gmra.mxu0 %v715_v2 }
  0x43   :  { %501 = vmatmul.mubr.bf16.vlgmr.msra.gmra.mxu1 %v718_v3 }
 0x102   :  { %v459_v11 = vpop.f32.mrf.mxu0 }
 0x103   :  { %v502_v12 = vpop.f32.mrf.mxu1 }
 0x104   :  { %v503_v13 = vadd.f32 %v502_v12, %v459_v11  ;;  %v461_v16 = vpop.f32.mrf.mxu0 }
 0x105   :  { %v504_v17 = vpop.f32.mrf.mxu1 }
 0x106   :  { %v523_v18 = vmul.f32 %v516_v10, %v503_v13  ;;  %v505_v19 = vadd.f32 %v504_v17, %v461_v16  ;;  %v463_v21 = vpop.f32.mrf.mxu0 }
 0x107   :  { %v506_v22 = vpop.f32.mrf.mxu1 }
 0x108   :  { %v539_v23 = vadd.f32 %v532_v14, %v523_v18  ;;  %v524_v24 = vmul.f32 %v520_v15, %v505_v19  ;;  %v507_v25 = vadd.f32 %v506_v22, %v463_v21  ;;  %v465_v26 = vpop.f32.mrf.mxu0 }
 0x109   :  { %v508_v27 = vpop.f32.mrf.mxu1 }
 0x10a   :  { %543 = vst [vmem:[%s972_s4] sm:$0xff] %v539_v23  ;;  %v540_v28 = vadd.f32 %v536_v20, %v524_v24  ;;  %v525_v29 = vmul.f32 %v516_v10, %v507_v25  ;;  %v509_v30 = vadd.f32 %v508_v27, %v465_v26 }
 0x10c   :  { %544 = vst [vmem:[%s972_s4 + $0x8] sm:$0xff] %v540_v28  ;;  %v541_v31 = vadd.f32 %v532_v14, %v525_v29  ;;  %v526_v32 = vmul.f32 %v520_v15, %v509_v30 }
 0x10e   :  { %545 = vst [vmem:[%s972_s4 + $0x10] sm:$0xff] %v541_v31  ;;  %v542_v33 = vadd.f32 %v536_v20, %v526_v32 }
 0x110   :  { %546 = vst [vmem:[%s972_s4 + $0x18] sm:$0xff] %v542_v33 }

// kernel: transcriber_crnn_forward.17
= control target key start
LH: loop header
LB: loop body
LE: loop exit
PB: predicated region body
PF: predicated region fallthrough
CT: control target
= control target key end

     0   :  { %s6462_s1 = inlined_call_operand.vmem [shape: bf16[512,2048], index: 1, kind: input, shape index: {}]   ;;  %s6463_s0 = inlined_call_operand.vmem [shape: bf16[16,512], index: 0, kind: input, shape index: {}]   ;;  %s6464_s2 = inlined_call_operand.vmem [shape: f32[1,2048], index: 2, kind: input, shape index: {}]   ;;  %s6465_s3 = inlined_call_operand.vmem [shape: f32[1,2048], index: 3, kind: input, shape index: {}]   ;;  %s6466_s4 = inlined_call_operand.vmem [shape: f32[16,2048], index: 4, kind: output, shape index: {}]  }
   0x1   :  { %v133_v0 = vld [vmem:[%s6462_s1 + $0x380] sm:$0xff]  ;;  %v4730_v59 = vld [vmem:[%s6463_s0 + $0xc] ss:$16 sps:$4 sm:$0xff]  }
   0x2   :  { %v141_v1 = vld [vmem:[%s6462_s1 + $0x3c0] sm:$0xff]  ;;  %3188 = vmatprep.mubr.bf16.mxu1 %v4730_v59 }
   0x3   :  { %v389_v2 = vld [vmem:[%s6462_s1 + $0xb80] sm:$0xff]  ;;  %v4186_v3 = vcombine.high %v133_v0, %v141_v1  ;;  %v4185_v5 = vcombine.low %v133_v0, %v141_v1 }
   0x4   :  { %v397_v4 = vld [vmem:[%s6462_s1 + $0xbc0] sm:$0xff] }
   0x5   :  { %v117_v6 = vld [vmem:[%s6462_s1 + $0x300] sm:$0xff]  ;;  %v4442_v8 = vcombine.high %v389_v2, %v397_v4  ;;  %v4441_v9 = vcombine.low %v389_v2, %v397_v4  ;;  %3113 = vmatprep.subr.bf16.mxu0 %v4186_v3 }
   0x6   :  { %v125_v7 = vld [vmem:[%s6462_s1 + $0x340] sm:$0xff]  ;;  %3114 = vmatpush1.bf16.msra.mxu0 %v4185_v5 }
   0x7   :  { %v4170_v10 = vcombine.high %v117_v6, %v125_v7  ;;  %v373_v11 = vld [vmem:[%s6462_s1 + $0xb00] sm:$0xff]  ;;  %3156 = vmatprep.subr.bf16.mxu1 %v4442_v8  ;;  %v4169_v18 = vcombine.low %v117_v6, %v125_v7 }
   0x8   :  { %v381_v12 = vld [vmem:[%s6462_s1 + $0xb40] sm:$0xff]  ;;  %3157 = vmatpush1.bf16.msra.mxu1 %v4441_v9 }
   0x9   :  { %v101_v13 = vld [vmem:[%s6462_s1 + $0x280] sm:$0xff]  ;;  %v4426_v14 = vcombine.high %v373_v11, %v381_v12  ;;  %3115 = vmatprep.subr.bf16.mxu0 %v4170_v10  ;;  %v4425_v19 = vcombine.low %v373_v11, %v381_v12 }
   0xa   :  { %v109_v15 = vld [vmem:[%s6462_s1 + $0x2c0] sm:$0xff]  ;;  %3116 = vmatpush1.bf16.msra.mxu0 %v4169_v18 }
   0xb   :  { %v357_v16 = vld [vmem:[%s6462_s1 + $0xa80] sm:$0xff]  ;;  %v4154_v20 = vcombine.high %v101_v13, %v109_v15  ;;  %3158 = vmatprep.subr.bf16.mxu1 %v4426_v14  ;;  %v4153_v26 = vcombine.low %v101_v13, %v109_v15 }
   0xc   :  { %v365_v17 = vld [vmem:[%s6462_s1 + $0xac0] sm:$0xff]  ;;  %3159 = vmatpush1.bf16.msra.mxu1 %v4425_v19 }
   0xd   :  { %v4410_v21 = vcombine.high %v357_v16, %v365_v17  ;;  %v85_v22 = vld [vmem:[%s6462_s1 + $0x200] sm:$0xff]  ;;  %3117 = vmatprep.subr.bf16.mxu0 %v4154_v20  ;;  %v4409_v27 = vcombine.low %v357_v16, %v365_v17 }
   0xe   :  { %v93_v23 = vld [vmem:[%s6462_s1 + $0x240] sm:$0xff]  ;;  %3118 = vmatpush1.bf16.msra.mxu0 %v4153_v26 }
   0xf   :  { %v341_v24 = vld [vmem:[%s6462_s1 + $0xa00] sm:$0xff]  ;;  %v4138_v28 = vcombine.high %v85_v22, %v93_v23  ;;  %3160 = vmatprep.subr.bf16.mxu1 %v4410_v21  ;;  %v4137_v34 = vcombine.low %v85_v22, %v93_v23 }
  0x10   :  { %v349_v25 = vld [vmem:[%s6462_s1 + $0xa40] sm:$0xff]  ;;  %3161 = vmatpush1.bf16.msra.mxu1 %v4409_v27 }
  0x11   :  { %v4394_v29 = vcombine.high %v341_v24, %v349_v25  ;;  %v69_v30 = vld [vmem:[%s6462_s1 + $0x180] sm:$0xff]  ;;  %3119 = vmatprep.subr.bf16.mxu0 %v4138_v28  ;;  %v4393_v35 = vcombine.low %v341_v24, %v349_v25 }
  0x12   :  { %v77_v31 = vld [vmem:[%s6462_s1 + $0x1c0] sm:$0xff]  ;;  %3120 = vmatpush1.bf16.msra.mxu0 %v4137_v34 }
  0x13   :  { %v325_v32 = vld [vmem:[%s6462_s1 + $0x980] sm:$0xff]  ;;  %v4122_v36 = vcombine.high %v69_v30, %v77_v31  ;;  %3162 = vmatprep.subr.bf16.mxu1 %v4394_v29  ;;  %v4121_v42 = vcombine.low %v69_v30, %v77_v31 }
  0x14   :  { %v333_v33 = vld [vmem:[%s6462_s1 + $0x9c0] sm:$0xff]  ;;  %3163 = vmatpush1.bf16.msra.mxu1 %v4393_v35 }
  0x15   :  { %v4378_v37 = vcombine.high %v325_v32, %v333_v33  ;;  %v53_v38 = vld [vmem:[%s6462_s1 + $0x100] sm:$0xff]  ;;  %3121 = vmatprep.subr.bf16.mxu0 %v4122_v36  ;;  %v4377_v43 = vcombine.low %v325_v32, %v333_v33 }
  0x16   :  { %v61_v39 = vld [vmem:[%s6462_s1 + $0x140] sm:$0xff]  ;;  %3122 = vmatpush1.bf16.msra.mxu0 %v4121_v42 }
  0x17   :  { %v309_v40 = vld [vmem:[%s6462_s1 + $0x900] sm:$0xff]  ;;  %v4106_v44 = vcombine.high %v53_v38, %v61_v39  ;;  %3164 = vmatprep.subr.bf16.mxu1 %v4378_v37  ;;  %v4105_v50 = vcombine.low %v53_v38, %v61_v39 }
  0x18   :  { %v317_v41 = vld [vmem:[%s6462_s1 + $0x940] sm:$0xff]  ;;  %3165 = vmatpush1.bf16.msra.mxu1 %v4377_v43 }
  0x19   :  { %v4362_v45 = vcombine.high %v309_v40, %v317_v41  ;;  %v37_v46 = vld [vmem:[%s6462_s1 + $0x80] sm:$0xff]  ;;  %3123 = vmatprep.subr.bf16.mxu0 %v4106_v44  ;;  %v4361_v52 = vcombine.low %v309_v40, %v317_v41 }
  0x1a   :  { %v45_v47 = vld [vmem:[%s6462_s1 + $0xc0] sm:$0xff]  ;;  %3124 = vmatpush1.bf16.msra.mxu0 %v4105_v50 }
  0x1b   :  { %v293_v48 = vld [vmem:[%s6462_s1 + $0x880] sm:$0xff]  ;;  %v4090_v53 = vcombine.high %v37_v46, %v45_v47  ;;  %3166 = vmatprep.subr.bf16.mxu1 %v4362_v45  ;;  %v4089_v60 = vcombine.low %v37_v46, %v45_v47 }
  0x1c   :  { %v301_v49 = vld [vmem:[%s6462_s1 + $0x8c0] sm:$0xff]  ;;  %3167 = vmatpush1.bf16.msra.mxu1 %v4361_v52 }
  0x1d   :  { %v21_v51 = vld [vmem:[%s6462_s1] sm:$0xff]  ;;  %v4346_v55 = vcombine.high %v293_v48, %v301_v49  ;;  %3125 = vmatprep.subr.bf16.mxu0 %v4090_v53  ;;  %v4345_v61 = vcombine.low %v293_v48, %v301_v49 }
  0x1e   :  { %v29_v54 = vld [vmem:[%s6462_s1 + $0x40] sm:$0xff]  ;;  %3126 = vmatpush1.bf16.msra.mxu0 %v4089_v60 }
  0x1f   :  { %v4719_v56 = vld [vmem:[%s6463_s0 + $0x4] ss:$16 sps:$4 sm:$0xff]   ;;  %v4074_v62 = vcombine.high %v21_v51, %v29_v54  ;;  %3168 = vmatprep.subr.bf16.mxu1 %v4346_v55  ;;  %v4073_v4 = vcombine.low %v21_v51, %v29_v54 }
  0x20   :  { %v277_v57 = vld [vmem:[%s6462_s1 + $0x800] sm:$0xff]  ;;  %3145 = vmatprep.mubr.bf16.mxu0 %v4719_v56  ;;  %3169 = vmatpush1.bf16.msra.mxu1 %v4345_v61 }
  0x21   :  { %v285_v58 = vld [vmem:[%s6462_s1 + $0x840] sm:$0xff]  ;;  %3127 = vmatprep.subr.bf16.mxu0 %v4074_v62 }
  0x22   :  { %v4330_v63 = vcombine.high %v277_v57, %v285_v58  ;;  %v261_v0 = vld [vmem:[%s6462_s1 + $0x780] sm:$0xff]  ;;  %v4329_v5 = vcombine.low %v277_v57, %v285_v58  ;;  %3128 = vmatpush1.bf16.msra.mxu0 %v4073_v4  ;;  %v390_v4 = vld [vmem:[%s6462_s1 + $0xb88] sm:$0xff] }
  0x23   :  { %v269_v1 = vld [vmem:[%s6462_s1 + $0x7c0] sm:$0xff] }
  0x24   :  { %v517_v2 = vld [vmem:[%s6462_s1 + $0xf80] sm:$0xff]  ;;  %v4314_v6 = vcombine.high %v261_v0, %v269_v1  ;;  %3170 = vmatprep.subr.bf16.mxu1 %v4330_v63  ;;  %v4313_v12 = vcombine.low %v261_v0, %v269_v1 }
  0x25   :  { %v525_v3 = vld [vmem:[%s6462_s1 + $0xfc0] sm:$0xff]  ;;  %3171 = vmatpush1.bf16.msra.mxu1 %v4329_v5  ;;  %v398_v5 = vld [vmem:[%s6462_s1 + $0xbc8] sm:$0xff] }
  0x26   :  { %v4570_v7 = vcombine.high %v517_v2, %v525_v3  ;;  %v245_v8 = vld [vmem:[%s6462_s1 + $0x700] sm:$0xff]  ;;  %3129 = vmatprep.subr.bf16.mxu0 %v4314_v6  ;;  %v4569_v13 = vcombine.low %v517_v2, %v525_v3  ;;  %v134_v2 = vld [vmem:[%s6462_s1 + $0x388] sm:$0xff] }
  0x27   :  { %v253_v9 = vld [vmem:[%s6462_s1 + $0x740] sm:$0xff]  ;;  %3130 = vmatpush2.bf16.msra.mxu0 %v4313_v12  ;;  %v142_v3 = vld [vmem:[%s6462_s1 + $0x3c8] sm:$0xff] }
  0x28   :  { %v501_v10 = vld [vmem:[%s6462_s1 + $0xf00] sm:$0xff]  ;;  %v4298_v14 = vcombine.high %v245_v8, %v253_v9  ;;  %3172 = vmatprep.subr.bf16.mxu1 %v4570_v7  ;;  %v4297_v20 = vcombine.low %v245_v8, %v253_v9  ;;  %v4188_v8 = vcombine.high %v134_v2, %v142_v3  ;;  %v4444_v9 = vcombine.high %v390_v4, %v398_v5 }
  0x29   :  { %v509_v11 = vld [vmem:[%s6462_s1 + $0xf40] sm:$0xff]  ;;  %3173 = vmatpush2.bf16.msra.mxu1 %v4569_v13  ;;  %v374_v13 = vld [vmem:[%s6462_s1 + $0xb08] sm:$0xff] }
  0x2a   :  { %v4554_v15 = vcombine.high %v501_v10, %v509_v11  ;;  %v229_v16 = vld [vmem:[%s6462_s1 + $0x680] sm:$0xff]  ;;  %3131 = vmatprep.subr.bf16.mxu0 %v4298_v14  ;;  %v4553_v21 = vcombine.low %v501_v10, %v509_v11  ;;  %v118_v10 = vld [vmem:[%s6462_s1 + $0x308] sm:$0xff] }
  0x2b   :  { %v237_v17 = vld [vmem:[%s6462_s1 + $0x6c0] sm:$0xff]  ;;  %3132 = vmatpush2.bf16.msra.mxu0 %v4297_v20  ;;  %v126_v11 = vld [vmem:[%s6462_s1 + $0x348] sm:$0xff] }
  0x2c   :  { %v485_v18 = vld [vmem:[%s6462_s1 + $0xe80] sm:$0xff]  ;;  %v4282_v22 = vcombine.high %v229_v16, %v237_v17  ;;  %3174 = vmatprep.subr.bf16.mxu1 %v4554_v15  ;;  %v4281_v28 = vcombine.low %v229_v16, %v237_v17  ;;  %v382_v14 = vld [vmem:[%s6462_s1 + $0xb48] sm:$0xff]  ;;  %v4187_v16 = vcombine.low %v134_v2, %v142_v3  ;;  %v4443_v17 = vcombine.low %v390_v4, %v398_v5 }
  0x2d   :  { %v493_v19 = vld [vmem:[%s6462_s1 + $0xec0] sm:$0xff]  ;;  %3175 = vmatpush2.bf16.msra.mxu1 %v4553_v21  ;;  %v4862_v15 = vld [vmem:[%s6463_s0 + $0x8] ss:$16 sps:$4 sm:$0xff]  }
  0x2e   :  { %v4538_v23 = vcombine.high %v485_v18, %v493_v19  ;;  %v213_v24 = vld [vmem:[%s6462_s1 + $0x600] sm:$0xff]  ;;  %3133 = vmatprep.subr.bf16.mxu0 %v4282_v22  ;;  %v4537_v29 = vcombine.low %v485_v18, %v493_v19  ;;  %v4172_v18 = vcombine.high %v118_v10, %v126_v11  ;;  %v4428_v19 = vcombine.high %v374_v13, %v382_v14  ;;  %v102_v20 = vld [vmem:[%s6462_s1 + $0x288] sm:$0xff] }
  0x2f   :  { %v221_v25 = vld [vmem:[%s6462_s1 + $0x640] sm:$0xff]  ;;  %3134 = vmatpush2.bf16.msra.mxu0 %v4281_v28  ;;  %v110_v21 = vld [vmem:[%s6462_s1 + $0x2c8] sm:$0xff] }
  0x30   :  { %v469_v26 = vld [vmem:[%s6462_s1 + $0xe00] sm:$0xff]  ;;  %v4266_v30 = vcombine.high %v213_v24, %v221_v25  ;;  %3176 = vmatprep.subr.bf16.mxu1 %v4538_v23  ;;  %v4265_v36 = vcombine.low %v213_v24, %v221_v25  ;;  %v358_v22 = vld [vmem:[%s6462_s1 + $0xa88] sm:$0xff]  ;;  %v4171_v24 = vcombine.low %v118_v10, %v126_v11  ;;  %v4427_v25 = vcombine.low %v374_v13, %v382_v14 }
  0x31   :  { %v477_v27 = vld [vmem:[%s6462_s1 + $0xe40] sm:$0xff]  ;;  %3177 = vmatpush2.bf16.msra.mxu1 %v4537_v29  ;;  %v366_v23 = vld [vmem:[%s6462_s1 + $0xac8] sm:$0xff] }
  0x32   :  { %v4522_v31 = vcombine.high %v469_v26, %v477_v27  ;;  %v197_v32 = vld [vmem:[%s6462_s1 + $0x580] sm:$0xff]  ;;  %3135 = vmatprep.subr.bf16.mxu0 %v4266_v30  ;;  %v4521_v37 = vcombine.low %v469_v26, %v477_v27  ;;  %v4156_v26 = vcombine.high %v102_v20, %v110_v21  ;;  %v4412_v27 = vcombine.high %v358_v22, %v366_v23  ;;  %v86_v28 = vld [vmem:[%s6462_s1 + $0x208] sm:$0xff] }
  0x33   :  { %v205_v33 = vld [vmem:[%s6462_s1 + $0x5c0] sm:$0xff]  ;;  %3136 = vmatpush2.bf16.msra.mxu0 %v4265_v36  ;;  %v94_v29 = vld [vmem:[%s6462_s1 + $0x248] sm:$0xff] }
  0x34   :  { %v453_v34 = vld [vmem:[%s6462_s1 + $0xd80] sm:$0xff]  ;;  %v4250_v38 = vcombine.high %v197_v32, %v205_v33  ;;  %3178 = vmatprep.subr.bf16.mxu1 %v4522_v31  ;;  %v4249_v44 = vcombine.low %v197_v32, %v205_v33  ;;  %v342_v30 = vld [vmem:[%s6462_s1 + $0xa08] sm:$0xff]  ;;  %v4155_v32 = vcombine.low %v102_v20, %v110_v21  ;;  %v4411_v33 = vcombine.low %v358_v22, %v366_v23 }
  0x35   :  { %v461_v35 = vld [vmem:[%s6462_s1 + $0xdc0] sm:$0xff]  ;;  %3179 = vmatpush2.bf16.msra.mxu1 %v4521_v37  ;;  %v350_v31 = vld [vmem:[%s6462_s1 + $0xa48] sm:$0xff] }
  0x36   :  { %v4506_v39 = vcombine.high %v453_v34, %v461_v35  ;;  %v181_v40 = vld [vmem:[%s6462_s1 + $0x500] sm:$0xff]  ;;  %3137 = vmatprep.subr.bf16.mxu0 %v4250_v38  ;;  %v4505_v45 = vcombine.low %v453_v34, %v461_v35  ;;  %v4140_v34 = vcombine.high %v86_v28, %v94_v29  ;;  %v4396_v35 = vcombine.high %v342_v30, %v350_v31  ;;  %v70_v36 = vld [vmem:[%s6462_s1 + $0x188] sm:$0xff] }
  0x37   :  { %v189_v41 = vld [vmem:[%s6462_s1 + $0x540] sm:$0xff]  ;;  %3138 = vmatpush2.bf16.msra.mxu0 %v4249_v44  ;;  %v78_v37 = vld [vmem:[%s6462_s1 + $0x1c8] sm:$0xff] }
  0x38   :  { %v437_v42 = vld [vmem:[%s6462_s1 + $0xd00] sm:$0xff]  ;;  %v4234_v46 = vcombine.high %v181_v40, %v189_v41  ;;  %3180 = vmatprep.subr.bf16.mxu1 %v4506_v39  ;;  %v4233_v52 = vcombine.low %v181_v40, %v189_v41  ;;  %v326_v38 = vld [vmem:[%s6462_s1 + $0x988] sm:$0xff]  ;;  %v4139_v40 = vcombine.low %v86_v28, %v94_v29  ;;  %v4395_v41 = vcombine.low %v342_v30, %v350_v31 }
  0x39   :  { %v445_v43 = vld [vmem:[%s6462_s1 + $0xd40] sm:$0xff]  ;;  %3181 = vmatpush2.bf16.msra.mxu1 %v4505_v45  ;;  %v334_v39 = vld [vmem:[%s6462_s1 + $0x9c8] sm:$0xff] }
  0x3a   :  { %v4490_v47 = vcombine.high %v437_v42, %v445_v43  ;;  %v165_v48 = vld [vmem:[%s6462_s1 + $0x480] sm:$0xff]  ;;  %3139 = vmatprep.subr.bf16.mxu0 %v4234_v46  ;;  %v4489_v53 = vcombine.low %v437_v42, %v445_v43  ;;  %v4124_v42 = vcombine.high %v70_v36, %v78_v37  ;;  %v4380_v43 = vcombine.high %v326_v38, %v334_v39  ;;  %v54_v44 = vld [vmem:[%s6462_s1 + $0x108] sm:$0xff] }
  0x3b   :  { %v173_v49 = vld [vmem:[%s6462_s1 + $0x4c0] sm:$0xff]  ;;  %3140 = vmatpush2.bf16.msra.mxu0 %v4233_v52  ;;  %v62_v45 = vld [vmem:[%s6462_s1 + $0x148] sm:$0xff] }
  0x3c   :  { %v421_v50 = vld [vmem:[%s6462_s1 + $0xc80] sm:$0xff]  ;;  %v4218_v54 = vcombine.high %v165_v48, %v173_v49  ;;  %3182 = vmatprep.subr.bf16.mxu1 %v4490_v47  ;;  %v4217_v62 = vcombine.low %v165_v48, %v173_v49  ;;  %v310_v46 = vld [vmem:[%s6462_s1 + $0x908] sm:$0xff]  ;;  %v4123_v48 = vcombine.low %v70_v36, %v78_v37  ;;  %v4379_v49 = vcombine.low %v326_v38, %v334_v39 }
  0x3d   :  { %v429_v51 = vld [vmem:[%s6462_s1 + $0xcc0] sm:$0xff]  ;;  %3183 = vmatpush2.bf16.msra.mxu1 %v4489_v53  ;;  %v318_v47 = vld [vmem:[%s6462_s1 + $0x948] sm:$0xff] }
  0x3e   :  { %v4474_v55 = vcombine.high %v421_v50, %v429_v51  ;;  %v149_v57 = vld [vmem:[%s6462_s1 + $0x400] sm:$0xff]  ;;  %3141 = vmatprep.subr.bf16.mxu0 %v4218_v54  ;;  %v4473_v63 = vcombine.low %v421_v50, %v429_v51  ;;  %v4108_v50 = vcombine.high %v54_v44, %v62_v45  ;;  %v4364_v51 = vcombine.high %v310_v46, %v318_v47  ;;  %v38_v52 = vld [vmem:[%s6462_s1 + $0x88] sm:$0xff] }
  0x3f   :  { %v157_v58 = vld [vmem:[%s6462_s1 + $0x440] sm:$0xff]  ;;  %3142 = vmatpush2.bf16.msra.mxu0 %v4217_v62  ;;  %v46_v53 = vld [vmem:[%s6462_s1 + $0xc8] sm:$0xff] }
  0x40   :  { %v405_v60 = vld [vmem:[%s6462_s1 + $0xc00] sm:$0xff]  ;;  %v4202_v0 = vcombine.high %v149_v57, %v157_v58  ;;  %3184 = vmatprep.subr.bf16.mxu1 %v4474_v55  ;;  %v4201_v6 = vcombine.low %v149_v57, %v157_v58  ;;  %v294_v54 = vld [vmem:[%s6462_s1 + $0x888] sm:$0xff]  ;;  %v4107_v57 = vcombine.low %v54_v44, %v62_v45  ;;  %v4363_v58 = vcombine.low %v310_v46, %v318_v47 }
  0x41   :  { %v413_v61 = vld [vmem:[%s6462_s1 + $0xc40] sm:$0xff]  ;;  %3185 = vmatpush2.bf16.msra.mxu1 %v4473_v63  ;;  %v302_v55 = vld [vmem:[%s6462_s1 + $0x8c8] sm:$0xff]  ;;  %v4091_v2 = vcombine.low %v38_v52, %v46_v53 }
  0x42   :  { %v4458_v1 = vcombine.high %v405_v60, %v413_v61  ;;  %3143 = vmatprep.subr.bf16.mxu0 %v4202_v0  ;;  %v4457_v7 = vcombine.low %v405_v60, %v413_v61  ;;  %v4851_v12 = vld [vmem:[%s6463_s0] ss:$16 sps:$4 sm:$0xff]   ;;  %v4092_v60 = vcombine.high %v38_v52, %v46_v53  ;;  %v4348_v61 = vcombine.high %v294_v54, %v302_v55  ;;  %v22_v62 = vld [vmem:[%s6462_s1 + $0x8] sm:$0xff] }
  0x43   :  { %3144 = vmatpush2.bf16.msra.mxu0 %v4201_v6  ;;  %v30_v63 = vld [vmem:[%s6462_s1 + $0x48] sm:$0xff]  ;;  %v4347_v3 = vcombine.low %v294_v54, %v302_v55 }
  0x44   :  { %3186 = vmatprep.subr.bf16.mxu1 %v4458_v1  ;;  %3199 = vmatprep.subr.bf16.mxu0 %v4188_v8  ;;  %v278_v0 = vld [vmem:[%s6462_s1 + $0x808] sm:$0xff]  ;;  %v4076_v4 = vcombine.high %v22_v62, %v30_v63  ;;  %v4075_v10 = vcombine.low %v22_v62, %v30_v63 }
  0x45   :  { %3187 = vmatpush2.bf16.msra.mxu1 %v4457_v7  ;;  %v286_v1 = vld [vmem:[%s6462_s1 + $0x848] sm:$0xff] }
  0x46   :  { %3242 = vmatprep.subr.bf16.mxu1 %v4444_v9  ;;  %3146 = vmatmul.mubr.bf16.vlgmr.msra.gmra.mxu0 %v4851_v12  ;;  %v4332_v5 = vcombine.high %v278_v0, %v286_v1  ;;  %v262_v6 = vld [vmem:[%s6462_s1 + $0x788] sm:$0xff]  ;;  %v4331_v11 = vcombine.low %v278_v0, %v286_v1 }
  0x47   :  { %3200 = vmatpush1.bf16.msra.mxu0 %v4187_v16  ;;  %3231 = vmatprep.mubr.bf16.mxu0 %v4719_v56  ;;  %v270_v7 = vld [vmem:[%s6462_s1 + $0x7c8] sm:$0xff] }
  0x48   :  { %3189 = vmatmul.mubr.bf16.vlgmr.msra.gmra.mxu1 %v4862_v15  ;;  %3201 = vmatprep.subr.bf16.mxu0 %v4172_v18  ;;  %v518_v8 = vld [vmem:[%s6462_s1 + $0xf88] sm:$0xff]  ;;  %v4316_v13 = vcombine.high %v262_v6, %v270_v7  ;;  %v4315_v20 = vcombine.low %v262_v6, %v270_v7 }
  0x49   :  { %3243 = vmatpush1.bf16.msra.mxu1 %v4443_v17  ;;  %3274 = vmatprep.mubr.bf16.mxu1 %v4730_v59  ;;  %v526_v9 = vld [vmem:[%s6462_s1 + $0xfc8] sm:$0xff] }
  0x4a   :  { %3244 = vmatprep.subr.bf16.mxu1 %v4428_v19  ;;  %v4572_v14 = vcombine.high %v518_v8, %v526_v9  ;;  %v246_v16 = vld [vmem:[%s6462_s1 + $0x708] sm:$0xff]  ;;  %v4571_v21 = vcombine.low %v518_v8, %v526_v9 }
  0x4b   :  { %3202 = vmatpush1.bf16.msra.mxu0 %v4171_v24  ;;  %v254_v17 = vld [vmem:[%s6462_s1 + $0x748] sm:$0xff] }
  0x4c   :  { %3203 = vmatprep.subr.bf16.mxu0 %v4156_v26  ;;  %v502_v18 = vld [vmem:[%s6462_s1 + $0xf08] sm:$0xff]  ;;  %v4300_v22 = vcombine.high %v246_v16, %v254_v17  ;;  %v4299_v28 = vcombine.low %v246_v16, %v254_v17 }
  0x4d   :  { %3245 = vmatpush1.bf16.msra.mxu1 %v4427_v25  ;;  %v510_v19 = vld [vmem:[%s6462_s1 + $0xf48] sm:$0xff] }
  0x4e   :  { %3246 = vmatprep.subr.bf16.mxu1 %v4412_v27  ;;  %v4556_v23 = vcombine.high %v502_v18, %v510_v19  ;;  %v230_v24 = vld [vmem:[%s6462_s1 + $0x688] sm:$0xff]  ;;  %v4555_v29 = vcombine.low %v502_v18, %v510_v19 }
  0x4f   :  { %3204 = vmatpush1.bf16.msra.mxu0 %v4155_v32  ;;  %v238_v25 = vld [vmem:[%s6462_s1 + $0x6c8] sm:$0xff] }
  0x50   :  { %3205 = vmatprep.subr.bf16.mxu0 %v4140_v34  ;;  %v486_v26 = vld [vmem:[%s6462_s1 + $0xe88] sm:$0xff]  ;;  %v4284_v30 = vcombine.high %v230_v24, %v238_v25  ;;  %v4283_v36 = vcombine.low %v230_v24, %v238_v25 }
  0x51   :  { %3247 = vmatpush1.bf16.msra.mxu1 %v4411_v33  ;;  %v494_v27 = vld [vmem:[%s6462_s1 + $0xec8] sm:$0xff] }
  0x52   :  { %3248 = vmatprep.subr.bf16.mxu1 %v4396_v35  ;;  %v4540_v31 = vcombine.high %v486_v26, %v494_v27  ;;  %v214_v32 = vld [vmem:[%s6462_s1 + $0x608] sm:$0xff]  ;;  %v4539_v37 = vcombine.low %v486_v26, %v494_v27 }
  0x53   :  { %3206 = vmatpush1.bf16.msra.mxu0 %v4139_v40  ;;  %v222_v33 = vld [vmem:[%s6462_s1 + $0x648] sm:$0xff] }
  0x54   :  { %3207 = vmatprep.subr.bf16.mxu0 %v4124_v42  ;;  %v470_v34 = vld [vmem:[%s6462_s1 + $0xe08] sm:$0xff]  ;;  %v4268_v38 = vcombine.high %v214_v32, %v222_v33  ;;  %v4267_v44 = vcombine.low %v214_v32, %v222_v33 }
  0x55   :  { %3249 = vmatpush1.bf16.msra.mxu1 %v4395_v41  ;;  %v478_v35 = vld [vmem:[%s6462_s1 + $0xe48] sm:$0xff] }
  0x56   :  { %3250 = vmatprep.subr.bf16.mxu1 %v4380_v43  ;;  %v4524_v39 = vcombine.high %v470_v34, %v478_v35  ;;  %v198_v40 = vld [vmem:[%s6462_s1 + $0x588] sm:$0xff]  ;;  %v4523_v45 = vcombine.low %v470_v34, %v478_v35 }
  0x57   :  { %3208 = vmatpush1.bf16.msra.mxu0 %v4123_v48  ;;  %v206_v41 = vld [vmem:[%s6462_s1 + $0x5c8] sm:$0xff] }
  0x58   :  { %3209 = vmatprep.subr.bf16.mxu0 %v4108_v50  ;;  %v454_v42 = vld [vmem:[%s6462_s1 + $0xd88] sm:$0xff]  ;;  %v4252_v46 = vcombine.high %v198_v40, %v206_v41  ;;  %v4251_v52 = vcombine.low %v198_v40, %v206_v41 }
  0x59   :  { %3251 = vmatpush1.bf16.msra.mxu1 %v4379_v49  ;;  %v462_v43 = vld [vmem:[%s6462_s1 + $0xdc8] sm:$0xff] }
  0x5a   :  { %3252 = vmatprep.subr.bf16.mxu1 %v4364_v51  ;;  %v4508_v47 = vcombine.high %v454_v42, %v462_v43  ;;  %v182_v48 = vld [vmem:[%s6462_s1 + $0x508] sm:$0xff]  ;;  %v4507_v53 = vcombine.low %v454_v42, %v462_v43 }
  0x5b   :  { %3210 = vmatpush1.bf16.msra.mxu0 %v4107_v57  ;;  %v190_v49 = vld [vmem:[%s6462_s1 + $0x548] sm:$0xff] }
  0x5c   :  { %3211 = vmatprep.subr.bf16.mxu0 %v4092_v60  ;;  %v438_v50 = vld [vmem:[%s6462_s1 + $0xd08] sm:$0xff]  ;;  %v4236_v54 = vcombine.high %v182_v48, %v190_v49  ;;  %v4235_v62 = vcombine.low %v182_v48, %v190_v49 }
  0x5d   :  { %3253 = vmatpush1.bf16.msra.mxu1 %v4363_v58  ;;  %v446_v51 = vld [vmem:[%s6462_s1 + $0xd48] sm:$0xff] }
  0x5e   :  { %3254 = vmatprep.subr.bf16.mxu1 %v4348_v61  ;;  %v4492_v55 = vcombine.high %v438_v50, %v446_v51  ;;  %v166_v57 = vld [vmem:[%s6462_s1 + $0x488] sm:$0xff]  ;;  %v4491_v63 = vcombine.low %v438_v50, %v446_v51  ;;  %v55_v50 = vld [vmem:[%s6462_s1 + $0x110] sm:$0xff] }
  0x5f   :  { %3212 = vmatpush1.bf16.msra.mxu0 %v4091_v2  ;;  %v174_v58 = vld [vmem:[%s6462_s1 + $0x4c8] sm:$0xff]  ;;  %v63_v51 = vld [vmem:[%s6462_s1 + $0x150] sm:$0xff] }
  0x60   :  { %3213 = vmatprep.subr.bf16.mxu0 %v4076_v4  ;;  %v422_v60 = vld [vmem:[%s6462_s1 + $0xc88] sm:$0xff]  ;;  %v4220_v0 = vcombine.high %v166_v57, %v174_v58  ;;  %v4219_v6 = vcombine.low %v166_v57, %v174_v58  ;;  %v4110_v57 = vcombine.high %v55_v50, %v63_v51 }
  0x61   :  { %3255 = vmatpush1.bf16.msra.mxu1 %v4347_v3  ;;  %v430_v61 = vld [vmem:[%s6462_s1 + $0xcc8] sm:$0xff] }
  0x62   :  { %3256 = vmatprep.subr.bf16.mxu1 %v4332_v5  ;;  %v4476_v1 = vcombine.high %v422_v60, %v430_v61  ;;  %v150_v2 = vld [vmem:[%s6462_s1 + $0x408] sm:$0xff]  ;;  %v4475_v7 = vcombine.low %v422_v60, %v430_v61  ;;  %v39_v60 = vld [vmem:[%s6462_s1 + $0x90] sm:$0xff] }
  0x63   :  { %3214 = vmatpush1.bf16.msra.mxu0 %v4075_v10  ;;  %v158_v3 = vld [vmem:[%s6462_s1 + $0x448] sm:$0xff]  ;;  %v135_v10 = vld [vmem:[%s6462_s1 + $0x390] sm:$0xff] }
  0x64   :  { %3215 = vmatprep.subr.bf16.mxu0 %v4316_v13  ;;  %v406_v4 = vld [vmem:[%s6462_s1 + $0xc08] sm:$0xff]  ;;  %v4204_v8 = vcombine.high %v150_v2, %v158_v3  ;;  %v391_v13 = vld [vmem:[%s6462_s1 + $0xb90] sm:$0xff]  ;;  %v4203_v16 = vcombine.low %v150_v2, %v158_v3 }
  0x65   :  { %3257 = vmatpush1.bf16.msra.mxu1 %v4331_v11  ;;  %v414_v5 = vld [vmem:[%s6462_s1 + $0xc48] sm:$0xff]  ;;  %v143_v11 = vld [vmem:[%s6462_s1 + $0x3d0] sm:$0xff] }
  0x66   :  { %3258 = vmatprep.subr.bf16.mxu1 %v4572_v14  ;;  %v4460_v9 = vcombine.high %v406_v4, %v414_v5  ;;  %v399_v14 = vld [vmem:[%s6462_s1 + $0xbd0] sm:$0xff]  ;;  %v4459_v17 = vcombine.low %v406_v4, %v414_v5  ;;  %v4190_v18 = vcombine.high %v135_v10, %v143_v11  ;;  %v4189_v24 = vcombine.low %v135_v10, %v143_v11 }
  0x67   :  { %3216 = vmatpush2.bf16.msra.mxu0 %v4315_v20  ;;  %v4446_v19 = vcombine.high %v391_v13, %v399_v14  ;;  %v119_v20 = vld [vmem:[%s6462_s1 + $0x310] sm:$0xff]  ;;  %v4445_v25 = vcombine.low %v391_v13, %v399_v14 }
  0x68   :  { %3217 = vmatprep.subr.bf16.mxu0 %v4300_v22  ;;  %v375_v22 = vld [vmem:[%s6462_s1 + $0xb10] sm:$0xff] }
  0x69   :  { %3259 = vmatpush2.bf16.msra.mxu1 %v4571_v21  ;;  %v127_v21 = vld [vmem:[%s6462_s1 + $0x350] sm:$0xff] }
  0x6a   :  { %3260 = vmatprep.subr.bf16.mxu1 %v4556_v23  ;;  %v383_v23 = vld [vmem:[%s6462_s1 + $0xb50] sm:$0xff]  ;;  %v4174_v26 = vcombine.high %v119_v20, %v127_v21  ;;  %v4173_v32 = vcombine.low %v119_v20, %v127_v21 }
  0x6b   :  { %3218 = vmatpush2.bf16.msra.mxu0 %v4299_v28  ;;  %v4430_v27 = vcombine.high %v375_v22, %v383_v23  ;;  %v103_v28 = vld [vmem:[%s6462_s1 + $0x290] sm:$0xff]  ;;  %v4429_v33 = vcombine.low %v375_v22, %v383_v23 }
  0x6c   :  { %3219 = vmatprep.subr.bf16.mxu0 %v4284_v30  ;;  %v359_v30 = vld [vmem:[%s6462_s1 + $0xa90] sm:$0xff] }
  0x6d   :  { %3261 = vmatpush2.bf16.msra.mxu1 %v4555_v29  ;;  %v111_v29 = vld [vmem:[%s6462_s1 + $0x2d0] sm:$0xff] }
  0x6e   :  { %3262 = vmatprep.subr.bf16.mxu1 %v4540_v31  ;;  %v367_v31 = vld [vmem:[%s6462_s1 + $0xad0] sm:$0xff]  ;;  %v4158_v34 = vcombine.high %v103_v28, %v111_v29  ;;  %v4157_v40 = vcombine.low %v103_v28, %v111_v29 }
  0x6f   :  { %3220 = vmatpush2.bf16.msra.mxu0 %v4283_v36  ;;  %v4414_v35 = vcombine.high %v359_v30, %v367_v31  ;;  %v87_v36 = vld [vmem:[%s6462_s1 + $0x210] sm:$0xff]  ;;  %v4413_v41 = vcombine.low %v359_v30, %v367_v31 }
  0x70   :  { %3221 = vmatprep.subr.bf16.mxu0 %v4268_v38  ;;  %v343_v38 = vld [vmem:[%s6462_s1 + $0xa10] sm:$0xff] }
  0x71   :  { %3263 = vmatpush2.bf16.msra.mxu1 %v4539_v37  ;;  %v95_v37 = vld [vmem:[%s6462_s1 + $0x250] sm:$0xff] }
  0x72   :  { %3264 = vmatprep.subr.bf16.mxu1 %v4524_v39  ;;  %v351_v39 = vld [vmem:[%s6462_s1 + $0xa50] sm:$0xff]  ;;  %v4142_v42 = vcombine.high %v87_v36, %v95_v37 }
  0x73   :  { %3222 = vmatpush2.bf16.msra.mxu0 %v4267_v44  ;;  %v4398_v43 = vcombine.high %v343_v38, %v351_v39  ;;  %v79_v44 = vld [vmem:[%s6462_s1 + $0x1d0] sm:$0xff] }
  0x74   :  { %3223 = vmatprep.subr.bf16.mxu0 %v4252_v46  ;;  %v4141_v46 = vcombine.low %v87_v36, %v95_v37  ;;  %v47_v61 = vld [vmem:[%s6462_s1 + $0xd0] sm:$0xff] }
  0x75   :  { %3265 = vmatpush2.bf16.msra.mxu1 %v4523_v45  ;;  %v335_v45 = vld [vmem:[%s6462_s1 + $0x9d0] sm:$0xff]  ;;  %v4094_v2 = vcombine.high %v39_v60, %v47_v61 }
  0x76   :  { %3266 = vmatprep.subr.bf16.mxu1 %v4508_v47  ;;  %v4397_v47 = vcombine.low %v343_v38, %v351_v39  ;;  %v23_v4 = vld [vmem:[%s6462_s1 + $0x10] sm:$0xff] }
  0x77   :  { %3224 = vmatpush2.bf16.msra.mxu0 %v4251_v52  ;;  %v311_v52 = vld [vmem:[%s6462_s1 + $0x910] sm:$0xff] }
  0x78   :  { %3225 = vmatprep.subr.bf16.mxu0 %v4236_v54  ;;  %v31_v5 = vld [vmem:[%s6462_s1 + $0x50] sm:$0xff] }
  0x79   :  { %3267 = vmatpush2.bf16.msra.mxu1 %v4507_v53  ;;  %v319_v53 = vld [vmem:[%s6462_s1 + $0x950] sm:$0xff]  ;;  %v4078_v10 = vcombine.high %v23_v4, %v31_v5 }
  0x7a   :  { %3268 = vmatprep.subr.bf16.mxu1 %v4492_v55  ;;  %v4366_v58 = vcombine.high %v311_v52, %v319_v53  ;;  %v263_v13 = vld [vmem:[%s6462_s1 + $0x790] sm:$0xff] }
  0x7b   :  { %3226 = vmatpush2.bf16.msra.mxu0 %v4235_v62  ;;  %v295_v62 = vld [vmem:[%s6462_s1 + $0x890] sm:$0xff] }
  0x7c   :  { %3227 = vmatprep.subr.bf16.mxu0 %v4220_v0  ;;  %v4109_v0 = vcombine.low %v55_v50, %v63_v51  ;;  %v271_v14 = vld [vmem:[%s6462_s1 + $0x7d0] sm:$0xff] }
  0x7d   :  { %3269 = vmatpush2.bf16.msra.mxu1 %v4491_v63  ;;  %v303_v63 = vld [vmem:[%s6462_s1 + $0x8d0] sm:$0xff]  ;;  %v4318_v20 = vcombine.high %v263_v13, %v271_v14 }
  0x7e   :  { %3270 = vmatprep.subr.bf16.mxu1 %v4476_v1  ;;  %v4365_v1 = vcombine.low %v311_v52, %v319_v53  ;;  %v4350_v3 = vcombine.high %v295_v62, %v303_v63  ;;  %v247_v22 = vld [vmem:[%s6462_s1 + $0x710] sm:$0xff] }
  0x7f   :  { %3228 = vmatpush2.bf16.msra.mxu0 %v4219_v6  ;;  %v279_v6 = vld [vmem:[%s6462_s1 + $0x810] sm:$0xff] }
  0x80   :  { %3229 = vmatprep.subr.bf16.mxu0 %v4204_v8  ;;  %v4093_v8 = vcombine.low %v39_v60, %v47_v61  ;;  %v255_v23 = vld [vmem:[%s6462_s1 + $0x750] sm:$0xff] }
  0x81   :  { %3271 = vmatpush2.bf16.msra.mxu1 %v4475_v7  ;;  %v287_v7 = vld [vmem:[%s6462_s1 + $0x850] sm:$0xff]  ;;  %v4302_v28 = vcombine.high %v247_v22, %v255_v23 }
  0x82   :  { %3272 = vmatprep.subr.bf16.mxu1 %v4460_v9  ;;  %v4349_v9 = vcombine.low %v295_v62, %v303_v63  ;;  %v4334_v11 = vcombine.high %v279_v6, %v287_v7  ;;  %v231_v30 = vld [vmem:[%s6462_s1 + $0x690] sm:$0xff] }
  0x83   :  { %3230 = vmatpush2.bf16.msra.mxu0 %v4203_v16  ;;  %v519_v16 = vld [vmem:[%s6462_s1 + $0xf90] sm:$0xff] }
  0x84   :  { %3285 = vmatprep.subr.bf16.mxu0 %v4190_v18  ;;  %v4077_v18 = vcombine.low %v23_v4, %v31_v5  ;;  %v239_v31 = vld [vmem:[%s6462_s1 + $0x6d0] sm:$0xff] }
  0x85   :  { %3273 = vmatpush2.bf16.msra.mxu1 %v4459_v17  ;;  %v527_v17 = vld [vmem:[%s6462_s1 + $0xfd0] sm:$0xff]  ;;  %v4286_v36 = vcombine.high %v231_v30, %v239_v31 }
  0x86   :  { %3328 = vmatprep.subr.bf16.mxu1 %v4446_v19  ;;  %3232 = vmatmul.mubr.bf16.vlgmr.msra.gmra.mxu0 %v4851_v12  ;;  %v4333_v19 = vcombine.low %v279_v6, %v287_v7  ;;  %v4574_v21 = vcombine.high %v519_v16, %v527_v17  ;;  %v215_v38 = vld [vmem:[%s6462_s1 + $0x610] sm:$0xff] }
  0x87   :  { %3286 = vmatpush1.bf16.msra.mxu0 %v4189_v24  ;;  %3317 = vmatprep.mubr.bf16.mxu0 %v4719_v56  ;;  %v71_v56 = vld [vmem:[%s6462_s1 + $0x190] sm:$0xff] }
  0x88   :  { %3275 = vmatmul.mubr.bf16.vlgmr.msra.gmra.mxu1 %v4862_v15  ;;  %3287 = vmatprep.subr.bf16.mxu0 %v4174_v26  ;;  %v4126_v48 = vcombine.high %v71_v56, %v79_v44  ;;  %v4125_v54 = vcombine.low %v71_v56, %v79_v44  ;;  %v503_v24 = vld [vmem:[%s6462_s1 + $0xf10] sm:$0xff]  ;;  %v4317_v26 = vcombine.low %v263_v13, %v271_v14 }
  0x89   :  { %3329 = vmatpush1.bf16.msra.mxu1 %v4445_v25  ;;  %3360 = vmatprep.mubr.bf16.mxu1 %v4730_v59  ;;  %v327_v59 = vld [vmem:[%s6462_s1 + $0x990] sm:$0xff] }
  0x8a   :  { %3330 = vmatprep.subr.bf16.mxu1 %v4430_v27  ;;  %v4382_v49 = vcombine.high %v327_v59, %v335_v45  ;;  %v4381_v55 = vcombine.low %v327_v59, %v335_v45  ;;  %v511_v25 = vld [vmem:[%s6462_s1 + $0xf50] sm:$0xff]  ;;  %v4573_v27 = vcombine.low %v519_v16, %v527_v17  ;;  %v136_v16 = vld [vmem:[%s6462_s1 + $0x398] sm:$0xff] }
  0x8b   :  { %3288 = vmatpush1.bf16.msra.mxu0 %v4173_v32  ;;  %v4558_v29 = vcombine.high %v503_v24, %v511_v25  ;;  %v487_v32 = vld [vmem:[%s6462_s1 + $0xe90] sm:$0xff]  ;;  %v144_v17 = vld [vmem:[%s6462_s1 + $0x3d8] sm:$0xff] }
  0x8c   :  { %3289 = vmatprep.subr.bf16.mxu0 %v4158_v34  ;;  %v4301_v34 = vcombine.low %v247_v22, %v255_v23  ;;  %v223_v39 = vld [vmem:[%s6462_s1 + $0x650] sm:$0xff]  ;;  %v4192_v22 = vcombine.high %v136_v16, %v144_v17 }
  0x8d   :  { %3331 = vmatpush1.bf16.msra.mxu1 %v4429_v33  ;;  %v495_v33 = vld [vmem:[%s6462_s1 + $0xed0] sm:$0xff]  ;;  %v4270_v56 = vcombine.high %v215_v38, %v223_v39 }
  0x8e   :  { %3332 = vmatprep.subr.bf16.mxu1 %v4414_v35  ;;  %v4557_v35 = vcombine.low %v503_v24, %v511_v25  ;;  %v4542_v37 = vcombine.high %v487_v32, %v495_v33  ;;  %v199_v59 = vld [vmem:[%s6462_s1 + $0x590] sm:$0xff]  ;;  %v120_v24 = vld [vmem:[%s6462_s1 + $0x318] sm:$0xff] }
  0x8f   :  { %3290 = vmatpush1.bf16.msra.mxu0 %v4157_v40  ;;  %v471_v40 = vld [vmem:[%s6462_s1 + $0xe10] sm:$0xff]  ;;  %v128_v25 = vld [vmem:[%s6462_s1 + $0x358] sm:$0xff] }
  0x90   :  { %3291 = vmatprep.subr.bf16.mxu0 %v4142_v42  ;;  %v4285_v42 = vcombine.low %v231_v30, %v239_v31  ;;  %v207_v45 = vld [vmem:[%s6462_s1 + $0x5d0] sm:$0xff]  ;;  %v4176_v30 = vcombine.high %v120_v24, %v128_v25 }
  0x91   :  { %3333 = vmatpush1.bf16.msra.mxu1 %v4413_v41  ;;  %v479_v41 = vld [vmem:[%s6462_s1 + $0xe50] sm:$0xff]  ;;  %v4254_v50 = vcombine.high %v199_v59, %v207_v45 }
  0x92   :  { %3334 = vmatprep.subr.bf16.mxu1 %v4398_v43  ;;  %v4541_v43 = vcombine.low %v487_v32, %v495_v33  ;;  %v4526_v44 = vcombine.high %v471_v40, %v479_v41  ;;  %v183_v52 = vld [vmem:[%s6462_s1 + $0x510] sm:$0xff]  ;;  %v104_v32 = vld [vmem:[%s6462_s1 + $0x298] sm:$0xff] }
  0x93   :  { %3292 = vmatpush1.bf16.msra.mxu0 %v4141_v46  ;;  %v455_v46 = vld [vmem:[%s6462_s1 + $0xd90] sm:$0xff]  ;;  %v112_v33 = vld [vmem:[%s6462_s1 + $0x2d8] sm:$0xff] }
  0x94   :  { %3293 = vmatprep.subr.bf16.mxu0 %v4126_v48  ;;  %v4269_v48 = vcombine.low %v215_v38, %v223_v39  ;;  %v191_v53 = vld [vmem:[%s6462_s1 + $0x550] sm:$0xff]  ;;  %v4160_v38 = vcombine.high %v104_v32, %v112_v33 }
  0x95   :  { %3335 = vmatpush1.bf16.msra.mxu1 %v4397_v47  ;;  %v463_v47 = vld [vmem:[%s6462_s1 + $0xdd0] sm:$0xff]  ;;  %v4238_v60 = vcombine.high %v183_v52, %v191_v53 }
  0x96   :  { %3336 = vmatprep.subr.bf16.mxu1 %v4382_v49  ;;  %v4525_v49 = vcombine.low %v471_v40, %v479_v41  ;;  %v4510_v51 = vcombine.high %v455_v46, %v463_v47  ;;  %v167_v62 = vld [vmem:[%s6462_s1 + $0x490] sm:$0xff]  ;;  %v96_v40 = vld [vmem:[%s6462_s1 + $0x258] sm:$0xff] }
  0x97   :  { %3294 = vmatpush1.bf16.msra.mxu0 %v4125_v54  ;;  %v439_v54 = vld [vmem:[%s6462_s1 + $0xd10] sm:$0xff]  ;;  %v344_v41 = vld [vmem:[%s6462_s1 + $0xa18] sm:$0xff] }
  0x98   :  { %3295 = vmatprep.subr.bf16.mxu0 %v4110_v57  ;;  %v4253_v57 = vcombine.low %v199_v59, %v207_v45  ;;  %v175_v63 = vld [vmem:[%s6462_s1 + $0x4d0] sm:$0xff] }
  0x99   :  { %3337 = vmatpush1.bf16.msra.mxu1 %v4381_v55  ;;  %v447_v55 = vld [vmem:[%s6462_s1 + $0xd50] sm:$0xff]  ;;  %v4222_v4 = vcombine.high %v167_v62, %v175_v63 }
  0x9a   :  { %3338 = vmatprep.subr.bf16.mxu1 %v4366_v58  ;;  %v4509_v58 = vcombine.low %v455_v46, %v463_v47  ;;  %v4494_v61 = vcombine.high %v439_v54, %v447_v55  ;;  %v151_v6 = vld [vmem:[%s6462_s1 + $0x410] sm:$0xff]  ;;  %v72_v46 = vld [vmem:[%s6462_s1 + $0x198] sm:$0xff] }
  0x9b   :  { %3296 = vmatpush1.bf16.msra.mxu0 %v4109_v0  ;;  %v423_v0 = vld [vmem:[%s6462_s1 + $0xc90] sm:$0xff]  ;;  %v80_v47 = vld [vmem:[%s6462_s1 + $0x1d8] sm:$0xff] }
  0x9c   :  { %3297 = vmatprep.subr.bf16.mxu0 %v4094_v2  ;;  %v4237_v2 = vcombine.low %v183_v52, %v191_v53  ;;  %v159_v7 = vld [vmem:[%s6462_s1 + $0x450] sm:$0xff]  ;;  %v4128_v52 = vcombine.high %v72_v46, %v80_v47 }
  0x9d   :  { %3339 = vmatpush1.bf16.msra.mxu1 %v4365_v1  ;;  %v431_v1 = vld [vmem:[%s6462_s1 + $0xcd0] sm:$0xff]  ;;  %v4206_v13 = vcombine.high %v151_v6, %v159_v7 }
  0x9e   :  { %3340 = vmatprep.subr.bf16.mxu1 %v4350_v3  ;;  %v4493_v3 = vcombine.low %v439_v54, %v447_v55  ;;  %v4478_v5 = vcombine.high %v423_v0, %v431_v1  ;;  %v56_v54 = vld [vmem:[%s6462_s1 + $0x118] sm:$0xff] }
  0x9f   :  { %3298 = vmatpush1.bf16.msra.mxu0 %v4093_v8  ;;  %v407_v8 = vld [vmem:[%s6462_s1 + $0xc10] sm:$0xff]  ;;  %v64_v55 = vld [vmem:[%s6462_s1 + $0x158] sm:$0xff] }
  0xa0   :  { %3299 = vmatprep.subr.bf16.mxu0 %v4078_v10  ;;  %v4221_v10 = vcombine.low %v167_v62, %v175_v63  ;;  %v4112_v62 = vcombine.high %v56_v54, %v64_v55 }
  0xa1   :  { %3341 = vmatpush1.bf16.msra.mxu1 %v4349_v9  ;;  %v415_v9 = vld [vmem:[%s6462_s1 + $0xc50] sm:$0xff] }
  0xa2   :  { %3342 = vmatprep.subr.bf16.mxu1 %v4334_v11  ;;  %v4477_v11 = vcombine.low %v423_v0, %v431_v1  ;;  %v4462_v14 = vcombine.high %v407_v8, %v415_v9  ;;  %v40_v0 = vld [vmem:[%s6462_s1 + $0x98] sm:$0xff] }
  0xa3   :  { %3300 = vmatpush1.bf16.msra.mxu0 %v4077_v18  ;;  %v392_v18 = vld [vmem:[%s6462_s1 + $0xb98] sm:$0xff] }
  0xa4   :  { %3301 = vmatprep.subr.bf16.mxu0 %v4318_v20  ;;  %v4205_v20 = vcombine.low %v151_v6, %v159_v7  ;;  %v48_v1 = vld [vmem:[%s6462_s1 + $0xd8] sm:$0xff] }
  0xa5   :  { %3343 = vmatpush1.bf16.msra.mxu1 %v4333_v19  ;;  %v400_v19 = vld [vmem:[%s6462_s1 + $0xbd8] sm:$0xff]  ;;  %v4096_v6 = vcombine.high %v40_v0, %v48_v1 }
  0xa6   :  { %3344 = vmatprep.subr.bf16.mxu1 %v4574_v21  ;;  %v4461_v21 = vcombine.low %v407_v8, %v415_v9  ;;  %v4448_v23 = vcombine.high %v392_v18, %v400_v19  ;;  %v24_v8 = vld [vmem:[%s6462_s1 + $0x18] sm:$0xff] }
  0xa7   :  { %3302 = vmatpush2.bf16.msra.mxu0 %v4317_v26  ;;  %v376_v26 = vld [vmem:[%s6462_s1 + $0xb18] sm:$0xff] }
  0xa8   :  { %3303 = vmatprep.subr.bf16.mxu0 %v4302_v28  ;;  %v4191_v28 = vcombine.low %v136_v16, %v144_v17  ;;  %v32_v9 = vld [vmem:[%s6462_s1 + $0x58] sm:$0xff] }
  0xa9   :  { %3345 = vmatpush2.bf16.msra.mxu1 %v4573_v27  ;;  %v384_v27 = vld [vmem:[%s6462_s1 + $0xb58] sm:$0xff]  ;;  %v4080_v16 = vcombine.high %v24_v8, %v32_v9 }
  0xaa   :  { %3346 = vmatprep.subr.bf16.mxu1 %v4558_v29  ;;  %v4447_v29 = vcombine.low %v392_v18, %v400_v19  ;;  %v4432_v31 = vcombine.high %v376_v26, %v384_v27  ;;  %v264_v18 = vld [vmem:[%s6462_s1 + $0x798] sm:$0xff] }
  0xab   :  { %3304 = vmatpush2.bf16.msra.mxu0 %v4301_v34  ;;  %v360_v34 = vld [vmem:[%s6462_s1 + $0xa98] sm:$0xff] }
  0xac   :  { %3305 = vmatprep.subr.bf16.mxu0 %v4286_v36  ;;  %v4175_v36 = vcombine.low %v120_v24, %v128_v25  ;;  %v272_v19 = vld [vmem:[%s6462_s1 + $0x7d8] sm:$0xff] }
  0xad   :  { %3347 = vmatpush2.bf16.msra.mxu1 %v4557_v35  ;;  %v368_v35 = vld [vmem:[%s6462_s1 + $0xad8] sm:$0xff]  ;;  %v4320_v24 = vcombine.high %v264_v18, %v272_v19 }
  0xae   :  { %3348 = vmatprep.subr.bf16.mxu1 %v4542_v37  ;;  %v4431_v37 = vcombine.low %v376_v26, %v384_v27  ;;  %v4416_v39 = vcombine.high %v360_v34, %v368_v35  ;;  %v248_v26 = vld [vmem:[%s6462_s1 + $0x718] sm:$0xff] }
  0xaf   :  { %3306 = vmatpush2.bf16.msra.mxu0 %v4285_v42  ;;  %v352_v42 = vld [vmem:[%s6462_s1 + $0xa58] sm:$0xff] }
  0xb0   :  { %3307 = vmatprep.subr.bf16.mxu0 %v4270_v56  ;;  %v4159_v56 = vcombine.low %v104_v32, %v112_v33  ;;  %v4400_v45 = vcombine.high %v344_v41, %v352_v42  ;;  %v256_v27 = vld [vmem:[%s6462_s1 + $0x758] sm:$0xff] }
  0xb1   :  { %3349 = vmatpush2.bf16.msra.mxu1 %v4541_v43  ;;  %v5291_v43 = vld [vmem:[%s6463_s0 + $0xc] ss:$16 sps:$4 sm:$0xff]   ;;  %v4304_v32 = vcombine.high %v248_v26, %v256_v27 }
  0xb2   :  { %3350 = vmatprep.subr.bf16.mxu1 %v4526_v44  ;;  %v4415_v44 = vcombine.low %v360_v34, %v368_v35  ;;  %v232_v34 = vld [vmem:[%s6462_s1 + $0x698] sm:$0xff] }
  0xb3   :  { %3308 = vmatpush2.bf16.msra.mxu0 %v4269_v48  ;;  %v328_v48 = vld [vmem:[%s6462_s1 + $0x998] sm:$0xff] }
  0xb4   :  { %3309 = vmatprep.subr.bf16.mxu0 %v4254_v50  ;;  %v240_v35 = vld [vmem:[%s6462_s1 + $0x6d8] sm:$0xff] }
  0xb5   :  { %3351 = vmatpush2.bf16.msra.mxu1 %v4525_v49  ;;  %v336_v49 = vld [vmem:[%s6462_s1 + $0x9d8] sm:$0xff] }
  0xb6   :  { %3352 = vmatprep.subr.bf16.mxu1 %v4510_v51  ;;  %v4399_v51 = vcombine.low %v344_v41, %v352_v42  ;;  %v4384_v53 = vcombine.high %v328_v48, %v336_v49  ;;  %v216_v41 = vld [vmem:[%s6462_s1 + $0x618] sm:$0xff] }
  0xb7   :  { %3310 = vmatpush2.bf16.msra.mxu0 %v4253_v57  ;;  %v312_v57 = vld [vmem:[%s6462_s1 + $0x918] sm:$0xff] }
  0xb8   :  { %3311 = vmatprep.subr.bf16.mxu0 %v4238_v60  ;;  %v4127_v60 = vcombine.low %v72_v46, %v80_v47  ;;  %v224_v42 = vld [vmem:[%s6462_s1 + $0x658] sm:$0xff] }
  0xb9   :  { %3353 = vmatpush2.bf16.msra.mxu1 %v4509_v58  ;;  %v320_v58 = vld [vmem:[%s6462_s1 + $0x958] sm:$0xff]  ;;  %v4272_v46 = vcombine.high %v216_v41, %v224_v42 }
  0xba   :  { %3354 = vmatprep.subr.bf16.mxu1 %v4494_v61  ;;  %v4383_v61 = vcombine.low %v328_v48, %v336_v49  ;;  %v4368_v63 = vcombine.high %v312_v57, %v320_v58  ;;  %v200_v48 = vld [vmem:[%s6462_s1 + $0x598] sm:$0xff] }
  0xbb   :  { %3312 = vmatpush2.bf16.msra.mxu0 %v4237_v2  ;;  %v296_v2 = vld [vmem:[%s6462_s1 + $0x898] sm:$0xff] }
  0xbc   :  { %3313 = vmatprep.subr.bf16.mxu0 %v4222_v4  ;;  %v4111_v4 = vcombine.low %v56_v54, %v64_v55  ;;  %v208_v49 = vld [vmem:[%s6462_s1 + $0x5d8] sm:$0xff] }
  0xbd   :  { %3355 = vmatpush2.bf16.msra.mxu1 %v4493_v3  ;;  %v304_v3 = vld [vmem:[%s6462_s1 + $0x8d8] sm:$0xff]  ;;  %v4256_v54 = vcombine.high %v200_v48, %v208_v49 }
  0xbe   :  { %3356 = vmatprep.subr.bf16.mxu1 %v4478_v5  ;;  %v4367_v5 = vcombine.low %v312_v57, %v320_v58  ;;  %v4352_v7 = vcombine.high %v296_v2, %v304_v3  ;;  %v184_v57 = vld [vmem:[%s6462_s1 + $0x518] sm:$0xff] }
  0xbf   :  { %3314 = vmatpush2.bf16.msra.mxu0 %v4221_v10  ;;  %v280_v10 = vld [vmem:[%s6462_s1 + $0x818] sm:$0xff] }
  0xc0   :  { %3315 = vmatprep.subr.bf16.mxu0 %v4206_v13  ;;  %v4095_v13 = vcombine.low %v40_v0, %v48_v1  ;;  %v192_v58 = vld [vmem:[%s6462_s1 + $0x558] sm:$0xff] }
  0xc1   :  { %3357 = vmatpush2.bf16.msra.mxu1 %v4477_v11  ;;  %v288_v11 = vld [vmem:[%s6462_s1 + $0x858] sm:$0xff]  ;;  %v4240_v0 = vcombine.high %v184_v57, %v192_v58 }
  0xc2   :  { %3358 = vmatprep.subr.bf16.mxu1 %v4462_v14  ;;  %v4351_v14 = vcombine.low %v296_v2, %v304_v3  ;;  %v4336_v17 = vcombine.high %v280_v10, %v288_v11  ;;  %v168_v2 = vld [vmem:[%s6462_s1 + $0x498] sm:$0xff] }
  0xc3   :  { %3316 = vmatpush2.bf16.msra.mxu0 %v4205_v20  ;;  %v520_v20 = vld [vmem:[%s6462_s1 + $0xf98] sm:$0xff] }
  0xc4   :  { %3371 = vmatprep.subr.bf16.mxu0 %v4192_v22  ;;  %v4079_v22 = vcombine.low %v24_v8, %v32_v9  ;;  %v176_v3 = vld [vmem:[%s6462_s1 + $0x4d8] sm:$0xff] }
  0xc5   :  { %3359 = vmatpush2.bf16.msra.mxu1 %v4461_v21  ;;  %v528_v21 = vld [vmem:[%s6462_s1 + $0xfd8] sm:$0xff]  ;;  %v4224_v8 = vcombine.high %v168_v2, %v176_v3 }
  0xc6   :  { %3414 = vmatprep.subr.bf16.mxu1 %v4448_v23  ;;  %3318 = vmatmul.mubr.bf16.vlgmr.msra.gmra.mxu0 %v4851_v12  ;;  %v88_v12 = vld [vmem:[%s6462_s1 + $0x218] sm:$0xff]  ;;  %v4335_v23 = vcombine.low %v280_v10, %v288_v11  ;;  %v4576_v25 = vcombine.high %v520_v20, %v528_v21 }
  0xc7   :  { %3372 = vmatpush1.bf16.msra.mxu0 %v4191_v28  ;;  %v4144_v59 = vcombine.high %v88_v12, %v96_v40  ;;  %v4143_v50 = vcombine.low %v88_v12, %v96_v40  ;;  %v504_v28 = vld [vmem:[%s6462_s1 + $0xf18] sm:$0xff]  ;;  %v4288_v12 = vcombine.high %v232_v34, %v240_v35 }
  0xc8   :  { %3361 = vmatmul.mubr.bf16.vlgmr.msra.gmra.mxu1 %v4862_v15  ;;  %3373 = vmatprep.subr.bf16.mxu0 %v4176_v30  ;;  %v5279_v15 = vld [vmem:[%s6463_s0 + $0x4] ss:$16 sps:$4 sm:$0xff]   ;;  %v4319_v30 = vcombine.low %v264_v18, %v272_v19  ;;  %v152_v10 = vld [vmem:[%s6462_s1 + $0x418] sm:$0xff] }
  0xc9   :  { %3415 = vmatpush1.bf16.msra.mxu1 %v4447_v29  ;;  %3403 = vmatprep.mubr.bf16.mxu0 %v5279_v15  ;;  %v512_v29 = vld [vmem:[%s6462_s1 + $0xf58] sm:$0xff] }
  0xca   :  { %3416 = vmatprep.subr.bf16.mxu1 %v4432_v31  ;;  %3446 = vmatprep.mubr.bf16.mxu1 %v5291_v43  ;;  %v4575_v31 = vcombine.low %v520_v20, %v528_v21  ;;  %v4560_v33 = vcombine.high %v504_v28, %v512_v29  ;;  %v160_v11 = vld [vmem:[%s6462_s1 + $0x458] sm:$0xff]  ;;  %v137_v21 = vld [vmem:[%s6462_s1 + $0x3a0] sm:$0xff] }
  0xcb   :  { %3374 = vmatpush1.bf16.msra.mxu0 %v4175_v36  ;;  %v488_v36 = vld [vmem:[%s6462_s1 + $0xe98] sm:$0xff]  ;;  %v4208_v19 = vcombine.high %v152_v10, %v160_v11 }
  0xcc   :  { %3375 = vmatprep.subr.bf16.mxu0 %v4160_v38  ;;  %v4303_v38 = vcombine.low %v248_v26, %v256_v27  ;;  %v4207_v26 = vcombine.low %v152_v10, %v160_v11 }
  0xcd   :  { %3417 = vmatpush1.bf16.msra.mxu1 %v4431_v37  ;;  %v496_v37 = vld [vmem:[%s6462_s1 + $0xed8] sm:$0xff] }
  0xce   :  { %3418 = vmatprep.subr.bf16.mxu1 %v4416_v39  ;;  %v4559_v39 = vcombine.low %v504_v28, %v512_v29  ;;  %v4544_v40 = vcombine.high %v488_v36, %v496_v37 }
  0xcf   :  { %3376 = vmatpush1.bf16.msra.mxu0 %v4159_v56  ;;  %v472_v56 = vld [vmem:[%s6462_s1 + $0xe18] sm:$0xff] }
  0xd0   :  { %3377 = vmatprep.subr.bf16.mxu0 %v4144_v59  ;;  %v4287_v59 = vcombine.low %v232_v34, %v240_v35  ;;  %v385_v34 = vld [vmem:[%s6462_s1 + $0xb60] sm:$0xff] }
  0xd1   :  { %3419 = vmatpush1.bf16.msra.mxu1 %v4415_v44  ;;  %v480_v44 = vld [vmem:[%s6462_s1 + $0xe58] sm:$0xff]  ;;  %v5470_v35 = vld [vmem:[%s6464_s2] sm:$0xff] }
  0xd2   :  { %3420 = vmatprep.subr.bf16.mxu1 %v4400_v45  ;;  %v4543_v45 = vcombine.low %v488_v36, %v496_v37  ;;  %v4528_v47 = vcombine.high %v472_v56, %v480_v44 }
  0xd3   :  { %3378 = vmatpush1.bf16.msra.mxu0 %v4143_v50  ;;  %v456_v50 = vld [vmem:[%s6462_s1 + $0xd98] sm:$0xff] }
  0xd4   :  { %3379 = vmatprep.subr.bf16.mxu0 %v4128_v52  ;;  %v4271_v52 = vcombine.low %v216_v41, %v224_v42  ;;  %v105_v41 = vld [vmem:[%s6462_s1 + $0x2a0] sm:$0xff] }
  0xd5   :  { %3421 = vmatpush1.bf16.msra.mxu1 %v4399_v51  ;;  %v464_v51 = vld [vmem:[%s6462_s1 + $0xdd8] sm:$0xff]  ;;  %v113_v42 = vld [vmem:[%s6462_s1 + $0x2e0] sm:$0xff] }
  0xd6   :  { %3422 = vmatprep.subr.bf16.mxu1 %v4384_v53  ;;  %v4527_v53 = vcombine.low %v472_v56, %v480_v44  ;;  %v4512_v55 = vcombine.high %v456_v50, %v464_v51 }
  0xd7   :  { %3380 = vmatpush1.bf16.msra.mxu0 %v4127_v60  ;;  %v440_v60 = vld [vmem:[%s6462_s1 + $0xd18] sm:$0xff] }
  0xd8   :  { %3381 = vmatprep.subr.bf16.mxu0 %v4112_v62  ;;  %v4255_v62 = vcombine.low %v200_v48, %v208_v49  ;;  %v5503_v48 = vld [vmem:[%s6463_s0 + $0x8] ss:$16 sps:$4 sm:$0xff]  }
  0xd9   :  { %3423 = vmatpush1.bf16.msra.mxu1 %v4383_v61  ;;  %v448_v61 = vld [vmem:[%s6462_s1 + $0xd58] sm:$0xff] }
  0xda   :  { %3424 = vmatprep.subr.bf16.mxu1 %v4368_v63  ;;  %v4511_v63 = vcombine.low %v456_v50, %v464_v51  ;;  %v4496_v1 = vcombine.high %v440_v60, %v448_v61 }
  0xdb   :  { %3382 = vmatpush1.bf16.msra.mxu0 %v4111_v4  ;;  %v424_v4 = vld [vmem:[%s6462_s1 + $0xc98] sm:$0xff] }
  0xdc   :  { %3383 = vmatprep.subr.bf16.mxu0 %v4096_v6  ;;  %v4239_v6 = vcombine.low %v184_v57, %v192_v58  ;;  %v89_v57 = vld [vmem:[%s6462_s1 + $0x220] sm:$0xff] }
  0xdd   :  { %3425 = vmatpush1.bf16.msra.mxu1 %v4367_v5  ;;  %v432_v5 = vld [vmem:[%s6462_s1 + $0xcd8] sm:$0xff]  ;;  %v97_v58 = vld [vmem:[%s6462_s1 + $0x260] sm:$0xff] }
  0xde   :  { %3426 = vmatprep.subr.bf16.mxu1 %v4352_v7  ;;  %v4495_v7 = vcombine.low %v440_v60, %v448_v61  ;;  %v4480_v9 = vcombine.high %v424_v4, %v432_v5  ;;  %v4479_v18 = vcombine.low %v424_v4, %v432_v5  ;;  %v4161_v5 = vcombine.low %v105_v41, %v113_v42 }
  0xdf   :  { %3384 = vmatpush1.bf16.msra.mxu0 %v4095_v13  ;;  %v408_v13 = vld [vmem:[%s6462_s1 + $0xc18] sm:$0xff] }
  0xe0   :  { %3385 = vmatprep.subr.bf16.mxu0 %v4080_v16  ;;  %v3805_v16 = vlaneseq }
  0xe1   :  { %3427 = vmatpush1.bf16.msra.mxu1 %v4351_v14  ;;  %v416_v14 = vld [vmem:[%s6462_s1 + $0xc58] sm:$0xff] }
  0xe2   :  { %3428 = vmatprep.subr.bf16.mxu1 %v4336_v17  ;;  %v4223_v17 = vcombine.low %v168_v2, %v176_v3  ;;  %v4464_v20 = vcombine.high %v408_v13, %v416_v14  ;;  %v4463_v27 = vcombine.low %v408_v13, %v416_v14  ;;  %v345_v2 = vld [vmem:[%s6462_s1 + $0xa20] sm:$0xff] }
  0xe3   :  { %3386 = vmatpush1.bf16.msra.mxu0 %v4079_v22  ;;  %v145_v22 = vld [vmem:[%s6462_s1 + $0x3e0] sm:$0xff] }
  0xe4   :  { %3387 = vmatprep.subr.bf16.mxu0 %v4320_v24  ;;  %v393_v24 = vld [vmem:[%s6462_s1 + $0xba0] sm:$0xff]  ;;  %v4194_v28 = vcombine.high %v137_v21, %v145_v22  ;;  %v4193_v36 = vcombine.low %v137_v21, %v145_v22 }
  0xe5   :  { %3429 = vmatpush1.bf16.msra.mxu1 %v4335_v23  ;;  %v5444_v23 = vshrl.u32 %v3805_v16, 7  ;;  %v353_v3 = vld [vmem:[%s6462_s1 + $0xa60] sm:$0xff] }
  0xe6   :  { %3430 = vmatprep.subr.bf16.mxu1 %v4576_v25  ;;  %v401_v25 = vld [vmem:[%s6462_s1 + $0xbe0] sm:$0xff]  ;;  %v4402_v14 = vcombine.high %v345_v2, %v353_v3 }
  0xe7   :  { %3388 = vmatpush2.bf16.msra.mxu0 %v4319_v30  ;;  %v4450_v29 = vcombine.high %v393_v24, %v401_v25  ;;  %v121_v30 = vld [vmem:[%s6462_s1 + $0x320] sm:$0xff]  ;;  %v5473_v37 = vsub.s32 1, %v5444_v23 }
  0xe8   :  { %3389 = vmatprep.subr.bf16.mxu0 %v4304_v32  ;;  %v5459_v32 = vsub.s32 0, %v5444_v23  ;;  %v73_v16 = vld [vmem:[%s6462_s1 + $0x1a0] sm:$0xff] }
  0xe9   :  { %3431 = vmatpush2.bf16.msra.mxu1 %v4575_v31  ;;  %v129_v31 = vld [vmem:[%s6462_s1 + $0x360] sm:$0xff]  ;;  %v3812_v49 = vrot.slane %v5470_v35, %v5473_v37 }
  0xea   :  { %3432 = vmatprep.subr.bf16.mxu1 %v4560_v33  ;;  %v377_v33 = vld [vmem:[%s6462_s1 + $0xb20] sm:$0xff]  ;;  %v3808_v44 = vrot.slane %v5470_v35, %v5459_v32  ;;  %v4177_v50 = vcombine.low %v121_v30, %v129_v31 }
  0xeb   :  { %3390 = vmatpush2.bf16.msra.mxu0 %v4303_v38  ;;  %v4449_v38 = vcombine.low %v393_v24, %v401_v25  ;;  %v4433_v51 = vcombine.low %v377_v33, %v385_v34  ;;  %v329_v21 = vld [vmem:[%s6462_s1 + $0x9a0] sm:$0xff]  ;;  %v4145_v24 = vcombine.low %v89_v57, %v97_v58  ;;  %v4401_v25 = vcombine.low %v345_v2, %v353_v3 }
  0xec   :  { %3391 = vmatprep.subr.bf16.mxu0 %v4288_v12  ;;  %v5478_v12 = vld [vmem:[%s6465_s3] sm:$0xff] }
  0xed   :  { %3433 = vmatpush2.bf16.msra.mxu1 %v4559_v39  ;;  %v4178_v39 = vcombine.high %v121_v30, %v129_v31  ;;  %v337_v22 = vld [vmem:[%s6462_s1 + $0x9e0] sm:$0xff] }
  0xee   :  { %3434 = vmatprep.subr.bf16.mxu1 %v4544_v40  ;;  %v4434_v40 = vcombine.high %v377_v33, %v385_v34  ;;  %v57_v30 = vld [vmem:[%s6462_s1 + $0x120] sm:$0xff] }
  0xef   :  { %3392 = vmatpush2.bf16.msra.mxu0 %v4287_v59  ;;  %v5491_v59 = vld [vmem:[%s6463_s0] ss:$16 sps:$4 sm:$0xff]  }
  0xf0   :  { %3393 = vmatprep.subr.bf16.mxu0 %v4272_v46  ;;  %v369_v46 = vld [vmem:[%s6462_s1 + $0xae0] sm:$0xff] }
  0xf1   :  { %3435 = vmatpush2.bf16.msra.mxu1 %v4543_v45  ;;  %v361_v45 = vld [vmem:[%s6462_s1 + $0xaa0] sm:$0xff] }
  0xf2   :  { %3436 = vmatprep.subr.bf16.mxu1 %v4528_v47  ;;  %v4418_v61 = vcombine.high %v361_v45, %v369_v46  ;;  %v65_v31 = vld [vmem:[%s6462_s1 + $0x160] sm:$0xff] }
  0xf3   :  { %3394 = vmatpush2.bf16.msra.mxu0 %v4271_v52  ;;  %v313_v34 = vld [vmem:[%s6462_s1 + $0x920] sm:$0xff] }
  0xf4   :  { %3395 = vmatprep.subr.bf16.mxu0 %v4256_v54 }
  0xf5   :  { %3437 = vmatpush2.bf16.msra.mxu1 %v4527_v53  ;;  %v3924_v53 = vrot.slane %v5478_v12, %v5459_v32 }
  0xf6   :  { %3438 = vmatprep.subr.bf16.mxu1 %v4512_v55  ;;  %v4162_v55 = vcombine.high %v105_v41, %v113_v42  ;;  %v41_v42 = vld [vmem:[%s6462_s1 + $0xa0] sm:$0xff] }
  0xf7   :  { %3396 = vmatpush2.bf16.msra.mxu0 %v4255_v62 }
  0xf8   :  { %3397 = vmatprep.subr.bf16.mxu0 %v4240_v0  ;;  %v3928_v0 = vrot.slane %v5478_v12, %v5473_v37 }
  0xf9   :  { %3439 = vmatpush2.bf16.msra.mxu1 %v4511_v63 }
  0xfa   :  { %3440 = vmatprep.subr.bf16.mxu1 %v4496_v1 }
  0xfb   :  { %3398 = vmatpush2.bf16.msra.mxu0 %v4239_v6  ;;  %v4417_v6 = vcombine.low %v361_v45, %v369_v46  ;;  %v305_v45 = vld [vmem:[%s6462_s1 + $0x8e0] sm:$0xff]  ;;  %v4113_v46 = vcombine.low %v57_v30, %v65_v31 }
  0xfc   :  { %3399 = vmatprep.subr.bf16.mxu0 %v4224_v8 }
  0xfd   :  { %3441 = vmatpush2.bf16.msra.mxu1 %v4495_v7  ;;  %v4146_v7 = vcombine.high %v89_v57, %v97_v58 }
  0xfe   :  { %3442 = vmatprep.subr.bf16.mxu1 %v4480_v9 }
  0xff   :  { %3400 = vmatpush2.bf16.msra.mxu0 %v4223_v17  ;;  %v81_v17 = vld [vmem:[%s6462_s1 + $0x1e0] sm:$0xff] }
 0x100   :  { %3401 = vmatprep.subr.bf16.mxu0 %v4208_v19 }
 0x101   :  { %3443 = vmatpush2.bf16.msra.mxu1 %v4479_v18 }
 0x102   :  { %3444 = vmatprep.subr.bf16.mxu1 %v4464_v20 }
 0x103   :  { %3402 = vmatpush2.bf16.msra.mxu0 %v4207_v26 }
 0x104   :  { %3457 = vmatprep.subr.bf16.mxu0 %v4194_v28  ;;  %v4130_v28 = vcombine.high %v73_v16, %v81_v17 }
 0x105   :  { %3445 = vmatpush2.bf16.msra.mxu1 %v4463_v27 }
 0x106   :  { %3500 = vmatprep.subr.bf16.mxu1 %v4450_v29  ;;  %v3147_v56 = vpop.f32.mrf.mxu0  ;;  %3404 = vmatmul.mubr.bf16.vlgmr.msra.gmra.mxu0 %v5491_v59  ;;  %v4386_v29 = vcombine.high %v329_v21, %v337_v22 }
 0x107   :  { %3458 = vmatpush1.bf16.msra.mxu0 %v4193_v36  ;;  %3489 = vmatprep.mubr.bf16.mxu0 %v5279_v15  ;;  %v321_v36 = vld [vmem:[%s6462_s1 + $0x960] sm:$0xff] }
 0x108   :  { %v3190_v47 = vpop.f32.mrf.mxu1  ;;  %3447 = vmatmul.mubr.bf16.vlgmr.msra.gmra.mxu1 %v5503_v48  ;;  %v3149_v54 = vpop.f32.mrf.mxu0  ;;  %3459 = vmatprep.subr.bf16.mxu0 %v4178_v39  ;;  %v4385_v39 = vcombine.low %v329_v21, %v337_v22  ;;  %v4370_v41 = vcombine.high %v313_v34, %v321_v36 }
 0x109   :  { %v3191_v52 = vadd.f32 %v3190_v47, %v3147_v56  ;;  %3501 = vmatpush1.bf16.msra.mxu1 %v4449_v38  ;;  %3532 = vmatprep.mubr.bf16.mxu1 %v5291_v43  ;;  %v4129_v38 = vcombine.low %v73_v16, %v81_v17  ;;  %v49_v56 = vld [vmem:[%s6462_s1 + $0xe0] sm:$0xff]  ;;  %v4369_v47 = vcombine.low %v313_v34, %v321_v36 }
 0x10a   :  { %v3192_v60 = vpop.f32.mrf.mxu1  ;;  %3502 = vmatprep.subr.bf16.mxu1 %v4434_v40  ;;  %v3151_v1 = vpop.f32.mrf.mxu0  ;;  %v4114_v40 = vcombine.high %v57_v30, %v65_v31  ;;  %v241_v16 = vld [vmem:[%s6462_s1 + $0x6e0] sm:$0xff] }
 0x10b   :  { %v3885_v62 = vmul.f32 %v3808_v44, %v3191_v52  ;;  %v3193_v63 = vadd.f32 %v3192_v60, %v3149_v54  ;;  %3460 = vmatpush1.bf16.msra.mxu0 %v4177_v50  ;;  %v33_v52 = vld [vmem:[%s6462_s1 + $0x60] sm:$0xff] }
 0x10c   :  { %v3194_v4 = vpop.f32.mrf.mxu1  ;;  %v3153_v11 = vpop.f32.mrf.mxu0  ;;  %3461 = vmatprep.subr.bf16.mxu0 %v4162_v55  ;;  %v289_v54 = vld [vmem:[%s6462_s1 + $0x860] sm:$0xff]  ;;  %v4097_v55 = vcombine.low %v41_v42, %v49_v56 }
 0x10d   :  { %v4001_v8 = vadd.f32 %v3924_v53, %v3885_v62  ;;  %v3886_v9 = vmul.f32 %v3812_v49, %v3193_v63  ;;  %v3195_v10 = vadd.f32 %v3194_v4, %v3151_v1  ;;  %3503 = vmatpush1.bf16.msra.mxu1 %v4433_v51  ;;  %v25_v51 = vld [vmem:[%s6462_s1 + $0x20] sm:$0xff] }
 0x10e   :  { %v3196_v13 = vpop.f32.mrf.mxu1  ;;  %3504 = vmatprep.subr.bf16.mxu1 %v4418_v61  ;;  %v4082_v58 = vcombine.high %v25_v51, %v33_v52  ;;  %v265_v61 = vld [vmem:[%s6462_s1 + $0x7a0] sm:$0xff]  ;;  %v4081_v1 = vcombine.low %v25_v51, %v33_v52 }
 0x10f   :  { %4033 = vst [vmem:[%s6466_s4] sm:$0xff] %v4001_v8  ;;  %v4002_v18 = vadd.f32 %v3928_v0, %v3886_v9  ;;  %v3901_v19 = vmul.f32 %v3808_v44, %v3195_v10  ;;  %v3197_v20 = vadd.f32 %v3196_v13, %v3153_v11  ;;  %3462 = vmatpush1.bf16.msra.mxu0 %v4161_v5  ;;  %v297_v44 = vld [vmem:[%s6462_s1 + $0x8a0] sm:$0xff] }
 0x110   :  { %3463 = vmatprep.subr.bf16.mxu0 %v4146_v7  ;;  %v4354_v50 = vcombine.high %v297_v44, %v305_v45  ;;  %v4353_v57 = vcombine.low %v297_v44, %v305_v45  ;;  %v273_v62 = vld [vmem:[%s6462_s1 + $0x7e0] sm:$0xff] }
 0x111   :  { %4034 = vst [vmem:[%s6466_s4 + $0x8] sm:$0xff] %v4002_v18  ;;  %v4017_v26 = vadd.f32 %v3924_v53, %v3901_v19  ;;  %v3902_v27 = vmul.f32 %v3812_v49, %v3197_v20  ;;  %3505 = vmatpush1.bf16.msra.mxu1 %v4417_v6  ;;  %v4098_v49 = vcombine.high %v41_v42, %v49_v56  ;;  %v281_v53 = vld [vmem:[%s6462_s1 + $0x820] sm:$0xff] }
 0x112   :  { %3506 = vmatprep.subr.bf16.mxu1 %v4402_v14  ;;  %v4338_v60 = vcombine.high %v281_v53, %v289_v54  ;;  %v521_v63 = vld [vmem:[%s6462_s1 + $0xfa0] sm:$0xff]  ;;  %v4337_v2 = vcombine.low %v281_v53, %v289_v54  ;;  %v4322_v3 = vcombine.high %v265_v61, %v273_v62  ;;  %v4321_v9 = vcombine.low %v265_v61, %v273_v62 }
 0x113   :  { %4049 = vst [vmem:[%s6466_s4 + $0x80] sm:$0xff] %v4017_v26  ;;  %v4018_v33 = vadd.f32 %v3928_v0, %v3902_v27  ;;  %3464 = vmatpush1.bf16.msra.mxu0 %v4145_v24  ;;  %v529_v0 = vld [vmem:[%s6462_s1 + $0xfe0] sm:$0xff] }
 0x114   :  { %3465 = vmatprep.subr.bf16.mxu0 %v4130_v28  ;;  %v4578_v4 = vcombine.high %v521_v63, %v529_v0  ;;  %v249_v5 = vld [vmem:[%s6462_s1 + $0x720] sm:$0xff]  ;;  %v4577_v10 = vcombine.low %v521_v63, %v529_v0 }
 0x115   :  { %4050 = vst [vmem:[%s6466_s4 + $0x88] sm:$0xff] %v4018_v33  ;;  %3507 = vmatpush1.bf16.msra.mxu1 %v4401_v25  ;;  %v257_v6 = vld [vmem:[%s6462_s1 + $0x760] sm:$0xff] }
 0x116   :  { %3508 = vmatprep.subr.bf16.mxu1 %v4386_v29  ;;  %v505_v7 = vld [vmem:[%s6462_s1 + $0xf20] sm:$0xff]  ;;  %v4306_v11 = vcombine.high %v249_v5, %v257_v6  ;;  %v4305_v19 = vcombine.low %v249_v5, %v257_v6  ;;  %v138_v6 = vld [vmem:[%s6462_s1 + $0x3a8] sm:$0xff] }
 0x117   :  { %3466 = vmatpush1.bf16.msra.mxu0 %v4129_v38  ;;  %v513_v8 = vld [vmem:[%s6462_s1 + $0xf60] sm:$0xff] }
 0x118   :  { %3467 = vmatprep.subr.bf16.mxu0 %v4114_v40  ;;  %v4562_v13 = vcombine.high %v505_v7, %v513_v8  ;;  %v233_v14 = vld [vmem:[%s6462_s1 + $0x6a0] sm:$0xff]  ;;  %v4561_v20 = vcombine.low %v505_v7, %v513_v8  ;;  %v146_v7 = vld [vmem:[%s6462_s1 + $0x3e8] sm:$0xff] }
 0x119   :  { %3509 = vmatpush1.bf16.msra.mxu1 %v4385_v39  ;;  %v489_v17 = vld [vmem:[%s6462_s1 + $0xea0] sm:$0xff]  ;;  %v4290_v21 = vcombine.high %v233_v14, %v241_v16  ;;  %v4289_v28 = vcombine.low %v233_v14, %v241_v16  ;;  %v394_v8 = vld [vmem:[%s6462_s1 + $0xba8] sm:$0xff] }
 0x11a   :  { %3510 = vmatprep.subr.bf16.mxu1 %v4370_v41  ;;  %v497_v18 = vld [vmem:[%s6462_s1 + $0xee0] sm:$0xff]  ;;  %v122_v16 = vld [vmem:[%s6462_s1 + $0x328] sm:$0xff] }
 0x11b   :  { %3468 = vmatpush1.bf16.msra.mxu0 %v4113_v46  ;;  %v4546_v22 = vcombine.high %v489_v17, %v497_v18  ;;  %v217_v24 = vld [vmem:[%s6462_s1 + $0x620] sm:$0xff]  ;;  %v4545_v29 = vcombine.low %v489_v17, %v497_v18  ;;  %v130_v17 = vld [vmem:[%s6462_s1 + $0x368] sm:$0xff]  ;;  %v5701_v18 = vsub.s32 2, %v5444_v23 }
 0x11c   :  { %3469 = vmatprep.subr.bf16.mxu0 %v4098_v49  ;;  %v225_v25 = vld [vmem:[%s6462_s1 + $0x660] sm:$0xff] }
 0x11d   :  { %3511 = vmatpush1.bf16.msra.mxu1 %v4369_v47  ;;  %v473_v26 = vld [vmem:[%s6462_s1 + $0xe20] sm:$0xff]  ;;  %v4274_v30 = vcombine.high %v217_v24, %v225_v25  ;;  %v4273_v39 = vcombine.low %v217_v24, %v225_v25  ;;  %v4180_v25 = vcombine.high %v122_v16, %v130_v17 }
 0x11e   :  { %3512 = vmatprep.subr.bf16.mxu1 %v4354_v50  ;;  %v481_v27 = vld [vmem:[%s6462_s1 + $0xe60] sm:$0xff] }
 0x11f   :  { %3470 = vmatpush1.bf16.msra.mxu0 %v4097_v55  ;;  %v4530_v31 = vcombine.high %v473_v26, %v481_v27  ;;  %v201_v33 = vld [vmem:[%s6462_s1 + $0x5a0] sm:$0xff]  ;;  %v4529_v40 = vcombine.low %v473_v26, %v481_v27  ;;  %v106_v27 = vld [vmem:[%s6462_s1 + $0x2a8] sm:$0xff] }
 0x120   :  { %3471 = vmatprep.subr.bf16.mxu0 %v4082_v58  ;;  %v209_v34 = vld [vmem:[%s6462_s1 + $0x5e0] sm:$0xff] }
 0x121   :  { %3513 = vmatpush1.bf16.msra.mxu1 %v4353_v57  ;;  %v457_v36 = vld [vmem:[%s6462_s1 + $0xda0] sm:$0xff]  ;;  %v4258_v41 = vcombine.high %v201_v33, %v209_v34  ;;  %v4257_v47 = vcombine.low %v201_v33, %v209_v34  ;;  %v370_v33 = vld [vmem:[%s6462_s1 + $0xae8] sm:$0xff] }
 0x122   :  { %3514 = vmatprep.subr.bf16.mxu1 %v4338_v60  ;;  %v465_v38 = vld [vmem:[%s6462_s1 + $0xde0] sm:$0xff] }
 0x123   :  { %3472 = vmatpush1.bf16.msra.mxu0 %v4081_v1  ;;  %v4514_v42 = vcombine.high %v457_v36, %v465_v38  ;;  %v185_v56 = vld [vmem:[%s6462_s1 + $0x520] sm:$0xff]  ;;  %v4513_v49 = vcombine.low %v457_v36, %v465_v38  ;;  %v3932_v36 = vrot.slane %v5478_v12, %v5701_v18 }
 0x124   :  { %3473 = vmatprep.subr.bf16.mxu0 %v4322_v3  ;;  %v193_v44 = vld [vmem:[%s6462_s1 + $0x560] sm:$0xff] }
 0x125   :  { %3515 = vmatpush1.bf16.msra.mxu1 %v4337_v2  ;;  %v441_v45 = vld [vmem:[%s6462_s1 + $0xd20] sm:$0xff]  ;;  %v4242_v50 = vcombine.high %v185_v56, %v193_v44  ;;  %v4241_v57 = vcombine.low %v185_v56, %v193_v44  ;;  %v90_v44 = vld [vmem:[%s6462_s1 + $0x228] sm:$0xff] }
 0x126   :  { %3516 = vmatprep.subr.bf16.mxu1 %v4578_v4  ;;  %v449_v46 = vld [vmem:[%s6462_s1 + $0xd60] sm:$0xff] }
 0x127   :  { %3474 = vmatpush2.bf16.msra.mxu0 %v4321_v9  ;;  %v4498_v51 = vcombine.high %v441_v45, %v449_v46  ;;  %v169_v52 = vld [vmem:[%s6462_s1 + $0x4a0] sm:$0xff]  ;;  %v4497_v58 = vcombine.low %v441_v45, %v449_v46  ;;  %v402_v9 = vld [vmem:[%s6462_s1 + $0xbe8] sm:$0xff] }
 0x128   :  { %3475 = vmatprep.subr.bf16.mxu0 %v4306_v11  ;;  %v177_v53 = vld [vmem:[%s6462_s1 + $0x4e0] sm:$0xff]  ;;  %v4452_v14 = vcombine.high %v394_v8, %v402_v9  ;;  %v4451_v24 = vcombine.low %v394_v8, %v402_v9  ;;  %v98_v45 = vld [vmem:[%s6462_s1 + $0x268] sm:$0xff] }
 0x129   :  { %3517 = vmatpush2.bf16.msra.mxu1 %v4577_v10  ;;  %v425_v54 = vld [vmem:[%s6462_s1 + $0xca0] sm:$0xff]  ;;  %v4226_v60 = vcombine.high %v169_v52, %v177_v53  ;;  %v4225_v2 = vcombine.low %v169_v52, %v177_v53  ;;  %v346_v53 = vld [vmem:[%s6462_s1 + $0xa28] sm:$0xff]  ;;  %v4147_v8 = vcombine.low %v90_v44, %v98_v45 }
 0x12a   :  { %3518 = vmatprep.subr.bf16.mxu1 %v4562_v13  ;;  %v433_v55 = vld [vmem:[%s6462_s1 + $0xce0] sm:$0xff]  ;;  %v4196_v13 = vcombine.high %v138_v6, %v146_v7 }
 0x12b   :  { %3476 = vmatpush2.bf16.msra.mxu0 %v4305_v19  ;;  %v4482_v61 = vcombine.high %v425_v54, %v433_v55  ;;  %v153_v62 = vld [vmem:[%s6462_s1 + $0x420] sm:$0xff]  ;;  %v4481_v3 = vcombine.low %v425_v54, %v433_v55  ;;  %v378_v19 = vld [vmem:[%s6462_s1 + $0xb28] sm:$0xff] }
 0x12c   :  { %3477 = vmatprep.subr.bf16.mxu0 %v4290_v21  ;;  %v161_v63 = vld [vmem:[%s6462_s1 + $0x460] sm:$0xff]  ;;  %v4195_v21 = vcombine.low %v138_v6, %v146_v7  ;;  %v354_v54 = vld [vmem:[%s6462_s1 + $0xa68] sm:$0xff] }
 0x12d   :  { %3519 = vmatpush2.bf16.msra.mxu1 %v4561_v20  ;;  %v409_v0 = vld [vmem:[%s6462_s1 + $0xc20] sm:$0xff]  ;;  %v4210_v4 = vcombine.high %v153_v62, %v161_v63  ;;  %v4209_v10 = vcombine.low %v153_v62, %v161_v63  ;;  %v386_v20 = vld [vmem:[%s6462_s1 + $0xb68] sm:$0xff]  ;;  %v4403_v9 = vcombine.low %v346_v53, %v354_v54 }
 0x12e   :  { %3520 = vmatprep.subr.bf16.mxu1 %v4546_v22  ;;  %v417_v1 = vld [vmem:[%s6462_s1 + $0xc60] sm:$0xff]  ;;  %v5710_v22 = vsub.s32 3, %v5444_v23  ;;  %v4436_v26 = vcombine.high %v378_v19, %v386_v20  ;;  %v330_v6 = vld [vmem:[%s6462_s1 + $0x9a8] sm:$0xff] }
 0x12f   :  { %3478 = vmatpush2.bf16.msra.mxu0 %v4289_v28  ;;  %v4466_v5 = vcombine.high %v409_v0, %v417_v1  ;;  %v4465_v11 = vcombine.low %v409_v0, %v417_v1  ;;  %v114_v28 = vld [vmem:[%s6462_s1 + $0x2e8] sm:$0xff]  ;;  %v4404_v1 = vcombine.high %v346_v53, %v354_v54 }
 0x130   :  { %3479 = vmatprep.subr.bf16.mxu0 %v4274_v30  ;;  %v3816_v30 = vrot.slane %v5470_v35, %v5701_v18  ;;  %v3820_v38 = vrot.slane %v5470_v35, %v5710_v22  ;;  %v4164_v56 = vcombine.high %v106_v27, %v114_v28  ;;  %v338_v7 = vld [vmem:[%s6462_s1 + $0x9e8] sm:$0xff] }
 0x131   :  { %3521 = vmatpush2.bf16.msra.mxu1 %v4545_v29 }
 0x132   :  { %3522 = vmatprep.subr.bf16.mxu1 %v4530_v31  ;;  %v362_v31 = vld [vmem:[%s6462_s1 + $0xaa8] sm:$0xff] }
 0x133   :  { %3480 = vmatpush2.bf16.msra.mxu0 %v4273_v39  ;;  %v4179_v39 = vcombine.low %v122_v16, %v130_v17  ;;  %v58_v16 = vld [vmem:[%s6462_s1 + $0x128] sm:$0xff] }
 0x134   :  { %3481 = vmatprep.subr.bf16.mxu0 %v4258_v41  ;;  %v66_v17 = vld [vmem:[%s6462_s1 + $0x168] sm:$0xff] }
 0x135   :  { %3523 = vmatpush2.bf16.msra.mxu1 %v4529_v40 }
 0x136   :  { %3524 = vmatprep.subr.bf16.mxu1 %v4514_v42  ;;  %v4435_v42 = vcombine.low %v378_v19, %v386_v20  ;;  %v314_v20 = vld [vmem:[%s6462_s1 + $0x928] sm:$0xff] }
 0x137   :  { %3482 = vmatpush2.bf16.msra.mxu0 %v4257_v47  ;;  %v4420_v47 = vcombine.high %v362_v31, %v370_v33 }
 0x138   :  { %3483 = vmatprep.subr.bf16.mxu0 %v4242_v50 }
 0x139   :  { %3525 = vmatpush2.bf16.msra.mxu1 %v4513_v49 }
 0x13a   :  { %3526 = vmatprep.subr.bf16.mxu1 %v4498_v51  ;;  %v3936_v51 = vrot.slane %v5478_v12, %v5710_v22 }
 0x13b   :  { %3484 = vmatpush2.bf16.msra.mxu0 %v4241_v57  ;;  %v4163_v57 = vcombine.low %v106_v27, %v114_v28  ;;  %v42_v28 = vld [vmem:[%s6462_s1 + $0xa8] sm:$0xff] }
 0x13c   :  { %3485 = vmatprep.subr.bf16.mxu0 %v4226_v60 }
 0x13d   :  { %3527 = vmatpush2.bf16.msra.mxu1 %v4497_v58  ;;  %v4148_v58 = vcombine.high %v90_v44, %v98_v45 }
 0x13e   :  { %3528 = vmatprep.subr.bf16.mxu1 %v4482_v61 }
 0x13f   :  { %3486 = vmatpush2.bf16.msra.mxu0 %v4225_v2  ;;  %v74_v2 = vld [vmem:[%s6462_s1 + $0x1a8] sm:$0xff] }
 0x140   :  { %3487 = vmatprep.subr.bf16.mxu0 %v4210_v4 }
 0x141   :  { %3529 = vmatpush2.bf16.msra.mxu1 %v4481_v3 }
 0x142   :  { %3530 = vmatprep.subr.bf16.mxu1 %v4466_v5 }
 0x143   :  { %3488 = vmatpush2.bf16.msra.mxu0 %v4209_v10 }
 0x144   :  { %3543 = vmatprep.subr.bf16.mxu0 %v4196_v13 }
 0x145   :  { %3531 = vmatpush2.bf16.msra.mxu1 %v4465_v11 }
 0x146   :  { %3586 = vmatprep.subr.bf16.mxu1 %v4452_v14  ;;  %v3233_v29 = vpop.f32.mrf.mxu0  ;;  %3490 = vmatmul.mubr.bf16.vlgmr.msra.gmra.mxu0 %v5491_v59  ;;  %v4388_v14 = vcombine.high %v330_v6, %v338_v7 }
 0x147   :  { %3544 = vmatpush1.bf16.msra.mxu0 %v4195_v21  ;;  %3575 = vmatprep.mubr.bf16.mxu0 %v5279_v15  ;;  %v4419_v15 = vcombine.low %v362_v31, %v370_v33  ;;  %v322_v21 = vld [vmem:[%s6462_s1 + $0x968] sm:$0xff]  ;;  %v4115_v33 = vcombine.low %v58_v16, %v66_v17 }
 0x148   :  { %v3276_v34 = vpop.f32.mrf.mxu1  ;;  %3533 = vmatmul.mubr.bf16.vlgmr.msra.gmra.mxu1 %v5503_v48  ;;  %v3235_v41 = vpop.f32.mrf.mxu0  ;;  %3545 = vmatprep.subr.bf16.mxu0 %v4180_v25  ;;  %v4387_v25 = vcombine.low %v330_v6, %v338_v7  ;;  %v4372_v27 = vcombine.high %v314_v20, %v322_v21  ;;  %v306_v31 = vld [vmem:[%s6462_s1 + $0x8e8] sm:$0xff] }
 0x149   :  { %v3277_v40 = vadd.f32 %v3276_v34, %v3233_v29  ;;  %3587 = vmatpush1.bf16.msra.mxu1 %v4451_v24  ;;  %3618 = vmatprep.mubr.bf16.mxu1 %v5291_v43  ;;  %v82_v43 = vld [vmem:[%s6462_s1 + $0x1e8] sm:$0xff]  ;;  %v4371_v34 = vcombine.low %v314_v20, %v322_v21 }
 0x14a   :  { %v3278_v46 = vpop.f32.mrf.mxu1  ;;  %3588 = vmatprep.subr.bf16.mxu1 %v4436_v26  ;;  %v3237_v52 = vpop.f32.mrf.mxu0  ;;  %v4132_v13 = vcombine.high %v74_v2, %v82_v43  ;;  %v4131_v24 = vcombine.low %v74_v2, %v82_v43  ;;  %v4116_v26 = vcombine.high %v58_v16, %v66_v17  ;;  %v50_v29 = vld [vmem:[%s6462_s1 + $0xe8] sm:$0xff] }
 0x14b   :  { %v3887_v49 = vmul.f32 %v3816_v30, %v3277_v40  ;;  %v3279_v50 = vadd.f32 %v3278_v46, %v3235_v41  ;;  %3546 = vmatpush1.bf16.msra.mxu0 %v4179_v39  ;;  %v26_v39 = vld [vmem:[%s6462_s1 + $0x28] sm:$0xff] }
 0x14c   :  { %v3280_v55 = vpop.f32.mrf.mxu1  ;;  %v3239_v63 = vpop.f32.mrf.mxu0  ;;  %3547 = vmatprep.subr.bf16.mxu0 %v4164_v56  ;;  %v34_v40 = vld [vmem:[%s6462_s1 + $0x68] sm:$0xff]  ;;  %v4099_v56 = vcombine.low %v42_v28, %v50_v29 }
 0x14d   :  { %v4003_v60 = vadd.f32 %v3932_v36, %v3887_v49  ;;  %v3888_v61 = vmul.f32 %v3820_v38, %v3279_v50  ;;  %v3281_v62 = vadd.f32 %v3280_v55, %v3237_v52  ;;  %3589 = vmatpush1.bf16.msra.mxu1 %v4435_v42  ;;  %v282_v41 = vld [vmem:[%s6462_s1 + $0x828] sm:$0xff]  ;;  %v4084_v45 = vcombine.high %v26_v39, %v34_v40 }
 0x14e   :  { %v3282_v0 = vpop.f32.mrf.mxu1  ;;  %3590 = vmatprep.subr.bf16.mxu1 %v4420_v47  ;;  %v290_v42 = vld [vmem:[%s6462_s1 + $0x868] sm:$0xff]  ;;  %v4083_v52 = vcombine.low %v26_v39, %v34_v40 }
 0x14f   :  { %4035 = vst [vmem:[%s6466_s4 + $0x10] sm:$0xff] %v4003_v60  ;;  %v4004_v3 = vadd.f32 %v3936_v51, %v3888_v61  ;;  %v3903_v4 = vmul.f32 %v3816_v30, %v3281_v62  ;;  %v3283_v5 = vadd.f32 %v3282_v0, %v3239_v63  ;;  %3548 = vmatpush1.bf16.msra.mxu0 %v4163_v57  ;;  %v298_v30 = vld [vmem:[%s6462_s1 + $0x8a8] sm:$0xff] }
 0x150   :  { %3549 = vmatprep.subr.bf16.mxu0 %v4148_v58  ;;  %v4355_v44 = vcombine.low %v298_v30, %v306_v31  ;;  %v4340_v46 = vcombine.high %v282_v41, %v290_v42  ;;  %v266_v47 = vld [vmem:[%s6462_s1 + $0x7a8] sm:$0xff]  ;;  %v4339_v53 = vcombine.low %v282_v41, %v290_v42 }
 0x151   :  { %4036 = vst [vmem:[%s6466_s4 + $0x18] sm:$0xff] %v4004_v3  ;;  %v4019_v10 = vadd.f32 %v3932_v36, %v3903_v4  ;;  %v3904_v11 = vmul.f32 %v3820_v38, %v3283_v5  ;;  %3591 = vmatpush1.bf16.msra.mxu1 %v4419_v15  ;;  %v4100_v36 = vcombine.high %v42_v28, %v50_v29  ;;  %v274_v49 = vld [vmem:[%s6462_s1 + $0x7e8] sm:$0xff] }
 0x152   :  { %3592 = vmatprep.subr.bf16.mxu1 %v4404_v1  ;;  %v4356_v38 = vcombine.high %v298_v30, %v306_v31  ;;  %v522_v50 = vld [vmem:[%s6462_s1 + $0xfa8] sm:$0xff]  ;;  %v4324_v54 = vcombine.high %v266_v47, %v274_v49  ;;  %v4323_v61 = vcombine.low %v266_v47, %v274_v49 }
 0x153   :  { %4051 = vst [vmem:[%s6466_s4 + $0x90] sm:$0xff] %v4019_v10  ;;  %v4020_v19 = vadd.f32 %v3936_v51, %v3904_v11  ;;  %3550 = vmatpush1.bf16.msra.mxu0 %v4147_v8  ;;  %v530_v51 = vld [vmem:[%s6462_s1 + $0xfe8] sm:$0xff] }
 0x154   :  { %3551 = vmatprep.subr.bf16.mxu0 %v4132_v13  ;;  %v4580_v55 = vcombine.high %v522_v50, %v530_v51  ;;  %v250_v57 = vld [vmem:[%s6462_s1 + $0x728] sm:$0xff]  ;;  %v4579_v62 = vcombine.low %v522_v50, %v530_v51 }
 0x155   :  { %4052 = vst [vmem:[%s6466_s4 + $0x98] sm:$0xff] %v4020_v19  ;;  %3593 = vmatpush1.bf16.msra.mxu1 %v4403_v9  ;;  %v258_v15 = vld [vmem:[%s6462_s1 + $0x768] sm:$0xff] }
 0x156   :  { %3594 = vmatprep.subr.bf16.mxu1 %v4388_v14  ;;  %v506_v58 = vld [vmem:[%s6462_s1 + $0xf28] sm:$0xff]  ;;  %v4308_v63 = vcombine.high %v250_v57, %v258_v15  ;;  %v4307_v4 = vcombine.low %v250_v57, %v258_v15  ;;  %v139_v15 = vld [vmem:[%s6462_s1 + $0x3b0] sm:$0xff] }
 0x157   :  { %3552 = vmatpush1.bf16.msra.mxu0 %v4131_v24  ;;  %v514_v60 = vld [vmem:[%s6462_s1 + $0xf68] sm:$0xff] }
 0x158   :  { %3553 = vmatprep.subr.bf16.mxu0 %v4116_v26  ;;  %v4564_v0 = vcombine.high %v506_v58, %v514_v60  ;;  %v234_v1 = vld [vmem:[%s6462_s1 + $0x6a8] sm:$0xff]  ;;  %v4563_v5 = vcombine.low %v506_v58, %v514_v60  ;;  %v147_v58 = vld [vmem:[%s6462_s1 + $0x3f0] sm:$0xff] }
 0x159   :  { %3595 = vmatpush1.bf16.msra.mxu1 %v4387_v25  ;;  %v242_v2 = vld [vmem:[%s6462_s1 + $0x6e8] sm:$0xff]  ;;  %v395_v60 = vld [vmem:[%s6462_s1 + $0xbb0] sm:$0xff] }
 0x15a   :  { %3596 = vmatprep.subr.bf16.mxu1 %v4372_v27  ;;  %v490_v43 = vld [vmem:[%s6462_s1 + $0xea8] sm:$0xff]  ;;  %v4292_v6 = vcombine.high %v234_v1, %v242_v2  ;;  %v4291_v13 = vcombine.low %v234_v1, %v242_v2  ;;  %v123_v2 = vld [vmem:[%s6462_s1 + $0x330] sm:$0xff] }
 0x15b   :  { %3554 = vmatpush1.bf16.msra.mxu0 %v4115_v33  ;;  %v498_v3 = vld [vmem:[%s6462_s1 + $0xee8] sm:$0xff] }
 0x15c   :  { %3555 = vmatprep.subr.bf16.mxu0 %v4100_v36  ;;  %v4548_v7 = vcombine.high %v490_v43, %v498_v3  ;;  %v218_v8 = vld [vmem:[%s6462_s1 + $0x628] sm:$0xff]  ;;  %v4547_v14 = vcombine.low %v490_v43, %v498_v3  ;;  %v131_v43 = vld [vmem:[%s6462_s1 + $0x370] sm:$0xff]  ;;  %v5923_v3 = vsub.s32 4, %v5444_v23 }
 0x15d   :  { %3597 = vmatpush1.bf16.msra.mxu1 %v4371_v34  ;;  %v226_v9 = vld [vmem:[%s6462_s1 + $0x668] sm:$0xff] }
 0x15e   :  { %3598 = vmatprep.subr.bf16.mxu1 %v4356_v38  ;;  %v474_v10 = vld [vmem:[%s6462_s1 + $0xe28] sm:$0xff]  ;;  %v4276_v16 = vcombine.high %v218_v8, %v226_v9  ;;  %v4275_v25 = vcombine.low %v218_v8, %v226_v9  ;;  %v4182_v9 = vcombine.high %v123_v2, %v131_v43 }
 0x15f   :  { %3556 = vmatpush1.bf16.msra.mxu0 %v4099_v56  ;;  %v482_v11 = vld [vmem:[%s6462_s1 + $0xe68] sm:$0xff] }
 0x160   :  { %3557 = vmatprep.subr.bf16.mxu0 %v4084_v45  ;;  %v4532_v17 = vcombine.high %v474_v10, %v482_v11  ;;  %v202_v19 = vld [vmem:[%s6462_s1 + $0x5a8] sm:$0xff]  ;;  %v4531_v26 = vcombine.low %v474_v10, %v482_v11  ;;  %v107_v11 = vld [vmem:[%s6462_s1 + $0x2b0] sm:$0xff] }
 0x161   :  { %3599 = vmatpush1.bf16.msra.mxu1 %v4355_v44  ;;  %v210_v20 = vld [vmem:[%s6462_s1 + $0x5e8] sm:$0xff] }
 0x162   :  { %3600 = vmatprep.subr.bf16.mxu1 %v4340_v46  ;;  %v458_v21 = vld [vmem:[%s6462_s1 + $0xda8] sm:$0xff]  ;;  %v4260_v27 = vcombine.high %v202_v19, %v210_v20  ;;  %v4259_v34 = vcombine.low %v202_v19, %v210_v20  ;;  %v371_v19 = vld [vmem:[%s6462_s1 + $0xaf0] sm:$0xff] }
 0x163   :  { %3558 = vmatpush1.bf16.msra.mxu0 %v4083_v52  ;;  %v466_v24 = vld [vmem:[%s6462_s1 + $0xde8] sm:$0xff] }
 0x164   :  { %3559 = vmatprep.subr.bf16.mxu0 %v4324_v54  ;;  %v4516_v28 = vcombine.high %v458_v21, %v466_v24  ;;  %v186_v29 = vld [vmem:[%s6462_s1 + $0x528] sm:$0xff]  ;;  %v4515_v36 = vcombine.low %v458_v21, %v466_v24  ;;  %v3940_v21 = vrot.slane %v5478_v12, %v5923_v3 }
 0x165   :  { %3601 = vmatpush1.bf16.msra.mxu1 %v4339_v53  ;;  %v194_v30 = vld [vmem:[%s6462_s1 + $0x568] sm:$0xff] }
 0x166   :  { %3602 = vmatprep.subr.bf16.mxu1 %v4580_v55  ;;  %v442_v31 = vld [vmem:[%s6462_s1 + $0xd28] sm:$0xff]  ;;  %v4244_v38 = vcombine.high %v186_v29, %v194_v30  ;;  %v4243_v44 = vcombine.low %v186_v29, %v194_v30  ;;  %v91_v29 = vld [vmem:[%s6462_s1 + $0x230] sm:$0xff] }
 0x167   :  { %3560 = vmatpush2.bf16.msra.mxu0 %v4323_v61  ;;  %v450_v33 = vld [vmem:[%s6462_s1 + $0xd68] sm:$0xff]  ;;  %v403_v61 = vld [vmem:[%s6462_s1 + $0xbf0] sm:$0xff] }
 0x168   :  { %3561 = vmatprep.subr.bf16.mxu0 %v4308_v63  ;;  %v4500_v39 = vcombine.high %v442_v31, %v450_v33  ;;  %v170_v40 = vld [vmem:[%s6462_s1 + $0x4a8] sm:$0xff]  ;;  %v4499_v45 = vcombine.low %v442_v31, %v450_v33  ;;  %v4454_v1 = vcombine.high %v395_v60, %v403_v61  ;;  %v4453_v8 = vcombine.low %v395_v60, %v403_v61  ;;  %v99_v30 = vld [vmem:[%s6462_s1 + $0x270] sm:$0xff] }
 0x169   :  { %3603 = vmatpush2.bf16.msra.mxu1 %v4579_v62  ;;  %v178_v41 = vld [vmem:[%s6462_s1 + $0x4e8] sm:$0xff]  ;;  %v4149_v60 = vcombine.low %v91_v29, %v99_v30 }
 0x16a   :  { %3604 = vmatprep.subr.bf16.mxu1 %v4564_v0  ;;  %v426_v42 = vld [vmem:[%s6462_s1 + $0xca8] sm:$0xff]  ;;  %v4228_v46 = vcombine.high %v170_v40, %v178_v41  ;;  %v4227_v53 = vcombine.low %v170_v40, %v178_v41  ;;  %v4198_v0 = vcombine.high %v139_v15, %v147_v58  ;;  %v355_v40 = vld [vmem:[%s6462_s1 + $0xa70] sm:$0xff] }
 0x16b   :  { %3562 = vmatpush2.bf16.msra.mxu0 %v4307_v4  ;;  %v434_v56 = vld [vmem:[%s6462_s1 + $0xce8] sm:$0xff]  ;;  %v379_v4 = vld [vmem:[%s6462_s1 + $0xb30] sm:$0xff] }
 0x16c   :  { %3563 = vmatprep.subr.bf16.mxu0 %v4292_v6  ;;  %v4484_v47 = vcombine.high %v426_v42, %v434_v56  ;;  %v154_v49 = vld [vmem:[%s6462_s1 + $0x428] sm:$0xff]  ;;  %v4483_v54 = vcombine.low %v426_v42, %v434_v56  ;;  %v4197_v6 = vcombine.low %v139_v15, %v147_v58  ;;  %v331_v15 = vld [vmem:[%s6462_s1 + $0x9b0] sm:$0xff] }
 0x16d   :  { %3605 = vmatpush2.bf16.msra.mxu1 %v4563_v5  ;;  %v162_v50 = vld [vmem:[%s6462_s1 + $0x468] sm:$0xff]  ;;  %v387_v5 = vld [vmem:[%s6462_s1 + $0xb70] sm:$0xff] }
 0x16e   :  { %3606 = vmatprep.subr.bf16.mxu1 %v4548_v7  ;;  %v410_v51 = vld [vmem:[%s6462_s1 + $0xc28] sm:$0xff]  ;;  %v4212_v55 = vcombine.high %v154_v49, %v162_v50  ;;  %v4211_v62 = vcombine.low %v154_v49, %v162_v50  ;;  %v5932_v7 = vsub.s32 5, %v5444_v23  ;;  %v4438_v10 = vcombine.high %v379_v4, %v387_v5  ;;  %v339_v58 = vld [vmem:[%s6462_s1 + $0x9f0] sm:$0xff] }
 0x16f   :  { %3564 = vmatpush2.bf16.msra.mxu0 %v4291_v13  ;;  %v418_v52 = vld [vmem:[%s6462_s1 + $0xc68] sm:$0xff]  ;;  %v115_v13 = vld [vmem:[%s6462_s1 + $0x2f0] sm:$0xff] }
 0x170   :  { %3565 = vmatprep.subr.bf16.mxu0 %v4276_v16  ;;  %v4468_v57 = vcombine.high %v410_v51, %v418_v52  ;;  %v4467_v63 = vcombine.low %v410_v51, %v418_v52  ;;  %v3824_v16 = vrot.slane %v5470_v35, %v5923_v3  ;;  %v3828_v24 = vrot.slane %v5470_v35, %v5932_v7  ;;  %v5963_v35 = vld [vmem:[%s6463_s0 + $0x4] ss:$16 sps:$4 sm:$0xff]   ;;  %v5977_v41 = vld [vmem:[%s6463_s0 + $0xc] ss:$16 sps:$4 sm:$0xff]  }
 0x171   :  { %3607 = vmatpush2.bf16.msra.mxu1 %v4547_v14  ;;  %v4165_v56 = vcombine.low %v107_v11, %v115_v13  ;;  %v75_v52 = vld [vmem:[%s6462_s1 + $0x1b0] sm:$0xff] }
 0x172   :  { %3608 = vmatprep.subr.bf16.mxu1 %v4532_v17  ;;  %v363_v17 = vld [vmem:[%s6462_s1 + $0xab0] sm:$0xff] }
 0x173   :  { %3566 = vmatpush2.bf16.msra.mxu0 %v4275_v25  ;;  %v4181_v25 = vcombine.low %v123_v2, %v131_v43  ;;  %v4422_v31 = vcombine.high %v363_v17, %v371_v19  ;;  %v59_v2 = vld [vmem:[%s6462_s1 + $0x130] sm:$0xff] }
 0x174   :  { %3567 = vmatprep.subr.bf16.mxu0 %v4260_v27  ;;  %v4437_v27 = vcombine.low %v379_v4, %v387_v5  ;;  %v67_v43 = vld [vmem:[%s6462_s1 + $0x170] sm:$0xff] }
 0x175   :  { %3609 = vmatpush2.bf16.msra.mxu1 %v4531_v26  ;;  %v315_v5 = vld [vmem:[%s6462_s1 + $0x930] sm:$0xff] }
 0x176   :  { %3610 = vmatprep.subr.bf16.mxu1 %v4516_v28  ;;  %v4166_v28 = vcombine.high %v107_v11, %v115_v13  ;;  %v43_v13 = vld [vmem:[%s6462_s1 + $0xb0] sm:$0xff] }
 0x177   :  { %3568 = vmatpush2.bf16.msra.mxu0 %v4259_v34 }
 0x178   :  { %3569 = vmatprep.subr.bf16.mxu0 %v4244_v38 }
 0x179   :  { %3611 = vmatpush2.bf16.msra.mxu1 %v4515_v36  ;;  %v3944_v36 = vrot.slane %v5478_v12, %v5932_v7  ;;  %v4421_v12 = vcombine.low %v363_v17, %v371_v19  ;;  %v307_v17 = vld [vmem:[%s6462_s1 + $0x8f0] sm:$0xff]  ;;  %v4117_v19 = vcombine.low %v59_v2, %v67_v43 }
 0x17a   :  { %3612 = vmatprep.subr.bf16.mxu1 %v4500_v39  ;;  %v347_v39 = vld [vmem:[%s6462_s1 + $0xa30] sm:$0xff] }
 0x17b   :  { %3570 = vmatpush2.bf16.msra.mxu0 %v4243_v44  ;;  %v4150_v44 = vcombine.high %v91_v29, %v99_v30  ;;  %v4406_v51 = vcombine.high %v347_v39, %v355_v40  ;;  %v4405_v61 = vcombine.low %v347_v39, %v355_v40 }
 0x17c   :  { %3571 = vmatprep.subr.bf16.mxu0 %v4228_v46 }
 0x17d   :  { %3613 = vmatpush2.bf16.msra.mxu1 %v4499_v45 }
 0x17e   :  { %3614 = vmatprep.subr.bf16.mxu1 %v4484_v47 }
 0x17f   :  { %3572 = vmatpush2.bf16.msra.mxu0 %v4227_v53  ;;  %v83_v53 = vld [vmem:[%s6462_s1 + $0x1f0] sm:$0xff] }
 0x180   :  { %3573 = vmatprep.subr.bf16.mxu0 %v4212_v55 }
 0x181   :  { %3615 = vmatpush2.bf16.msra.mxu1 %v4483_v54 }
 0x182   :  { %3616 = vmatprep.subr.bf16.mxu1 %v4468_v57 }
 0x183   :  { %3574 = vmatpush2.bf16.msra.mxu0 %v4211_v62 }
 0x184   :  { %3629 = vmatprep.subr.bf16.mxu0 %v4198_v0  ;;  %v4134_v0 = vcombine.high %v75_v52, %v83_v53 }
 0x185   :  { %3617 = vmatpush2.bf16.msra.mxu1 %v4467_v63 }
 0x186   :  { %3672 = vmatprep.subr.bf16.mxu1 %v4454_v1  ;;  %v3319_v14 = vpop.f32.mrf.mxu0  ;;  %3576 = vmatmul.mubr.bf16.vlgmr.msra.gmra.mxu0 %v5491_v59  ;;  %v4390_v1 = vcombine.high %v331_v15, %v339_v58 }
 0x187   :  { %3630 = vmatpush1.bf16.msra.mxu0 %v4197_v6  ;;  %3661 = vmatprep.mubr.bf16.mxu0 %v5963_v35  ;;  %v323_v6 = vld [vmem:[%s6462_s1 + $0x970] sm:$0xff] }
 0x188   :  { %v3362_v20 = vpop.f32.mrf.mxu1  ;;  %3619 = vmatmul.mubr.bf16.vlgmr.msra.gmra.mxu1 %v5503_v48  ;;  %v3321_v26 = vpop.f32.mrf.mxu0  ;;  %3631 = vmatprep.subr.bf16.mxu0 %v4182_v9  ;;  %v4389_v9 = vcombine.low %v331_v15, %v339_v58  ;;  %v4374_v11 = vcombine.high %v315_v5, %v323_v6 }
 0x189   :  { %v3363_v59 = vadd.f32 %v3362_v20, %v3319_v14  ;;  %3673 = vmatpush1.bf16.msra.mxu1 %v4453_v8  ;;  %3704 = vmatprep.mubr.bf16.mxu1 %v5977_v41  ;;  %v4133_v8 = vcombine.low %v75_v52, %v83_v53  ;;  %v51_v14 = vld [vmem:[%s6462_s1 + $0xf0] sm:$0xff]  ;;  %v4373_v20 = vcombine.low %v315_v5, %v323_v6 }
 0x18a   :  { %v3364_v48 = vpop.f32.mrf.mxu1  ;;  %3674 = vmatprep.subr.bf16.mxu1 %v4438_v10  ;;  %v3323_v38 = vpop.f32.mrf.mxu0  ;;  %v4118_v10 = vcombine.high %v59_v2, %v67_v43  ;;  %v243_v52 = vld [vmem:[%s6462_s1 + $0x6f0] sm:$0xff] }
 0x18b   :  { %v3889_v33 = vmul.f32 %v3824_v16, %v3363_v59  ;;  %v3365_v34 = vadd.f32 %v3364_v48, %v3321_v26  ;;  %3632 = vmatpush1.bf16.msra.mxu0 %v4181_v25  ;;  %v27_v25 = vld [vmem:[%s6462_s1 + $0x30] sm:$0xff] }
 0x18c   :  { %v3366_v42 = vpop.f32.mrf.mxu1  ;;  %v3325_v49 = vpop.f32.mrf.mxu0  ;;  %3633 = vmatprep.subr.bf16.mxu0 %v4166_v28  ;;  %v35_v59 = vld [vmem:[%s6462_s1 + $0x70] sm:$0xff]  ;;  %v4101_v28 = vcombine.low %v43_v13, %v51_v14 }
 0x18d   :  { %v4005_v45 = vadd.f32 %v3940_v21, %v3889_v33  ;;  %v3890_v46 = vmul.f32 %v3828_v24, %v3365_v34  ;;  %v3367_v47 = vadd.f32 %v3366_v42, %v3323_v38  ;;  %3675 = vmatpush1.bf16.msra.mxu1 %v4437_v27  ;;  %v283_v26 = vld [vmem:[%s6462_s1 + $0x830] sm:$0xff]  ;;  %v4086_v30 = vcombine.high %v27_v25, %v35_v59 }
 0x18e   :  { %v3368_v50 = vpop.f32.mrf.mxu1  ;;  %3676 = vmatprep.subr.bf16.mxu1 %v4422_v31  ;;  %v291_v27 = vld [vmem:[%s6462_s1 + $0x870] sm:$0xff]  ;;  %v4085_v38 = vcombine.low %v27_v25, %v35_v59 }
 0x18f   :  { %4037 = vst [vmem:[%s6466_s4 + $0x20] sm:$0xff] %v4005_v45  ;;  %v4006_v54 = vadd.f32 %v3944_v36, %v3890_v46  ;;  %v3905_v55 = vmul.f32 %v3824_v16, %v3367_v47  ;;  %v3369_v57 = vadd.f32 %v3368_v50, %v3325_v49  ;;  %3634 = vmatpush1.bf16.msra.mxu0 %v4165_v56  ;;  %v299_v16 = vld [vmem:[%s6462_s1 + $0x8b0] sm:$0xff] }
 0x190   :  { %3635 = vmatprep.subr.bf16.mxu0 %v4150_v44  ;;  %v4357_v29 = vcombine.low %v299_v16, %v307_v17  ;;  %v4342_v48 = vcombine.high %v283_v26, %v291_v27  ;;  %v267_v31 = vld [vmem:[%s6462_s1 + $0x7b0] sm:$0xff]  ;;  %v4341_v39 = vcombine.low %v283_v26, %v291_v27 }
 0x191   :  { %4038 = vst [vmem:[%s6466_s4 + $0x28] sm:$0xff] %v4006_v54  ;;  %v4021_v62 = vadd.f32 %v3940_v21, %v3905_v55  ;;  %v3906_v63 = vmul.f32 %v3828_v24, %v3369_v57  ;;  %3677 = vmatpush1.bf16.msra.mxu1 %v4421_v12  ;;  %v4102_v21 = vcombine.high %v43_v13, %v51_v14  ;;  %v275_v33 = vld [vmem:[%s6462_s1 + $0x7f0] sm:$0xff] }
 0x192   :  { %3678 = vmatprep.subr.bf16.mxu1 %v4406_v51  ;;  %v4358_v24 = vcombine.high %v299_v16, %v307_v17  ;;  %v523_v34 = vld [vmem:[%s6462_s1 + $0xfb0] sm:$0xff]  ;;  %v4326_v40 = vcombine.high %v267_v31, %v275_v33  ;;  %v4325_v46 = vcombine.low %v267_v31, %v275_v33 }
 0x193   :  { %4053 = vst [vmem:[%s6466_s4 + $0xa0] sm:$0xff] %v4021_v62  ;;  %v4022_v4 = vadd.f32 %v3944_v36, %v3906_v63  ;;  %3636 = vmatpush1.bf16.msra.mxu0 %v4149_v60  ;;  %v531_v36 = vld [vmem:[%s6462_s1 + $0xff0] sm:$0xff] }
 0x194   :  { %3637 = vmatprep.subr.bf16.mxu0 %v4134_v0  ;;  %v4582_v42 = vcombine.high %v523_v34, %v531_v36  ;;  %v251_v56 = vld [vmem:[%s6462_s1 + $0x730] sm:$0xff]  ;;  %v4581_v47 = vcombine.low %v523_v34, %v531_v36 }
 0x195   :  { %4054 = vst [vmem:[%s6466_s4 + $0xa8] sm:$0xff] %v4022_v4  ;;  %3679 = vmatpush1.bf16.msra.mxu1 %v4405_v61  ;;  %v259_v12 = vld [vmem:[%s6462_s1 + $0x770] sm:$0xff] }
 0x196   :  { %3680 = vmatprep.subr.bf16.mxu1 %v4390_v1  ;;  %v507_v44 = vld [vmem:[%s6462_s1 + $0xf30] sm:$0xff]  ;;  %v4310_v49 = vcombine.high %v251_v56, %v259_v12  ;;  %v4309_v55 = vcombine.low %v251_v56, %v259_v12  ;;  %v140_v12 = vld [vmem:[%s6462_s1 + $0x3b8] sm:$0xff] }
 0x197   :  { %3638 = vmatpush1.bf16.msra.mxu0 %v4133_v8  ;;  %v515_v45 = vld [vmem:[%s6462_s1 + $0xf70] sm:$0xff] }
 0x198   :  { %3639 = vmatprep.subr.bf16.mxu0 %v4118_v10  ;;  %v4566_v50 = vcombine.high %v507_v44, %v515_v45  ;;  %v235_v51 = vld [vmem:[%s6462_s1 + $0x6b0] sm:$0xff]  ;;  %v4565_v57 = vcombine.low %v507_v44, %v515_v45  ;;  %v148_v44 = vld [vmem:[%s6462_s1 + $0x3f8] sm:$0xff] }
 0x199   :  { %3681 = vmatpush1.bf16.msra.mxu1 %v4389_v9  ;;  %v491_v53 = vld [vmem:[%s6462_s1 + $0xeb0] sm:$0xff]  ;;  %v4294_v15 = vcombine.high %v235_v51, %v243_v52  ;;  %v4293_v0 = vcombine.low %v235_v51, %v243_v52  ;;  %v396_v45 = vld [vmem:[%s6462_s1 + $0xbb8] sm:$0xff] }
 0x19a   :  { %3682 = vmatprep.subr.bf16.mxu1 %v4374_v11  ;;  %v499_v54 = vld [vmem:[%s6462_s1 + $0xef0] sm:$0xff]  ;;  %v124_v52 = vld [vmem:[%s6462_s1 + $0x338] sm:$0xff] }
 0x19b   :  { %3640 = vmatpush1.bf16.msra.mxu0 %v4117_v19  ;;  %v4550_v58 = vcombine.high %v491_v53, %v499_v54  ;;  %v219_v60 = vld [vmem:[%s6462_s1 + $0x630] sm:$0xff]  ;;  %v4549_v1 = vcombine.low %v491_v53, %v499_v54  ;;  %v132_v53 = vld [vmem:[%s6462_s1 + $0x378] sm:$0xff]  ;;  %v6155_v54 = vsub.s32 6, %v5444_v23 }
 0x19c   :  { %3641 = vmatprep.subr.bf16.mxu0 %v4102_v21  ;;  %v227_v61 = vld [vmem:[%s6462_s1 + $0x670] sm:$0xff] }
 0x19d   :  { %3683 = vmatpush1.bf16.msra.mxu1 %v4373_v20  ;;  %v475_v62 = vld [vmem:[%s6462_s1 + $0xe30] sm:$0xff]  ;;  %v4278_v2 = vcombine.high %v219_v60, %v227_v61  ;;  %v4277_v9 = vcombine.low %v219_v60, %v227_v61  ;;  %v4184_v61 = vcombine.high %v124_v52, %v132_v53 }
 0x19e   :  { %3684 = vmatprep.subr.bf16.mxu1 %v4358_v24  ;;  %v483_v63 = vld [vmem:[%s6462_s1 + $0xe70] sm:$0xff] }
 0x19f   :  { %3642 = vmatpush1.bf16.msra.mxu0 %v4101_v28  ;;  %v4534_v43 = vcombine.high %v475_v62, %v483_v63  ;;  %v203_v4 = vld [vmem:[%s6462_s1 + $0x5b0] sm:$0xff]  ;;  %v4533_v10 = vcombine.low %v475_v62, %v483_v63  ;;  %v108_v63 = vld [vmem:[%s6462_s1 + $0x2b8] sm:$0xff] }
 0x1a0   :  { %3643 = vmatprep.subr.bf16.mxu0 %v4086_v30  ;;  %v211_v5 = vld [vmem:[%s6462_s1 + $0x5f0] sm:$0xff] }
 0x1a1   :  { %3685 = vmatpush1.bf16.msra.mxu1 %v4357_v29  ;;  %v459_v6 = vld [vmem:[%s6462_s1 + $0xdb0] sm:$0xff]  ;;  %v4262_v11 = vcombine.high %v203_v4, %v211_v5  ;;  %v4261_v20 = vcombine.low %v203_v4, %v211_v5  ;;  %v364_v4 = vld [vmem:[%s6462_s1 + $0xab8] sm:$0xff] }
 0x1a2   :  { %3686 = vmatprep.subr.bf16.mxu1 %v4342_v48  ;;  %v467_v8 = vld [vmem:[%s6462_s1 + $0xdf0] sm:$0xff]  ;;  %v372_v5 = vld [vmem:[%s6462_s1 + $0xaf8] sm:$0xff] }
 0x1a3   :  { %3644 = vmatpush1.bf16.msra.mxu0 %v4085_v38  ;;  %v4518_v13 = vcombine.high %v459_v6, %v467_v8  ;;  %v187_v14 = vld [vmem:[%s6462_s1 + $0x530] sm:$0xff]  ;;  %v4517_v21 = vcombine.low %v459_v6, %v467_v8  ;;  %v4599_v8 = vld [vmem:[%s6465_s3] sm:$0xff] }
 0x1a4   :  { %3645 = vmatprep.subr.bf16.mxu0 %v4326_v40  ;;  %v195_v16 = vld [vmem:[%s6462_s1 + $0x570] sm:$0xff] }
 0x1a5   :  { %3687 = vmatpush1.bf16.msra.mxu1 %v4341_v39  ;;  %v443_v17 = vld [vmem:[%s6462_s1 + $0xd30] sm:$0xff]  ;;  %v4246_v24 = vcombine.high %v187_v14, %v195_v16  ;;  %v4245_v29 = vcombine.low %v187_v14, %v195_v16 }
 0x1a6   :  { %3688 = vmatprep.subr.bf16.mxu1 %v4582_v42  ;;  %v451_v19 = vld [vmem:[%s6462_s1 + $0xd70] sm:$0xff] }
 0x1a7   :  { %3646 = vmatpush2.bf16.msra.mxu0 %v4325_v46  ;;  %v4502_v25 = vcombine.high %v443_v17, %v451_v19  ;;  %v171_v59 = vld [vmem:[%s6462_s1 + $0x4b0] sm:$0xff]  ;;  %v4501_v30 = vcombine.low %v443_v17, %v451_v19  ;;  %v404_v46 = vld [vmem:[%s6462_s1 + $0xbf8] sm:$0xff] }
 0x1a8   :  { %3647 = vmatprep.subr.bf16.mxu0 %v4310_v49  ;;  %v179_v26 = vld [vmem:[%s6462_s1 + $0x4f0] sm:$0xff]  ;;  %v4456_v51 = vcombine.high %v396_v45, %v404_v46  ;;  %v4455_v60 = vcombine.low %v396_v45, %v404_v46  ;;  %v332_v46 = vld [vmem:[%s6462_s1 + $0x9b8] sm:$0xff] }
 0x1a9   :  { %3689 = vmatpush2.bf16.msra.mxu1 %v4581_v47  ;;  %v427_v27 = vld [vmem:[%s6462_s1 + $0xcb0] sm:$0xff]  ;;  %v4230_v48 = vcombine.high %v171_v59, %v179_v26  ;;  %v4229_v39 = vcombine.low %v171_v59, %v179_v26 }
 0x1aa   :  { %3690 = vmatprep.subr.bf16.mxu1 %v4566_v50  ;;  %v435_v28 = vld [vmem:[%s6462_s1 + $0xcf0] sm:$0xff]  ;;  %v4200_v50 = vcombine.high %v140_v12, %v148_v44 }
 0x1ab   :  { %3648 = vmatpush2.bf16.msra.mxu0 %v4309_v55  ;;  %v4486_v31 = vcombine.high %v427_v27, %v435_v28  ;;  %v155_v33 = vld [vmem:[%s6462_s1 + $0x430] sm:$0xff]  ;;  %v4485_v40 = vcombine.low %v427_v27, %v435_v28  ;;  %v380_v55 = vld [vmem:[%s6462_s1 + $0xb38] sm:$0xff] }
 0x1ac   :  { %3649 = vmatprep.subr.bf16.mxu0 %v4294_v15  ;;  %v163_v34 = vld [vmem:[%s6462_s1 + $0x470] sm:$0xff]  ;;  %v4199_v15 = vcombine.low %v140_v12, %v148_v44 }
 0x1ad   :  { %3691 = vmatpush2.bf16.msra.mxu1 %v4565_v57  ;;  %v411_v36 = vld [vmem:[%s6462_s1 + $0xc30] sm:$0xff]  ;;  %v4214_v42 = vcombine.high %v155_v33, %v163_v34  ;;  %v4213_v47 = vcombine.low %v155_v33, %v163_v34  ;;  %v388_v57 = vld [vmem:[%s6462_s1 + $0xb78] sm:$0xff]  ;;  %v4423_v33 = vcombine.low %v364_v4, %v372_v5 }
 0x1ae   :  { %3692 = vmatprep.subr.bf16.mxu1 %v4550_v58  ;;  %v419_v38 = vld [vmem:[%s6462_s1 + $0xc70] sm:$0xff]  ;;  %v6164_v58 = vsub.s32 7, %v5444_v23  ;;  %v4440_v62 = vcombine.high %v380_v55, %v388_v57  ;;  %v4597_v23 = vld [vmem:[%s6464_s2] sm:$0xff]  ;;  %v4439_v17 = vcombine.low %v380_v55, %v388_v57  ;;  %v60_v57 = vld [vmem:[%s6462_s1 + $0x138] sm:$0xff] }
 0x1af   :  { %3650 = vmatpush2.bf16.msra.mxu0 %v4293_v0  ;;  %v4470_v56 = vcombine.high %v411_v36, %v419_v38  ;;  %v4469_v49 = vcombine.low %v411_v36, %v419_v38  ;;  %v116_v0 = vld [vmem:[%s6462_s1 + $0x2f8] sm:$0xff] }
 0x1b0   :  { %3651 = vmatprep.subr.bf16.mxu0 %v4278_v2  ;;  %v3832_v2 = vrot.slane %v4597_v23, %v6155_v54  ;;  %v4168_v19 = vcombine.high %v108_v63, %v116_v0  ;;  %v3952_v27 = vrot.slane %v4599_v8, %v6164_v58 }
 0x1b1   :  { %3693 = vmatpush2.bf16.msra.mxu1 %v4549_v1 }
 0x1b2   :  { %3694 = vmatprep.subr.bf16.mxu1 %v4534_v43  ;;  %v6179_v43 = vld [vmem:[%s6463_s0] ss:$16 sps:$4 sm:$0xff]  }
 0x1b3   :  { %3652 = vmatpush2.bf16.msra.mxu0 %v4277_v9  ;;  %v3948_v9 = vrot.slane %v4599_v8, %v6155_v54 }
 0x1b4   :  { %3653 = vmatprep.subr.bf16.mxu0 %v4262_v11  ;;  %v3836_v11 = vrot.slane %v4597_v23, %v6164_v58 }
 0x1b5   :  { %3695 = vmatpush2.bf16.msra.mxu1 %v4533_v10  ;;  %v6195_v10 = vld [vmem:[%s6463_s0 + $0x8] ss:$16 sps:$4 sm:$0xff]  }
 0x1b6   :  { %3696 = vmatprep.subr.bf16.mxu1 %v4518_v13  ;;  %v4183_v13 = vcombine.low %v124_v52, %v132_v53 }
 0x1b7   :  { %3654 = vmatpush2.bf16.msra.mxu0 %v4261_v20  ;;  %v92_v20 = vld [vmem:[%s6462_s1 + $0x238] sm:$0xff] }
 0x1b8   :  { %3655 = vmatprep.subr.bf16.mxu0 %v4246_v24 }
 0x1b9   :  { %3697 = vmatpush2.bf16.msra.mxu1 %v4517_v21  ;;  %v100_v21 = vld [vmem:[%s6462_s1 + $0x278] sm:$0xff] }
 0x1ba   :  { %3698 = vmatprep.subr.bf16.mxu1 %v4502_v25  ;;  %v4424_v25 = vcombine.high %v364_v4, %v372_v5  ;;  %v52_v4 = vld [vmem:[%s6462_s1 + $0xf8] sm:$0xff] }
 0x1bb   :  { %3656 = vmatpush2.bf16.msra.mxu0 %v4245_v29  ;;  %v348_v29 = vld [vmem:[%s6462_s1 + $0xa38] sm:$0xff] }
 0x1bc   :  { %3657 = vmatprep.subr.bf16.mxu0 %v4230_v48  ;;  %v300_v5 = vld [vmem:[%s6462_s1 + $0x8b8] sm:$0xff] }
 0x1bd   :  { %3699 = vmatpush2.bf16.msra.mxu1 %v4501_v30  ;;  %v356_v30 = vld [vmem:[%s6462_s1 + $0xa78] sm:$0xff] }
 0x1be   :  { %3700 = vmatprep.subr.bf16.mxu1 %v4486_v31  ;;  %v4167_v31 = vcombine.low %v108_v63, %v116_v0 }
 0x1bf   :  { %3658 = vmatpush2.bf16.msra.mxu0 %v4229_v39 }
 0x1c0   :  { %3659 = vmatprep.subr.bf16.mxu0 %v4214_v42  ;;  %v4408_v42 = vcombine.high %v348_v29, %v356_v30 }
 0x1c1   :  { %3701 = vmatpush2.bf16.msra.mxu1 %v4485_v40 }
 0x1c2   :  { %3702 = vmatprep.subr.bf16.mxu1 %v4470_v56  ;;  %v76_v56 = vld [vmem:[%s6462_s1 + $0x1b8] sm:$0xff] }
 0x1c3   :  { %3660 = vmatpush2.bf16.msra.mxu0 %v4213_v47  ;;  %v340_v47 = vld [vmem:[%s6462_s1 + $0x9f8] sm:$0xff] }
 0x1c4   :  { %3715 = vmatprep.subr.bf16.mxu0 %v4200_v50  ;;  %v4407_v50 = vcombine.low %v348_v29, %v356_v30  ;;  %v4392_v55 = vcombine.high %v332_v46, %v340_v47  ;;  %v4391_v0 = vcombine.low %v332_v46, %v340_v47 }
 0x1c5   :  { %3703 = vmatpush2.bf16.msra.mxu1 %v4469_v49  ;;  %v4151_v49 = vcombine.low %v92_v20, %v100_v21 }
 0x1c6   :  { %3758 = vmatprep.subr.bf16.mxu1 %v4456_v51  ;;  %v3405_v1 = vpop.f32.mrf.mxu0  ;;  %3662 = vmatmul.mubr.bf16.vlgmr.msra.gmra.mxu0 %v6179_v43 }
 0x1c7   :  { %3716 = vmatpush1.bf16.msra.mxu0 %v4199_v15  ;;  %3747 = vmatprep.mubr.bf16.mxu0 %v5963_v35  ;;  %v4152_v35 = vcombine.high %v92_v20, %v100_v21  ;;  %v68_v15 = vld [vmem:[%s6462_s1 + $0x178] sm:$0xff] }
 0x1c8   :  { %v3448_v6 = vpop.f32.mrf.mxu1  ;;  %3705 = vmatmul.mubr.bf16.vlgmr.msra.gmra.mxu1 %v6195_v10  ;;  %v3407_v16 = vpop.f32.mrf.mxu0  ;;  %3717 = vmatprep.subr.bf16.mxu0 %v4184_v61  ;;  %v316_v61 = vld [vmem:[%s6462_s1 + $0x938] sm:$0xff]  ;;  %v4119_v8 = vcombine.low %v60_v57, %v68_v15 }
 0x1c9   :  { %v3449_v14 = vadd.f32 %v3448_v6, %v3405_v1  ;;  %3759 = vmatpush1.bf16.msra.mxu1 %v4455_v60  ;;  %3790 = vmatprep.mubr.bf16.mxu1 %v5977_v41  ;;  %v84_v41 = vld [vmem:[%s6462_s1 + $0x1f8] sm:$0xff]  ;;  %v4120_v1 = vcombine.high %v60_v57, %v68_v15 }
 0x1ca   :  { %v3450_v24 = vpop.f32.mrf.mxu1  ;;  %3760 = vmatprep.subr.bf16.mxu1 %v4440_v62  ;;  %v3409_v28 = vpop.f32.mrf.mxu0  ;;  %v4136_v53 = vcombine.high %v76_v56, %v84_v41  ;;  %v324_v62 = vld [vmem:[%s6462_s1 + $0x978] sm:$0xff]  ;;  %v4135_v63 = vcombine.low %v76_v56, %v84_v41 }
 0x1cb   :  { %v3891_v59 = vmul.f32 %v3832_v2, %v3449_v14  ;;  %v3451_v26 = vadd.f32 %v3450_v24, %v3407_v16  ;;  %3718 = vmatpush1.bf16.msra.mxu0 %v4183_v13  ;;  %v4376_v23 = vcombine.high %v316_v61, %v324_v62  ;;  %v308_v6 = vld [vmem:[%s6462_s1 + $0x8f8] sm:$0xff] }
 0x1cc   :  { %v3452_v48 = vpop.f32.mrf.mxu1  ;;  %v3411_v39 = vpop.f32.mrf.mxu0  ;;  %3719 = vmatprep.subr.bf16.mxu0 %v4168_v19  ;;  %v4360_v13 = vcombine.high %v300_v5, %v308_v6  ;;  %v28_v14 = vld [vmem:[%s6462_s1 + $0x38] sm:$0xff]  ;;  %v4359_v21 = vcombine.low %v300_v5, %v308_v6 }
 0x1cd   :  { %v4007_v34 = vadd.f32 %v3948_v9, %v3891_v59  ;;  %v3892_v36 = vmul.f32 %v3836_v11, %v3451_v26  ;;  %v3453_v38 = vadd.f32 %v3452_v48, %v3409_v28  ;;  %3761 = vmatpush1.bf16.msra.mxu1 %v4439_v17  ;;  %v36_v16 = vld [vmem:[%s6462_s1 + $0x78] sm:$0xff] }
 0x1ce   :  { %v3454_v40 = vpop.f32.mrf.mxu1  ;;  %3762 = vmatprep.subr.bf16.mxu1 %v4424_v25  ;;  %v284_v17 = vld [vmem:[%s6462_s1 + $0x838] sm:$0xff]  ;;  %v4088_v24 = vcombine.high %v28_v14, %v36_v16  ;;  %v4087_v29 = vcombine.low %v28_v14, %v36_v16 }
 0x1cf   :  { %4039 = vst [vmem:[%s6466_s4 + $0x30] sm:$0xff] %v4007_v34  ;;  %v4008_v12 = vadd.f32 %v3952_v27, %v3892_v36  ;;  %v3907_v44 = vmul.f32 %v3832_v2, %v3453_v38  ;;  %v3455_v45 = vadd.f32 %v3454_v40, %v3411_v39  ;;  %3720 = vmatpush1.bf16.msra.mxu0 %v4167_v31  ;;  %v44_v2 = vld [vmem:[%s6462_s1 + $0xb8] sm:$0xff] }
 0x1d0   :  { %3721 = vmatprep.subr.bf16.mxu0 %v4152_v35  ;;  %v292_v19 = vld [vmem:[%s6462_s1 + $0x878] sm:$0xff]  ;;  %v4103_v20 = vcombine.low %v44_v2, %v52_v4 }
 0x1d1   :  { %4040 = vst [vmem:[%s6466_s4 + $0x38] sm:$0xff] %v4008_v12  ;;  %v4023_v51 = vadd.f32 %v3948_v9, %v3907_v44  ;;  %v3908_v52 = vmul.f32 %v3836_v11, %v3455_v45  ;;  %3763 = vmatpush1.bf16.msra.mxu1 %v4423_v33  ;;  %v4375_v9 = vcombine.low %v316_v61, %v324_v62  ;;  %v268_v59 = vld [vmem:[%s6462_s1 + $0x7b8] sm:$0xff] }
 0x1d2   :  { %3764 = vmatprep.subr.bf16.mxu1 %v4408_v42  ;;  %v4104_v11 = vcombine.high %v44_v2, %v52_v4  ;;  %v4344_v25 = vcombine.high %v284_v17, %v292_v19  ;;  %v276_v26 = vld [vmem:[%s6462_s1 + $0x7f8] sm:$0xff]  ;;  %v4343_v30 = vcombine.low %v284_v17, %v292_v19 }
 0x1d3   :  { %4055 = vst [vmem:[%s6466_s4 + $0xb0] sm:$0xff] %v4023_v51  ;;  %v4024_v60 = vadd.f32 %v3952_v27, %v3908_v52  ;;  %3722 = vmatpush1.bf16.msra.mxu0 %v4151_v49  ;;  %v524_v27 = vld [vmem:[%s6462_s1 + $0xfb8] sm:$0xff]  ;;  %v4328_v48 = vcombine.high %v268_v59, %v276_v26  ;;  %v4327_v38 = vcombine.low %v268_v59, %v276_v26 }
 0x1d4   :  { %3723 = vmatprep.subr.bf16.mxu0 %v4136_v53  ;;  %v532_v28 = vld [vmem:[%s6462_s1 + $0xff8] sm:$0xff] }
 0x1d5   :  { %4056 = vst [vmem:[%s6466_s4 + $0xb8] sm:$0xff] %v4024_v60  ;;  %3765 = vmatpush1.bf16.msra.mxu1 %v4407_v50  ;;  %v4584_v31 = vcombine.high %v524_v27, %v532_v28  ;;  %v252_v33 = vld [vmem:[%s6462_s1 + $0x738] sm:$0xff]  ;;  %v4583_v39 = vcombine.low %v524_v27, %v532_v28 }
 0x1d6   :  { %3766 = vmatprep.subr.bf16.mxu1 %v4392_v55  ;;  %v260_v35 = vld [vmem:[%s6462_s1 + $0x778] sm:$0xff] }
 0x1d7   :  { %3724 = vmatpush1.bf16.msra.mxu0 %v4135_v63  ;;  %v508_v34 = vld [vmem:[%s6462_s1 + $0xf38] sm:$0xff]  ;;  %v4312_v40 = vcombine.high %v252_v33, %v260_v35  ;;  %v4311_v45 = vcombine.low %v252_v33, %v260_v35 }
 0x1d8   :  { %3725 = vmatprep.subr.bf16.mxu0 %v4120_v1  ;;  %v516_v36 = vld [vmem:[%s6462_s1 + $0xf78] sm:$0xff] }
 0x1d9   :  { %3767 = vmatpush1.bf16.msra.mxu1 %v4391_v0  ;;  %v4568_v42 = vcombine.high %v508_v34, %v516_v36  ;;  %v236_v56 = vld [vmem:[%s6462_s1 + $0x6b8] sm:$0xff]  ;;  %v4567_v46 = vcombine.low %v508_v34, %v516_v36 }
 0x1da   :  { %3768 = vmatprep.subr.bf16.mxu1 %v4376_v23  ;;  %v244_v41 = vld [vmem:[%s6462_s1 + $0x6f8] sm:$0xff] }
 0x1db   :  { %3726 = vmatpush1.bf16.msra.mxu0 %v4119_v8  ;;  %v492_v12 = vld [vmem:[%s6462_s1 + $0xeb8] sm:$0xff]  ;;  %v4296_v47 = vcombine.high %v236_v56, %v244_v41  ;;  %v4295_v55 = vcombine.low %v236_v56, %v244_v41 }
 0x1dc   :  { %3727 = vmatprep.subr.bf16.mxu0 %v4104_v11  ;;  %v500_v44 = vld [vmem:[%s6462_s1 + $0xef8] sm:$0xff] }
 0x1dd   :  { %3769 = vmatpush1.bf16.msra.mxu1 %v4375_v9  ;;  %v4552_v49 = vcombine.high %v492_v12, %v500_v44  ;;  %v220_v50 = vld [vmem:[%s6462_s1 + $0x638] sm:$0xff]  ;;  %v4551_v57 = vcombine.low %v492_v12, %v500_v44 }
 0x1de   :  { %3770 = vmatprep.subr.bf16.mxu1 %v4360_v13  ;;  %v228_v51 = vld [vmem:[%s6462_s1 + $0x678] sm:$0xff] }
 0x1df   :  { %3728 = vmatpush1.bf16.msra.mxu0 %v4103_v20  ;;  %v476_v52 = vld [vmem:[%s6462_s1 + $0xe38] sm:$0xff]  ;;  %v4280_v15 = vcombine.high %v220_v50, %v228_v51  ;;  %v4279_v1 = vcombine.low %v220_v50, %v228_v51 }
 0x1e0   :  { %3729 = vmatprep.subr.bf16.mxu0 %v4088_v24  ;;  %v484_v53 = vld [vmem:[%s6462_s1 + $0xe78] sm:$0xff] }
 0x1e1   :  { %3771 = vmatpush1.bf16.msra.mxu1 %v4359_v21  ;;  %v4536_v60 = vcombine.high %v476_v52, %v484_v53  ;;  %v204_v61 = vld [vmem:[%s6462_s1 + $0x5b8] sm:$0xff]  ;;  %v4535_v23 = vcombine.low %v476_v52, %v484_v53 }
 0x1e2   :  { %3772 = vmatprep.subr.bf16.mxu1 %v4344_v25  ;;  %v212_v62 = vld [vmem:[%s6462_s1 + $0x5f8] sm:$0xff] }
 0x1e3   :  { %3730 = vmatpush1.bf16.msra.mxu0 %v4087_v29  ;;  %v460_v63 = vld [vmem:[%s6462_s1 + $0xdb8] sm:$0xff]  ;;  %v4264_v2 = vcombine.high %v204_v61, %v212_v62  ;;  %v4263_v11 = vcombine.low %v204_v61, %v212_v62 }
 0x1e4   :  { %3731 = vmatprep.subr.bf16.mxu0 %v4328_v48  ;;  %v468_v0 = vld [vmem:[%s6462_s1 + $0xdf8] sm:$0xff] }
 0x1e5   :  { %3773 = vmatpush1.bf16.msra.mxu1 %v4343_v30  ;;  %v4520_v4 = vcombine.high %v460_v63, %v468_v0  ;;  %v188_v5 = vld [vmem:[%s6462_s1 + $0x538] sm:$0xff]  ;;  %v4519_v13 = vcombine.low %v460_v63, %v468_v0 }
 0x1e6   :  { %3774 = vmatprep.subr.bf16.mxu1 %v4584_v31  ;;  %v196_v6 = vld [vmem:[%s6462_s1 + $0x578] sm:$0xff] }
 0x1e7   :  { %3732 = vmatpush2.bf16.msra.mxu0 %v4327_v38  ;;  %v444_v8 = vld [vmem:[%s6462_s1 + $0xd38] sm:$0xff]  ;;  %v4248_v14 = vcombine.high %v188_v5, %v196_v6  ;;  %v4247_v24 = vcombine.low %v188_v5, %v196_v6  ;;  %v6373_v38 = vld [vmem:[%s6464_s2 + $0x8] sm:$0xff] }
 0x1e8   :  { %3733 = vmatprep.subr.bf16.mxu0 %v4312_v40  ;;  %v452_v9 = vld [vmem:[%s6462_s1 + $0xd78] sm:$0xff]  ;;  %v3848_v0 = vrot.slane %v6373_v38, %v5701_v18  ;;  %v3852_v5 = vrot.slane %v6373_v38, %v5710_v22 }
 0x1e9   :  { %3775 = vmatpush2.bf16.msra.mxu1 %v4583_v39  ;;  %v4504_v16 = vcombine.high %v444_v8, %v452_v9  ;;  %v172_v17 = vld [vmem:[%s6462_s1 + $0x4b8] sm:$0xff]  ;;  %v4503_v25 = vcombine.low %v444_v8, %v452_v9  ;;  %v6378_v39 = vld [vmem:[%s6465_s3 + $0x8] sm:$0xff] }
 0x1ea   :  { %3776 = vmatprep.subr.bf16.mxu1 %v4568_v42  ;;  %v180_v19 = vld [vmem:[%s6462_s1 + $0x4f8] sm:$0xff]  ;;  %v3840_v42 = vrot.slane %v6373_v38, %v5459_v32  ;;  %v3956_v12 = vrot.slane %v6378_v39, %v5459_v32  ;;  %v3960_v50 = vrot.slane %v6378_v39, %v5473_v37 }
 0x1eb   :  { %3734 = vmatpush2.bf16.msra.mxu0 %v4311_v45  ;;  %v428_v20 = vld [vmem:[%s6462_s1 + $0xcb8] sm:$0xff]  ;;  %v4232_v59 = vcombine.high %v172_v17, %v180_v19  ;;  %v4231_v48 = vcombine.low %v172_v17, %v180_v19  ;;  %v3844_v45 = vrot.slane %v6373_v38, %v5473_v37 }
 0x1ec   :  { %3735 = vmatprep.subr.bf16.mxu0 %v4296_v47  ;;  %v436_v21 = vld [vmem:[%s6462_s1 + $0xcf8] sm:$0xff] }
 0x1ed   :  { %3777 = vmatpush2.bf16.msra.mxu1 %v4567_v46  ;;  %v4488_v26 = vcombine.high %v428_v20, %v436_v21  ;;  %v156_v27 = vld [vmem:[%s6462_s1 + $0x438] sm:$0xff]  ;;  %v4487_v31 = vcombine.low %v428_v20, %v436_v21 }
 0x1ee   :  { %3778 = vmatprep.subr.bf16.mxu1 %v4552_v49  ;;  %v164_v28 = vld [vmem:[%s6462_s1 + $0x478] sm:$0xff] }
 0x1ef   :  { %3736 = vmatpush2.bf16.msra.mxu0 %v4295_v55  ;;  %v412_v29 = vld [vmem:[%s6462_s1 + $0xc38] sm:$0xff]  ;;  %v4216_v33 = vcombine.high %v156_v27, %v164_v28  ;;  %v4215_v34 = vcombine.low %v156_v27, %v164_v28  ;;  %v3856_v28 = vrot.slane %v6373_v38, %v5923_v3 }
 0x1f0   :  { %3737 = vmatprep.subr.bf16.mxu0 %v4280_v15  ;;  %v420_v30 = vld [vmem:[%s6462_s1 + $0xc78] sm:$0xff] }
 0x1f1   :  { %3779 = vmatpush2.bf16.msra.mxu1 %v4551_v57  ;;  %v4472_v35 = vcombine.high %v412_v29, %v420_v30  ;;  %v4471_v36 = vcombine.low %v412_v29, %v420_v30 }
 0x1f2   :  { %3780 = vmatprep.subr.bf16.mxu1 %v4536_v60 }
 0x1f3   :  { %3738 = vmatpush2.bf16.msra.mxu0 %v4279_v1 }
 0x1f4   :  { %3739 = vmatprep.subr.bf16.mxu0 %v4264_v2  ;;  %v3964_v2 = vrot.slane %v6378_v39, %v5701_v18 }
 0x1f5   :  { %3781 = vmatpush2.bf16.msra.mxu1 %v4535_v23 }
 0x1f6   :  { %3782 = vmatprep.subr.bf16.mxu1 %v4520_v4 }
 0x1f7   :  { %3740 = vmatpush2.bf16.msra.mxu0 %v4263_v11  ;;  %v3968_v11 = vrot.slane %v6378_v39, %v5710_v22 }
 0x1f8   :  { %3741 = vmatprep.subr.bf16.mxu0 %v4248_v14 }
 0x1f9   :  { %3783 = vmatpush2.bf16.msra.mxu1 %v4519_v13 }
 0x1fa   :  { %3784 = vmatprep.subr.bf16.mxu1 %v4504_v16 }
 0x1fb   :  { %3742 = vmatpush2.bf16.msra.mxu0 %v4247_v24 }
 0x1fc   :  { %3743 = vmatprep.subr.bf16.mxu0 %v4232_v59 }
 0x1fd   :  { %3785 = vmatpush2.bf16.msra.mxu1 %v4503_v25 }
 0x1fe   :  { %3786 = vmatprep.subr.bf16.mxu1 %v4488_v26 }
 0x1ff   :  { %3744 = vmatpush2.bf16.msra.mxu0 %v4231_v48  ;;  %v3972_v48 = vrot.slane %v6378_v39, %v5923_v3 }
 0x200   :  { %3745 = vmatprep.subr.bf16.mxu0 %v4216_v33  ;;  %v3860_v33 = vrot.slane %v6373_v38, %v5932_v7 }
 0x201   :  { %3787 = vmatpush2.bf16.msra.mxu1 %v4487_v31 }
 0x202   :  { %3788 = vmatprep.subr.bf16.mxu1 %v4472_v35 }
 0x203   :  { %3746 = vmatpush2.bf16.msra.mxu0 %v4215_v34 }
 0x205   :  { %3789 = vmatpush2.bf16.msra.mxu1 %v4471_v36 }
 0x206   :  { %v3491_v40 = vpop.f32.mrf.mxu0  ;;  %3748 = vmatmul.mubr.bf16.vlgmr.msra.gmra.mxu0 %v6179_v43 }
 0x208   :  { %v3534_v56 = vpop.f32.mrf.mxu1  ;;  %3791 = vmatmul.mubr.bf16.vlgmr.msra.gmra.mxu1 %v6195_v10  ;;  %v3493_v44 = vpop.f32.mrf.mxu0 }
 0x209   :  { %v3535_v41 = vadd.f32 %v3534_v56, %v3491_v40  ;;  %v3976_v40 = vrot.slane %v6378_v39, %v5932_v7 }
 0x20a   :  { %v3536_v46 = vpop.f32.mrf.mxu1  ;;  %v3495_v51 = vpop.f32.mrf.mxu0 }
 0x20b   :  { %v3893_v47 = vmul.f32 %v3840_v42, %v3535_v41  ;;  %v3537_v49 = vadd.f32 %v3536_v46, %v3493_v44 }
 0x20c   :  { %v3538_v52 = vpop.f32.mrf.mxu1  ;;  %v3497_v10 = vpop.f32.mrf.mxu0 }
 0x20d   :  { %v4009_v43 = vadd.f32 %v3956_v12, %v3893_v47  ;;  %v3894_v53 = vmul.f32 %v3844_v45, %v3537_v49  ;;  %v3539_v55 = vadd.f32 %v3538_v52, %v3495_v51 }
 0x20e   :  { %v3540_v57 = vpop.f32.mrf.mxu1 }
 0x20f   :  { %4041 = vst [vmem:[%s6466_s4 + $0x40] sm:$0xff] %v4009_v43  ;;  %v4010_v32 = vadd.f32 %v3960_v50, %v3894_v53  ;;  %v3909_v15 = vmul.f32 %v3840_v42, %v3539_v55  ;;  %v3541_v60 = vadd.f32 %v3540_v57, %v3497_v10  ;;  %v3864_v43 = vrot.slane %v6373_v38, %v6155_v54 }
 0x210   :  { %v3980_v10 = vrot.slane %v6378_v39, %v6155_v54 }
 0x211   :  { %4042 = vst [vmem:[%s6466_s4 + $0x48] sm:$0xff] %v4010_v32  ;;  %v4025_v61 = vadd.f32 %v3956_v12, %v3909_v15  ;;  %v3910_v37 = vmul.f32 %v3844_v45, %v3541_v60  ;;  %v3868_v32 = vrot.slane %v6373_v38, %v6164_v58 }
 0x213   :  { %4057 = vst [vmem:[%s6466_s4 + $0xc0] sm:$0xff] %v4025_v61  ;;  %v4026_v62 = vadd.f32 %v3960_v50, %v3910_v37  ;;  %v3984_v37 = vrot.slane %v6378_v39, %v6164_v58 }
 0x215   :  { %4058 = vst [vmem:[%s6466_s4 + $0xc8] sm:$0xff] %v4026_v62 }
 0x246   :  { %v3577_v63 = vpop.f32.mrf.mxu0 }
 0x248   :  { %v3620_v1 = vpop.f32.mrf.mxu1  ;;  %v3579_v4 = vpop.f32.mrf.mxu0 }
 0x249   :  { %v3621_v23 = vadd.f32 %v3620_v1, %v3577_v63 }
 0x24a   :  { %v3622_v6 = vpop.f32.mrf.mxu1  ;;  %v3581_v13 = vpop.f32.mrf.mxu0 }
 0x24b   :  { %v3895_v8 = vmul.f32 %v3848_v0, %v3621_v23  ;;  %v3623_v9 = vadd.f32 %v3622_v6, %v3579_v4 }
 0x24c   :  { %v3624_v14 = vpop.f32.mrf.mxu1  ;;  %v3583_v20 = vpop.f32.mrf.mxu0 }
 0x24d   :  { %v4011_v16 = vadd.f32 %v3964_v2, %v3895_v8  ;;  %v3896_v17 = vmul.f32 %v3852_v5, %v3623_v9  ;;  %v3625_v19 = vadd.f32 %v3624_v14, %v3581_v13 }
 0x24e   :  { %v3626_v21 = vpop.f32.mrf.mxu1 }
 0x24f   :  { %4043 = vst [vmem:[%s6466_s4 + $0x50] sm:$0xff] %v4011_v16  ;;  %v4012_v18 = vadd.f32 %v3968_v11, %v3896_v17  ;;  %v3911_v24 = vmul.f32 %v3848_v0, %v3625_v19  ;;  %v3627_v25 = vadd.f32 %v3626_v21, %v3583_v20 }
 0x251   :  { %4044 = vst [vmem:[%s6466_s4 + $0x58] sm:$0xff] %v4012_v18  ;;  %v4027_v59 = vadd.f32 %v3964_v2, %v3911_v24  ;;  %v3912_v22 = vmul.f32 %v3852_v5, %v3627_v25 }
 0x253   :  { %4059 = vst [vmem:[%s6466_s4 + $0xd0] sm:$0xff] %v4027_v59  ;;  %v4028_v26 = vadd.f32 %v3968_v11, %v3912_v22 }
 0x255   :  { %4060 = vst [vmem:[%s6466_s4 + $0xd8] sm:$0xff] %v4028_v26 }
 0x286   :  { %v3663_v27 = vpop.f32.mrf.mxu0 }
 0x288   :  { %v3706_v29 = vpop.f32.mrf.mxu1  ;;  %v3665_v31 = vpop.f32.mrf.mxu0 }
 0x289   :  { %v3707_v30 = vadd.f32 %v3706_v29, %v3663_v27 }
 0x28a   :  { %v3708_v35 = vpop.f32.mrf.mxu1  ;;  %v3667_v42 = vpop.f32.mrf.mxu0 }
 0x28b   :  { %v3897_v34 = vmul.f32 %v3856_v28, %v3707_v30  ;;  %v3709_v36 = vadd.f32 %v3708_v35, %v3665_v31 }
 0x28c   :  { %v3710_v56 = vpop.f32.mrf.mxu1  ;;  %v3669_v45 = vpop.f32.mrf.mxu0 }
 0x28d   :  { %v4013_v41 = vadd.f32 %v3972_v48, %v3897_v34  ;;  %v3898_v12 = vmul.f32 %v3860_v33, %v3709_v36  ;;  %v3711_v44 = vadd.f32 %v3710_v56, %v3667_v42 }
 0x28e   :  { %v3712_v46 = vpop.f32.mrf.mxu1 }
 0x28f   :  { %4045 = vst [vmem:[%s6466_s4 + $0x60] sm:$0xff] %v4013_v41  ;;  %v4014_v3 = vadd.f32 %v3976_v40, %v3898_v12  ;;  %v3913_v47 = vmul.f32 %v3856_v28, %v3711_v44  ;;  %v3713_v49 = vadd.f32 %v3712_v46, %v3669_v45 }
 0x291   :  { %4046 = vst [vmem:[%s6466_s4 + $0x68] sm:$0xff] %v4014_v3  ;;  %v4029_v50 = vadd.f32 %v3972_v48, %v3913_v47  ;;  %v3914_v7 = vmul.f32 %v3860_v33, %v3713_v49 }
 0x293   :  { %4061 = vst [vmem:[%s6466_s4 + $0xe0] sm:$0xff] %v4029_v50  ;;  %v4030_v51 = vadd.f32 %v3976_v40, %v3914_v7 }
 0x295   :  { %4062 = vst [vmem:[%s6466_s4 + $0xe8] sm:$0xff] %v4030_v51 }
 0x2c6   :  { %v3749_v52 = vpop.f32.mrf.mxu0 }
 0x2c8   :  { %v3792_v53 = vpop.f32.mrf.mxu1  ;;  %v3751_v57 = vpop.f32.mrf.mxu0 }
 0x2c9   :  { %v3793_v55 = vadd.f32 %v3792_v53, %v3749_v52 }
 0x2ca   :  { %v3794_v15 = vpop.f32.mrf.mxu1  ;;  %v3753_v62 = vpop.f32.mrf.mxu0 }
 0x2cb   :  { %v3899_v60 = vmul.f32 %v3864_v43, %v3793_v55  ;;  %v3795_v61 = vadd.f32 %v3794_v15, %v3751_v57 }
 0x2cc   :  { %v3796_v63 = vpop.f32.mrf.mxu1  ;;  %v3755_v2 = vpop.f32.mrf.mxu0 }
 0x2cd   :  { %v4015_v0 = vadd.f32 %v3980_v10, %v3899_v60  ;;  %v3900_v1 = vmul.f32 %v3868_v32, %v3795_v61  ;;  %v3797_v23 = vadd.f32 %v3796_v63, %v3753_v62 }
 0x2ce   :  { %v3798_v4 = vpop.f32.mrf.mxu1 }
 0x2cf   :  { %4047 = vst [vmem:[%s6466_s4 + $0x70] sm:$0xff] %v4015_v0  ;;  %v4016_v54 = vadd.f32 %v3984_v37, %v3900_v1  ;;  %v3915_v5 = vmul.f32 %v3864_v43, %v3797_v23  ;;  %v3799_v38 = vadd.f32 %v3798_v4, %v3755_v2 }
 0x2d1   :  { %4048 = vst [vmem:[%s6466_s4 + $0x78] sm:$0xff] %v4016_v54  ;;  %v4031_v6 = vadd.f32 %v3980_v10, %v3915_v5  ;;  %v3916_v58 = vmul.f32 %v3868_v32, %v3799_v38 }
 0x2d3   :  { %4063 = vst [vmem:[%s6466_s4 + $0xf0] sm:$0xff] %v4031_v6  ;;  %v4032_v39 = vadd.f32 %v3984_v37, %v3916_v58 }
 0x2d5   :  { %4064 = vst [vmem:[%s6466_s4 + $0xf8] sm:$0xff] %v4032_v39 }

</bundles_post_ra>
